<compile_context>
chip_gen: v6e
topology: v6e:2x2x1
jax: 0.10.0
libtpu: 0.0.40
codegen_flags: <defaults>
</compile_context>

<pallas_src>
import functools

import numpy as np
import jax
import jax.numpy as jnp
from jax.experimental import pallas as pl
from jax.experimental.pallas import tpu as pltpu

TILE_E = 512          # edges per grid step (reduction axis, innermost)
TILE_V = 512          # voxels per grid step (lane axis of the accumulators)
NUM_MOMENTS = 16      # [bxyz(4) | ones(1) | (x-c)(x-c)^T(9) | zero-pad(2)]
_DN = (((0,), (0,)), ((), ()))   # contract dim-0 of both operands


# -----------------------------------------------------------------------------
# Kernel 1 (fused): per-voxel segment-sum of all edge moments in one MXU matmul.
#   out[c, v] = sum_e feats[e, c] * onehot[e, v]
# Features arrive as a bf16 [E, 2C] hi/lo split; the two halves are added after
# the (single-pass, f32-accumulating) bf16 matmul -> near-f32 accuracy.
# C = 16 keeps the hi/lo split at a sublane-tile boundary (no relayout).
# -----------------------------------------------------------------------------
def _seg_moments_kernel(evox_ref, feat_ref, out_ref, *, tile_v, n_cols):
    @pl.when(pl.program_id(1) == 0)
    def _init():
        out_ref[...] = jnp.zeros_like(out_ref)

    evox = evox_ref[...]                                              # [TE, 1] int32
    te = evox.shape[0]
    v0 = pl.program_id(0) * tile_v
    iota = v0 + jax.lax.broadcasted_iota(jnp.int32, (te, tile_v), 1)  # [TE, TV]
    onehot = (evox == iota).astype(jnp.bfloat16)                      # exact 0/1
    acc = jax.lax.dot_general(
        feat_ref[...], onehot, _DN,
        preferred_element_type=jnp.float32)                           # [2C, TV] f32
    out_ref[...] += acc[:n_cols] + acc[n_cols:]                       # hi + lo


def segment_moments(evox_col, feats_hilo, v_pad):
    e_pad, c2 = feats_hilo.shape
    c = c2 // 2
    return pl.pallas_call(
        functools.partial(_seg_moments_kernel, tile_v=TILE_V, n_cols=c),
        out_shape=jax.ShapeDtypeStruct((c, v_pad), jnp.float32),
        grid=(v_pad // TILE_V, e_pad // TILE_E),
        in_specs=[pl.BlockSpec((TILE_E, 1), lambda vt, et: (et, 0)),
                  pl.BlockSpec((TILE_E, c2), lambda vt, et: (et, 0))],
        out_specs=pl.BlockSpec((c, TILE_V), lambda vt, et: (0, vt)),
        compiler_params=pltpu.CompilerParams(
            dimension_semantics=("parallel", "arbitrary")),
    )(evox_col, feats_hilo)


# -----------------------------------------------------------------------------
# Kernel 2: masked segment max / min of the (precomputed) l1 projections.
# Outputs are lane-dense [3, V]; transposed back in glue.  A single +inf
# "penalty" select is shared by all six masked reductions.
# -----------------------------------------------------------------------------
def _seg_minmax_kernel(evox_ref, proj_ref, max_ref, min_ref, *, tile_v):
    @pl.when(pl.program_id(1) == 0)
    def _init():
        max_ref[...] = jnp.full_like(max_ref, -jnp.inf)
        min_ref[...] = jnp.full_like(min_ref, jnp.inf)

    evox = evox_ref[...]                                              # [TE, 1]
    te = evox.shape[0]
    v0 = pl.program_id(0) * tile_v
    iota = v0 + jax.lax.broadcasted_iota(jnp.int32, (te, tile_v), 1)  # [TE, TV]
    # +inf where the edge does NOT belong to this voxel column, 0 where it does.
    pen = jnp.where(evox == iota, 0.0, jnp.inf)                       # [TE, TV] f32
    mx_rows, mn_rows = [], []
    for j in range(3):
        pj = proj_ref[:, j:j + 1]                                     # [TE, 1]
        mx_rows.append(jnp.max(pj - pen, axis=0, keepdims=True))      # [1, TV]
        mn_rows.append(jnp.min(pj + pen, axis=0, keepdims=True))      # [1, TV]
    max_ref[...] = jnp.maximum(max_ref[...], jnp.concatenate(mx_rows, axis=0))
    min_ref[...] = jnp.minimum(min_ref[...], jnp.concatenate(mn_rows, axis=0))


def segment_minmax(evox_col, proj, v_pad):
    e_pad, _ = proj.shape
    return pl.pallas_call(
        functools.partial(_seg_minmax_kernel, tile_v=TILE_V),
        out_shape=(jax.ShapeDtypeStruct((3, v_pad), jnp.float32),
                   jax.ShapeDtypeStruct((3, v_pad), jnp.float32)),
        grid=(v_pad // TILE_V, e_pad // TILE_E),
        in_specs=[pl.BlockSpec((TILE_E, 1), lambda vt, et: (et, 0)),
                  pl.BlockSpec((TILE_E, 3), lambda vt, et: (et, 0))],
        out_specs=(pl.BlockSpec((3, TILE_V), lambda vt, et: (0, vt)),
                   pl.BlockSpec((3, TILE_V), lambda vt, et: (0, vt))),
        compiler_params=pltpu.CompilerParams(
            dimension_semantics=("parallel", "arbitrary")),
    )(evox_col, proj)


# -----------------------------------------------------------------------------
# PCAVolume.forward  (given the edges that VoxelGraph would have produced)
# -----------------------------------------------------------------------------
def pca_volume_forward(base_bxyz, bcenter, e_base, e_voxel):
    num_voxels = bcenter.shape[0]
    E = e_base.shape[0]
    e_pad = pl.cdiv(E, TILE_E) * TILE_E
    v_pad = pl.cdiv(num_voxels, TILE_V) * TILE_V
    pad = e_pad - E

    e_voxel = e_voxel.astype(jnp.int32)
    e_base = e_base.astype(jnp.int32)
    # sentinel voxel index (>= v_pad, never matched by any voxel tile) for pads
    e_voxel_s = jnp.concatenate([e_voxel, jnp.full((pad,), v_pad, jnp.int32)])
    e_voxel_g = jnp.concatenate([e_voxel, jnp.zeros((pad,), jnp.int32)])
    e_base_g = jnp.concatenate([e_base, jnp.zeros((pad,), jnp.int32)])
    evox_col = e_voxel_s[:, None]                                     # [E_pad, 1]

    # --- single fused edge pass: bxyz sum, count, centered 2nd moments --------
    x = base_bxyz[e_base_g]                                           # [E_pad, 4]
    c = bcenter[e_voxel_g, 1:]                                        # [E_pad, 3]
    cd = x[:, 1:] - c                                                 # [E_pad, 3]
    cc = (cd[:, :, None] * cd[:, None, :]).reshape(e_pad, 9)          # [E_pad, 9]
    feats32 = jnp.concatenate(
        [x, jnp.ones((e_pad, 1), jnp.float32), cc,
         jnp.zeros((e_pad, NUM_MOMENTS - 14), jnp.float32)], axis=1)  # [E_pad, 16]
    f_hi = feats32.astype(jnp.bfloat16)
    f_lo = (feats32 - f_hi.astype(jnp.float32)).astype(jnp.bfloat16)
    feats = jnp.concatenate([f_hi, f_lo], axis=1)                     # [E_pad, 32] bf16

    moments = segment_moments(evox_col, feats, v_pad)                 # [16, V_pad]
    moments = moments[:, :num_voxels].T                               # [V, 16]
    bxyz_sum = moments[:, 0:4]
    volume = moments[:, 4]
    cc_sum = moments[:, 5:14].reshape(num_voxels, 3, 3)

    mask = volume > 0.5
    safe = jnp.maximum(volume, 1.0)
    bxyz = jnp.where(mask[:, None], bxyz_sum / safe[:, None], bcenter)

    # covariance identity centered on bcenter (empty voxels -> exactly 0)
    mc = bxyz[:, 1:] - bcenter[:, 1:]                                 # [V, 3]
    voxel_ddT = cc_sum / safe[:, None, None] - mc[:, :, None] * mc[:, None, :]

    # TODO(synk): batched 3x3 eigh has no Pallas equivalent; done in plain JAX.
    eigvals, eigvecs = jnp.linalg.eigh(voxel_ddT)

    # --- l1 projection in glue (elementwise f32), masked max/min in kernel ----
    point_d = base_bxyz[e_base_g, 1:] - bxyz[e_voxel_g, 1:]           # [E_pad, 3]
    proj = jnp.sum(point_d[:, :, None] * eigvecs[e_voxel_g], axis=1)  # [E_pad, 3]

    pmax, pmin = segment_minmax(evox_col, proj, v_pad)                # [3, V_pad] x2
    # torch_scatter fills segments with no entries with 0 for max/min
    pmax = jnp.where(mask[:, None], pmax[:, :num_voxels].T, 0.0)
    pmin = jnp.where(mask[:, None], pmin[:, :num_voxels].T, 0.0)

    return dict(bxyz=bxyz, volume=volume, volume_mask=mask,
                voxel_ddT=voxel_ddT, eigvals=eigvals, eigvecs=eigvecs,
                l1_proj_max=pmax, l1_proj_min=pmin)


# -----------------------------------------------------------------------------
if __name__ == "__main__":
    key = jax.random.PRNGKey(0)
    k1, k2, k3, k4 = jax.random.split(key, 4)
    N, V, E = 64, 32, 200   # base points, voxels, graph edges

    base_bxyz = jnp.concatenate(
        [jnp.zeros((N, 1), jnp.float32),
         2.0 * jax.random.normal(k1, (N, 3), dtype=jnp.float32)], axis=1)
    bcenter = jnp.concatenate(
        [jnp.zeros((V, 1), jnp.float32),
         2.0 * jax.random.normal(k2, (V, 3), dtype=jnp.float32)], axis=1)

    # Synthesized VoxelGraph edges (VoxelGraph class not provided); e_weight is
    # unused by PCAVolume.forward. The last 4 voxels are left empty to exercise
    # the bcenter fallback branch.
    e_base = jax.random.randint(k3, (E,), 0, N, dtype=jnp.int32)
    e_voxel = jax.random.randint(k4, (E,), 0, V - 4, dtype=jnp.int32)

    out = jax.jit(pca_volume_forward)(base_bxyz, bcenter, e_base, e_voxel)
    out = jax.block_until_ready(out)

    # ---- pure-JAX reference ----
    ones = jnp.ones((E,), jnp.float32)
    bxyz_sum_r = jax.ops.segment_sum(base_bxyz[e_base], e_voxel, V)
    vol_r = jax.ops.segment_sum(ones, e_voxel, V)
    mask_r = vol_r > 0.5
    safe_r = jnp.maximum(vol_r, 1.0)
    bxyz_r = jnp.where(mask_r[:, None], bxyz_sum_r / safe_r[:, None], bcenter)
    d_r = base_bxyz[e_base, 1:] - bxyz_r[e_voxel, 1:]
    ddT_r = jax.ops.segment_sum(d_r[:, :, None] * d_r[:, None, :], e_voxel, V) \
        / safe_r[:, None, None]
    eigvals_r, _ = jnp.linalg.eigh(ddT_r)

    np.testing.assert_array_equal(np.asarray(out["volume_mask"]), np.asarray(mask_r))
    np.testing.assert_allclose(out["volume"], vol_r, atol=1e-5)
    np.testing.assert_allclose(out["bxyz"], bxyz_r, rtol=1e-3, atol=1e-3)
    np.testing.assert_allclose(out["voxel_ddT"], ddT_r, rtol=1e-3, atol=1e-3)
    np.testing.assert_allclose(out["eigvals"], eigvals_r, rtol=1e-2, atol=1e-3)

    # validate proj max/min with the pipeline's own eigvecs (avoids eigenvector
    # sign ambiguity between two independent eigh calls)
    d_pipe = base_bxyz[e_base, 1:] - out["bxyz"][e_voxel, 1:]
    proj_r = jnp.sum(d_pipe[:, :, None] * out["eigvecs"][e_voxel], axis=1)
    pmax_r = jnp.where(mask_r[:, None], jax.ops.segment_max(proj_r, e_voxel, V), 0.0)
    pmin_r = jnp.where(mask_r[:, None], jax.ops.segment_min(proj_r, e_voxel, V), 0.0)
    np.testing.assert_allclose(out["l1_proj_max"], pmax_r, rtol=1e-3, atol=1e-3)
    np.testing.assert_allclose(out["l1_proj_min"], pmin_r, rtol=1e-3, atol=1e-3)

    print("KERNEL_OK")
</pallas_src>

<mosaic_0001>
module attributes {stable_mosaic.version = 11 : i64} {
  func.func @_seg_moments_kernel(%arg0: i32, %arg1: i32, %arg2: memref<512x1xi32, #tpu.memory_space<vmem>>, %arg3: memref<512x32xbf16, #tpu.memory_space<vmem>>, %arg4: memref<16x512xf32, #tpu.memory_space<vmem>>) attributes {dimension_semantics = [#tpu.dimension_semantics<parallel>, #tpu.dimension_semantics<arbitrary>], iteration_bounds = array<i64: 1, 1>, scalar_prefetch = 0 : i64, scratch_operands = 0 : i64, tpu.core_type = #tpu.core_type<tc>, window_params = [{transform_indices = @transform_0, window_bounds = array<i64: 512, 1>}, {transform_indices = @transform_1, window_bounds = array<i64: 512, 32>}, {transform_indices = @transform_2, window_bounds = array<i64: 16, 512>}]} {
    %c0_i32 = arith.constant 0 : i32
    %0 = arith.cmpi eq, %arg1, %c0_i32 : i32
    %1 = arith.extui %0 : i1 to i32
    %c0_i32_0 = arith.constant 0 : i32
    %2 = arith.cmpi ne, %1, %c0_i32_0 : i32
    scf.if %2 {
      %cst_8 = arith.constant 0.000000e+00 : f32
      %21 = vector.broadcast %cst_8 : f32 to vector<16x512xf32>
      %c0_9 = arith.constant 0 : index
      %c0_10 = arith.constant 0 : index
      %22 = vector.load %arg4[%c0_9, %c0_10] : memref<16x512xf32, #tpu.memory_space<vmem>>, vector<16x512xf32>
      tpu.vector_store %arg4[%c0_9, %c0_10], %21 {strides = array<i32>} : memref<16x512xf32, #tpu.memory_space<vmem>>, vector<16x512xf32>,
    } else {
    }
    %c0 = arith.constant 0 : index
    %c0_1 = arith.constant 0 : index
    %3 = vector.load %arg2[%c0, %c0_1] : memref<512x1xi32, #tpu.memory_space<vmem>>, vector<512x1xi32>
    %c512_i32 = arith.constant 512 : i32
    %4 = arith.muli %arg0, %c512_i32 : i32
    %5 = tpu.iota {dimensions = array<i32: 1>} : vector<512x512xi32>
    %6 = vector.broadcast %4 : i32 to vector<512x512xi32>
    %7 = arith.addi %6, %5 : vector<512x512xi32>
    %8 = vector.broadcast %3 : vector<512x1xi32> to vector<512x512xi32>
    %9 = arith.cmpi eq, %8, %7 : vector<512x512xi32>
    %10 = arith.extui %9 : vector<512x512xi1> to vector<512x512xi32>
    %11 = arith.sitofp %10 : vector<512x512xi32> to vector<512x512xf32>
    %12 = arith.truncf %11 : vector<512x512xf32> to vector<512x512xbf16>
    %c0_2 = arith.constant 0 : index
    %c0_3 = arith.constant 0 : index
    %13 = vector.load %arg3[%c0_2, %c0_3] : memref<512x32xbf16, #tpu.memory_space<vmem>>, vector<512x32xbf16>
    %cst = arith.constant dense<0.000000e+00> : vector<32x512xf32>
    %14 = tpu.matmul %13, %12, %cst {dimension_numbers = #tpu.dot_dimension_numbers<[0], [0], [1], [1], [0, 1, 1, 1], [], []>} : vector<512x32xbf16>, vector<512x512xbf16>, vector<32x512xf32> -> vector<32x512xf32>
    %c0_4 = arith.constant 0 : index
    %c0_5 = arith.constant 0 : index
    %15 = vector.load %arg4[%c0_4, %c0_5] : memref<16x512xf32, #tpu.memory_space<vmem>>, vector<16x512xf32>
    %16 = vector.extract_strided_slice %14 {offsets = [0, 0], sizes = [16, 512], strides = [1, 1]} : vector<32x512xf32> to vector<16x512xf32>
    %17 = vector.extract_strided_slice %14 {offsets = [16, 0], sizes = [16, 512], strides = [1, 1]} : vector<32x512xf32> to vector<16x512xf32>
    %18 = arith.addf %16, %17 : vector<16x512xf32>
    %19 = arith.addf %15, %18 : vector<16x512xf32>
    %c0_6 = arith.constant 0 : index
    %c0_7 = arith.constant 0 : index
    %20 = vector.load %arg4[%c0_6, %c0_7] : memref<16x512xf32, #tpu.memory_space<vmem>>, vector<16x512xf32>
    tpu.vector_store %arg4[%c0_6, %c0_7], %19 {strides = array<i32>} : memref<16x512xf32, #tpu.memory_space<vmem>>, vector<16x512xf32>,
    return
  }
  func.func @transform_0(%arg0: i32, %arg1: i32) -> (i32, i32) {
    %c0_i32 = arith.constant 0 : i32
    %c0_i32_0 = arith.constant 0 : i32
    return %arg1, %c0_i32 : i32, i32
  }
  func.func @transform_1(%arg0: i32, %arg1: i32) -> (i32, i32) {
    %c0_i32 = arith.constant 0 : i32
    %c0_i32_0 = arith.constant 0 : i32
    return %arg1, %c0_i32 : i32, i32
  }
  func.func @transform_2(%arg0: i32, %arg1: i32) -> (i32, i32) {
    %c0_i32 = arith.constant 0 : i32
    %c0_i32_0 = arith.constant 0 : i32
    return %c0_i32, %arg0 : i32, i32
  }
}

module attributes {stable_mosaic.version = 11 : i64} {
  func.func @_seg_minmax_kernel(%arg0: i32, %arg1: i32, %arg2: memref<512x1xi32, #tpu.memory_space<vmem>>, %arg3: memref<512x3xf32, #tpu.memory_space<vmem>>, %arg4: memref<3x512xf32, #tpu.memory_space<vmem>>, %arg5: memref<3x512xf32, #tpu.memory_space<vmem>>) attributes {dimension_semantics = [#tpu.dimension_semantics<parallel>, #tpu.dimension_semantics<arbitrary>], iteration_bounds = array<i64: 1, 1>, scalar_prefetch = 0 : i64, scratch_operands = 0 : i64, tpu.core_type = #tpu.core_type<tc>, window_params = [{transform_indices = @transform_0, window_bounds = array<i64: 512, 1>}, {transform_indices = @transform_1, window_bounds = array<i64: 512, 3>}, {transform_indices = @transform_2, window_bounds = array<i64: 3, 512>}, {transform_indices = @transform_3, window_bounds = array<i64: 3, 512>}]} {
    %c0_i32 = arith.constant 0 : i32
    %0 = arith.cmpi eq, %arg1, %c0_i32 : i32
    %1 = arith.extui %0 : i1 to i32
    %c0_i32_0 = arith.constant 0 : i32
    %2 = arith.cmpi ne, %1, %c0_i32_0 : i32
    scf.if %2 {
      %cst_21 = arith.constant 0xFF800000 : f32
      %48 = vector.broadcast %cst_21 : f32 to vector<3x512xf32>
      %c0_22 = arith.constant 0 : index
      %c0_23 = arith.constant 0 : index
      %49 = vector.load %arg4[%c0_22, %c0_23] : memref<3x512xf32, #tpu.memory_space<vmem>>, vector<3x512xf32>
      tpu.vector_store %arg4[%c0_22, %c0_23], %48 {strides = array<i32>} : memref<3x512xf32, #tpu.memory_space<vmem>>, vector<3x512xf32>,
      %cst_24 = arith.constant 0x7F800000 : f32
      %50 = vector.broadcast %cst_24 : f32 to vector<3x512xf32>
      %c0_25 = arith.constant 0 : index
      %c0_26 = arith.constant 0 : index
      %51 = vector.load %arg5[%c0_25, %c0_26] : memref<3x512xf32, #tpu.memory_space<vmem>>, vector<3x512xf32>
      tpu.vector_store %arg5[%c0_25, %c0_26], %50 {strides = array<i32>} : memref<3x512xf32, #tpu.memory_space<vmem>>, vector<3x512xf32>,
    } else {
    }
    %c0 = arith.constant 0 : index
    %c0_1 = arith.constant 0 : index
    %3 = vector.load %arg2[%c0, %c0_1] : memref<512x1xi32, #tpu.memory_space<vmem>>, vector<512x1xi32>
    %c512_i32 = arith.constant 512 : i32
    %4 = arith.muli %arg0, %c512_i32 : i32
    %5 = tpu.iota {dimensions = array<i32: 1>} : vector<512x512xi32>
    %6 = vector.broadcast %4 : i32 to vector<512x512xi32>
    %7 = arith.addi %6, %5 : vector<512x512xi32>
    %8 = vector.broadcast %3 : vector<512x1xi32> to vector<512x512xi32>
    %9 = arith.cmpi eq, %8, %7 : vector<512x512xi32>
    %cst = arith.constant 0.000000e+00 : f32
    %cst_2 = arith.constant 0x7F800000 : f32
    %10 = vector.broadcast %cst : f32 to vector<512x512xf32>
    %11 = vector.broadcast %cst_2 : f32 to vector<512x512xf32>
    %12 = arith.select %9, %10, %11 : vector<512x512xi1>, vector<512x512xf32>
    %c0_3 = arith.constant 0 : index
    %c0_4 = arith.constant 0 : index
    %13 = vector.load %arg3[%c0_3, %c0_4] : memref<512x3xf32, #tpu.memory_space<vmem>>, vector<512x1xf32>
    %14 = vector.broadcast %13 : vector<512x1xf32> to vector<512x512xf32>
    %15 = arith.subf %14, %12 : vector<512x512xf32>
    %cst_5 = arith.constant dense<0xFF800000> : vector<512xf32>
    %16 = vector.multi_reduction <maximumf>, %15, %cst_5 [0] : vector<512x512xf32> to vector<512xf32>
    %17 = vector.shape_cast %16 : vector<512xf32> to vector<1x512xf32>
    %18 = vector.broadcast %13 : vector<512x1xf32> to vector<512x512xf32>
    %19 = arith.addf %18, %12 : vector<512x512xf32>
    %cst_6 = arith.constant dense<0x7F800000> : vector<512xf32>
    %20 = vector.multi_reduction <minimumf>, %19, %cst_6 [0] : vector<512x512xf32> to vector<512xf32>
    %21 = vector.shape_cast %20 : vector<512xf32> to vector<1x512xf32>
    %c0_7 = arith.constant 0 : index
    %c1 = arith.constant 1 : index
    %22 = vector.load %arg3[%c0_7, %c1] : memref<512x3xf32, #tpu.memory_space<vmem>>, vector<512x1xf32>
    %23 = vector.broadcast %22 : vector<512x1xf32> to vector<512x512xf32>
    %24 = arith.subf %23, %12 : vector<512x512xf32>
    %cst_8 = arith.constant dense<0xFF800000> : vector<512xf32>
    %25 = vector.multi_reduction <maximumf>, %24, %cst_8 [0] : vector<512x512xf32> to vector<512xf32>
    %26 = vector.shape_cast %25 : vector<512xf32> to vector<1x512xf32>
    %27 = vector.broadcast %22 : vector<512x1xf32> to vector<512x512xf32>
    %28 = arith.addf %27, %12 : vector<512x512xf32>
    %cst_9 = arith.constant dense<0x7F800000> : vector<512xf32>
    %29 = vector.multi_reduction <minimumf>, %28, %cst_9 [0] : vector<512x512xf32> to vector<512xf32>
    %30 = vector.shape_cast %29 : vector<512xf32> to vector<1x512xf32>
    %c0_10 = arith.constant 0 : index
    %c2 = arith.constant 2 : index
    %31 = vector.load %arg3[%c0_10, %c2] : memref<512x3xf32, #tpu.memory_space<vmem>>, vector<512x1xf32>
    %32 = vector.broadcast %31 : vector<512x1xf32> to vector<512x512xf32>
    %33 = arith.subf %32, %12 : vector<512x512xf32>
    %cst_11 = arith.constant dense<0xFF800000> : vector<512xf32>
    %34 = vector.multi_reduction <maximumf>, %33, %cst_11 [0] : vector<512x512xf32> to vector<512xf32>
    %35 = vector.shape_cast %34 : vector<512xf32> to vector<1x512xf32>
    %36 = vector.broadcast %31 : vector<512x1xf32> to vector<512x512xf32>
    %37 = arith.addf %36, %12 : vector<512x512xf32>
    %cst_12 = arith.constant dense<0x7F800000> : vector<512xf32>
    %38 = vector.multi_reduction <minimumf>, %37, %cst_12 [0] : vector<512x512xf32> to vector<512xf32>
    %39 = vector.shape_cast %38 : vector<512xf32> to vector<1x512xf32>
    %c0_13 = arith.constant 0 : index
    %c0_14 = arith.constant 0 : index
    %40 = vector.load %arg4[%c0_13, %c0_14] : memref<3x512xf32, #tpu.memory_space<vmem>>, vector<3x512xf32>
    %41 = tpu.concatenate %17, %26, %35 in 0 : vector<1x512xf32>, vector<1x512xf32>, vector<1x512xf32> -> vector<3x512xf32>
    %42 = arith.maximumf %40, %41 : vector<3x512xf32>
    %c0_15 = arith.constant 0 : index
    %c0_16 = arith.constant 0 : index
    %43 = vector.load %arg4[%c0_15, %c0_16] : memref<3x512xf32, #tpu.memory_space<vmem>>, vector<3x512xf32>
    tpu.vector_store %arg4[%c0_15, %c0_16], %42 {strides = array<i32>} : memref<3x512xf32, #tpu.memory_space<vmem>>, vector<3x512xf32>,
    %c0_17 = arith.constant 0 : index
    %c0_18 = arith.constant 0 : index
    %44 = vector.load %arg5[%c0_17, %c0_18] : memref<3x512xf32, #tpu.memory_space<vmem>>, vector<3x512xf32>
    %45 = tpu.concatenate %21, %30, %39 in 0 : vector<1x512xf32>, vector<1x512xf32>, vector<1x512xf32> -> vector<3x512xf32>
    %46 = arith.minimumf %44, %45 : vector<3x512xf32>
    %c0_19 = arith.constant 0 : index
    %c0_20 = arith.constant 0 : index
    %47 = vector.load %arg5[%c0_19, %c0_20] : memref<3x512xf32, #tpu.memory_space<vmem>>, vector<3x512xf32>
    tpu.vector_store %arg5[%c0_19, %c0_20], %46 {strides = array<i32>} : memref<3x512xf32, #tpu.memory_space<vmem>>, vector<3x512xf32>,
    return
  }
  func.func @transform_0(%arg0: i32, %arg1: i32) -> (i32, i32) {
    %c0_i32 = arith.constant 0 : i32
    %c0_i32_0 = arith.constant 0 : i32
    return %arg1, %c0_i32 : i32, i32
  }
  func.func @transform_1(%arg0: i32, %arg1: i32) -> (i32, i32) {
    %c0_i32 = arith.constant 0 : i32
    %c0_i32_0 = arith.constant 0 : i32
    return %arg1, %c0_i32 : i32, i32
  }
  func.func @transform_2(%arg0: i32, %arg1: i32) -> (i32, i32) {
    %c0_i32 = arith.constant 0 : i32
    %c0_i32_0 = arith.constant 0 : i32
    return %c0_i32, %arg0 : i32, i32
  }
  func.func @transform_3(%arg0: i32, %arg1: i32) -> (i32, i32) {
    %c0_i32 = arith.constant 0 : i32
    %c0_i32_0 = arith.constant 0 : i32
    return %c0_i32, %arg0 : i32, i32
  }
}

</mosaic_0001>

<bundles_post_ra>
// kernel: custom-call.2
= control target key start
LH: loop header
LB: loop body
LE: loop exit
PB: predicated region body
PF: predicated region fallthrough
CT: control target
= control target key end

     0   :  { %s1724_s30 = smov 0   ;;  %s1726_s10 = smov 0   ;;  %s2050_s0 = inlined_call_operand.vmem [shape: f32[32,2,2], index: 0, kind: input, shape index: {}]   ;;  %s2051_s1 = inlined_call_operand.vmem [shape: f32[32,2,2], index: 1, kind: input, shape index: {}]   ;;  %s2052_s2 = inlined_call_operand.vmem [shape: f32[32,2,2], index: 2, kind: input, shape index: {}]   ;;  %s2053_s3 = inlined_call_operand.vmem [shape: f32[32,2,2], index: 3, kind: input, shape index: {}]   ;;  %s2054_s4 = inlined_call_operand.vmem [shape: f32[32,2], index: 4, kind: output, shape index: {0}]   ;;  %s2055_s5 = inlined_call_operand.vmem [shape: f32[32,2], index: 5, kind: output, shape index: {1}]   ;;  %s2056_s6 = inlined_call_operand.vmem [shape: f32[32,2,2], index: 6, kind: output, shape index: {2}]   ;;  %s2057_s7 = inlined_call_operand.vmem [shape: f32[32,2,2], index: 7, kind: output, shape index: {3}]   ;;  %s2058_s8 = inlined_call_operand.vmem [shape: f32[32,2,2], index: 8, kind: output, shape index: {4}]   ;;  %s2059_s9 = inlined_call_operand.vmem [shape: f32[32,2,2], index: 9, kind: output, shape index: {5}]  }
   0x1   :  { %s1728_s11 = smov 0  }
   0x2 LB: > { %s1740_s12 = sadd.s32 4294967295, %s1661_s11   ;;  %s1743_s13 = sadd.s32 1, %s1661_s11   ;;  %s1661_s11 = sphi %s1728_s11, %s2078_s11   ;;  %s1657_s10 = sphi %s1726_s10, %s2077_s10   ;;  %s1653_s30 = sphi %s1724_s30, %s2076_s30  }
   0x3   : > { %s20_s14 = sshrl.u32 %s1661_s11, 3  ;;  %s21_s15 = sshrl.u32 %s1743_s13, 3 }
   0x4   : > { %s22_s16 = ssub.s32 %s20_s14, %s21_s15  ;;  %s25_s17 = sadd.s32 1, %s1657_s10 }
   0x5   : > { %p23_p0 = scmp.eq.s32.totalorder %s22_s16, 0  ;;  %p35_p1 = scmp.ne.s32.totalorder %s1657_s10, %s1653_s30 }
   0x6   : > { %p36_p2 = scmp.eq.s32.totalorder %s1740_s12, 31  ;;  %p1522_p4 = scmp.ge.s32.totalorder %s1661_s11, 32 }
   0x7   : > { %s1752_s18 = scalar_select %p23_p0, %s1657_s10, %s25_s17  }
   0x8   : > { %p1754_p3 = por %p36_p2, %p35_p1  ;;  %86 = sbr.rel (%p1522_p4) target bundleno = 18 (0x12), region = 16 }
   0x9   : > { %2060 = sst [smem:[#allocation31_spill]] %s1752_s18  ;;  %s88_s20 = sand.u32 (!%p1522_p4), 1, %s1661_s11  }
   0xa   : > { %s1524_s21 = sshll.u32 (!%p1522_p4), %s1661_s11, 1  ;;  %s1523_s22 = sshll.u32 (!%p1522_p4), %s88_s20, 1 }
   0xb   : > { %s92_s25 = scalar_lea.vmem (!%p1522_p4), %s2050_s0, %s1524_s21  ;;  %s90_s26 = scalar_lea.vmem (!%p1522_p4), [#allocation1], %s1523_s22 }
   0xc   : > { %s131_s29 = scalar_lea.vmem (!%p1522_p4), %s2051_s1, %s1524_s21  ;;  %s170_s16 = scalar_lea.vmem (!%p1522_p4), %s2052_s2, %s1524_s21 }
   0xd   : > { %v109_v0 = vld [vmem:[%s92_s25] sm:$0x3]  ;;  %s129_s17 = scalar_lea.vmem [#allocation3], %s1523_s22  ;;  %s209_s23 = scalar_lea.vmem %s2053_s3, %s1524_s21 }
   0xe   : > { %110 = vst [vmem:[%s90_s26] sm:$0x3] %v109_v0  ;;  %v148_v1 = vld [vmem:[%s131_s29] sm:$0x3]  ;;  %s168_s24 = scalar_lea.vmem [#allocation5], %s1523_s22  ;;  %s207_s25 = scalar_lea.vmem [#allocation7], %s1523_s22 }
   0xf   : > { %149 = vst [vmem:[%s129_s17] sm:$0x3] %v148_v1  ;;  %v187_v2 = vld [vmem:[%s170_s16] sm:$0x3] }
  0x10   : > { %188 = vst [vmem:[%s168_s24] sm:$0x3] %v187_v2  ;;  %v226_v3 = vld [vmem:[%s209_s23] sm:$0x3] }
  0x11   : > { %227 = vst [vmem:[%s207_s25] sm:$0x3] %v226_v3 }
  0x12 PF: > { %p1531_p5 = scmp.ge.s32.totalorder %s1661_s11, 1  ;;  %p244_p6 = scmp.lt.s32.totalorder %s1661_s11, 33 }
  0x14   : > { %p245_p7 = pnand %p1531_p5, %p244_p6 }
  0x16   : > { %248 = sbr.rel (%p245_p7) target bundleno = 986 (0x3da), region = 140 }
  0x1b   : > { %s267_s26 = sand.u32 1, %s1740_s12   ;;  %s285_s27 = sand.u32 1, %s1653_s30   ;;  %v349_v4 = vlaneseq  ;;  %v1671_v5 = vmov 0.0  }
  0x1c   : > { %s1777_s28 = sshll.u32 %s267_s26, 1  ;;  %s1779_s18 = sshll.u32 %s285_s27, 3  ;;  %344 = vst [vmem:[#allocation10] sm:$0xff] %v1671_v5  ;;  %345 = vst [vmem:[#allocation12] sm:$0xff] %v1671_v5 }
  0x1d   : > { %346 = vst [vmem:[#allocation14] sm:$0xff] %v1671_v5  ;;  %347 = vst [vmem:[#allocation16] sm:$0xff] %v1671_v5  ;;  %v1781_v6 = vand.u32 127, %v349_v4  ;;  %v1783_v7 = vshrl.u32 %v349_v4, 7  ;;  %s269_s11 = scalar_lea.vmem [#allocation1], %s1777_s28  ;;  %s273_s30 = scalar_lea.vmem [#allocation3], %s1777_s28 }
  0x1e   : > { %v313_v8 = vld [vmem:[%s269_s11] sm:$0x3]  ;;  %v318_v9 = vld [vmem:[%s273_s30] sm:$0x3]  ;;  %s277_s21 = scalar_lea.vmem [#allocation5], %s1777_s28  ;;  %s281_s22 = scalar_lea.vmem [#allocation7], %s1777_s28 }
  0x1f   : > { %314 = vst [vmem:[#allocation0] sm:$0x3] %v313_v8  ;;  %319 = vst [vmem:[#allocation2] sm:$0x3] %v318_v9  ;;  %v323_v10 = vld [vmem:[%s277_s21] sm:$0x3]  ;;  %v351_v6 = vmov %v1781_v6  ;;  %v354_v7 = vmov %v1783_v7 }
  0x20   : > { %v328_v11 = vld [vmem:[%s281_s22] sm:$0x3]  ;;  %324 = vst [vmem:[#allocation4] sm:$0x3] %v323_v10  ;;  %v364_v6 = vmov %v1781_v6  ;;  %v367_v7 = vmov %v1783_v7  ;;  %s332_s29 = smov [#allocation18]  ;;  %s335_s14 = smov [#allocation19]  ;;  %vm358_vm0 = vcmp.eq.s32.totalorder %v354_v7, %v351_v6 }
  0x21   : > { %329 = vst [vmem:[#allocation6] sm:$0x3] %v328_v11  ;;  %vm371_vm1 = vcmp.eq.s32.totalorder %v367_v7, %v364_v6  ;;  %s348_s15 = smov [#allocation10]  ;;  %s361_s16 = smov [#allocation16]  ;;  %vm1411_vm2 = vcmp.lt.s32.totalorder %v1781_v6, 2  ;;  %v1403_v6 = vmov %v1781_v6  ;;  %v1406_v7 = vmov %v1783_v7 }
  0x22   : > { %s338_s17 = smov [#allocation20]  ;;  %s341_s20 = smov [#allocation21]  ;;  %vm1416_vm3 = vcmp.eq.s32.totalorder %v1406_v7, %v1403_v6  ;;  %v1454_v6 = vmov %v1781_v6  ;;  %v1423_v7 = vmov %v1783_v7 }
  0x23   : > { %v355_v12 = vld [vmem:[%s348_s15] sm:$0x3]  ;;  %s1407_s30 = smov [#allocation18]  ;;  %s1424_s21 = smov [#allocation19]  ;;  %v1420_v6 = vmov %v1781_v6  ;;  %v1457_v7 = vmov %v1783_v7 }
  0x24   : > { %v368_v13 = vld [vmem:[%s361_s16] sm:$0x3]  ;;  %v359_v16 = vsel %vm358_vm0, 1.0, %v355_v12  ;;  %s1441_s22 = smov [#allocation20]  ;;  %v1437_v6 = vmov %v1781_v6  ;;  %v1440_v7 = vmov %v1783_v7  ;;  %vm1467_vm4 = vcmp.eq.s32.totalorder %v1457_v7, %v1454_v6 }
  0x25   : > { %v372_v17 = vsel %vm371_vm1, 1.0, %v368_v13  ;;  %360 = vst [vmem:[%s348_s15] sm:$0x3] %v359_v16 }
  0x26   : > { %v333_v14 = vld [vmem:[#allocation0] sm:$0xff]  ;;  %v336_v15 = vld [vmem:[#allocation2] sm:$0xff]  ;;  %373 = vst [vmem:[%s361_s16] sm:$0x3] %v372_v17 }
  0x27   : > { %334 = vst [vmem:[%s332_s29] sm:$0xff] %v333_v14  ;;  %337 = vst [vmem:[%s335_s14] sm:$0xff] %v336_v15  ;;  %v339_v18 = vld [vmem:[#allocation4] sm:$0xff]  ;;  %s1458_s29 = smov [#allocation21] }
  0x28   : > { %v342_v19 = vld [vmem:[#allocation6] sm:$0xff]  ;;  %340 = vst [vmem:[%s338_s17] sm:$0xff] %v339_v18 }
  0x29   : > { %343 = vst [vmem:[%s341_s20] sm:$0xff] %v342_v19 }
  0x2e   : > { %v1413_v20 = vld [vmem:[%s1407_s30] sm:$0x3] }
  0x2f   : > { %v1430_v21 = vld [vmem:[%s1424_s21] sm:$0x3]  ;;  %v1414_v22 = vsel %vm1411_vm2, %v1413_v20, 0.0 }
  0x30   : > { %v1431_v23 = vsel %vm1411_vm2, %v1430_v21, 0.0  ;;  %v1447_v24 = vld [vmem:[%s1441_s22] sm:$0x3]  ;;  %v1415_v26 = vmul.f32 %v1414_v22, %v1414_v22 }
  0x31   : > { %v1464_v25 = vld [vmem:[%s1458_s29] sm:$0x3]  ;;  %v1432_v27 = vmul.f32 %v1431_v23, %v1431_v23  ;;  %v1448_v28 = vsel %vm1411_vm2, %v1447_v24, 0.0 }
  0x32   : > { %v1465_v29 = vsel %vm1411_vm2, %v1464_v25, 0.0  ;;  %v1449_v30 = vmul.f32 %v1448_v28, %v1448_v28  ;;  %v1417_v33 = vsel %vm1416_vm3, 0.0, %v1415_v26 }
  0x33   : > { %v1434_v31 = vadd.f32 %v1432_v27, %v1415_v26  ;;  %v1466_v32 = vmul.f32 %v1465_v29, %v1465_v29  ;;  %v1433_v34 = vadd.f32 %v1432_v27, %v1417_v33 }
  0x35   : > { %v1451_v35 = vadd.f32 %v1449_v30, %v1434_v31  ;;  %v1450_v36 = vadd.f32 %v1449_v30, %v1433_v34  ;;  %v1468_v37 = vsel %vm1467_vm4, 0.0, %v1466_v32 }
  0x37   : > { %v1470_v38 = vadd.f32 %v1466_v32, %v1451_v35  ;;  %v1469_v39 = vadd.f32 %v1468_v37, %v1450_v36 }
  0x39   : > { %1471 = vadd.xlane.f32.xlu0 %v1470_v38 }
  0x3d   : > { %1479 = vadd.xlane.f32.xlu0 %v1469_v39 }
  0xc2   : > { %v1472_v40 = vpop.xlane.xlu0 %1471 }
  0xc3   : > { %v1473_v41 = vrot.slane %v1472_v40, 4 }
  0xc5   : > { %v1474_v42 = vadd.f32 %v1473_v41, %v1472_v40 }
  0xc6   : > { %v1480_v43 = vpop.xlane.xlu0 %1479 }
  0xc7   : > { %v1475_v44 = vrot.slane %v1474_v42, 2  ;;  %v1481_v45 = vrot.slane %v1480_v43, 4 }
  0xc9   : > { %v1482_v46 = vadd.f32 %v1481_v45, %v1480_v43  ;;  %v1476_v47 = vadd.f32 %v1475_v44, %v1474_v42 }
  0xcb   : > { %v1483_v48 = vrot.slane %v1482_v46, 2  ;;  %v1477_v50 = vrot.slane %v1476_v47, 1 }
  0xcd   : > { %v1484_v49 = vadd.f32 %v1483_v48, %v1482_v46  ;;  %v1478_v53 = vadd.f32 %v1477_v50, %v1476_v47 }
  0xcf   : > { %v1485_v51 = vrot.slane %v1484_v49, 1 }
  0xd1   : > { %v1486_v52 = vadd.f32 %v1485_v51, %v1484_v49 }
  0xd3   : > { %1572 = vpush %v1486_v52 }
  0xd4   : > { %1574 = vpush %v1478_v53 }
 0x104   : > { %s1573_s14 = spop %1572 }
 0x105   : > { %s1575_s15 = spop %1574 }
 0x106   : > { %s1489_s16 = smul.f32 1e-10, %s1575_s15 }
 0x108   : > { %p1490_p8 = scmp.le.f32.partialorder %s1573_s14, %s1489_s16 }
 0x109   : > { %s1817_s17 = smov (!%p1490_p8), 0  }
 0x10a   : > { %1493 = sbr.rel (%p1490_p8) target bundleno = 948 (0x3b4), region = 475 }
 0x10f LB: >> { %s1822_s20 = smov 0   ;;  %s1665_s17 = sphi %s1817_s17, %s2062_s17  }
 0x110 LB: >>> { %s478_s30 = smov [#allocation18]  ;;  %v482_v6 = vmov %v1781_v6  ;;  %v485_v7 = vmov %v1783_v7  ;;  %s498_s21 = smov [#allocation19]  ;;  %vm801_vm14 = vcmp.eq.s32.totalorder %v1783_v7, 0  ;;  %vm813_vm15 = vcmp.eq.s32.totalorder %v1783_v7, 1  ;;  %s1669_s20 = sphi %s1822_s20, %s477_s20  }
 0x111   : >>> { %v502_v6 = vmov %v1781_v6  ;;  %v505_v7 = vmov %v1783_v7  ;;  %v486_v54 = vld [vmem:[%s478_s30] sm:$0x3]  ;;  %vm489_vm5 = vcmp.eq.s32.totalorder %v485_v7, %v482_v6  ;;  %s518_s22 = smov [#allocation21]  ;;  %s479_s29 = smov [#allocation22] }
 0x112   : >>> { %vm509_vm6 = vcmp.eq.s32.totalorder %v505_v7, %v502_v6  ;;  %v522_v6 = vmov %v1781_v6  ;;  %v525_v7 = vmov %v1783_v7  ;;  %v490_v55 = vsel %vm489_vm5, %v486_v54, 0.0  ;;  %v506_v56 = vld [vmem:[%s498_s21] sm:$0x3]  ;;  %s499_s14 = smov [#allocation23]  ;;  %s519_s15 = smov [#allocation24] }
 0x113   : >>> { %vm529_vm7 = vcmp.eq.s32.totalorder %v525_v7, %v522_v6  ;;  %v491_v57 = vrot.slane %v490_v55, 4  ;;  %v510_v58 = vsel %vm509_vm6, %v506_v56, 0.0  ;;  %v526_v59 = vld [vmem:[%s518_s22] sm:$0x3]  ;;  %s542_s16 = smov [#allocation23]  ;;  %s540_s30 = smov [#allocation22]  ;;  %v591_v6 = vmov %v1781_v6 }
 0x114   : >>> { %v511_v60 = vrot.slane %v510_v58, 4  ;;  %v530_v61 = vsel %vm529_vm7, %v526_v59, 0.0  ;;  %s544_s21 = smov [#allocation24]  ;;  %s579_s22 = smov [#allocation25]  ;;  %v594_v7 = vmov %v1783_v7  ;;  %v606_v6 = vmov %v1781_v6 }
 0x115   : >>> { %v492_v62 = vadd.f32 %v491_v57, %v490_v55  ;;  %v531_v63 = vrot.slane %v530_v61, 4  ;;  %v609_v7 = vmov %v1783_v7  ;;  %vm596_vm12 = vcmp.eq.s32.totalorder %v594_v7, %v591_v6  ;;  %s1841_s24 = smov [#allocation20]  ;;  %s1847_s23 = smov [#allocation12] }
 0x116   : >>> { %v512_v0 = vadd.f32 %v511_v60, %v510_v58  ;;  %vm611_vm13 = vcmp.eq.s32.totalorder %v609_v7, %v606_v6  ;;  %s841_s11 = smov [#allocation29]  ;;  %s1853_s27 = smov [#allocation16]  ;;  %v627_v55 = vld [vmem:[%s1841_s24] sm:$0x3]  ;;  %v704_v6 = vmov %v1781_v6  ;;  %v707_v7 = vmov %v1783_v7 }
 0x117   : >>> { %v493_v1 = vrot.slane %v492_v62, 2  ;;  %v532_v2 = vadd.f32 %v531_v63, %v530_v61  ;;  %v850_v58 = vld [vmem:[%s1847_s23] sm:$0x3]  ;;  %s619_s26 = smov [#allocation30]  ;;  %s843_s25 = smov [#allocation30]  ;;  %v718_v6 = vmov %v1781_v6  ;;  %v721_v7 = vmov %v1783_v7 }
 0x118   : >>> { %v513_v3 = vrot.slane %v512_v0, 2  ;;  %v852_v61 = vld [vmem:[%s1853_s27] sm:$0x3]  ;;  %vm711_vm0 = vcmp.eq.s32.totalorder %v707_v7, %v704_v6  ;;  %v677_v6 = vmov %v1781_v6  ;;  %v680_v7 = vmov %v1783_v7  ;;  %s477_s20 = sadd.s32 1, %s1669_s20  }
 0x119   : >>> { %v494_v4 = vadd.f32 %v493_v1, %v492_v62  ;;  %v533_v5 = vrot.slane %v532_v2, 2  ;;  %v691_v6 = vmov %v1781_v6  ;;  %v694_v7 = vmov %v1783_v7  ;;  %p474_p9 = scmp.ge.s32.totalorder %s477_s20, 3  }
 0x11a   : >>> { %v514_v8 = vadd.f32 %v513_v3, %v512_v0  ;;  %vm726_vm1 = vcmp.eq.s32.totalorder %v721_v7, %v718_v6  ;;  %vm685_vm3 = vcmp.eq.s32.totalorder %v680_v7, %v677_v6  ;;  %vm698_vm4 = vcmp.eq.s32.totalorder %v694_v7, %v691_v6 }
 0x11b   : >>> { %v495_v9 = vrot.slane %v494_v4, 1  ;;  %v534_v10 = vadd.f32 %v533_v5, %v532_v2  ;;  %vm740_vm5 = vcmp.eq.s32.totalorder %v1781_v6, 0  ;;  %vm744_vm6 = vcmp.eq.s32.totalorder %v1781_v6, 1 }
 0x11c   : >>> { %v515_v11 = vrot.slane %v514_v8, 1  ;;  %v378_v6 = vmov (%p474_p9), %v1781_v6  ;;  %v381_v7 = vmov (%p474_p9), %v1783_v7 }
 0x11d   : >>> { %v496_v12 = vadd.f32 %v495_v9, %v494_v4  ;;  %v535_v13 = vrot.slane %v534_v10, 1  ;;  %v431_v6 = vmov (%p474_p9), %v1781_v6  ;;  %vm393_vm7 = vcmp.eq.s32.totalorder (%p474_p9), %v381_v7, %v378_v6 }
 0x11e   : >>> { %v516_v14 = vadd.f32 %v515_v11, %v514_v8  ;;  %v434_v7 = vmov (%p474_p9), %v1783_v7  ;;  %v397_v6 = vmov (%p474_p9), %v1781_v6 }
 0x11f   : >>> { %497 = vst [vmem:[%s479_s29] sm:$0x1] %v496_v12  ;;  %v536_v15 = vadd.f32 %v535_v13, %v534_v10  ;;  %s581_s29 = smov [#allocation26]  ;;  %v400_v7 = vmov (%p474_p9), %v1783_v7  ;;  %v414_v6 = vmov (%p474_p9), %v1781_v6 }
 0x120   : >>> { %517 = vst [vmem:[%s499_s14] sm:$0x1] %v516_v14  ;;  %s538_s14 = smov [#allocation27]  ;;  %v417_v7 = vmov (%p474_p9), %v1783_v7 }
 0x121   : >>> { %537 = vst [vmem:[%s519_s15] sm:$0x1] %v536_v15  ;;  %s539_s15 = smov [#allocation28]  ;;  %s583_s14 = smov %s538_s14 }
 0x122   : >>> { %s585_s15 = smov %s539_s15 }
 0x126   : >>> { %v541_v18 = vld [vmem:[%s540_s30] sm:$0xff]  ;;  %s602_s30 = smov [#allocation28] }
 0x127   : >>> { %v543_v16 = vld [vmem:[%s542_s16] sm:$0xff]  ;;  %v564_v33 = vand.u32 2147483647, %v541_v18  ;;  %s587_s16 = smov [#allocation27] }
 0x128   : >>> { %v547_v17 = vmul.f32 2.0, %v543_v16  ;;  %v545_v19 = vld [vmem:[%s544_s21] sm:$0xff]  ;;  %v565_v36 = vand.u32 2147483647, %v543_v16  ;;  %s600_s21 = smov [#allocation29] }
 0x129   : >>> { %v546_v20 = vsub.f32 %v545_v19, %v541_v18  ;;  %v566_v34 = vand.u32 2147483647, %v545_v19 }
 0x12a   : >>> { %1623 = vrcp.f32 %v547_v17 }
 0x12b   : >>> { %v567_v35 = vmin.f32 %v564_v33, %v566_v34 }
 0x12d   : >>> { %v568_v37 = vmul.f32 1.1920929e-08, %v567_v35 }
 0x12f   : >>> { %vm569_vm11 = vcmp.le.f32.partialorder %v565_v36, %v568_v37 }
 0x137   : >>> { %v1624_v21 = vpop.eup %1623 }
 0x138   : >>> { %v549_v22 = vmul.f32 %v1624_v21, %v546_v20 }
 0x13a   : >>> { %v551_v23 = vmul.f32 %v549_v22, %v549_v22  ;;  %vm550_vm10 = vcmp.ge.f32.partialorder %v549_v22, 0.0 }
 0x13c   : >>> { %v552_v24 = vadd.f32 1.0, %v551_v23 }
 0x13e   : >>> { %1625 = vrsqrt.f32 %v552_v24  ;;  %vm555_vm8 = vcmp.eq.f32.partialorder %v552_v24, inf  ;;  %v558_v26 = vand.u32 2147483648, %v552_v24  ;;  %vm557_vm9 = vcmp.eq.f32.partialorder %v552_v24, 0.0 }
 0x14b   : >>> { %v1626_v25 = vpop.eup %1625 }
 0x14c   : >>> { %v554_v27 = vmul.f32 %v1626_v25, %v552_v24 }
 0x14e   : >>> { %v556_v28 = vsel %vm555_vm8, %v552_v24, %v554_v27  ;;  %vm446_vm8 = vcmp.eq.s32.totalorder (%p474_p9), %v434_v7, %v431_v6 }
 0x14f   : >>> { %v559_v29 = vsel %vm557_vm9, %v558_v26, %v556_v28 }
 0x150   : >>> { %v560_v30 = vxor.u32 2147483648, %v559_v29 }
 0x152   : >>> { %v561_v31 = vsel %vm550_vm10, %v559_v29, %v560_v30 }
 0x153   : >>> { %v562_v32 = vadd.f32 %v561_v31, %v549_v22 }
 0x155   : >>> { %1627 = vrcp.f32 %v562_v32 }
 0x162   : >>> { %v1628_v38 = vpop.eup %1627 }
 0x163   : >>> { %v570_v39 = vsel %vm569_vm11, 0.0, %v1628_v38 }
 0x164   : >>> { %v571_v40 = vmul.f32 %v570_v39, %v570_v39  ;;  %v575_v41 = vmul.f32 %v570_v39, %v543_v16 }
 0x166   : >>> { %v572_v42 = vadd.f32 1.0, %v571_v40  ;;  %v576_v43 = vsub.f32 %v541_v18, %v575_v41  ;;  %v578_v44 = vadd.f32 %v575_v41, %v545_v19 }
 0x168   : >>> { %1629 = vrsqrt.f32 %v572_v42  ;;  %580 = vst [vmem:[%s579_s22] sm:$0xff] %v576_v43  ;;  %582 = vst [vmem:[%s581_s29] sm:$0xff] %v578_v44  ;;  %s617_s22 = smov [#allocation29]  ;;  %s1837_s29 = smov [#allocation18] }
 0x169   : >>> { %v625_v53 = vld [vmem:[%s1837_s29] sm:$0x3] }
 0x175   : >>> { %v1630_v45 = vpop.eup %1629 }
 0x176   : >>> { %584 = vst [vmem:[%s583_s14] sm:$0xff] %v1630_v45  ;;  %v574_v46 = vmul.f32 %v1630_v45, %v570_v39  ;;  %s615_s14 = smov [#allocation30] }
 0x178   : >>> { %586 = vst [vmem:[%s585_s15] sm:$0xff] %v574_v46  ;;  %s1839_s15 = smov [#allocation19] }
 0x179   : >>> { %v626_v54 = vld [vmem:[%s1839_s15] sm:$0x3] }
 0x17d   : >>> { %v588_v47 = vld [vmem:[%s587_s16] ss:$0 sm:$0xff]  ;;  %s1843_s16 = smov [#allocation21] }
 0x17e   : >>> { %v597_v48 = vsel %vm596_vm12, %v588_v47, 0.0  ;;  %v628_v56 = vld [vmem:[%s1843_s16] sm:$0x3] }
 0x17f   : >>> { %598 = vadd.xlane.f32.xlu0 %v597_v48  ;;  %v603_v49 = vld [vmem:[%s602_s30] ss:$0 sm:$0xff]  ;;  %s1845_s30 = smov [#allocation10] }
 0x180   : >>> { %v612_v50 = vsel %vm611_vm13, %v603_v49, 0.0  ;;  %v849_v57 = vld [vmem:[%s1845_s30] sm:$0x3] }
 0x183   : >>> { %613 = vadd.xlane.f32.xlu0 %v612_v50 }
 0x208   : >>> { %v599_v51 = vpop.xlane.xlu0 %598 }
 0x209   : >>> { %601 = vst [vmem:[%s600_s21] sm:$0xff] %v599_v51  ;;  %s1849_s21 = smov [#allocation14] }
 0x20a   : >>> { %v851_v59 = vld [vmem:[%s1849_s21] sm:$0x3] }
 0x20c   : >>> { %v614_v52 = vpop.xlane.xlu0 %613 }
 0x20d   : >>> { %616 = vst [vmem:[%s615_s14] sm:$0xff] %v614_v52  ;;  %s1873_s14 = smov [#allocation21] }
 0x210   : >>> { %v618_v60 = vld [vmem:[%s617_s22] sm:$0xff]  ;;  %s1871_s22 = smov [#allocation20] }
 0x211   : >>> { %v842_v62 = vld [vmem:[%s841_s11] sm:$0xff]  ;;  %v629_v63 = vmul.f32 %v625_v53, %v618_v60  ;;  %v632_v0 = vmul.f32 %v626_v54, %v618_v60  ;;  %v636_v1 = vmul.f32 %v627_v55, %v618_v60  ;;  %v639_v2 = vmul.f32 %v628_v56, %v618_v60  ;;  %s1869_s11 = smov [#allocation10] }
 0x212   : >>> { %v853_v3 = vmul.f32 %v849_v57, %v842_v62  ;;  %v856_v4 = vmul.f32 %v850_v58, %v842_v62  ;;  %v860_v5 = vmul.f32 %v851_v59, %v842_v62  ;;  %v863_v8 = vmul.f32 %v852_v61, %v842_v62 }
 0x214   : >>> { %v620_v9 = vld [vmem:[%s619_s26] sm:$0xff]  ;;  %s647_s26 = smov [#allocation28] }
 0x215   : >>> { %v844_v10 = vld [vmem:[%s843_s25] sm:$0xff]  ;;  %v630_v11 = vmul.f32 %v627_v55, %v620_v9  ;;  %v633_v12 = vmul.f32 %v628_v56, %v620_v9  ;;  %v635_v13 = vmul.f32 %v625_v53, %v620_v9  ;;  %v638_v14 = vmul.f32 %v626_v54, %v620_v9  ;;  %s645_s25 = smov [#allocation27] }
 0x216   : >>> { %v854_v15 = vmul.f32 %v851_v59, %v844_v10  ;;  %v857_v16 = vmul.f32 %v852_v61, %v844_v10  ;;  %v859_v17 = vmul.f32 %v849_v57, %v844_v10  ;;  %v862_v18 = vmul.f32 %v850_v58, %v844_v10  ;;  %v646_v27 = vld [vmem:[%s645_s25] ss:$0 sm:$0xff]  ;;  %s674_s25 = smov [#allocation25] }
 0x217   : >>> { %v631_v19 = vsub.f32 %v629_v63, %v630_v11  ;;  %v634_v20 = vsub.f32 %v632_v0, %v633_v12  ;;  %v637_v21 = vadd.f32 %v636_v1, %v635_v13  ;;  %v640_v22 = vadd.f32 %v639_v2, %v638_v14  ;;  %v648_v28 = vld [vmem:[%s647_s26] ss:$0 sm:$0xff]  ;;  %s673_s26 = smov [#allocation18] }
 0x218   : >>> { %v855_v23 = vsub.f32 %v853_v3, %v854_v15  ;;  %v858_v24 = vsub.f32 %v856_v4, %v857_v16  ;;  %v861_v25 = vadd.f32 %v860_v5, %v859_v17  ;;  %v864_v26 = vadd.f32 %v863_v8, %v862_v18  ;;  %v681_v63 = vld [vmem:[%s674_s25] ss:$0 sm:$0xff]  ;;  %s917_s25 = sadd.s32 (%p474_p9), 1, %s1665_s17  }
 0x219   : >>> { %642 = vst [vmem:[%s1839_s15] sm:$0x3] %v634_v20  ;;  %644 = vst [vmem:[%s1843_s16] sm:$0x3] %v640_v22  ;;  %s1875_s15 = smov [#allocation18]  ;;  %s715_s16 = smov [#allocation26] }
 0x21a   : >>> { %641 = vst [vmem:[%s1837_s29] sm:$0x3] %v631_v19  ;;  %643 = vst [vmem:[%s1841_s24] sm:$0x3] %v637_v21  ;;  %s1877_s24 = smov [#allocation14]  ;;  %s1885_s29 = smov [#allocation19]  ;;  %v722_v59 = vld [vmem:[%s715_s16] ss:$0 sm:$0xff] }
 0x21b   : >>> { %865 = vst [vmem:[%s1845_s30] sm:$0x3] %v855_v23  ;;  %866 = vst [vmem:[%s1847_s23] sm:$0x3] %v858_v24  ;;  %s1879_s23 = smov [#allocation12]  ;;  %s701_s30 = smov [#allocation20] }
 0x21c   : >>> { %867 = vst [vmem:[%s1849_s21] sm:$0x3] %v861_v25  ;;  %868 = vst [vmem:[%s1853_s27] sm:$0x3] %v864_v26  ;;  %s1883_s27 = smov [#allocation16]  ;;  %s714_s21 = smov [#allocation21] }
 0x21d   : >>> { %s817_s16 = smov [#allocation19]  ;;  %p470_p10 = scmp.ge.s32.totalorder (%p474_p9), %s917_s25, 15 }
 0x21e   : >> { %s2062_s17 = smov (%p474_p9), %s917_s25 }
 0x220   : >>> { %v656_v30 = vld [vmem:[%s1873_s14] sm:$0x3] }
 0x221   : >>> { %v655_v29 = vld [vmem:[%s1871_s22] sm:$0x3]  ;;  %v664_v36 = vmul.f32 %v656_v30, %v648_v28  ;;  %v667_v42 = vmul.f32 %v656_v30, %v646_v27 }
 0x222   : >>> { %v653_v31 = vld [vmem:[%s1875_s15] sm:$0x3]  ;;  %v663_v35 = vmul.f32 %v655_v29, %v646_v27  ;;  %v666_v37 = vmul.f32 %v655_v29, %v648_v28 }
 0x223   : >>> { %v871_v32 = vld [vmem:[%s1869_s11] ss:$0 sm:$0xff]  ;;  %v1551_v34 = vld [vmem:[%s1869_s11 + $0x1] ss:$0 sm:$0xff]  ;;  %v657_v48 = vmul.f32 %v653_v31, %v646_v27  ;;  %v660_v49 = vmul.f32 %v653_v31, %v648_v28 }
 0x224   : >>> { %v1550_v33 = vld [vmem:[%s1869_s11 - $0x1] sm:$0x2]  ;;  %v1553_v40 = vld [vmem:[%s1877_s24 + $0x1] sm:$0x1]  ;;  %v665_v47 = vsub.f32 %v663_v35, %v664_v36  ;;  %v668_v53 = vadd.f32 %v667_v42, %v666_v37 }
 0x225   : >>> { %v878_v38 = vsel %vm801_vm14, %v871_v32, %v1550_v33  ;;  %v882_v39 = vld [vmem:[%s1877_s24] ss:$0 sm:$0xff]  ;;  %v890_v43 = vsel %vm813_vm15, %v1551_v34, %v1553_v40  ;;  %v1555_v45 = vld [vmem:[%s1879_s23 + $0x1] ss:$0 sm:$0xff] }
 0x226   : >>> { %v895_v41 = vld [vmem:[%s1879_s23] ss:$0 sm:$0xff]  ;;  %881 = vst [vmem:[%s1869_s11] sm:$0x3] %v878_v38  ;;  %892 = vst [vmem:[%s1877_s24] sm:$0x3] %v890_v43  ;;  %v1557_v51 = vld [vmem:[%s1883_s27 + $0x1] sm:$0x1] }
 0x227   : >>> { %v1554_v44 = vld [vmem:[%s1879_s23 - $0x1] sm:$0x2]  ;;  %1552 = vst [vmem:[%s1869_s11 + $0x1] sm:$0x1] %v882_v39  ;;  %v914_v54 = vsel %vm813_vm15, %v1555_v45, %v1557_v51  ;;  %671 = vst [vmem:[%s1871_s22] sm:$0x3] %v665_v47  ;;  %s688_s11 = smov [#allocation19] }
 0x228   : >>> { %v906_v46 = vld [vmem:[%s1883_s27] ss:$0 sm:$0xff]  ;;  %v902_v50 = vsel %vm801_vm14, %v895_v41, %v1554_v44  ;;  %672 = vst [vmem:[%s1873_s14] sm:$0x3] %v668_v53  ;;  %s1927_s22 = smov [#allocation20]  ;;  %s1672_s14 = smov 1  }
 0x229   : >>> { %v654_v52 = vld [vmem:[%s1885_s29] sm:$0x3]  ;;  %905 = vst [vmem:[%s1879_s23] sm:$0x3] %v902_v50  ;;  %916 = vst [vmem:[%s1883_s27] sm:$0x3] %v914_v54  ;;  %s730_s24 = smov [#allocation19]  ;;  %s1930_s27 = smov [#allocation21] }
 0x22a   : >>> { %v658_v55 = vmul.f32 %v654_v52, %v648_v28  ;;  %v661_v56 = vmul.f32 %v654_v52, %v646_v27  ;;  %1556 = vst [vmem:[%s1879_s23 + $0x1] sm:$0x1] %v906_v46  ;;  %s1673_s23 = smov 127  }
 0x22c   : >>> { %v659_v57 = vsub.f32 %v657_v48, %v658_v55  ;;  %v662_v58 = vadd.f32 %v661_v56, %v660_v49 }
 0x22e   : >>> { %669 = vst [vmem:[%s1875_s15] sm:$0x3] %v659_v57  ;;  %670 = vst [vmem:[%s1885_s29] sm:$0x3] %v662_v58  ;;  %v708_v60 = vld [vmem:[%s701_s30] sm:$0x3]  ;;  %s729_s15 = smov [#allocation18]  ;;  %s793_s29 = smov [#allocation18] }
 0x22f   : >>> { %v712_v61 = vsel %vm711_vm0, 0.0, %v708_v60  ;;  %v723_v62 = vld [vmem:[%s714_s21] sm:$0x3] }
 0x230   : >>> { %713 = vst [vmem:[%s701_s30] sm:$0x3] %v712_v61  ;;  %v727_v0 = vsel %vm726_vm1, %v722_v59, %v723_v62  ;;  %s794_s30 = smov [#allocation20] }
 0x231   : >>> { %728 = vst [vmem:[%s714_s21] sm:$0x3] %v727_v0  ;;  %s818_s21 = smov [#allocation21] }
 0x235   : >>> { %v682_v1 = vld [vmem:[%s673_s26] sm:$0x3] }
 0x236   : >>> { %v695_v2 = vld [vmem:[%s688_s11] sm:$0x3]  ;;  %v686_v3 = vsel %vm685_vm3, %v681_v63, %v682_v1 }
 0x237   : >>> { %v699_v4 = vsel %vm698_vm4, 0.0, %v695_v2  ;;  %687 = vst [vmem:[%s673_s26] sm:$0x3] %v686_v3  ;;  %v767_v5 = vld [vmem:[%s1927_s22] sm:$0x3]  ;;  %s382_s26 = smov (%p474_p9), [#allocation18] }
 0x238   : >>> { %700 = vst [vmem:[%s688_s11] sm:$0x3] %v699_v4  ;;  %768 = vrot.lane.b32.xlu0 %v767_v5, %s1672_s14  ;;  %v763_v11 = vld [vmem:[%s1930_s27] sm:$0x3]  ;;  %s401_s11 = smov (%p474_p9), [#allocation19] }
 0x239   : >>> { %v784_v12 = vld [vmem:[%s1930_s27] sm:$0x3] }
 0x23a   : >>> { %v766_v30 = vld [vmem:[%s1927_s22] sm:$0x3] }
 0x23e   : >>> { %v735_v8 = vld [vmem:[%s729_s15] sm:$0x3] }
 0x23f   : >>> { %736 = vrot.lane.b32.xlu1 %v735_v8, %s1672_s14  ;;  %v731_v9 = vld [vmem:[%s730_s24] sm:$0x3] }
 0x240   : >>> { %v752_v10 = vld [vmem:[%s730_s24] sm:$0x3] }
 0x241   : >>> { %v734_v18 = vld [vmem:[%s729_s15] sm:$0x3] }
 0x243   : >>> { %732 = vrot.lane.b32.xlu1 %v731_v9, %s1672_s14 }
 0x247   : >>> { %753 = vrot.lane.b32.xlu1 %v752_v10, %s1673_s23 }
 0x24b   : >>> { %764 = vrot.lane.b32.xlu1 %v763_v11, %s1672_s14  ;;  %s435_s14 = smov (%p474_p9), [#allocation21] }
 0x24f   : >>> { %785 = vrot.lane.b32.xlu1 %v784_v12, %s1673_s23 }
 0x2aa   : >>> { %v769_v20 = vpop.permute.xlu0 %768 }
 0x2ab   : >>> { %v773_v22 = vsel %vm740_vm5, %v767_v5, %v769_v20 }
 0x2b1   : >>> { %v737_v13 = vpop.permute.xlu1 %736 }
 0x2b2   : >>> { %v741_v14 = vsel %vm740_vm5, %v735_v8, %v737_v13 }
 0x2b5   : >>> { %v733_v15 = vpop.permute.xlu1 %732 }
 0x2b6   : >>> { %v745_v16 = vsel %vm744_vm6, %v733_v15, %v741_v14 }
 0x2b7   : >>> { %v751_v17 = vsel %vm1411_vm2, %v745_v16, 0.0 }
 0x2b8   : >>> { %759 = vst [vmem:[%s729_s15] sm:$0x3] %v751_v17 }
 0x2b9   : >>> { %v754_v19 = vpop.permute.xlu1 %753 }
 0x2ba   : >>> { %v758_v21 = vsel %vm744_vm6, %v734_v18, %v754_v19 }
 0x2bb   : >>> { %760 = vst [vmem:[%s730_s24] sm:$0x3] %v758_v21 }
 0x2bd   : >>> { %v765_v23 = vpop.permute.xlu1 %764 }
 0x2be   : >>> { %v777_v24 = vsel %vm744_vm6, %v765_v23, %v773_v22 }
 0x2bf   : >>> { %v795_v25 = vld [vmem:[%s793_s29] ss:$0 sm:$0xff]  ;;  %v1543_v27 = vld [vmem:[%s793_s29 + $0x1] ss:$0 sm:$0xff]  ;;  %v783_v29 = vsel %vm1411_vm2, %v777_v24, 0.0 }
 0x2c0   : >>> { %v1542_v26 = vld [vmem:[%s793_s29 - $0x1] sm:$0x2]  ;;  %791 = vst [vmem:[%s1927_s22] sm:$0x3] %v783_v29  ;;  %s418_s22 = smov (%p474_p9), [#allocation20] }
 0x2c1   : >>> { %v802_v28 = vsel %vm801_vm14, %v795_v25, %v1542_v26  ;;  %v786_v31 = vpop.permute.xlu1 %785 }
 0x2c2   : >>> { %805 = vst [vmem:[%s793_s29] sm:$0x3] %v802_v28  ;;  %v819_v32 = vld [vmem:[%s817_s16] ss:$0 sm:$0xff]  ;;  %v1547_v34 = vld [vmem:[%s817_s16 + $0x1] ss:$0 sm:$0xff]  ;;  %v790_v35 = vsel %vm744_vm6, %v766_v30, %v786_v31 }
 0x2c3   : >>> { %v1546_v33 = vld [vmem:[%s817_s16 - $0x1] sm:$0x2]  ;;  %792 = vst [vmem:[%s1930_s27] sm:$0x3] %v790_v35 }
 0x2c4   : >>> { %v826_v36 = vsel %vm801_vm14, %v819_v32, %v1546_v33 }
 0x2c5   : >>> { %829 = vst [vmem:[%s817_s16] sm:$0x3] %v826_v36 }
 0x2c7   : >>> { %v806_v37 = vld [vmem:[%s794_s30] ss:$0 sm:$0xff]  ;;  %v1545_v38 = vld [vmem:[%s794_s30 + $0x1] sm:$0x1] }
 0x2c8   : >>> { %1544 = vst [vmem:[%s793_s29 + $0x1] sm:$0x1] %v806_v37  ;;  %v814_v39 = vsel %vm813_vm15, %v1543_v27, %v1545_v38 }
 0x2c9   : >>> { %816 = vst [vmem:[%s794_s30] sm:$0x3] %v814_v39 }
 0x2ca   : >>> { %v830_v40 = vld [vmem:[%s818_s21] ss:$0 sm:$0xff]  ;;  %v1549_v41 = vld [vmem:[%s818_s21 + $0x1] sm:$0x1] }
 0x2cb   : >>> { %1548 = vst [vmem:[%s817_s16 + $0x1] sm:$0x1] %v830_v40  ;;  %v838_v42 = vsel %vm813_vm15, %v1547_v34, %v1549_v41 }
 0x2cc   : >>> { %840 = vst [vmem:[%s818_s21] sm:$0x3] %v838_v42  ;;  %476 = sbr.rel (!%p474_p9) target bundleno = 272 (0x110), region = 470 }
 0x2cf   : >> { %v388_v43 = vld [vmem:[%s382_s26] sm:$0x3] (%p474_p9) }
 0x2d0   : >> { %v389_v45 = vsel (%p474_p9), %vm1411_vm2, %v388_v43, 0.0  ;;  %v424_v47 = vld [vmem:[%s418_s22] sm:$0x3] (%p474_p9) }
 0x2d1   : >> { %v390_v49 = vmul.f32 %v389_v45, %v389_v45  ;;  %v425_v51 = vsel %vm1411_vm2, %v424_v47, 0.0 }
 0x2d2   : >> { %v407_v44 = vld [vmem:[%s401_s11] sm:$0x3]  ;;  %v426_v53 = vmul.f32 %v425_v51, %v425_v51 }
 0x2d3   : >> { %v408_v46 = vsel %vm1411_vm2, %v407_v44, 0.0  ;;  %v441_v48 = vld [vmem:[%s435_s14] sm:$0x3]  ;;  %v394_v56 = vsel %vm393_vm7, 0.0, %v390_v49 }
 0x2d4   : >> { %v409_v50 = vmul.f32 %v408_v46, %v408_v46  ;;  %v442_v52 = vsel %vm1411_vm2, %v441_v48, 0.0 }
 0x2d5   : >> { %v443_v55 = vmul.f32 %v442_v52, %v442_v52 }
 0x2d6   : >> { %v411_v54 = vadd.f32 %v409_v50, %v390_v49  ;;  %v410_v57 = vadd.f32 %v409_v50, %v394_v56 }
 0x2d7   : >> { %v447_v60 = vsel %vm446_vm8, 0.0, %v443_v55 }
 0x2d8   : >> { %v428_v58 = vadd.f32 %v426_v53, %v411_v54  ;;  %v427_v59 = vadd.f32 %v426_v53, %v410_v57 }
 0x2da   : >> { %v449_v61 = vadd.f32 %v443_v55, %v428_v58  ;;  %v448_v62 = vadd.f32 %v447_v60, %v427_v59 }
 0x2dc   : >> { %450 = vadd.xlane.f32.xlu0 %v449_v61 }
 0x2e0   : >> { %458 = vadd.xlane.f32.xlu0 %v448_v62 }
 0x365   : >> { %v451_v63 = vpop.xlane.xlu0 %450 }
 0x366   : >> { %v452_v0 = vrot.slane %v451_v63, 4 }
 0x368   : >> { %v453_v1 = vadd.f32 %v452_v0, %v451_v63 }
 0x369   : >> { %v459_v2 = vpop.xlane.xlu0 %458 }
 0x36a   : >> { %v454_v3 = vrot.slane %v453_v1, 2  ;;  %v460_v4 = vrot.slane %v459_v2, 4 }
 0x36c   : >> { %v461_v5 = vadd.f32 %v460_v4, %v459_v2  ;;  %v455_v8 = vadd.f32 %v454_v3, %v453_v1 }
 0x36e   : >> { %v462_v9 = vrot.slane %v461_v5, 2  ;;  %v456_v11 = vrot.slane %v455_v8, 1 }
 0x370   : >> { %v463_v10 = vadd.f32 %v462_v9, %v461_v5  ;;  %v457_v14 = vadd.f32 %v456_v11, %v455_v8 }
 0x372   : >> { %v464_v12 = vrot.slane %v463_v10, 1 }
 0x374   : >> { %v465_v13 = vadd.f32 %v464_v12, %v463_v10 }
 0x376   : >> { %1576 = vpush %v465_v13 }
 0x377   : >> { %1578 = vpush %v457_v14 }
 0x3a7   : >> { %s1577_s20 = spop %1576 }
 0x3a8   : >> { %s1579_s15 = spop %1578 }
 0x3a9   : >> { %s468_s24 = smul.f32 1e-10, %s1579_s15 }
 0x3ab   : >> { %p469_p11 = scmp.le.f32.partialorder %s1577_s20, %s468_s24 }
 0x3ad   : >> { %p471_p12 = por %p470_p10, %p469_p11 }
 0x3af   : > { %919 = sbr.rel (!%p471_p12) target bundleno = 271 (0x10f), region = 481 }
 0x3b4 PF: > { %s924_s23 = smov [#allocation18]  ;;  %v928_v6 = vmov %v1781_v6  ;;  %v931_v7 = vmov %v1783_v7  ;;  %v968_v15 = vld [vmem:[#allocation10] sm:$0x3]  ;;  %v976_v16 = vld [vmem:[#allocation12] sm:$0x3]  ;;  %s2063_s17 = scalar_lea.vmem [#allocation11], %s1777_s28 }
 0x3b5   : > { %v948_v6 = vmov %v1781_v6  ;;  %v951_v7 = vmov %v1783_v7  ;;  %v932_v17 = vld [vmem:[%s924_s23] sm:$0x3]  ;;  %vm935_vm9 = vcmp.eq.s32.totalorder %v931_v7, %v928_v6  ;;  %971 = vst [vmem:[%s2063_s17] sm:$0x3] %v968_v15  ;;  %s2064_s27 = scalar_lea.vmem [#allocation13], %s1777_s28  ;;  %v984_v18 = vld [vmem:[#allocation14] sm:$0x3] }
 0x3b6   : > { %vm955_vm10 = vcmp.eq.s32.totalorder %v951_v7, %v948_v6  ;;  %979 = vst [vmem:[%s2064_s27] sm:$0x3] %v976_v16  ;;  %v992_v19 = vld [vmem:[#allocation16] sm:$0x3]  ;;  %v936_v20 = vsel %vm935_vm9, %v932_v17, 0.0  ;;  %s944_s29 = smov [#allocation21]  ;;  %s2065_s16 = scalar_lea.vmem [#allocation15], %s1777_s28 }
 0x3b7   : > { %987 = vst [vmem:[%s2065_s16] sm:$0x3] %v984_v18  ;;  %s2066_s30 = scalar_lea.vmem [#allocation17], %s1777_s28  ;;  %v937_v21 = vrot.slane %v936_v20, 4  ;;  %v952_v22 = vld [vmem:[%s944_s29] sm:$0x3]  ;;  %s920_s21 = sand.u32 7, %s1740_s12  }
 0x3b8   : > { %995 = vst [vmem:[%s2066_s30] sm:$0x3] %v992_v19  ;;  %v956_v23 = vsel %vm955_vm10, %v952_v22, 0.0  ;;  %s2067_s25 = scalar_lea.vmem [#allocation8], %s1779_s18  ;;  %s2068_s11 = scalar_lea.vmem [#allocation9], %s1779_s18 }
 0x3b9   : > { %v938_v24 = vadd.f32 %v937_v21, %v936_v20  ;;  %v957_v25 = vrot.slane %v956_v23, 4  ;;  %s921_s26 = scalar_lea.vmem %s2067_s25, %s920_s21 [#allocation8]  ;;  %s923_s22 = scalar_lea.vmem %s2068_s11, %s920_s21 [#allocation9] }
 0x3ba   : > { %s925_s26 = smov %s921_s26  ;;  %s945_s22 = smov %s923_s22 }
 0x3bb   : > { %v939_v6 = vrot.slane %v938_v24, 2  ;;  %v958_v7 = vadd.f32 %v957_v25, %v956_v23  ;;  %s1023_s14 = sshrl.u32 (%p1754_p3), %s1740_s12, 3  ;;  %s2069_s20 = scalar_lea.vmem (%p1754_p3), [#allocation8], %s1779_s18 }
 0x3bc   : > { %s1564_s15 = sshll.u32 (%p1754_p3), %s1023_s14, 3 }
 0x3bd   : > { %v940_v26 = vadd.f32 %v939_v6, %v938_v24  ;;  %v959_v27 = vrot.slane %v958_v7, 2  ;;  %s1025_s17 = scalar_lea.vmem (%p1754_p3), %s2054_s4, %s1564_s15 }
 0x3bf   : > { %v941_v28 = vrot.slane %v940_v26, 1  ;;  %v960_v29 = vadd.f32 %v959_v27, %v958_v7 }
 0x3c1   : > { %v942_v30 = vadd.f32 %v941_v28, %v940_v26  ;;  %v961_v31 = vrot.slane %v960_v29, 1  ;;  %1022 = sbr.rel (!%p1754_p3) target bundleno = 972 (0x3cc), region = 158 }
 0x3c3   : > { %943 = vst [vmem:[%s925_s26] sm:$0x1] %v942_v30  ;;  %v962_v32 = vadd.f32 %v961_v31, %v960_v29 }
 0x3c5   : > { %963 = vst [vmem:[%s945_s22] sm:$0x1] %v962_v32 }
 0x3ca   : > { %v1054_v33 = vld [vmem:[%s2069_s20] sm:$0xff] }
 0x3cb   : > { %1055 = vst [vmem:[%s1025_s17] sm:$0xff] %v1054_v33 }
 0x3cc PF: > { %1061 = sbr.rel (!%p1754_p3) target bundleno = 980 (0x3d4), region = 196  ;;  %s1062_s27 = sshrl.u32 (%p1754_p3), %s1740_s12, 3 }
 0x3cd   : > { %s2070_s29 = scalar_lea.vmem (%p1754_p3), [#allocation9], %s1779_s18  ;;  %s1565_s16 = sshll.u32 (%p1754_p3), %s1062_s27, 3 }
 0x3ce   : > { %s1064_s25 = scalar_lea.vmem (%p1754_p3), %s2055_s5, %s1565_s16 }
 0x3d2   : > { %v1093_v34 = vld [vmem:[%s2070_s29] sm:$0xff] }
 0x3d3   : > { %1094 = vst [vmem:[%s1064_s25] sm:$0xff] %v1093_v34 }
 0x3d4 PF: > { %s1566_s26 = sshll.u32 %s1740_s12, 1  ;;  %s2071_s19 = scalar_lea.vmem [#allocation11], %s1777_s28 }
 0x3d5   : > { %v1116_v35 = vld [vmem:[%s2071_s19] sm:$0x3]  ;;  %s2072_s11 = scalar_lea.vmem [#allocation13], %s1777_s28  ;;  %s1099_s14 = scalar_lea.vmem %s2056_s6, %s1566_s26 }
 0x3d6   : > { %v1151_v36 = vld [vmem:[%s2072_s11] sm:$0x3]  ;;  %s1134_s24 = scalar_lea.vmem %s2057_s7, %s1566_s26  ;;  %s2073_s23 = scalar_lea.vmem [#allocation15], %s1777_s28  ;;  %1117 = vst [vmem:[%s1099_s14] sm:$0x3] %v1116_v35 }
 0x3d7   : > { %v1186_v37 = vld [vmem:[%s2073_s23] sm:$0x3]  ;;  %s2074_s17 = scalar_lea.vmem [#allocation17], %s1777_s28  ;;  %1152 = vst [vmem:[%s1134_s24] sm:$0x3] %v1151_v36  ;;  %s1169_s29 = scalar_lea.vmem %s2058_s8, %s1566_s26 }
 0x3d8   : > { %v1221_v38 = vld [vmem:[%s2074_s17] sm:$0x3]  ;;  %s1204_s21 = scalar_lea.vmem %s2059_s9, %s1566_s26  ;;  %1187 = vst [vmem:[%s1169_s29] sm:$0x3] %v1186_v37 }
 0x3d9   : > { %1222 = vst [vmem:[%s1204_s21] sm:$0x3] %v1221_v38 }
 0x3da PF: > { %s2075_s25 = sld [smem:[#allocation31_spill]]  ;;  %p13_p13 = scmp.ge.s32.totalorder %s1743_s13, 34  }
 0x3db   : > { %s2076_s30 = smov %s1657_s10  ;;  %s2078_s11 = smov %s1743_s13 }
 0x3dc   :  { %15 = sbr.rel (!%p13_p13) target bundleno = 2 (0x2), region = 492 }
 0x3e0   : > { %s2077_s10 = smov %s2075_s25 }

// kernel: pca_volume_forward.2
= control target key start
LH: loop header
LB: loop body
LE: loop exit
PB: predicated region body
PF: predicated region fallthrough
CT: control target
= control target key end

     0   :  { %v2335_v0 = vmov 0   ;;  %v88_v61 = vlaneseq  ;;  %s3910_s0 = inlined_call_operand.vmem [shape: s32[512,1], index: 0, kind: input, shape index: {}]   ;;  %s3911_s1 = inlined_call_operand.vmem [shape: bf16[512,32], index: 1, kind: input, shape index: {}]   ;;  %s3912_s2 = inlined_call_operand.vmem [shape: f32[16,512], index: 2, kind: output, shape index: {}]  }
   0x1   :  { %2302 = vset.pattern.permute.xlu1 %v2335_v0  ;;  %2301 = vset.pattern.permute.xlu0 %v2335_v0  ;;  %v69_v1 = vld [vmem:[%s3910_s0 + $0x170] sm:$0xff]  ;;  %v70_v3 = vld [vmem:[%s3910_s0 + $0x178] sm:$0xff]  ;;  %v36_v5 = vld [vmem:[%s3910_s0 + $0x68] sm:$0xff] }
   0x2   :  { %v37_v2 = vld [vmem:[%s3910_s0 + $0x70] sm:$0xff]  ;;  %237 = vperm.xlu1 %2302, %v69_v1   ;;  %v38_v4 = vld [vmem:[%s3910_s0 + $0x78] sm:$0xff]  ;;  %v35_v6 = vld [vmem:[%s3910_s0 + $0x60] sm:$0xff]  ;;  %v2538_v0 = vand.u32 127, %v88_v61 }
   0x3   :  { %141 = vperm.xlu0 %2301, %v37_v2   ;;  %v68_v7 = vld [vmem:[%s3910_s0 + $0x168] sm:$0xff]  ;;  %v67_v8 = vld [vmem:[%s3910_s0 + $0x160] sm:$0xff]  ;;  %v34_v9 = vld [vmem:[%s3910_s0 + $0x58] sm:$0xff] }
   0x4   :  { %v33_v10 = vld [vmem:[%s3910_s0 + $0x50] sm:$0xff]  ;;  %v66_v11 = vld [vmem:[%s3910_s0 + $0x158] sm:$0xff]  ;;  %v32_v13 = vld [vmem:[%s3910_s0 + $0x48] sm:$0xff] }
   0x5   :  { %v65_v12 = vld [vmem:[%s3910_s0 + $0x150] sm:$0xff]  ;;  %v31_v14 = vld [vmem:[%s3910_s0 + $0x40] sm:$0xff]  ;;  %v64_v15 = vld [vmem:[%s3910_s0 + $0x148] sm:$0xff] }
   0x6   :  { %240 = vperm.xlu1 %2302, %v70_v3   ;;  %v63_v16 = vld [vmem:[%s3910_s0 + $0x140] sm:$0xff]  ;;  %v30_v17 = vld [vmem:[%s3910_s0 + $0x38] sm:$0xff]  ;;  %v29_v18 = vld [vmem:[%s3910_s0 + $0x30] sm:$0xff] }
   0x7   :  { %144 = vperm.xlu0 %2301, %v38_v4   ;;  %v62_v19 = vld [vmem:[%s3910_s0 + $0x138] sm:$0xff]  ;;  %v61_v20 = vld [vmem:[%s3910_s0 + $0x130] sm:$0xff]  ;;  %v28_v21 = vld [vmem:[%s3910_s0 + $0x28] sm:$0xff] }
   0x8   :  { %v27_v22 = vld [vmem:[%s3910_s0 + $0x20] sm:$0xff]  ;;  %v60_v23 = vld [vmem:[%s3910_s0 + $0x128] sm:$0xff]  ;;  %v26_v25 = vld [vmem:[%s3910_s0 + $0x18] sm:$0xff] }
   0x9   :  { %v59_v24 = vld [vmem:[%s3910_s0 + $0x120] sm:$0xff]  ;;  %v25_v26 = vld [vmem:[%s3910_s0 + $0x10] sm:$0xff]  ;;  %v58_v27 = vld [vmem:[%s3910_s0 + $0x118] sm:$0xff] }
   0xa   :  { %138 = vperm.xlu1 %2302, %v36_v5   ;;  %v57_v28 = vld [vmem:[%s3910_s0 + $0x110] sm:$0xff]  ;;  %v24_v29 = vld [vmem:[%s3910_s0 + $0x8] sm:$0xff]  ;;  %v23_v30 = vld [vmem:[%s3910_s0] sm:$0xff]  ;;  %v2549_v5 = vadd.s32 128, %v2538_v0 }
   0xb   :  { %135 = vperm.xlu0 %2301, %v35_v6   ;;  %v56_v31 = vld [vmem:[%s3910_s0 + $0x108] sm:$0xff]  ;;  %v55_v32 = vld [vmem:[%s3910_s0 + $0x100] sm:$0xff]  ;;  %v54_v33 = vld [vmem:[%s3910_s0 + $0xf8] sm:$0xff] }
   0xc   :  { %v53_v34 = vld [vmem:[%s3910_s0 + $0xf0] sm:$0xff]  ;;  %v86_v35 = vld [vmem:[%s3910_s0 + $0x1f8] sm:$0xff]  ;;  %v52_v37 = vld [vmem:[%s3910_s0 + $0xe8] sm:$0xff] }
   0xd   :  { %v85_v36 = vld [vmem:[%s3910_s0 + $0x1f0] sm:$0xff]  ;;  %v51_v38 = vld [vmem:[%s3910_s0 + $0xe0] sm:$0xff]  ;;  %v84_v39 = vld [vmem:[%s3910_s0 + $0x1e8] sm:$0xff] }
   0xe   :  { %234 = vperm.xlu1 %2302, %v68_v7   ;;  %v83_v40 = vld [vmem:[%s3910_s0 + $0x1e0] sm:$0xff]  ;;  %v50_v41 = vld [vmem:[%s3910_s0 + $0xd8] sm:$0xff]  ;;  %v49_v42 = vld [vmem:[%s3910_s0 + $0xd0] sm:$0xff] }
   0xf   :  { %231 = vperm.xlu0 %2301, %v67_v8   ;;  %v82_v43 = vld [vmem:[%s3910_s0 + $0x1d8] sm:$0xff]  ;;  %v81_v44 = vld [vmem:[%s3910_s0 + $0x1d0] sm:$0xff]  ;;  %v48_v45 = vld [vmem:[%s3910_s0 + $0xc8] sm:$0xff]  ;;  %v3916_v8 = vmov 1.0|1.0  }
  0x10   :  { %v47_v46 = vld [vmem:[%s3910_s0 + $0xc0] sm:$0xff]  ;;  %v80_v47 = vld [vmem:[%s3910_s0 + $0x1c8] sm:$0xff]  ;;  %v46_v49 = vld [vmem:[%s3910_s0 + $0xb8] sm:$0xff] }
  0x11   :  { %v79_v48 = vld [vmem:[%s3910_s0 + $0x1c0] sm:$0xff]  ;;  %v45_v50 = vld [vmem:[%s3910_s0 + $0xb0] sm:$0xff]  ;;  %v78_v51 = vld [vmem:[%s3910_s0 + $0x1b8] sm:$0xff] }
  0x12   :  { %132 = vperm.xlu1 %2302, %v34_v9   ;;  %v77_v52 = vld [vmem:[%s3910_s0 + $0x1b0] sm:$0xff]  ;;  %v44_v53 = vld [vmem:[%s3910_s0 + $0xa8] sm:$0xff]  ;;  %v43_v54 = vld [vmem:[%s3910_s0 + $0xa0] sm:$0xff]  ;;  %v2565_v9 = vadd.s32 384, %v2538_v0 }
  0x13   :  { %129 = vperm.xlu0 %2301, %v33_v10   ;;  %v76_v55 = vld [vmem:[%s3910_s0 + $0x1a8] sm:$0xff]  ;;  %v75_v56 = vld [vmem:[%s3910_s0 + $0x1a0] sm:$0xff]  ;;  %v42_v57 = vld [vmem:[%s3910_s0 + $0x98] sm:$0xff] }
  0x14   :  { %v41_v58 = vld [vmem:[%s3910_s0 + $0x90] sm:$0xff]  ;;  %v74_v59 = vld [vmem:[%s3910_s0 + $0x198] sm:$0xff]  ;;  %v40_v62 = vld [vmem:[%s3910_s0 + $0x88] sm:$0xff] }
  0x15   :  { %v73_v60 = vld [vmem:[%s3910_s0 + $0x190] sm:$0xff]  ;;  %v39_v63 = vld [vmem:[%s3910_s0 + $0x80] sm:$0xff]  ;;  %v72_v1 = vld [vmem:[%s3910_s0 + $0x188] sm:$0xff] }
  0x16   :  { %228 = vperm.xlu1 %2302, %v66_v11   ;;  %v71_v2 = vld [vmem:[%s3910_s0 + $0x180] sm:$0xff] }
  0x17   :  { %225 = vperm.xlu0 %2301, %v65_v12   ;;  %v2581_v12 = vadd.s32 256, %v2538_v0  ;;  %v2313_v61 = vld [vmem:[%s3911_s1 + $0xe0] sm:$0xff]  }
  0x1a   :  { %126 = vperm.xlu1 %2302, %v32_v13  }
  0x1b   :  { %123 = vperm.xlu0 %2301, %v31_v14  }
  0x1e   :  { %222 = vperm.xlu1 %2302, %v64_v15  }
  0x1f   :  { %219 = vperm.xlu0 %2301, %v63_v16  }
  0x22   :  { %120 = vperm.xlu1 %2302, %v30_v17  }
  0x23   :  { %117 = vperm.xlu0 %2301, %v29_v18  }
  0x26   :  { %216 = vperm.xlu1 %2302, %v62_v19  }
  0x27   :  { %213 = vperm.xlu0 %2301, %v61_v20  }
  0x2a   :  { %114 = vperm.xlu1 %2302, %v28_v21  }
  0x2b   :  { %111 = vperm.xlu0 %2301, %v27_v22  }
  0x2e   :  { %210 = vperm.xlu1 %2302, %v60_v23   ;;  %v3930_v23 = vmov 0 }
  0x2f   :  { %207 = vperm.xlu0 %2301, %v59_v24   ;;  %v3932_v24 = vmov 0 }
  0x32   :  { %108 = vperm.xlu1 %2302, %v26_v25  }
  0x33   :  { %105 = vperm.xlu0 %2301, %v25_v26  }
  0x36   :  { %204 = vperm.xlu1 %2302, %v58_v27   ;;  %v3935_v27 = vmov 0 }
  0x37   :  { %201 = vperm.xlu0 %2301, %v57_v28   ;;  %v3937_v28 = vmov 0 }
  0x3a   :  { %102 = vperm.xlu1 %2302, %v24_v29   ;;  %v2303_v29 = vld [vmem:[%s3911_s1 + $0x40] sm:$0xff]  }
  0x3b   :  { %99 = vperm.xlu0 %2301, %v23_v30  }
  0x3e   :  { %198 = vperm.xlu1 %2302, %v56_v31  }
  0x3f   :  { %195 = vperm.xlu0 %2301, %v55_v32   ;;  %v3940_v32 = vmov 0 }
  0x42   :  { %192 = vperm.xlu1 %2302, %v54_v33   ;;  %v3942_v33 = vmov 0 }
  0x43   :  { %189 = vperm.xlu0 %2301, %v53_v34   ;;  %v2304_v34 = vld [vmem:[%s3911_s1 + $0x48] sm:$0xff]  }
  0x46   :  { %288 = vperm.xlu1 %2302, %v86_v35  }
  0x47   :  { %285 = vperm.xlu0 %2301, %v85_v36  }
  0x4a   :  { %186 = vperm.xlu1 %2302, %v52_v37   ;;  %v2305_v37 = vld [vmem:[%s3911_s1 + $0xc0] sm:$0xff]  }
  0x4b   :  { %183 = vperm.xlu0 %2301, %v51_v38   ;;  %v3946_v38 = vmov 0 }
  0x4e   :  { %282 = vperm.xlu1 %2302, %v84_v39   ;;  %v3948_v39 = vmov 0 }
  0x4f   :  { %279 = vperm.xlu0 %2301, %v83_v40   ;;  %v2306_v40 = vld [vmem:[%s3911_s1 + $0x50] sm:$0xff]  }
  0x52   :  { %180 = vperm.xlu1 %2302, %v50_v41  }
  0x53   :  { %177 = vperm.xlu0 %2301, %v49_v42  }
  0x56   :  { %276 = vperm.xlu1 %2302, %v82_v43   ;;  %v2307_v43 = vld [vmem:[%s3911_s1 + $0xc8] sm:$0xff]  }
  0x57   :  { %273 = vperm.xlu0 %2301, %v81_v44   ;;  %v3952_v44 = vmov 0 }
  0x5a   :  { %174 = vperm.xlu1 %2302, %v48_v45   ;;  %v3954_v45 = vmov 0 }
  0x5b   :  { %171 = vperm.xlu0 %2301, %v47_v46   ;;  %v2308_v46 = vld [vmem:[%s3911_s1 + $0x58] sm:$0xff]  }
  0x5e   :  { %270 = vperm.xlu1 %2302, %v80_v47  }
  0x5f   :  { %267 = vperm.xlu0 %2301, %v79_v48  }
  0x62   :  { %168 = vperm.xlu1 %2302, %v46_v49   ;;  %v2309_v49 = vld [vmem:[%s3911_s1 + $0xd0] sm:$0xff]  }
  0x63   :  { %165 = vperm.xlu0 %2301, %v45_v50   ;;  %v3958_v50 = vmov 0 }
  0x66   :  { %264 = vperm.xlu1 %2302, %v78_v51   ;;  %v3960_v51 = vmov 0 }
  0x67   :  { %261 = vperm.xlu0 %2301, %v77_v52   ;;  %v2310_v52 = vld [vmem:[%s3911_s1 + $0x60] sm:$0xff]  }
  0x6a   :  { %162 = vperm.xlu1 %2302, %v44_v53  }
  0x6b   :  { %159 = vperm.xlu0 %2301, %v43_v54  }
  0x6e   :  { %258 = vperm.xlu1 %2302, %v76_v55   ;;  %v2311_v55 = vld [vmem:[%s3911_s1 + $0xd8] sm:$0xff]  }
  0x6f   :  { %255 = vperm.xlu0 %2301, %v75_v56   ;;  %v3964_v56 = vmov 0 }
  0x72   :  { %156 = vperm.xlu1 %2302, %v42_v57   ;;  %v3966_v57 = vmov 0 }
  0x73   :  { %153 = vperm.xlu0 %2301, %v41_v58   ;;  %v2312_v58 = vld [vmem:[%s3911_s1 + $0x68] sm:$0xff]  }
  0x76   :  { %252 = vperm.xlu1 %2302, %v74_v59  }
  0x77   :  { %249 = vperm.xlu0 %2301, %v73_v60  }
  0x7a   :  { %150 = vperm.xlu1 %2302, %v40_v62   ;;  %v3970_v62 = vmov 0 }
  0x7b   :  { %147 = vperm.xlu0 %2301, %v39_v63   ;;  %v3972_v63 = vmov 0 }
  0x7d   :  { %v2546_v3 = vpop.permute.xlu1 %237 }
  0x7e   :  { %v142_v4 = vpop.permute.xlu0 %141  ;;  %246 = vperm.xlu1 %2302, %v72_v1   ;;  %vm475_vm5 = vcmp.eq.s32.totalorder %v2546_v3, %v2549_v5  ;;  %vm474_vm10 = vcmp.eq.s32.totalorder %v2546_v3, %v2538_v0  ;;  %v2314_v1 = vld [vmem:[%s3911_s1 + $0x70] sm:$0xff]  }
  0x7f   :  { %243 = vperm.xlu0 %2301, %v71_v2   ;;  %vm347_vm0 = vcmp.eq.s32.totalorder %v142_v4, %v2549_v5  ;;  %vm346_vm3 = vcmp.eq.s32.totalorder %v142_v4, %v2538_v0  ;;  %vm349_vm14 = vcmp.eq.s32.totalorder %v142_v4, %v2565_v9 }
  0x81   :  { %v2552_v6 = vpop.permute.xlu1 %240 }
  0x82   :  { %v145_v7 = vpop.permute.xlu0 %144  ;;  %vm479_vm2 = vcmp.eq.s32.totalorder %v2552_v6, %v2549_v5  ;;  %vm478_vm7 = vcmp.eq.s32.totalorder %v2552_v6, %v2538_v0 }
  0x83   :  { %vm351_vm1 = vcmp.eq.s32.totalorder %v145_v7, %v2549_v5  ;;  %vm350_vm6 = vcmp.eq.s32.totalorder %v145_v7, %v2538_v0  ;;  %vm2106_vm8 = vmpackc.low %vm479_vm2, %vm475_vm5  ;;  %vm353_vm15 = vcmp.eq.s32.totalorder %v145_v7, %v2565_v9 }
  0x84   :  { %vm2042_vm4 = vmpackc.low %vm351_vm1, %vm347_vm0  ;;  %2107 = vmatprep.subr.msk.bf16.mxu1 %vm2106_vm8, %v3916_v8  ;;  %vm352_vm8 = vcmp.eq.s32.totalorder %v145_v7, %v2581_v12  ;;  %v3978_v7 = vmov 0 }
  0x85   :  { %2043 = vmatprep.subr.msk.bf16.mxu0 %vm2042_vm4, %v3916_v8  ;;  %vm2044_vm9 = vmpackc.low %vm350_vm6, %vm346_vm3  ;;  %v139_v10 = vpop.permute.xlu1 %138  ;;  %vm481_vm3 = vcmp.eq.s32.totalorder %v2552_v6, %v2565_v9  ;;  %vm477_vm6 = vcmp.eq.s32.totalorder %v2546_v3, %v2565_v9 }
  0x86   :  { %v136_v11 = vpop.permute.xlu0 %135  ;;  %2045 = vmatpush1.bf16.msk.msra.mxu0 %vm2044_vm9, %v3916_v8  ;;  %vm2108_vm11 = vmpackc.low %vm478_vm7, %vm474_vm10  ;;  %vm343_vm13 = vcmp.eq.s32.totalorder %v139_v10, %v2549_v5  ;;  %vm342_vm2 = vcmp.eq.s32.totalorder %v139_v10, %v2538_v0  ;;  %vm348_vm7 = vcmp.eq.s32.totalorder %v142_v4, %v2581_v12  ;;  %v2315_v4 = vld [vmem:[%s3911_s1 + $0xe8] sm:$0xff]  }
  0x87   :  { %vm339_vm12 = vcmp.eq.s32.totalorder %v136_v11, %v2549_v5  ;;  %2109 = vmatpush1.bf16.msk.msra.mxu1 %vm2108_vm11, %v3916_v8  ;;  %vm338_vm1 = vcmp.eq.s32.totalorder %v136_v11, %v2538_v0  ;;  %vm2588_vm5 = vmpackc.low %vm353_vm15, %vm349_vm14  ;;  %vm341_vm15 = vcmp.eq.s32.totalorder %v136_v11, %v2565_v9 }
  0x88   :  { %vm2046_vm0 = vmpackc.low %vm343_vm13, %vm339_vm12 }
  0x89   :  { %2047 = vmatprep.subr.msk.bf16.mxu0 %vm2046_vm0, %v3916_v8  ;;  %vm2048_vm4 = vmpackc.low %vm342_vm2, %vm338_vm1  ;;  %v2584_v13 = vpop.permute.xlu1 %234  ;;  %vm345_vm0 = vcmp.eq.s32.totalorder %v139_v10, %v2565_v9 }
  0x8a   :  { %v2586_v14 = vpop.permute.xlu0 %231  ;;  %2049 = vmatpush1.bf16.msk.msra.mxu0 %vm2048_vm4, %v3916_v8  ;;  %vm471_vm10 = vcmp.eq.s32.totalorder %v2584_v13, %v2549_v5  ;;  %vm2601_vm11 = vmpackc.low %vm481_vm3, %vm477_vm6  ;;  %vm470_vm14 = vcmp.eq.s32.totalorder %v2584_v13, %v2538_v0  ;;  %vm344_vm3 = vcmp.eq.s32.totalorder %v139_v10, %v2581_v12  ;;  %vm340_vm4 = vcmp.eq.s32.totalorder %v136_v11, %v2581_v12  ;;  %v2316_v10 = vld [vmem:[%s3911_s1 + $0x78] sm:$0xff]  }
  0x8b   :  { %vm467_vm9 = vcmp.eq.s32.totalorder %v2586_v14, %v2549_v5  ;;  %vm466_vm13 = vcmp.eq.s32.totalorder %v2586_v14, %v2538_v0  ;;  %vm2617_vm2 = vmpackc.low %vm352_vm8, %vm348_vm7 }
  0x8c   :  { %vm2110_vm12 = vmpackc.low %vm471_vm10, %vm467_vm9 }
  0x8d   :  { %2111 = vmatprep.subr.msk.bf16.mxu1 %vm2110_vm12, %v3916_v8  ;;  %vm2112_vm1 = vmpackc.low %vm470_vm14, %vm466_vm13  ;;  %v133_v17 = vpop.permute.xlu1 %132 }
  0x8e   :  { %2113 = vmatpush1.bf16.msk.msra.mxu1 %vm2112_vm1, %v3916_v8  ;;  %v130_v18 = vpop.permute.xlu0 %129  ;;  %vm335_vm9 = vcmp.eq.s32.totalorder %v133_v17, %v2549_v5  ;;  %vm2625_vm10 = vmpackc.low %vm345_vm0, %vm341_vm15  ;;  %vm334_vm7 = vcmp.eq.s32.totalorder %v133_v17, %v2538_v0  ;;  %vm337_vm14 = vcmp.eq.s32.totalorder %v133_v17, %v2565_v9  ;;  %vm476_vm0 = vcmp.eq.s32.totalorder %v2546_v3, %v2581_v12 }
  0x8f   :  { %vm331_vm6 = vcmp.eq.s32.totalorder %v130_v18, %v2549_v5  ;;  %vm330_vm13 = vcmp.eq.s32.totalorder %v130_v18, %v2538_v0  ;;  %vm333_vm8 = vcmp.eq.s32.totalorder %v130_v18, %v2565_v9  ;;  %vm2641_vm15 = vmpackc.low %vm344_vm3, %vm340_vm4 }
  0x90   :  { %vm2050_vm12 = vmpackc.low %vm335_vm9, %vm331_vm6  ;;  %v3931_v23 = vsel %vm2641_vm15, 4294967295, %v3930_v23 }
  0x91   :  { %2051 = vmatprep.subr.msk.bf16.mxu0 %vm2050_vm12, %v3916_v8  ;;  %vm2052_vm1 = vmpackc.low %vm334_vm7, %vm330_vm13  ;;  %v2634_v21 = vpop.permute.xlu1 %228  ;;  %vm469_vm7 = vcmp.eq.s32.totalorder %v2586_v14, %v2565_v9 }
  0x92   :  { %2053 = vmatpush1.bf16.msk.msra.mxu0 %vm2052_vm1, %v3916_v8  ;;  %v2637_v22 = vpop.permute.xlu0 %225  ;;  %vm463_vm9 = vcmp.eq.s32.totalorder %v2634_v21, %v2549_v5  ;;  %vm2651_vm12 = vmpackc.low %vm337_vm14, %vm333_vm8  ;;  %vm462_vm4 = vcmp.eq.s32.totalorder %v2634_v21, %v2538_v0  ;;  %vm473_vm1 = vcmp.eq.s32.totalorder %v2584_v13, %v2565_v9  ;;  %vm3934_vm14 = vcmp.eq.s32.totalorder %v2552_v6, %v2581_v12 }
  0x93   :  { %vm459_vm6 = vcmp.eq.s32.totalorder %v2637_v22, %v2549_v5  ;;  %v3933_v24 = vsel %vm2651_vm12, 4294967295, %v3932_v24  ;;  %vm458_vm3 = vcmp.eq.s32.totalorder %v2637_v22, %v2538_v0  ;;  %vm332_vm12 = vcmp.eq.s32.totalorder %v130_v18, %v2581_v12 }
  0x94   :  { %vm2114_vm13 = vmpackc.low %vm463_vm9, %vm459_vm6  ;;  %v3976_v6 = vmov 0  ;;  %v3984_v18 = vmov 0 }
  0x95   :  { %2115 = vmatprep.subr.msk.bf16.mxu1 %vm2114_vm13, %v3916_v8  ;;  %vm2116_vm8 = vmpackc.low %vm462_vm4, %vm458_vm3  ;;  %v127_v25 = vpop.permute.xlu1 %126 }
  0x96   :  { %2117 = vmatpush1.bf16.msk.msra.mxu1 %vm2116_vm8, %v3916_v8  ;;  %v124_v26 = vpop.permute.xlu0 %123  ;;  %vm2670_vm6 = vmpackc.low %vm3934_vm14, %vm476_vm0  ;;  %vm327_vm13 = vcmp.eq.s32.totalorder %v127_v25, %v2549_v5  ;;  %vm326_vm0 = vcmp.eq.s32.totalorder %v127_v25, %v2538_v0 }
  0x97   :  { %v3936_v27 = vsel %vm2670_vm6, 4294967295, %v3935_v27  ;;  %vm323_vm15 = vcmp.eq.s32.totalorder %v124_v26, %v2549_v5  ;;  %vm2678_vm3 = vmpackc.low %vm473_vm1, %vm469_vm7  ;;  %vm322_vm8 = vcmp.eq.s32.totalorder %v124_v26, %v2538_v0  ;;  %vm325_vm14 = vcmp.eq.s32.totalorder %v124_v26, %v2565_v9 }
  0x98   :  { %v3938_v28 = vsel %vm2678_vm3, 4294967295, %v3937_v28  ;;  %vm2054_vm4 = vmpackc.low %vm327_vm13, %vm323_vm15  ;;  %vm329_vm6 = vcmp.eq.s32.totalorder %v127_v25, %v2565_v9  ;;  %vm3939_vm15 = vcmp.eq.s32.totalorder %v133_v17, %v2581_v12  ;;  %vm461_vm1 = vcmp.eq.s32.totalorder %v2637_v22, %v2565_v9 }
  0x99   :  { %2055 = vmatprep.subr.msk.bf16.mxu0 %vm2054_vm4, %v3916_v8  ;;  %vm2056_vm9 = vmpackc.low %vm326_vm0, %vm322_vm8  ;;  %v2690_v30 = vpop.permute.xlu1 %222  ;;  %vm465_vm13 = vcmp.eq.s32.totalorder %v2634_v21, %v2565_v9  ;;  %v3982_v17 = vmov 0 }
  0x9a   :  { %2057 = vmatpush1.bf16.msk.msra.mxu0 %vm2056_vm9, %v3916_v8  ;;  %v2693_v31 = vpop.permute.xlu0 %219  ;;  %vm2699_vm7 = vmpackc.low %vm3939_vm15, %vm332_vm12  ;;  %vm455_vm9 = vcmp.eq.s32.totalorder %v2690_v30, %v2549_v5  ;;  %vm454_vm15 = vcmp.eq.s32.totalorder %v2690_v30, %v2538_v0 }
  0x9b   :  { %v3941_v32 = vsel %vm2699_vm7, 4294967295, %v3940_v32  ;;  %vm451_vm4 = vcmp.eq.s32.totalorder %v2693_v31, %v2549_v5  ;;  %vm2711_vm8 = vmpackc.low %vm329_vm6, %vm325_vm14  ;;  %vm450_vm0 = vcmp.eq.s32.totalorder %v2693_v31, %v2538_v0  ;;  %vm3944_vm14 = vcmp.eq.s32.totalorder %v2586_v14, %v2581_v12  ;;  %v2317_v14 = vld [vmem:[%s3911_s1 + $0xf0] sm:$0xff]  }
  0x9c   :  { %v3943_v33 = vsel %vm2711_vm8, 4294967295, %v3942_v33  ;;  %vm2118_vm12 = vmpackc.low %vm455_vm9, %vm451_vm4  ;;  %vm3945_vm4 = vcmp.eq.s32.totalorder %v2584_v13, %v2581_v12 }
  0x9d   :  { %2119 = vmatprep.subr.msk.bf16.mxu1 %vm2118_vm12, %v3916_v8  ;;  %1458 = vxpose.xlu0.c.b16.start [1/8] (narrow) %v2303_v29, 32  ;;  %vm2120_vm6 = vmpackc.low %vm454_vm15, %vm450_vm0  ;;  %v2728_v35 = vpop.permute.xlu1 %120  ;;  %v3988_v29 = vmov 0 }
  0x9e   :  { %2121 = vmatpush1.bf16.msk.msra.mxu1 %vm2120_vm6, %v3916_v8  ;;  %v118_v36 = vpop.permute.xlu0 %117  ;;  %vm2739_vm9 = vmpackc.low %vm3945_vm4, %vm3944_vm14  ;;  %vm319_vm6 = vcmp.eq.s32.totalorder %v2728_v35, %v2549_v5  ;;  %vm318_vm12 = vcmp.eq.s32.totalorder %v2728_v35, %v2538_v0 }
  0x9f   :  { %v3947_v38 = vsel %vm2739_vm9, 4294967295, %v3946_v38  ;;  %vm315_vm15 = vcmp.eq.s32.totalorder %v118_v36, %v2549_v5  ;;  %vm2751_vm8 = vmpackc.low %vm465_vm13, %vm461_vm1  ;;  %vm314_vm4 = vcmp.eq.s32.totalorder %v118_v36, %v2538_v0  ;;  %vm317_vm0 = vcmp.eq.s32.totalorder %v118_v36, %v2565_v9 }
  0xa0   :  { %v3949_v39 = vsel %vm2751_vm8, 4294967295, %v3948_v39  ;;  %vm2058_vm14 = vmpackc.low %vm319_vm6, %vm315_vm15  ;;  %vm321_vm9 = vcmp.eq.s32.totalorder %v2728_v35, %v2565_v9  ;;  %vm3950_vm1 = vcmp.eq.s32.totalorder %v124_v26, %v2581_v12  ;;  %vm3951_vm13 = vcmp.eq.s32.totalorder %v127_v25, %v2581_v12  ;;  %v2319_v26 = vld [vmem:[%s3911_s1 + $0xf8] sm:$0xff]  }
  0xa1   :  { %2059 = vmatprep.subr.msk.bf16.mxu0 %vm2058_vm14, %v3916_v8  ;;  %1459 = vxpose.xlu0.c.b16.cont [2/8] (narrow) %v2304_v34, 32  ;;  %vm2060_vm7 = vmpackc.low %vm318_vm12, %vm314_vm4  ;;  %v2765_v41 = vpop.permute.xlu1 %216 }
  0xa2   :  { %2061 = vmatpush1.bf16.msk.msra.mxu0 %vm2060_vm7, %v3916_v8  ;;  %v2768_v42 = vpop.permute.xlu0 %213  ;;  %1490 = vxpose.xlu1.c.b16.start [1/8] (narrow) %v2305_v37, 32  ;;  %vm2777_vm12 = vmpackc.low %vm3951_vm13, %vm3950_vm1  ;;  %vm447_vm14 = vcmp.eq.s32.totalorder %v2765_v41, %v2549_v5  ;;  %vm446_vm15 = vcmp.eq.s32.totalorder %v2765_v41, %v2538_v0  ;;  %vm453_vm7 = vcmp.eq.s32.totalorder %v2693_v31, %v2565_v9  ;;  %v3994_v37 = vmov 0 }
  0xa3   :  { %v3953_v44 = vsel %vm2777_vm12, 4294967295, %v3952_v44  ;;  %vm443_vm6 = vcmp.eq.s32.totalorder %v2768_v42, %v2549_v5  ;;  %vm2794_vm4 = vmpackc.low %vm321_vm9, %vm317_vm0  ;;  %vm442_vm13 = vcmp.eq.s32.totalorder %v2768_v42, %v2538_v0  ;;  %vm457_vm12 = vcmp.eq.s32.totalorder %v2690_v30, %v2565_v9 }
  0xa4   :  { %v3955_v45 = vsel %vm2794_vm4, 4294967295, %v3954_v45  ;;  %vm2122_vm1 = vmpackc.low %vm447_vm14, %vm443_vm6  ;;  %vm3956_vm0 = vcmp.eq.s32.totalorder %v2637_v22, %v2581_v12 }
  0xa5   :  { %2123 = vmatprep.subr.msk.bf16.mxu1 %vm2122_vm1, %v3916_v8  ;;  %1460 = vxpose.xlu0.c.b16.cont [3/8] (narrow) %v2306_v40, 32  ;;  %vm2124_vm9 = vmpackc.low %vm446_vm15, %vm442_vm13  ;;  %v2811_v47 = vpop.permute.xlu1 %114  ;;  %vm3957_vm15 = vcmp.eq.s32.totalorder %v2634_v21, %v2581_v12  ;;  %v2318_v21 = vld [vmem:[%s3911_s1] sm:$0xff]   ;;  %v3996_v40 = vmov 0 }
  0xa6   :  { %2125 = vmatpush1.bf16.msk.msra.mxu1 %vm2124_vm9, %v3916_v8  ;;  %v2813_v48 = vpop.permute.xlu0 %111  ;;  %1491 = vxpose.xlu1.c.b16.cont [2/8] (narrow) %v2307_v43, 32  ;;  %vm2824_vm6 = vmpackc.low %vm3957_vm15, %vm3956_vm0  ;;  %vm311_vm9 = vcmp.eq.s32.totalorder %v2811_v47, %v2549_v5  ;;  %vm310_vm1 = vcmp.eq.s32.totalorder %v2811_v47, %v2538_v0  ;;  %vm313_vm4 = vcmp.eq.s32.totalorder %v2811_v47, %v2565_v9 }
  0xa7   :  { %v3959_v50 = vsel %vm2824_vm6, 4294967295, %v3958_v50  ;;  %vm307_vm13 = vcmp.eq.s32.totalorder %v2813_v48, %v2549_v5  ;;  %vm2841_vm0 = vmpackc.low %vm457_vm12, %vm453_vm7  ;;  %vm306_vm14 = vcmp.eq.s32.totalorder %v2813_v48, %v2538_v0  ;;  %vm309_vm6 = vcmp.eq.s32.totalorder %v2813_v48, %v2565_v9 }
  0xa8   :  { %v3961_v51 = vsel %vm2841_vm0, 4294967295, %v3960_v51  ;;  %vm2062_vm15 = vmpackc.low %vm311_vm9, %vm307_vm13  ;;  %vm3962_vm7 = vcmp.eq.s32.totalorder %v118_v36, %v2581_v12  ;;  %vm449_vm0 = vcmp.eq.s32.totalorder %v2765_v41, %v2565_v9  ;;  %v2321_v36 = vld [vmem:[%s3911_s1 + $0x80] sm:$0xff]  }
  0xa9   :  { %2063 = vmatprep.subr.msk.bf16.mxu0 %vm2062_vm15, %v3916_v8  ;;  %1461 = vxpose.xlu0.c.b16.cont [4/8] (narrow) %v2308_v46, 32  ;;  %vm2064_vm12 = vmpackc.low %vm310_vm1, %vm306_vm14  ;;  %v2857_v53 = vpop.permute.xlu1 %210  ;;  %vm3963_vm14 = vcmp.eq.s32.totalorder %v2728_v35, %v2581_v12  ;;  %v2323_v46 = vld [vmem:[%s3911_s1 + $0x88] sm:$0xff]  }
  0xaa   :  { %2065 = vmatpush1.bf16.msk.msra.mxu0 %vm2064_vm12, %v3916_v8  ;;  %v2860_v54 = vpop.permute.xlu0 %207  ;;  %1492 = vxpose.xlu1.c.b16.cont [3/8] (narrow) %v2309_v49, 32  ;;  %vm2870_vm1 = vmpackc.low %vm3963_vm14, %vm3962_vm7  ;;  %vm439_vm12 = vcmp.eq.s32.totalorder %v2857_v53, %v2549_v5  ;;  %vm438_vm9 = vcmp.eq.s32.totalorder %v2857_v53, %v2538_v0  ;;  %v2324_v49 = vld [vmem:[%s3911_s1 + $0x18] sm:$0xff]  }
  0xab   :  { %v3965_v56 = vsel %vm2870_vm1, 4294967295, %v3964_v56  ;;  %vm435_vm15 = vcmp.eq.s32.totalorder %v2860_v54, %v2549_v5  ;;  %vm2888_vm7 = vmpackc.low %vm313_vm4, %vm309_vm6  ;;  %vm434_vm13 = vcmp.eq.s32.totalorder %v2860_v54, %v2538_v0  ;;  %vm445_vm1 = vcmp.eq.s32.totalorder %v2768_v42, %v2565_v9 }
  0xac   :  { %v3967_v57 = vsel %vm2888_vm7, 4294967295, %v3966_v57  ;;  %vm2126_vm14 = vmpackc.low %vm439_vm12, %vm435_vm15  ;;  %vm3968_vm6 = vcmp.eq.s32.totalorder %v2693_v31, %v2581_v12  ;;  %v2320_v31 = vld [vmem:[%s3911_s1 + $0x8] sm:$0xff]  }
  0xad   :  { %2127 = vmatprep.subr.msk.bf16.mxu1 %vm2126_vm14, %v3916_v8  ;;  %1462 = vxpose.xlu0.c.b16.cont [5/8] (narrow) %v2310_v52, 32  ;;  %vm2128_vm4 = vmpackc.low %vm438_vm9, %vm434_vm13  ;;  %v2905_v59 = vpop.permute.xlu1 %108  ;;  %vm3969_vm13 = vcmp.eq.s32.totalorder %v2690_v30, %v2581_v12  ;;  %v3990_v30 = vmov 0 }
  0xae   :  { %2129 = vmatpush1.bf16.msk.msra.mxu1 %vm2128_vm4, %v3916_v8  ;;  %v2907_v60 = vpop.permute.xlu0 %105  ;;  %1493 = vxpose.xlu1.c.b16.cont [4/8] (narrow) %v2311_v55, 32  ;;  %vm2918_vm9 = vmpackc.low %vm3969_vm13, %vm3968_vm6  ;;  %vm303_vm4 = vcmp.eq.s32.totalorder %v2905_v59, %v2549_v5  ;;  %vm302_vm12 = vcmp.eq.s32.totalorder %v2905_v59, %v2538_v0  ;;  %vm305_vm7 = vcmp.eq.s32.totalorder %v2905_v59, %v2565_v9  ;;  %v4006_v55 = vmov 0 }
  0xaf   :  { %v3971_v62 = vsel %vm2918_vm9, 4294967295, %v3970_v62  ;;  %vm299_vm14 = vcmp.eq.s32.totalorder %v2907_v60, %v2549_v5  ;;  %vm2936_vm6 = vmpackc.low %vm449_vm0, %vm445_vm1  ;;  %vm298_vm15 = vcmp.eq.s32.totalorder %v2907_v60, %v2538_v0  ;;  %vm301_vm9 = vcmp.eq.s32.totalorder %v2907_v60, %v2565_v9 }
  0xb0   :  { %v3973_v63 = vsel %vm2936_vm6, 4294967295, %v3972_v63  ;;  %vm2066_vm13 = vmpackc.low %vm303_vm4, %vm299_vm14  ;;  %vm3974_vm1 = vcmp.eq.s32.totalorder %v2813_v48, %v2581_v12  ;;  %vm441_vm6 = vcmp.eq.s32.totalorder %v2857_v53, %v2565_v9  ;;  %v4002_v48 = vmov 0 }
  0xb1   :  { %2067 = vmatprep.subr.msk.bf16.mxu0 %vm2066_vm13, %v3916_v8  ;;  %1463 = vxpose.xlu0.c.b16.cont [6/8] (narrow) %v2312_v58, 32  ;;  %vm2068_vm0 = vmpackc.low %vm302_vm12, %vm298_vm15  ;;  %v2952_v2 = vpop.permute.xlu1 %204  ;;  %vm3975_vm15 = vcmp.eq.s32.totalorder %v2811_v47, %v2581_v12  ;;  %v4000_v47 = vmov 0  ;;  %v4008_v58 = vmov 0 }
  0xb2   :  { %2069 = vmatpush1.bf16.msk.msra.mxu0 %vm2068_vm0, %v3916_v8  ;;  %v2955_v3 = vpop.permute.xlu0 %201  ;;  %1494 = vxpose.xlu1.c.b16.cont [5/8] (narrow) %v2313_v61, 32  ;;  %vm2966_vm12 = vmpackc.low %vm3975_vm15, %vm3974_vm1  ;;  %vm431_vm0 = vcmp.eq.s32.totalorder %v2952_v2, %v2549_v5  ;;  %vm430_vm4 = vcmp.eq.s32.totalorder %v2952_v2, %v2538_v0 }
  0xb3   :  { %v3977_v6 = vsel %vm2966_vm12, 4294967295, %v3976_v6  ;;  %vm427_vm13 = vcmp.eq.s32.totalorder %v2955_v3, %v2549_v5  ;;  %vm2984_vm1 = vmpackc.low %vm305_vm7, %vm301_vm9  ;;  %vm426_vm14 = vcmp.eq.s32.totalorder %v2955_v3, %v2538_v0  ;;  %vm437_vm12 = vcmp.eq.s32.totalorder %v2860_v54, %v2565_v9 }
  0xb4   :  { %v3979_v7 = vsel %vm2984_vm1, 4294967295, %v3978_v7  ;;  %vm2130_vm15 = vmpackc.low %vm431_vm0, %vm427_vm13  ;;  %vm3980_vm9 = vcmp.eq.s32.totalorder %v2768_v42, %v2581_v12 }
  0xb5   :  { %2131 = vmatprep.subr.msk.bf16.mxu1 %vm2130_vm15, %v3916_v8  ;;  %1464 = vxpose.xlu0.c.b16.cont [7/8] (narrow) %v2314_v1, 32  ;;  %vm2132_vm7 = vmpackc.low %vm430_vm4, %vm426_vm14  ;;  %v3001_v11 = vpop.permute.xlu1 %102  ;;  %vm3981_vm14 = vcmp.eq.s32.totalorder %v2765_v41, %v2581_v12  ;;  %v2322_v41 = vld [vmem:[%s3911_s1 + $0x10] sm:$0xff]   ;;  %v2327_v1 = vld [vmem:[%s3911_s1 + $0x98] sm:$0xff]  }
  0xb6   :  { %2133 = vmatpush1.bf16.msk.msra.mxu1 %vm2132_vm7, %v3916_v8  ;;  %1495 = vxpose.xlu1.c.b16.cont [6/8] (narrow) %v2315_v4, 32  ;;  %v100_v13 = vpop.permute.xlu0 %99  ;;  %vm3012_vm4 = vmpackc.low %vm3981_vm14, %vm3980_vm9  ;;  %vm295_vm7 = vcmp.eq.s32.totalorder %v3001_v11, %v2549_v5  ;;  %vm294_vm0 = vcmp.eq.s32.totalorder %v3001_v11, %v2538_v0  ;;  %vm297_vm1 = vcmp.eq.s32.totalorder %v3001_v11, %v2565_v9  ;;  %v2328_v4 = vld [vmem:[%s3911_s1 + $0x28] sm:$0xff]  }
  0xb7   :  { %v3983_v17 = vsel %vm3012_vm4, 4294967295, %v3982_v17  ;;  %vm291_vm15 = vcmp.eq.s32.totalorder %v100_v13, %v2549_v5  ;;  %vm3029_vm9 = vmpackc.low %vm441_vm6, %vm437_vm12  ;;  %vm290_vm13 = vcmp.eq.s32.totalorder %v100_v13, %v2538_v0  ;;  %vm293_vm4 = vcmp.eq.s32.totalorder %v100_v13, %v2565_v9 }
  0xb8   :  { %v3985_v18 = vsel %vm3029_vm9, 4294967295, %v3984_v18  ;;  %vm2070_vm14 = vmpackc.low %vm295_vm7, %vm291_vm15  ;;  %vm3986_vm6 = vcmp.eq.s32.totalorder %v2907_v60, %v2581_v12  ;;  %vm3987_vm12 = vcmp.eq.s32.totalorder %v2905_v59, %v2581_v12  ;;  %v2326_v59 = vld [vmem:[%s3911_s1 + $0x20] sm:$0xff]  }
  0xb9   :  { %1465 = vxpose.xlu0.c.b16.end [8/8] (narrow) %v2316_v10, 32  ;;  %2071 = vmatprep.subr.msk.bf16.mxu0 %vm2070_vm14, %v3916_v8  ;;  %vm2072_vm8 = vmpackc.low %vm294_vm0, %vm290_vm13  ;;  %v3043_v22 = vpop.permute.xlu1 %198 }
  0xba   :  { %1496 = vxpose.xlu1.c.b16.cont [7/8] (narrow) %v2317_v14, 32  ;;  %2073 = vmatpush1.bf16.msk.msra.mxu0 %vm2072_vm8, %v3916_v8  ;;  %v3046_v25 = vpop.permute.xlu0 %195  ;;  %vm3057_vm13 = vmpackc.low %vm3987_vm12, %vm3986_vm6  ;;  %vm423_vm7 = vcmp.eq.s32.totalorder %v3043_v22, %v2549_v5  ;;  %vm422_vm0 = vcmp.eq.s32.totalorder %v3043_v22, %v2538_v0  ;;  %vm429_vm8 = vcmp.eq.s32.totalorder %v2955_v3, %v2565_v9  ;;  %v4018_v14 = vmov 0 }
  0xbb   :  { %v3989_v29 = vsel %vm3057_vm13, 4294967295, %v3988_v29  ;;  %vm419_vm15 = vcmp.eq.s32.totalorder %v3046_v25, %v2549_v5  ;;  %vm3074_vm14 = vmpackc.low %vm297_vm1, %vm293_vm4  ;;  %vm418_vm12 = vcmp.eq.s32.totalorder %v3046_v25, %v2538_v0  ;;  %vm433_vm13 = vcmp.eq.s32.totalorder %v2952_v2, %v2565_v9 }
  0xbc   :  { %v3991_v30 = vsel %vm3074_vm14, 4294967295, %v3990_v30  ;;  %vm2134_vm6 = vmpackc.low %vm423_vm7, %vm419_vm15  ;;  %vm3992_vm4 = vcmp.eq.s32.totalorder %v2860_v54, %v2581_v12  ;;  %v2325_v54 = vld [vmem:[%s3911_s1 + $0x90] sm:$0xff]  }
  0xbd   :  { %1442 = vxpose.xlu0.c.b16.start [1/8] (narrow) %v2318_v21, 32  ;;  %2135 = vmatprep.subr.msk.bf16.mxu1 %vm2134_vm6, %v3916_v8  ;;  %vm2136_vm1 = vmpackc.low %vm422_vm0, %vm418_vm12  ;;  %v3090_v34 = vpop.permute.xlu1 %192  ;;  %vm3993_vm0 = vcmp.eq.s32.totalorder %v2857_v53, %v2581_v12  ;;  %v4020_v21 = vmov 0 }
  0xbe   :  { %1497 = vxpose.xlu1.c.b16.end [8/8] (narrow) %v2319_v26, 32  ;;  %2137 = vmatpush1.bf16.msk.msra.mxu1 %vm2136_vm1, %v3916_v8  ;;  %v190_v35 = vpop.permute.xlu0 %189  ;;  %vm3102_vm15 = vmpackc.low %vm3993_vm0, %vm3992_vm4  ;;  %vm415_vm1 = vcmp.eq.s32.totalorder %v3090_v34, %v2549_v5  ;;  %vm414_vm6 = vcmp.eq.s32.totalorder %v3090_v34, %v2538_v0  ;;  %vm417_vm14 = vcmp.eq.s32.totalorder %v3090_v34, %v2565_v9 }
  0xbf   :  { %v3995_v37 = vsel %vm3102_vm15, 4294967295, %v3994_v37  ;;  %vm411_vm12 = vcmp.eq.s32.totalorder %v190_v35, %v2549_v5  ;;  %vm3118_vm4 = vmpackc.low %vm433_vm13, %vm429_vm8  ;;  %vm410_vm7 = vcmp.eq.s32.totalorder %v190_v35, %v2538_v0  ;;  %vm413_vm15 = vcmp.eq.s32.totalorder %v190_v35, %v2565_v9 }
  0xc0   :  { %v3997_v40 = vsel %vm3118_vm4, 4294967295, %v3996_v40  ;;  %vm2074_vm0 = vmpackc.low %vm415_vm1, %vm411_vm12  ;;  %vm3998_vm13 = vcmp.eq.s32.totalorder %v100_v13, %v2581_v12  ;;  %vm3999_vm8 = vcmp.eq.s32.totalorder %v3001_v11, %v2581_v12  ;;  %v2329_v13 = vld [vmem:[%s3911_s1 + $0xa0] sm:$0xff]  }
  0xc1   :  { %1443 = vxpose.xlu0.c.b16.cont [2/8] (narrow) %v2320_v31, 32  ;;  %2075 = vmatprep.subr.msk.bf16.mxu0 %vm2074_vm0, %v3916_v8  ;;  %vm2076_vm9 = vmpackc.low %vm414_vm6, %vm410_vm7  ;;  %v3132_v42 = vpop.permute.xlu1 %288  ;;  %v2331_v31 = vld [vmem:[%s3911_s1 + $0xa8] sm:$0xff]  }
  0xc2   :  { %1474 = vxpose.xlu1.c.b16.start [1/8] (narrow) %v2321_v36, 32  ;;  %2077 = vmatpush2.bf16.msk.msra.mxu0 %vm2076_vm9, %v3916_v8  ;;  %v3135_v43 = vpop.permute.xlu0 %285  ;;  %vm3145_vm7 = vmpackc.low %vm3999_vm8, %vm3998_vm13  ;;  %vm543_vm1 = vcmp.eq.s32.totalorder %v3132_v42, %v2549_v5  ;;  %vm542_vm6 = vcmp.eq.s32.totalorder %v3132_v42, %v2538_v0  ;;  %vm421_vm9 = vcmp.eq.s32.totalorder %v3046_v25, %v2565_v9  ;;  %v2332_v36 = vld [vmem:[%s3911_s1 + $0x38] sm:$0xff]  }
  0xc3   :  { %v4001_v47 = vsel %vm3145_vm7, 4294967295, %v4000_v47  ;;  %vm539_vm12 = vcmp.eq.s32.totalorder %v3135_v43, %v2549_v5  ;;  %vm3162_vm0 = vmpackc.low %vm417_vm14, %vm413_vm15  ;;  %vm538_vm8 = vcmp.eq.s32.totalorder %v3135_v43, %v2538_v0  ;;  %vm425_vm7 = vcmp.eq.s32.totalorder %v3043_v22, %v2565_v9 }
  0xc4   :  { %v4003_v48 = vsel %vm3162_vm0, 4294967295, %v4002_v48  ;;  %vm2138_vm13 = vmpackc.low %vm543_vm1, %vm539_vm12  ;;  %vm4004_vm15 = vcmp.eq.s32.totalorder %v2955_v3, %v2581_v12  ;;  %v4014_v3 = vmov 0 }
  0xc5   :  { %1444 = vxpose.xlu0.c.b16.cont [3/8] (narrow) %v2322_v41, 32  ;;  %2139 = vmatprep.subr.msk.bf16.mxu1 %vm2138_vm13, %v3916_v8  ;;  %vm2140_vm14 = vmpackc.low %vm542_vm6, %vm538_vm8  ;;  %v3178_v52 = vpop.permute.xlu1 %186  ;;  %vm4005_vm6 = vcmp.eq.s32.totalorder %v2952_v2, %v2581_v12  ;;  %v4012_v2 = vmov 0 }
  0xc6   :  { %1475 = vxpose.xlu1.c.b16.cont [2/8] (narrow) %v2323_v46, 32  ;;  %2141 = vmatpush2.bf16.msk.msra.mxu1 %vm2140_vm14, %v3916_v8  ;;  %v184_v53 = vpop.permute.xlu0 %183  ;;  %vm3190_vm12 = vmpackc.low %vm4005_vm6, %vm4004_vm15  ;;  %vm407_vm14 = vcmp.eq.s32.totalorder %v3178_v52, %v2549_v5  ;;  %vm406_vm13 = vcmp.eq.s32.totalorder %v3178_v52, %v2538_v0  ;;  %vm409_vm0 = vcmp.eq.s32.totalorder %v3178_v52, %v2565_v9 }
  0xc7   :  { %v4007_v55 = vsel %vm3190_vm12, 4294967295, %v4006_v55  ;;  %vm403_vm8 = vcmp.eq.s32.totalorder %v184_v53, %v2549_v5  ;;  %vm3206_vm15 = vmpackc.low %vm425_vm7, %vm421_vm9  ;;  %vm402_vm1 = vcmp.eq.s32.totalorder %v184_v53, %v2538_v0  ;;  %vm405_vm12 = vcmp.eq.s32.totalorder %v184_v53, %v2565_v9 }
  0xc8   :  { %v4009_v58 = vsel %vm3206_vm15, 4294967295, %v4008_v58  ;;  %vm2078_vm6 = vmpackc.low %vm407_vm14, %vm403_vm8  ;;  %vm4010_vm7 = vcmp.eq.s32.totalorder %v190_v35, %v2581_v12  ;;  %vm4011_vm9 = vcmp.eq.s32.totalorder %v3090_v34, %v2581_v12  ;;  %v4024_v34 = vmov 0 }
  0xc9   :  { %1445 = vxpose.xlu0.c.b16.cont [4/8] (narrow) %v2324_v49, 32  ;;  %2079 = vmatprep.subr.msk.bf16.mxu0 %vm2078_vm6, %v3916_v8  ;;  %vm2080_vm4 = vmpackc.low %vm406_vm13, %vm402_vm1  ;;  %v3220_v60 = vpop.permute.xlu1 %282  ;;  %v4026_v35 = vmov 0  ;;  %v2333_v49 = vld [vmem:[%s3911_s1 + $0xb0] sm:$0xff]  }
  0xca   :  { %1476 = vxpose.xlu1.c.b16.cont [3/8] (narrow) %v2325_v54, 32  ;;  %2081 = vmatpush2.bf16.msk.msra.mxu0 %vm2080_vm4, %v3916_v8  ;;  %v3223_v61 = vpop.permute.xlu0 %279  ;;  %vm3233_vm1 = vmpackc.low %vm4011_vm9, %vm4010_vm7  ;;  %vm535_vm14 = vcmp.eq.s32.totalorder %v3220_v60, %v2549_v5  ;;  %vm534_vm13 = vcmp.eq.s32.totalorder %v3220_v60, %v2538_v0  ;;  %vm541_vm4 = vcmp.eq.s32.totalorder %v3135_v43, %v2565_v9  ;;  %v2334_v54 = vld [vmem:[%s3911_s1 + $0xb8] sm:$0xff]  }
  0xcb   :  { %v4013_v2 = vsel %vm3233_vm1, 4294967295, %v4012_v2  ;;  %vm531_vm8 = vcmp.eq.s32.totalorder %v3223_v61, %v2549_v5  ;;  %vm3250_vm6 = vmpackc.low %vm409_vm0, %vm405_vm12  ;;  %vm530_vm9 = vcmp.eq.s32.totalorder %v3223_v61, %v2538_v0  ;;  %vm545_vm1 = vcmp.eq.s32.totalorder %v3132_v42, %v2565_v9 }
  0xcc   :  { %v4015_v3 = vsel %vm3250_vm6, 4294967295, %v4014_v3  ;;  %vm2142_vm7 = vmpackc.low %vm535_vm14, %vm531_vm8  ;;  %vm4016_vm12 = vcmp.eq.s32.totalorder %v3046_v25, %v2581_v12 }
  0xcd   :  { %1446 = vxpose.xlu0.c.b16.cont [5/8] (narrow) %v2326_v59, 32  ;;  %2143 = vmatprep.subr.msk.bf16.mxu1 %vm2142_vm7, %v3916_v8  ;;  %vm2144_vm0 = vmpackc.low %vm534_vm13, %vm530_vm9  ;;  %v3266_v10 = vpop.permute.xlu1 %180  ;;  %vm4017_vm13 = vcmp.eq.s32.totalorder %v3043_v22, %v2581_v12  ;;  %v2330_v22 = vld [vmem:[%s3911_s1 + $0x30] sm:$0xff]   ;;  %v4036_v59 = vmov 0 }
  0xce   :  { %1477 = vxpose.xlu1.c.b16.cont [4/8] (narrow) %v2327_v1, 32  ;;  %2145 = vmatpush2.bf16.msk.msra.mxu1 %vm2144_vm0, %v3916_v8  ;;  %v178_v11 = vpop.permute.xlu0 %177  ;;  %vm3278_vm8 = vmpackc.low %vm4017_vm13, %vm4016_vm12  ;;  %vm399_vm0 = vcmp.eq.s32.totalorder %v3266_v10, %v2549_v5  ;;  %vm398_vm7 = vcmp.eq.s32.totalorder %v3266_v10, %v2538_v0  ;;  %vm401_vm6 = vcmp.eq.s32.totalorder %v3266_v10, %v2565_v9  ;;  %v4038_v1 = vmov 0 }
  0xcf   :  { %v4019_v14 = vsel %vm3278_vm8, 4294967295, %v4018_v14  ;;  %vm395_vm9 = vcmp.eq.s32.totalorder %v178_v11, %v2549_v5  ;;  %vm3294_vm12 = vmpackc.low %vm545_vm1, %vm541_vm4  ;;  %vm394_vm14 = vcmp.eq.s32.totalorder %v178_v11, %v2538_v0  ;;  %vm397_vm8 = vcmp.eq.s32.totalorder %v178_v11, %v2565_v9 }
  0xd0   :  { %v4021_v21 = vsel %vm3294_vm12, 4294967295, %v4020_v21  ;;  %vm2082_vm13 = vmpackc.low %vm399_vm0, %vm395_vm9  ;;  %vm4022_vm1 = vcmp.eq.s32.totalorder %v184_v53, %v2581_v12  ;;  %vm4023_vm4 = vcmp.eq.s32.totalorder %v3178_v52, %v2581_v12  ;;  %v4030_v52 = vmov 0 }
  0xd1   :  { %1447 = vxpose.xlu0.c.b16.cont [6/8] (narrow) %v2328_v4, 32  ;;  %2083 = vmatprep.subr.msk.bf16.mxu0 %vm2082_vm13, %v3916_v8  ;;  %vm2084_vm15 = vmpackc.low %vm398_vm7, %vm394_vm14  ;;  %v3308_v25 = vpop.permute.xlu1 %276 }
  0xd2   :  { %1478 = vxpose.xlu1.c.b16.cont [5/8] (narrow) %v2329_v13, 32  ;;  %2085 = vmatpush2.bf16.msk.msra.mxu0 %vm2084_vm15, %v3916_v8  ;;  %v3311_v26 = vpop.permute.xlu0 %273  ;;  %vm3321_vm14 = vmpackc.low %vm4023_vm4, %vm4022_vm1  ;;  %vm527_vm0 = vcmp.eq.s32.totalorder %v3308_v25, %v2549_v5  ;;  %vm526_vm7 = vcmp.eq.s32.totalorder %v3308_v25, %v2538_v0  ;;  %vm533_vm15 = vcmp.eq.s32.totalorder %v3223_v61, %v2565_v9  ;;  %v4044_v13 = vmov 0 }
  0xd3   :  { %v4025_v34 = vsel %vm3321_vm14, 4294967295, %v4024_v34  ;;  %vm523_vm9 = vcmp.eq.s32.totalorder %v3311_v26, %v2549_v5  ;;  %vm3338_vm13 = vmpackc.low %vm401_vm6, %vm397_vm8  ;;  %vm522_vm4 = vcmp.eq.s32.totalorder %v3311_v26, %v2538_v0  ;;  %vm537_vm14 = vcmp.eq.s32.totalorder %v3220_v60, %v2565_v9 }
  0xd4   :  { %v4027_v35 = vsel %vm3338_vm13, 4294967295, %v4026_v35  ;;  %vm2146_vm1 = vmpackc.low %vm527_vm0, %vm523_vm9  ;;  %vm4028_vm8 = vcmp.eq.s32.totalorder %v3135_v43, %v2581_v12  ;;  %vm4029_vm9 = vcmp.eq.s32.totalorder %v3132_v42, %v2581_v12  ;;  %v4032_v42 = vmov 0 }
  0xd5   :  { %1448 = vxpose.xlu0.c.b16.cont [7/8] (narrow) %v2330_v22, 32  ;;  %2147 = vmatprep.subr.msk.bf16.mxu1 %vm2146_vm1, %v3916_v8  ;;  %vm2148_vm6 = vmpackc.low %vm526_vm7, %vm522_vm4  ;;  %v175_v41 = vpop.permute.xlu1 %174  ;;  %v4047_v22 = vmov 0 }
  0xd6   :  { %1479 = vxpose.xlu1.c.b16.cont [6/8] (narrow) %v2331_v31, 32  ;;  %2149 = vmatpush2.bf16.msk.msra.mxu1 %vm2148_vm6, %v3916_v8  ;;  %v172_v46 = vpop.permute.xlu0 %171  ;;  %vm3364_vm7 = vmpackc.low %vm4029_vm9, %vm4028_vm8  ;;  %vm391_vm6 = vcmp.eq.s32.totalorder %v175_v41, %v2549_v5  ;;  %vm390_vm0 = vcmp.eq.s32.totalorder %v175_v41, %v2538_v0  ;;  %v4049_v31 = vmov 0 }
  0xd7   :  { %v4031_v52 = vsel %vm3364_vm7, 4294967295, %v4030_v52  ;;  %vm387_vm4 = vcmp.eq.s32.totalorder %v172_v46, %v2549_v5  ;;  %vm3379_vm13 = vmpackc.low %vm537_vm14, %vm533_vm15  ;;  %vm386_vm9 = vcmp.eq.s32.totalorder %v172_v46, %v2538_v0  ;;  %vm389_vm1 = vcmp.eq.s32.totalorder %v172_v46, %v2565_v9 }
  0xd8   :  { %v4033_v42 = vsel %vm3379_vm13, 4294967295, %v4032_v42  ;;  %vm2086_vm8 = vmpackc.low %vm391_vm6, %vm387_vm4  ;;  %vm393_vm7 = vcmp.eq.s32.totalorder %v175_v41, %v2565_v9  ;;  %vm4034_vm14 = vcmp.eq.s32.totalorder %v178_v11, %v2581_v12  ;;  %vm4035_vm15 = vcmp.eq.s32.totalorder %v3266_v10, %v2581_v12 }
  0xd9   :  { %1449 = vxpose.xlu0.c.b16.end [8/8] (narrow) %v2332_v36, 32  ;;  %2087 = vmatprep.subr.msk.bf16.mxu0 %vm2086_vm8, %v3916_v8  ;;  %vm2088_vm12 = vmpackc.low %vm390_vm0, %vm386_vm9  ;;  %v3388_v43 = vpop.permute.xlu1 %270  ;;  %v4042_v11 = vmov 0 }
  0xda   :  { %1480 = vxpose.xlu1.c.b16.cont [7/8] (narrow) %v2333_v49, 32  ;;  %2089 = vmatpush2.bf16.msk.msra.mxu0 %vm2088_vm12, %v3916_v8  ;;  %v3391_v53 = vpop.permute.xlu0 %267  ;;  %vm3401_vm4 = vmpackc.low %vm4035_vm15, %vm4034_vm14  ;;  %vm519_vm8 = vcmp.eq.s32.totalorder %v3388_v43, %v2549_v5  ;;  %vm518_vm0 = vcmp.eq.s32.totalorder %v3388_v43, %v2538_v0  ;;  %vm525_vm12 = vcmp.eq.s32.totalorder %v3311_v26, %v2565_v9 }
  0xdb   :  { %v4037_v59 = vsel %vm3401_vm4, 4294967295, %v4036_v59  ;;  %vm515_vm6 = vcmp.eq.s32.totalorder %v3391_v53, %v2549_v5  ;;  %vm3415_vm9 = vmpackc.low %vm393_vm7, %vm389_vm1  ;;  %vm514_vm15 = vcmp.eq.s32.totalorder %v3391_v53, %v2538_v0  ;;  %vm529_vm4 = vcmp.eq.s32.totalorder %v3308_v25, %v2565_v9 }
  0xdc   :  { %v4039_v1 = vsel %vm3415_vm9, 4294967295, %v4038_v1  ;;  %vm2150_vm14 = vmpackc.low %vm519_vm8, %vm515_vm6  ;;  %vm4040_vm7 = vcmp.eq.s32.totalorder %v3223_v61, %v2581_v12  ;;  %vm4041_vm1 = vcmp.eq.s32.totalorder %v3220_v60, %v2581_v12 }
  0xdd   :  { %2151 = vmatprep.subr.msk.bf16.mxu1 %vm2150_vm14, %v3916_v8  ;;  %vm2152_vm13 = vmpackc.low %vm518_vm0, %vm514_vm15  ;;  %v169_v4 = vpop.permute.xlu1 %168  ;;  %vm388_vm14 = vcmp.eq.s32.totalorder %v172_v46, %v2581_v12  ;;  %v4054_v46 = vmov 0 }
  0xde   :  { %1481 = vxpose.xlu1.c.b16.end [8/8] (narrow) %v2334_v54, 32  ;;  %2153 = vmatpush2.bf16.msk.msra.mxu1 %vm2152_vm13, %v3916_v8  ;;  %v166_v10 = vpop.permute.xlu0 %165  ;;  %vm3435_vm6 = vmpackc.low %vm4041_vm1, %vm4040_vm7  ;;  %vm383_vm15 = vcmp.eq.s32.totalorder %v169_v4, %v2549_v5  ;;  %vm382_vm7 = vcmp.eq.s32.totalorder %v169_v4, %v2538_v0  ;;  %v4057_v54 = vmov 0 }
  0xdf   :  { %v4043_v11 = vsel %vm3435_vm6, 4294967295, %v4042_v11  ;;  %vm379_vm0 = vcmp.eq.s32.totalorder %v166_v10, %v2549_v5  ;;  %vm3443_vm13 = vmpackc.low %vm529_vm4, %vm525_vm12  ;;  %vm378_vm3 = vcmp.eq.s32.totalorder %v166_v10, %v2538_v0  ;;  %vm381_vm1 = vcmp.eq.s32.totalorder %v166_v10, %v2565_v9 }
  0xe0   :  { %v4045_v13 = vsel %vm3443_vm13, 4294967295, %v4044_v13  ;;  %vm2090_vm9 = vmpackc.low %vm383_vm15, %vm379_vm0  ;;  %vm385_vm6 = vcmp.eq.s32.totalorder %v169_v4, %v2565_v9  ;;  %vm4046_vm4 = vcmp.eq.s32.totalorder %v175_v41, %v2581_v12  ;;  %vm524_vm15 = vcmp.eq.s32.totalorder %v3311_v26, %v2581_v12 }
  0xe1   :  { %2091 = vmatprep.subr.msk.bf16.mxu0 %vm2090_vm9, %v3916_v8  ;;  %vm2092_vm8 = vmpackc.low %vm382_vm7, %vm378_vm3  ;;  %v3452_v60 = vpop.permute.xlu1 %264  ;;  %vm517_vm0 = vcmp.eq.s32.totalorder %v3391_v53, %v2565_v9  ;;  %v4052_v41 = vmov 0 }
  0xe2   :  { %2093 = vmatpush2.bf16.msk.msra.mxu0 %vm2092_vm8, %v3916_v8  ;;  %v3455_v61 = vpop.permute.xlu0 %261  ;;  %vm3459_vm12 = vmpackc.low %vm4046_vm4, %vm388_vm14  ;;  %vm511_vm9 = vcmp.eq.s32.totalorder %v3452_v60, %v2549_v5  ;;  %vm510_vm4 = vcmp.eq.s32.totalorder %v3452_v60, %v2538_v0 }
  0xe3   :  { %v4048_v22 = vsel %vm3459_vm12, 4294967295, %v4047_v22  ;;  %vm507_vm3 = vcmp.eq.s32.totalorder %v3455_v61, %v2549_v5  ;;  %vm3471_vm8 = vmpackc.low %vm385_vm6, %vm381_vm1  ;;  %vm506_vm7 = vcmp.eq.s32.totalorder %v3455_v61, %v2538_v0  ;;  %vm521_vm12 = vcmp.eq.s32.totalorder %v3388_v43, %v2565_v9 }
  0xe4   :  { %v4050_v31 = vsel %vm3471_vm8, 4294967295, %v4049_v31  ;;  %vm2154_vm14 = vmpackc.low %vm511_vm9, %vm507_vm3  ;;  %vm4051_vm6 = vcmp.eq.s32.totalorder %v3308_v25, %v2581_v12  ;;  %vm380_vm9 = vcmp.eq.s32.totalorder %v166_v10, %v2581_v12  ;;  %v4060_v10 = vmov 0 }
  0xe5   :  { %2155 = vmatprep.subr.msk.bf16.mxu1 %vm2154_vm14, %v3916_v8  ;;  %vm2156_vm13 = vmpackc.low %vm510_vm4, %vm506_vm7  ;;  %v163_v26 = vpop.permute.xlu1 %162 }
  0xe6   :  { %2157 = vmatpush2.bf16.msk.msra.mxu1 %vm2156_vm13, %v3916_v8  ;;  %v160_v36 = vpop.permute.xlu0 %159  ;;  %vm3488_vm1 = vmpackc.low %vm4051_vm6, %vm524_vm15  ;;  %vm375_vm14 = vcmp.eq.s32.totalorder %v163_v26, %v2549_v5  ;;  %vm374_vm15 = vcmp.eq.s32.totalorder %v163_v26, %v2538_v0 }
  0xe7   :  { %v4053_v41 = vsel %vm3488_vm1, 4294967295, %v4052_v41  ;;  %vm371_vm8 = vcmp.eq.s32.totalorder %v160_v36, %v2549_v5  ;;  %vm3496_vm7 = vmpackc.low %vm521_vm12, %vm517_vm0  ;;  %vm370_vm4 = vcmp.eq.s32.totalorder %v160_v36, %v2538_v0  ;;  %vm373_vm6 = vcmp.eq.s32.totalorder %v160_v36, %v2565_v9 }
  0xe8   :  { %v4055_v46 = vsel %vm3496_vm7, 4294967295, %v4054_v46  ;;  %vm2094_vm13 = vmpackc.low %vm375_vm14, %vm371_vm8  ;;  %vm377_vm1 = vcmp.eq.s32.totalorder %v163_v26, %v2565_v9  ;;  %vm4056_vm12 = vcmp.eq.s32.totalorder %v169_v4, %v2581_v12  ;;  %vm516_vm14 = vcmp.eq.s32.totalorder %v3391_v53, %v2581_v12 }
  0xe9   :  { %2095 = vmatprep.subr.msk.bf16.mxu0 %vm2094_vm13, %v3916_v8  ;;  %vm2096_vm3 = vmpackc.low %vm374_vm15, %vm370_vm4  ;;  %v3505_v25 = vpop.permute.xlu1 %258  ;;  %vm509_vm8 = vcmp.eq.s32.totalorder %v3455_v61, %v2565_v9 }
  0xea   :  { %2097 = vmatpush2.bf16.msk.msra.mxu0 %vm2096_vm3, %v3916_v8  ;;  %v3508_v49 = vpop.permute.xlu0 %255  ;;  %vm3512_vm0 = vmpackc.low %vm4056_vm12, %vm380_vm9  ;;  %vm503_vm3 = vcmp.eq.s32.totalorder %v3505_v25, %v2549_v5  ;;  %vm502_vm12 = vcmp.eq.s32.totalorder %v3505_v25, %v2538_v0 }
  0xeb   :  { %v4058_v54 = vsel %vm3512_vm0, 4294967295, %v4057_v54  ;;  %vm499_vm13 = vcmp.eq.s32.totalorder %v3508_v49, %v2549_v5  ;;  %vm3524_vm4 = vmpackc.low %vm377_vm1, %vm373_vm6  ;;  %vm498_vm15 = vcmp.eq.s32.totalorder %v3508_v49, %v2538_v0  ;;  %vm513_vm0 = vcmp.eq.s32.totalorder %v3452_v60, %v2565_v9 }
  0xec   :  { %4059 = vst [vmem:[#allocation2_spill] sm:$0xff] %v4058_v54  ;;  %v4061_v10 = vsel %vm3524_vm4, 4294967295, %v4060_v10  ;;  %vm2158_vm9 = vmpackc.low %vm503_vm3, %vm499_vm13  ;;  %vm4063_vm1 = vcmp.eq.s32.totalorder %v3388_v43, %v2581_v12  ;;  %vm372_vm3 = vcmp.eq.s32.totalorder %v160_v36, %v2581_v12  ;;  %v4067_v54 = vmov 0 }
  0xed   :  { %4062 = vst [vmem:[#allocation3_spill] sm:$0xff] %v4061_v10  ;;  %2159 = vmatprep.subr.msk.bf16.mxu1 %vm2158_vm9, %v3916_v8  ;;  %vm2160_vm7 = vmpackc.low %vm502_vm12, %vm498_vm15  ;;  %v157_v53 = vpop.permute.xlu1 %156  ;;  %v4064_v10 = vmov 0 }
  0xee   :  { %2161 = vmatpush2.bf16.msk.msra.mxu1 %vm2160_vm7, %v3916_v8  ;;  %v154_v4 = vpop.permute.xlu0 %153  ;;  %vm3541_vm6 = vmpackc.low %vm4063_vm1, %vm516_vm14  ;;  %vm367_vm9 = vcmp.eq.s32.totalorder %v157_v53, %v2549_v5  ;;  %vm366_vm14 = vcmp.eq.s32.totalorder %v157_v53, %v2538_v0 }
  0xef   :  { %v4065_v10 = vsel %vm3541_vm6, 4294967295, %v4064_v10  ;;  %vm363_vm4 = vcmp.eq.s32.totalorder %v154_v4, %v2549_v5  ;;  %vm3549_vm15 = vmpackc.low %vm513_vm0, %vm509_vm8  ;;  %vm362_vm12 = vcmp.eq.s32.totalorder %v154_v4, %v2538_v0  ;;  %vm365_vm1 = vcmp.eq.s32.totalorder %v154_v4, %v2565_v9 }
  0xf0   :  { %4066 = vst [vmem:[#allocation4_spill] sm:$0xff] %v4065_v10  ;;  %v4068_v54 = vsel %vm3549_vm15, 4294967295, %v4067_v54  ;;  %vm2098_vm7 = vmpackc.low %vm367_vm9, %vm363_vm4  ;;  %vm369_vm6 = vcmp.eq.s32.totalorder %v157_v53, %v2565_v9  ;;  %vm4070_vm0 = vcmp.eq.s32.totalorder %v163_v26, %v2581_v12  ;;  %vm508_vm9 = vcmp.eq.s32.totalorder %v3455_v61, %v2581_v12 }
  0xf1   :  { %4069 = vst [vmem:[#allocation5_spill] sm:$0xff] %v4068_v54  ;;  %2099 = vmatprep.subr.msk.bf16.mxu0 %vm2098_vm7, %v3916_v8  ;;  %vm2100_vm13 = vmpackc.low %vm366_vm14, %vm362_vm12  ;;  %v3558_v43 = vpop.permute.xlu1 %252  ;;  %v4071_v54 = vmov 0  ;;  %vm501_vm4 = vcmp.eq.s32.totalorder %v3508_v49, %v2565_v9  ;;  %v4077_v61 = vmov 1.0|1.0   ;;  %v4081_v10 = vmov 0 }
  0xf2   :  { %2101 = vmatpush2.bf16.msk.msra.mxu0 %vm2100_vm13, %v3916_v8  ;;  %v250_v36 = vpop.permute.xlu0 %249  ;;  %vm3563_vm8 = vmpackc.low %vm4070_vm0, %vm372_vm3  ;;  %vm495_vm12 = vcmp.eq.s32.totalorder %v3558_v43, %v2549_v5  ;;  %v4074_v8 = vmov 0  ;;  %vm494_vm0 = vcmp.eq.s32.totalorder %v3558_v43, %v2538_v0 }
  0xf3   :  { %v4072_v54 = vsel %vm3563_vm8, 4294967295, %v4071_v54  ;;  %vm491_vm7 = vcmp.eq.s32.totalorder %v250_v36, %v2549_v5  ;;  %vm3574_vm14 = vmpackc.low %vm369_vm6, %vm365_vm1  ;;  %vm490_vm3 = vcmp.eq.s32.totalorder %v250_v36, %v2538_v0  ;;  %vm505_vm8 = vcmp.eq.s32.totalorder %v3505_v25, %v2565_v9  ;;  %v4147_v20 = vld [vmem:[#allocation2_spill] sm:$0xff] }
  0xf4   :  { %4073 = vst [vmem:[#allocation6_spill] sm:$0xff] %v4072_v54  ;;  %v4075_v8 = vsel %vm3574_vm14, 4294967295, %v4074_v8  ;;  %vm2162_vm13 = vmpackc.low %vm495_vm12, %vm491_vm7  ;;  %vm4078_vm6 = vcmp.eq.s32.totalorder %v3452_v60, %v2581_v12  ;;  %vm364_vm12 = vcmp.eq.s32.totalorder %v154_v4, %v2581_v12 }
  0xf5   :  { %4076 = vst [vmem:[#allocation7_spill] sm:$0xff] %v4075_v8  ;;  %2163 = vmatprep.subr.msk.bf16.mxu1 %vm2162_vm13, %v4077_v61  ;;  %vm2164_vm15 = vmpackc.low %vm494_vm0, %vm490_vm3  ;;  %v151_v26 = vpop.permute.xlu1 %150  ;;  %v4079_v8 = vmov 0 }
  0xf6   :  { %2165 = vmatpush2.bf16.msk.msra.mxu1 %vm2164_vm15, %v4077_v61  ;;  %v148_v54 = vpop.permute.xlu0 %147  ;;  %vm3590_vm1 = vmpackc.low %vm4078_vm6, %vm508_vm9  ;;  %vm359_vm13 = vcmp.eq.s32.totalorder %v151_v26, %v2549_v5  ;;  %vm358_vm9 = vcmp.eq.s32.totalorder %v151_v26, %v2538_v0 }
  0xf7   :  { %v4080_v8 = vsel %vm3590_vm1, 4294967295, %v4079_v8  ;;  %vm355_vm14 = vcmp.eq.s32.totalorder %v148_v54, %v2549_v5  ;;  %vm3598_vm3 = vmpackc.low %vm505_vm8, %vm501_vm4  ;;  %vm354_vm0 = vcmp.eq.s32.totalorder %v148_v54, %v2538_v0  ;;  %vm357_vm6 = vcmp.eq.s32.totalorder %v148_v54, %v2565_v9 }
  0xf8   :  { %v4082_v10 = vsel %vm3598_vm3, 4294967295, %v4081_v10  ;;  %vm2102_vm15 = vmpackc.low %vm359_vm13, %vm355_vm14  ;;  %vm361_vm1 = vcmp.eq.s32.totalorder %v151_v26, %v2565_v9  ;;  %vm4084_vm8 = vcmp.eq.s32.totalorder %v157_v53, %v2581_v12  ;;  %v4087_v53 = vmov 0 }
  0xf9   :  { %4083 = vst [vmem:[#allocation8_spill] sm:$0xff] %v4082_v10  ;;  %2103 = vmatprep.subr.msk.bf16.mxu0 %vm2102_vm15, %v4077_v61  ;;  %vm2104_vm7 = vmpackc.low %vm358_vm9, %vm354_vm0  ;;  %v247_v60 = vpop.permute.xlu1 %246  ;;  %v4085_v10 = vmov 0  ;;  %vm493_vm14 = vcmp.eq.s32.totalorder %v250_v36, %v2565_v9  ;;  %vm497_vm13 = vcmp.eq.s32.totalorder %v3558_v43, %v2565_v9 }
  0xfa   :  { %2105 = vmatpush2.bf16.msk.msra.mxu0 %vm2104_vm7, %v4077_v61  ;;  %v244_v4 = vpop.permute.xlu0 %243  ;;  %vm3610_vm4 = vmpackc.low %vm4084_vm8, %vm364_vm12  ;;  %vm487_vm7 = vcmp.eq.s32.totalorder %v247_v60, %v2549_v5  ;;  %vm486_vm8 = vcmp.eq.s32.totalorder %v247_v60, %v2538_v0 }
  0xfb   :  { %v4086_v10 = vsel %vm3610_vm4, 4294967295, %v4085_v10  ;;  %2171 = vmatprep.subr.msk.bf16.mxu0 %vm2588_vm5, %v4077_v61  ;;  %vm483_vm15 = vcmp.eq.s32.totalorder %v244_v4, %v2549_v5  ;;  %vm3623_vm0 = vmpackc.low %vm361_vm1, %vm357_vm6  ;;  %vm482_vm9 = vcmp.eq.s32.totalorder %v244_v4, %v2538_v0  ;;  %vm360_vm5 = vcmp.eq.s32.totalorder %v151_v26, %v2581_v12 }
  0xfc   :  { %v4088_v53 = vsel %vm3623_vm0, 4294967295, %v4087_v53  ;;  %vm2166_vm12 = vmpackc.low %vm487_vm7, %vm483_vm15  ;;  %vm356_vm4 = vcmp.eq.s32.totalorder %v148_v54, %v2581_v12  ;;  %vm496_vm6 = vcmp.eq.s32.totalorder %v3558_v43, %v2581_v12  ;;  %vm492_vm15 = vcmp.eq.s32.totalorder %v250_v36, %v2581_v12 }
  0xfd   :  { %2167 = vmatprep.subr.msk.bf16.mxu1 %vm2166_vm12, %v4077_v61  ;;  %vm2168_vm1 = vmpackc.low %vm486_vm8, %vm482_vm9  ;;  %vm4089_vm7 = vcmp.eq.s32.totalorder %v3508_v49, %v2581_v12  ;;  %vm4090_vm0 = vcmp.eq.s32.totalorder %v3505_v25, %v2581_v12  ;;  %vm485_vm9 = vcmp.eq.s32.totalorder %v244_v4, %v2565_v9  ;;  %vm489_vm8 = vcmp.eq.s32.totalorder %v247_v60, %v2565_v9 }
  0xfe   :  { %2169 = vmatpush2.bf16.msk.msra.mxu1 %vm2168_vm1, %v4077_v61  ;;  %vm3645_vm3 = vmpackc.low %vm4090_vm0, %vm4089_vm7  ;;  %vm488_vm1 = vcmp.eq.s32.totalorder %v247_v60, %v2581_v12  ;;  %vm484_vm0 = vcmp.eq.s32.totalorder %v244_v4, %v2581_v12 }
  0xff   :  { %2235 = vmatprep.subr.msk.bf16.mxu1 %vm2601_vm11, %v4077_v61  ;;  %v1466_v5 = vpop.trf.xlu0  ;;  %vm3652_vm12 = vmpackc.low %vm497_vm13, %vm493_vm14 }
 0x100   :  { %1538 = vmatprep.mubr.bf16.mxu0 %v1466_v5  ;;  %vm3664_vm7 = vmpackc.low %vm360_vm5, %vm356_vm4  ;;  %vm4103_vm4 = vnez %v3931_v23  ;;  %vm4104_vm5 = vnez %v3933_v24  ;;  %v4149_v23 = vld [vmem:[#allocation3_spill] sm:$0xff]  ;;  %v4151_v24 = vld [vmem:[#allocation4_spill] sm:$0xff] }
 0x101   :  { %vm3668_vm11 = vmpackc.low %vm496_vm6, %vm492_vm15  ;;  %vm4107_vm6 = vnez %v3941_v32  ;;  %vm4108_vm15 = vnez %v3943_v33  ;;  %v4157_v32 = vld [vmem:[#allocation7_spill] sm:$0xff]  ;;  %v4160_v33 = vld [vmem:[#allocation8_spill] sm:$0xff] }
 0x102   :  { %vm3672_vm14 = vmpackc.low %vm489_vm8, %vm485_vm9  ;;  %vm4109_vm9 = vnez %v3947_v38  ;;  %vm4110_vm8 = vnez %v3949_v39 }
 0x103   :  { %vm3676_vm13 = vmpackc.low %vm488_vm1, %vm484_vm0  ;;  %v3680_v54 = vpop.trf.xlu0  ;;  %vm4111_vm1 = vnez %v3953_v44  ;;  %vm4112_vm0 = vnez %v3955_v45 }
 0x104   :  { %v1498_v43 = vpop.trf.xlu1 }
 0x105   :  { %1591 = vmatprep.mubr.bf16.mxu1 %v1498_v43 }
 0x108   :  { %v3682_v12 = vpop.trf.xlu1 }
 0x11f   :  { %v3684_v36 = vpop.trf.xlu0 }
 0x120   :  { %1539 = vmatmul.mubr.bf16.vlgmr.msra.gmra.mxu0 %v3684_v36 }
 0x121   :  { %2173 = vmatpush1.bf16.msk.msra.mxu0 %vm2617_vm2, %v4077_v61  ;;  %1548 = vmatprep.mubr.bf16.mxu0 %v3680_v54  ;;  %vm4105_vm2 = vnez %v3936_v27  ;;  %v4153_v27 = vld [vmem:[#allocation5_spill] sm:$0xff] }
 0x122   :  { %2175 = vmatprep.subr.msk.bf16.mxu0 %vm2625_vm10, %v4077_v61  ;;  %vm4106_vm10 = vnez %v3938_v28  ;;  %v4155_v28 = vld [vmem:[#allocation6_spill] sm:$0xff] }
 0x123   :  { %v3700_v60 = vpop.trf.xlu0 }
 0x124   :  { %v3694_v26 = vpop.trf.xlu1 }
 0x125   :  { %2177 = vmatpush1.bf16.msk.msra.mxu0 %vm4103_vm4, %v4077_v61  ;;  %1592 = vmatmul.mubr.bf16.vlgmr.msra.gmra.mxu1 %v3694_v26  ;;  %vm4113_vm4 = vnez %v3959_v50 }
 0x126   :  { %2179 = vmatprep.subr.msk.bf16.mxu0 %vm4104_vm5, %v4077_v61  ;;  %2237 = vmatpush1.bf16.msk.msra.mxu1 %vm4105_vm2, %v4077_v61  ;;  %vm4114_vm5 = vnez %v3961_v51  ;;  %vm4115_vm2 = vnez %v3965_v56 }
 0x127   :  { %1601 = vmatprep.mubr.bf16.mxu1 %v3682_v12  ;;  %2239 = vmatprep.subr.msk.bf16.mxu1 %vm4106_vm10, %v4077_v61  ;;  %vm4116_vm10 = vnez %v3967_v57 }
 0x128   :  { %1549 = vmatmul.mubr.bf16.gmra.mxu0 %v3700_v60  ;;  %v1483_v19 = vpop.trf.xlu1 }
 0x129   :  { %2181 = vmatpush1.bf16.msk.msra.mxu0 %vm4107_vm6, %v4077_v61  ;;  %1644 = vmatprep.mubr.bf16.mxu0 %v1466_v5  ;;  %vm4117_vm6 = vnez %v3971_v62 }
 0x12a   :  { %2183 = vmatprep.subr.msk.bf16.mxu0 %vm4108_vm15, %v4077_v61  ;;  %2241 = vmatpush1.bf16.msk.msra.mxu1 %vm4109_vm9, %v4077_v61  ;;  %vm4118_vm15 = vnez %v3973_v63  ;;  %vm4119_vm9 = vnez %v3977_v6 }
 0x12b   :  { %2243 = vmatprep.subr.msk.bf16.mxu1 %vm4110_vm8, %v4077_v61  ;;  %vm4120_vm8 = vnez %v3979_v7 }
 0x12d   :  { %2185 = vmatpush1.bf16.msk.msra.mxu0 %vm4111_vm1, %v4077_v61  ;;  %1602 = vmatmul.mubr.bf16.gmra.mxu1 %v1483_v19  ;;  %vm4121_vm1 = vnez %v3983_v17 }
 0x12e   :  { %2187 = vmatprep.subr.msk.bf16.mxu0 %vm4112_vm0, %v4077_v61  ;;  %2245 = vmatpush1.bf16.msk.msra.mxu1 %vm4113_vm4, %v4077_v61  ;;  %vm4122_vm0 = vnez %v3985_v18  ;;  %vm4123_vm4 = vnez %v3989_v29 }
 0x12f   :  { %2247 = vmatprep.subr.msk.bf16.mxu1 %vm4114_vm5, %v4077_v61  ;;  %1697 = vmatprep.mubr.bf16.mxu1 %v1498_v43  ;;  %vm4124_vm5 = vnez %v3991_v30 }
 0x131   :  { %2189 = vmatpush1.bf16.msk.msra.mxu0 %vm4115_vm2, %v4077_v61  ;;  %vm4125_vm2 = vnez %v3995_v37 }
 0x132   :  { %2191 = vmatprep.subr.msk.bf16.mxu0 %vm4116_vm10, %v4077_v61  ;;  %2249 = vmatpush1.bf16.msk.msra.mxu1 %vm4117_vm6, %v4077_v61  ;;  %vm4126_vm10 = vnez %v3997_v40  ;;  %vm4127_vm6 = vnez %v4001_v47 }
 0x133   :  { %2251 = vmatprep.subr.msk.bf16.mxu1 %vm4118_vm15, %v4077_v61  ;;  %vm4128_vm15 = vnez %v4003_v48 }
 0x135   :  { %2193 = vmatpush1.bf16.msk.msra.mxu0 %vm4119_vm9, %v4077_v61  ;;  %vm4129_vm9 = vnez %v4007_v55 }
 0x136   :  { %2195 = vmatprep.subr.msk.bf16.mxu0 %vm4120_vm8, %v4077_v61  ;;  %2253 = vmatpush1.bf16.msk.msra.mxu1 %vm4121_vm1, %v4077_v61  ;;  %vm4130_vm8 = vnez %v4009_v58  ;;  %vm4131_vm1 = vnez %v4013_v2 }
 0x137   :  { %2255 = vmatprep.subr.msk.bf16.mxu1 %vm4122_vm0, %v4077_v61  ;;  %vm4132_vm0 = vnez %v4015_v3 }
 0x139   :  { %2197 = vmatpush1.bf16.msk.msra.mxu0 %vm4123_vm4, %v4077_v61  ;;  %vm4133_vm4 = vnez %v4019_v14 }
 0x13a   :  { %2199 = vmatprep.subr.msk.bf16.mxu0 %vm4124_vm5, %v4077_v61  ;;  %2257 = vmatpush1.bf16.msk.msra.mxu1 %vm4125_vm2, %v4077_v61  ;;  %vm4134_vm5 = vnez %v4021_v21  ;;  %vm4135_vm2 = vnez %v4025_v34 }
 0x13b   :  { %2259 = vmatprep.subr.msk.bf16.mxu1 %vm4126_vm10, %v4077_v61  ;;  %vm4136_vm10 = vnez %v4027_v35 }
 0x13d   :  { %2201 = vmatpush1.bf16.msk.msra.mxu0 %vm4127_vm6, %v4077_v61  ;;  %vm4137_vm6 = vnez %v4031_v52 }
 0x13e   :  { %2203 = vmatprep.subr.msk.bf16.mxu0 %vm4128_vm15, %v4077_v61  ;;  %2261 = vmatpush1.bf16.msk.msra.mxu1 %vm4129_vm9, %v4077_v61  ;;  %vm4138_vm15 = vnez %v4033_v42  ;;  %vm4139_vm9 = vnez %v4037_v59 }
 0x13f   :  { %2263 = vmatprep.subr.msk.bf16.mxu1 %vm4130_vm8, %v4077_v61  ;;  %vm4140_vm8 = vnez %v4039_v1 }
 0x141   :  { %2205 = vmatpush2.bf16.msk.msra.mxu0 %vm4131_vm1, %v4077_v61  ;;  %vm4141_vm1 = vnez %v4043_v11 }
 0x142   :  { %2207 = vmatprep.subr.msk.bf16.mxu0 %vm4132_vm0, %v4077_v61  ;;  %2265 = vmatpush1.bf16.msk.msra.mxu1 %vm4133_vm4, %v4077_v61  ;;  %vm4142_vm0 = vnez %v4045_v13  ;;  %vm4143_vm4 = vnez %v4048_v22 }
 0x143   :  { %2267 = vmatprep.subr.msk.bf16.mxu1 %vm4134_vm5, %v4077_v61  ;;  %vm4144_vm5 = vnez %v4050_v31 }
 0x145   :  { %2209 = vmatpush2.bf16.msk.msra.mxu0 %vm4135_vm2, %v4077_v61  ;;  %vm4145_vm2 = vnez %v4053_v41 }
 0x146   :  { %2211 = vmatprep.subr.msk.bf16.mxu0 %vm4136_vm10, %v4077_v61  ;;  %2269 = vmatpush2.bf16.msk.msra.mxu1 %vm4137_vm6, %v4077_v61  ;;  %vm4146_vm10 = vnez %v4055_v46  ;;  %vm4148_vm6 = vnez %v4147_v20 }
 0x147   :  { %2271 = vmatprep.subr.msk.bf16.mxu1 %vm4138_vm15, %v4077_v61  ;;  %vm4150_vm15 = vnez %v4149_v23 }
 0x149   :  { %2213 = vmatpush2.bf16.msk.msra.mxu0 %vm4139_vm9, %v4077_v61  ;;  %vm4152_vm9 = vnez %v4151_v24 }
 0x14a   :  { %2215 = vmatprep.subr.msk.bf16.mxu0 %vm4140_vm8, %v4077_v61  ;;  %2273 = vmatpush2.bf16.msk.msra.mxu1 %vm4141_vm1, %v4077_v61  ;;  %vm4154_vm8 = vnez %v4153_v27  ;;  %vm4156_vm1 = vnez %v4155_v28 }
 0x14b   :  { %2275 = vmatprep.subr.msk.bf16.mxu1 %vm4142_vm0, %v4077_v61  ;;  %vm4158_vm0 = vnez %v4157_v32 }
 0x14d   :  { %2217 = vmatpush2.bf16.msk.msra.mxu0 %vm4143_vm4, %v4077_v61  ;;  %vm4159_vm4 = vnez %v4080_v8 }
 0x14e   :  { %2219 = vmatprep.subr.msk.bf16.mxu0 %vm4144_vm5, %v4077_v61  ;;  %2277 = vmatpush2.bf16.msk.msra.mxu1 %vm4145_vm2, %v4077_v61  ;;  %vm4161_vm5 = vnez %v4160_v33  ;;  %vm4162_vm2 = vnez %v4086_v10 }
 0x14f   :  { %2279 = vmatprep.subr.msk.bf16.mxu1 %vm4146_vm10, %v4077_v61  ;;  %vm4163_vm10 = vnez %v4088_v53 }
 0x151   :  { %2221 = vmatpush2.bf16.msk.msra.mxu0 %vm4148_vm6, %v4077_v61 }
 0x152   :  { %2223 = vmatprep.subr.msk.bf16.mxu0 %vm4150_vm15, %v4077_v61  ;;  %2281 = vmatpush2.bf16.msk.msra.mxu1 %vm4152_vm9, %v4077_v61 }
 0x153   :  { %2283 = vmatprep.subr.msk.bf16.mxu1 %vm4154_vm8, %v4077_v61 }
 0x155   :  { %2225 = vmatpush2.bf16.msk.msra.mxu0 %vm4156_vm1, %v4077_v61 }
 0x156   :  { %2227 = vmatprep.subr.msk.bf16.mxu0 %vm4158_vm0, %v4077_v61  ;;  %2285 = vmatpush2.bf16.msk.msra.mxu1 %vm4159_vm4, %v4077_v61 }
 0x157   :  { %2287 = vmatprep.subr.msk.bf16.mxu1 %vm4161_vm5, %v4077_v61 }
 0x159   :  { %2229 = vmatpush2.bf16.msk.msra.mxu0 %vm4162_vm2, %v4077_v61 }
 0x15a   :  { %2231 = vmatprep.subr.msk.bf16.mxu0 %vm4163_vm10, %v4077_v61  ;;  %2289 = vmatpush2.bf16.msk.msra.mxu1 %vm3645_vm3, %v4077_v61 }
 0x15b   :  { %2291 = vmatprep.subr.msk.bf16.mxu1 %vm3652_vm12, %v4077_v61 }
 0x15d   :  { %2233 = vmatpush2.bf16.msk.msra.mxu0 %vm3664_vm7, %v4077_v61 }
 0x15e   :  { %2293 = vmatpush2.bf16.msk.msra.mxu1 %vm3668_vm11, %v4077_v61 }
 0x15f   :  { %2295 = vmatprep.subr.msk.bf16.mxu1 %vm3672_vm14, %v4077_v61 }
 0x160   :  { %1645 = vmatmul.mubr.bf16.vlgmr.msra.gmra.mxu0 %v3684_v36 }
 0x161   :  { %1654 = vmatprep.mubr.bf16.mxu0 %v3680_v54 }
 0x162   :  { %2297 = vmatpush2.bf16.msk.msra.mxu1 %vm3676_vm13, %v4077_v61 }
 0x165   :  { %1698 = vmatmul.mubr.bf16.vlgmr.msra.gmra.mxu1 %v3694_v26 }
 0x166   :  { %1707 = vmatprep.mubr.bf16.mxu1 %v3682_v12 }
 0x168   :  { %1655 = vmatmul.mubr.bf16.gmra.mxu0 %v3700_v60 }
 0x16d   :  { %1708 = vmatmul.mubr.bf16.gmra.mxu1 %v1483_v19 }
 0x1e0   :  { %v1540_v8 = vpop.f32.mrf.mxu0 }
 0x1e2   :  { %v1542_v38 = vpop.f32.mrf.mxu0 }
 0x1e4   :  { %v1544_v39 = vpop.f32.mrf.mxu0 }
 0x1e5   :  { %v1593_v44 = vpop.f32.mrf.mxu1 }
 0x1e6   :  { %v1546_v45 = vpop.f32.mrf.mxu0  ;;  %v1594_v7 = vadd.f32 %v1593_v44, %v1540_v8 }
 0x1e7   :  { %v1595_v50 = vpop.f32.mrf.mxu1 }
 0x1e8   :  { %v1550_v51 = vpop.f32.mrf.mxu0  ;;  %v1596_v29 = vadd.f32 %v1595_v50, %v1542_v38 }
 0x1e9   :  { %v1597_v56 = vpop.f32.mrf.mxu1 }
 0x1ea   :  { %v1552_v57 = vpop.f32.mrf.mxu0  ;;  %v1598_v48 = vadd.f32 %v1597_v56, %v1544_v39 }
 0x1eb   :  { %v1599_v62 = vpop.f32.mrf.mxu1 }
 0x1ec   :  { %v1554_v6 = vpop.f32.mrf.mxu0  ;;  %v1600_v3 = vadd.f32 %v1599_v62, %v1546_v45 }
 0x1ed   :  { %v1603_v63 = vpop.f32.mrf.mxu1 }
 0x1ee   :  { %v1604_v17 = vadd.f32 %v1603_v63, %v1550_v51  ;;  %v1556_v47 = vpop.f32.mrf.mxu0 }
 0x1ef   :  { %v1605_v18 = vpop.f32.mrf.mxu1 }
 0x1f0   :  { %v1726_v30 = vadd.f32 %v1604_v17, %v1594_v7  ;;  %v1606_v37 = vadd.f32 %v1605_v18, %v1552_v57 }
 0x1f1   :  { %v1607_v40 = vpop.f32.mrf.mxu1 }
 0x1f2   :  { %v1727_v55 = vadd.f32 %v1606_v37, %v1596_v29  ;;  %v1608_v58 = vadd.f32 %v1607_v40, %v1554_v6  ;;  %1742 = vst [vmem:[%s3912_s2] sm:$0xff] %v1726_v30 }
 0x1f3   :  { %v1609_v2 = vpop.f32.mrf.mxu1 }
 0x1f4   :  { %v1730_v14 = vadd.f32 %v1608_v58, %v1598_v48  ;;  %v1610_v21 = vadd.f32 %v1609_v2, %v1556_v47  ;;  %1743 = vst [vmem:[%s3912_s2 + $0x8] sm:$0xff] %v1727_v55 }
 0x1f6   :  { %v1731_v34 = vadd.f32 %v1610_v21, %v1600_v3  ;;  %1746 = vst [vmem:[%s3912_s2 + $0x20] sm:$0xff] %v1730_v14 }
 0x1f8   :  { %1747 = vst [vmem:[%s3912_s2 + $0x28] sm:$0xff] %v1731_v34 }
 0x220   :  { %v1646_v35 = vpop.f32.mrf.mxu0 }
 0x222   :  { %v1648_v52 = vpop.f32.mrf.mxu0 }
 0x224   :  { %v1650_v42 = vpop.f32.mrf.mxu0 }
 0x225   :  { %v1699_v59 = vpop.f32.mrf.mxu1 }
 0x226   :  { %v1652_v1 = vpop.f32.mrf.mxu0  ;;  %v1700_v10 = vadd.f32 %v1699_v59, %v1646_v35 }
 0x227   :  { %v1701_v11 = vpop.f32.mrf.mxu1 }
 0x228   :  { %v1656_v13 = vpop.f32.mrf.mxu0  ;;  %v1702_v0 = vadd.f32 %v1701_v11, %v1648_v52 }
 0x229   :  { %v1703_v22 = vpop.f32.mrf.mxu1 }
 0x22a   :  { %v1658_v31 = vpop.f32.mrf.mxu0  ;;  %v1704_v25 = vadd.f32 %v1703_v22, %v1650_v42 }
 0x22b   :  { %v1705_v41 = vpop.f32.mrf.mxu1 }
 0x22c   :  { %v1660_v4 = vpop.f32.mrf.mxu0  ;;  %v1706_v12 = vadd.f32 %v1705_v41, %v1652_v1 }
 0x22d   :  { %v1709_v46 = vpop.f32.mrf.mxu1 }
 0x22e   :  { %v1710_v61 = vadd.f32 %v1709_v46, %v1656_v13  ;;  %v1662_v43 = vpop.f32.mrf.mxu0 }
 0x22f   :  { %v1711_v53 = vpop.f32.mrf.mxu1 }
 0x230   :  { %v1728_v5 = vadd.f32 %v1710_v61, %v1700_v10  ;;  %v1712_v15 = vadd.f32 %v1711_v53, %v1658_v31 }
 0x231   :  { %v1713_v16 = vpop.f32.mrf.mxu1 }
 0x232   :  { %v1729_v49 = vadd.f32 %v1712_v15, %v1702_v0  ;;  %v1714_v9 = vadd.f32 %v1713_v16, %v1660_v4  ;;  %1744 = vst [vmem:[%s3912_s2 + $0x10] sm:$0xff] %v1728_v5 }
 0x233   :  { %v1715_v54 = vpop.f32.mrf.mxu1 }
 0x234   :  { %v1732_v36 = vadd.f32 %v1714_v9, %v1704_v25  ;;  %v1716_v26 = vadd.f32 %v1715_v54, %v1662_v43  ;;  %1745 = vst [vmem:[%s3912_s2 + $0x18] sm:$0xff] %v1729_v49 }
 0x236   :  { %v1733_v60 = vadd.f32 %v1716_v26, %v1706_v12  ;;  %1748 = vst [vmem:[%s3912_s2 + $0x30] sm:$0xff] %v1732_v36 }
 0x238   :  { %1749 = vst [vmem:[%s3912_s2 + $0x38] sm:$0xff] %v1733_v60 }

// kernel: pca_volume_forward.3
= control target key start
LH: loop header
LB: loop body
LE: loop exit
PB: predicated region body
PF: predicated region fallthrough
CT: control target
= control target key end

     0   :  { %v5081_v0 = vmov 0   ;;  %v86_v59 = vlaneseq  ;;  %s9469_s0 = inlined_call_operand.vmem [shape: s32[512,1], index: 0, kind: input, shape index: {}]   ;;  %s9470_s1 = inlined_call_operand.vmem [shape: f32[512,3], index: 1, kind: input, shape index: {}]   ;;  %s9471_s3 = inlined_call_operand.vmem [shape: f32[3,512], index: 3, kind: output, shape index: {1}]   ;;  %s9472_s2 = inlined_call_operand.vmem [shape: f32[3,512], index: 2, kind: output, shape index: {0}]  }
   0x1   :  { %4948 = vset.pattern.permute.xlu1 %v5081_v0  ;;  %4947 = vset.pattern.permute.xlu0 %v5081_v0  ;;  %v23_v1 = vld [vmem:[%s9469_s0 + $0x10] sm:$0xff]  ;;  %v21_v2 = vld [vmem:[%s9469_s0] sm:$0xff]  ;;  %v24_v3 = vld [vmem:[%s9469_s0 + $0x18] sm:$0xff] }
   0x2   :  { %103 = vperm.xlu1 %4948, %v23_v1   ;;  %97 = vperm.xlu0 %4947, %v21_v2   ;;  %v22_v4 = vld [vmem:[%s9469_s0 + $0x8] sm:$0xff]  ;;  %v25_v6 = vld [vmem:[%s9469_s0 + $0x20] sm:$0xff]  ;;  %v28_v7 = vld [vmem:[%s9469_s0 + $0x38] sm:$0xff]  ;;  %v5286_v62 = vand.u32 127, %v86_v59 }
   0x3   :  { %v26_v5 = vld [vmem:[%s9469_s0 + $0x28] sm:$0xff]  ;;  %v27_v8 = vld [vmem:[%s9469_s0 + $0x30] sm:$0xff]  ;;  %v29_v10 = vld [vmem:[%s9469_s0 + $0x40] sm:$0xff] }
   0x4   :  { %v30_v9 = vld [vmem:[%s9469_s0 + $0x48] sm:$0xff]  ;;  %v32_v11 = vld [vmem:[%s9469_s0 + $0x58] sm:$0xff]  ;;  %v31_v12 = vld [vmem:[%s9469_s0 + $0x50] sm:$0xff]  ;;  %v5295_v1 = vadd.s32 128, %v5286_v62  ;;  %v5298_v2 = vadd.s32 256, %v5286_v62 }
   0x5   :  { %v34_v13 = vld [vmem:[%s9469_s0 + $0x68] sm:$0xff]  ;;  %v33_v14 = vld [vmem:[%s9469_s0 + $0x60] sm:$0xff]  ;;  %v36_v15 = vld [vmem:[%s9469_s0 + $0x78] sm:$0xff] }
   0x6   :  { %106 = vperm.xlu1 %4948, %v24_v3   ;;  %100 = vperm.xlu0 %4947, %v22_v4   ;;  %v35_v16 = vld [vmem:[%s9469_s0 + $0x70] sm:$0xff]  ;;  %v38_v17 = vld [vmem:[%s9469_s0 + $0x88] sm:$0xff]  ;;  %v37_v18 = vld [vmem:[%s9469_s0 + $0x80] sm:$0xff]  ;;  %v5301_v3 = vadd.s32 384, %v5286_v62 }
   0x7   :  { %v40_v19 = vld [vmem:[%s9469_s0 + $0x98] sm:$0xff]  ;;  %v39_v20 = vld [vmem:[%s9469_s0 + $0x90] sm:$0xff]  ;;  %v42_v21 = vld [vmem:[%s9469_s0 + $0xa8] sm:$0xff] }
   0x8   :  { %v41_v22 = vld [vmem:[%s9469_s0 + $0xa0] sm:$0xff]  ;;  %v44_v23 = vld [vmem:[%s9469_s0 + $0xb8] sm:$0xff]  ;;  %v43_v24 = vld [vmem:[%s9469_s0 + $0xb0] sm:$0xff] }
   0x9   :  { %v46_v25 = vld [vmem:[%s9469_s0 + $0xc8] sm:$0xff]  ;;  %v45_v26 = vld [vmem:[%s9469_s0 + $0xc0] sm:$0xff]  ;;  %v48_v27 = vld [vmem:[%s9469_s0 + $0xd8] sm:$0xff] }
   0xa   :  { %112 = vperm.xlu1 %4948, %v26_v5   ;;  %109 = vperm.xlu0 %4947, %v25_v6   ;;  %v47_v28 = vld [vmem:[%s9469_s0 + $0xd0] sm:$0xff]  ;;  %v50_v29 = vld [vmem:[%s9469_s0 + $0xe8] sm:$0xff]  ;;  %v49_v30 = vld [vmem:[%s9469_s0 + $0xe0] sm:$0xff] }
   0xb   :  { %v52_v31 = vld [vmem:[%s9469_s0 + $0xf8] sm:$0xff]  ;;  %v51_v32 = vld [vmem:[%s9469_s0 + $0xf0] sm:$0xff]  ;;  %v54_v33 = vld [vmem:[%s9469_s0 + $0x108] sm:$0xff] }
   0xc   :  { %v53_v34 = vld [vmem:[%s9469_s0 + $0x100] sm:$0xff]  ;;  %v56_v35 = vld [vmem:[%s9469_s0 + $0x118] sm:$0xff]  ;;  %v55_v36 = vld [vmem:[%s9469_s0 + $0x110] sm:$0xff] }
   0xd   :  { %v58_v37 = vld [vmem:[%s9469_s0 + $0x128] sm:$0xff]  ;;  %v57_v38 = vld [vmem:[%s9469_s0 + $0x120] sm:$0xff]  ;;  %v60_v39 = vld [vmem:[%s9469_s0 + $0x138] sm:$0xff] }
   0xe   :  { %118 = vperm.xlu1 %4948, %v28_v7   ;;  %115 = vperm.xlu0 %4947, %v27_v8   ;;  %v59_v40 = vld [vmem:[%s9469_s0 + $0x130] sm:$0xff]  ;;  %v62_v41 = vld [vmem:[%s9469_s0 + $0x148] sm:$0xff]  ;;  %v61_v42 = vld [vmem:[%s9469_s0 + $0x140] sm:$0xff] }
   0xf   :  { %v64_v43 = vld [vmem:[%s9469_s0 + $0x158] sm:$0xff]  ;;  %v63_v44 = vld [vmem:[%s9469_s0 + $0x150] sm:$0xff]  ;;  %v66_v45 = vld [vmem:[%s9469_s0 + $0x168] sm:$0xff] }
  0x10   :  { %v65_v46 = vld [vmem:[%s9469_s0 + $0x160] sm:$0xff]  ;;  %v68_v47 = vld [vmem:[%s9469_s0 + $0x178] sm:$0xff]  ;;  %v67_v48 = vld [vmem:[%s9469_s0 + $0x170] sm:$0xff] }
  0x11   :  { %v70_v49 = vld [vmem:[%s9469_s0 + $0x188] sm:$0xff]  ;;  %v69_v50 = vld [vmem:[%s9469_s0 + $0x180] sm:$0xff]  ;;  %v72_v51 = vld [vmem:[%s9469_s0 + $0x198] sm:$0xff] }
  0x12   :  { %124 = vperm.xlu1 %4948, %v30_v9   ;;  %121 = vperm.xlu0 %4947, %v29_v10   ;;  %v71_v52 = vld [vmem:[%s9469_s0 + $0x190] sm:$0xff]  ;;  %v74_v53 = vld [vmem:[%s9469_s0 + $0x1a8] sm:$0xff]  ;;  %v73_v54 = vld [vmem:[%s9469_s0 + $0x1a0] sm:$0xff]  ;;  %v9678_v10 = vmov inf  }
  0x13   :  { %v76_v55 = vld [vmem:[%s9469_s0 + $0x1b8] sm:$0xff]  ;;  %v75_v56 = vld [vmem:[%s9469_s0 + $0x1b0] sm:$0xff]  ;;  %v78_v57 = vld [vmem:[%s9469_s0 + $0x1c8] sm:$0xff] }
  0x14   :  { %v77_v58 = vld [vmem:[%s9469_s0 + $0x1c0] sm:$0xff]  ;;  %v80_v60 = vld [vmem:[%s9469_s0 + $0x1d8] sm:$0xff]  ;;  %v79_v61 = vld [vmem:[%s9469_s0 + $0x1d0] sm:$0xff] }
  0x15   :  { %v82_v63 = vld [vmem:[%s9469_s0 + $0x1e8] sm:$0xff]  ;;  %v81_v0 = vld [vmem:[%s9469_s0 + $0x1e0] sm:$0xff]  ;;  %v84_v4 = vld [vmem:[%s9469_s0 + $0x1f8] sm:$0xff] }
  0x16   :  { %130 = vperm.xlu1 %4948, %v32_v11   ;;  %127 = vperm.xlu0 %4947, %v31_v12   ;;  %v83_v5 = vld [vmem:[%s9469_s0 + $0x1f0] sm:$0xff]  ;;  %v801_v8 = vld [vmem:[%s9470_s1 + $0x8] sm:$0xff]  ;;  %v800_v9 = vld [vmem:[%s9470_s1] sm:$0xff] }
  0x1a   :  { %136 = vperm.xlu1 %4948, %v34_v13   ;;  %133 = vperm.xlu0 %4947, %v33_v14  }
  0x1e   :  { %142 = vperm.xlu1 %4948, %v36_v15   ;;  %139 = vperm.xlu0 %4947, %v35_v16  }
  0x22   :  { %148 = vperm.xlu1 %4948, %v38_v17   ;;  %145 = vperm.xlu0 %4947, %v37_v18  }
  0x26   :  { %154 = vperm.xlu1 %4948, %v40_v19   ;;  %151 = vperm.xlu0 %4947, %v39_v20  }
  0x2a   :  { %160 = vperm.xlu1 %4948, %v42_v21   ;;  %157 = vperm.xlu0 %4947, %v41_v22   ;;  %v803_v21 = vld [vmem:[%s9470_s1 + $0x18] sm:$0xff]  ;;  %v802_v22 = vld [vmem:[%s9470_s1 + $0x10] sm:$0xff] }
  0x2e   :  { %166 = vperm.xlu1 %4948, %v44_v23   ;;  %163 = vperm.xlu0 %4947, %v43_v24  }
  0x32   :  { %172 = vperm.xlu1 %4948, %v46_v25   ;;  %169 = vperm.xlu0 %4947, %v45_v26  }
  0x36   :  { %178 = vperm.xlu1 %4948, %v48_v27   ;;  %175 = vperm.xlu0 %4947, %v47_v28  }
  0x3a   :  { %184 = vperm.xlu1 %4948, %v50_v29   ;;  %181 = vperm.xlu0 %4947, %v49_v30  }
  0x3e   :  { %190 = vperm.xlu1 %4948, %v52_v31   ;;  %187 = vperm.xlu0 %4947, %v51_v32  }
  0x42   :  { %196 = vperm.xlu1 %4948, %v54_v33   ;;  %193 = vperm.xlu0 %4947, %v53_v34   ;;  %v805_v33 = vld [vmem:[%s9470_s1 + $0x28] sm:$0xff]  ;;  %v804_v34 = vld [vmem:[%s9470_s1 + $0x20] sm:$0xff] }
  0x46   :  { %202 = vperm.xlu1 %4948, %v56_v35   ;;  %199 = vperm.xlu0 %4947, %v55_v36  }
  0x4a   :  { %208 = vperm.xlu1 %4948, %v58_v37   ;;  %205 = vperm.xlu0 %4947, %v57_v38  }
  0x4e   :  { %214 = vperm.xlu1 %4948, %v60_v39   ;;  %211 = vperm.xlu0 %4947, %v59_v40  }
  0x52   :  { %220 = vperm.xlu1 %4948, %v62_v41   ;;  %217 = vperm.xlu0 %4947, %v61_v42  }
  0x56   :  { %226 = vperm.xlu1 %4948, %v64_v43   ;;  %223 = vperm.xlu0 %4947, %v63_v44  }
  0x5a   :  { %232 = vperm.xlu1 %4948, %v66_v45   ;;  %229 = vperm.xlu0 %4947, %v65_v46   ;;  %v807_v45 = vld [vmem:[%s9470_s1 + $0x38] sm:$0xff]  ;;  %v806_v46 = vld [vmem:[%s9470_s1 + $0x30] sm:$0xff] }
  0x5e   :  { %238 = vperm.xlu1 %4948, %v68_v47   ;;  %235 = vperm.xlu0 %4947, %v67_v48  }
  0x62   :  { %244 = vperm.xlu1 %4948, %v70_v49   ;;  %241 = vperm.xlu0 %4947, %v69_v50  }
  0x66   :  { %250 = vperm.xlu1 %4948, %v72_v51   ;;  %247 = vperm.xlu0 %4947, %v71_v52  }
  0x6a   :  { %256 = vperm.xlu1 %4948, %v74_v53   ;;  %253 = vperm.xlu0 %4947, %v73_v54  }
  0x6e   :  { %262 = vperm.xlu1 %4948, %v76_v55   ;;  %259 = vperm.xlu0 %4947, %v75_v56  }
  0x72   :  { %268 = vperm.xlu1 %4948, %v78_v57   ;;  %265 = vperm.xlu0 %4947, %v77_v58   ;;  %v809_v57 = vld [vmem:[%s9470_s1 + $0x48] sm:$0xff]  ;;  %v808_v58 = vld [vmem:[%s9470_s1 + $0x40] sm:$0xff] }
  0x76   :  { %274 = vperm.xlu1 %4948, %v80_v60   ;;  %271 = vperm.xlu0 %4947, %v79_v61  }
  0x7a   :  { %280 = vperm.xlu1 %4948, %v82_v63   ;;  %277 = vperm.xlu0 %4947, %v81_v0  }
  0x7d   :  { %v104_v6 = vpop.permute.xlu1 %103  ;;  %v98_v7 = vpop.permute.xlu0 %97 }
  0x7e   :  { %vm296_vm0 = vcmp.eq.s32.totalorder %v104_v6, %v5286_v62  ;;  %vm297_vm1 = vcmp.eq.s32.totalorder %v104_v6, %v5295_v1  ;;  %vm298_vm2 = vcmp.eq.s32.totalorder %v104_v6, %v5298_v2  ;;  %vm299_vm3 = vcmp.eq.s32.totalorder %v104_v6, %v5301_v3  ;;  %286 = vperm.xlu1 %4948, %v84_v4  }
  0x7f   :  { %283 = vperm.xlu0 %4947, %v83_v5   ;;  %vm288_vm4 = vcmp.eq.s32.totalorder %v98_v7, %v5286_v62  ;;  %vm289_vm5 = vcmp.eq.s32.totalorder %v98_v7, %v5295_v1  ;;  %vm290_vm6 = vcmp.eq.s32.totalorder %v98_v7, %v5298_v2  ;;  %vm291_vm7 = vcmp.eq.s32.totalorder %v98_v7, %v5301_v3 }
  0x80   :  { %v5324_v11 = vsel %vm296_vm0, 0.0, %v9678_v10  ;;  %v5327_v12 = vsel %vm297_vm1, 0.0, %v9678_v10  ;;  %v5330_v13 = vsel %vm298_vm2, 0.0, %v9678_v10  ;;  %v5333_v14 = vsel %vm299_vm3, 0.0, %v9678_v10 }
  0x81   :  { %10185 = vst [vmem:[#allocation2_spill] sm:$0xff] %v5327_v12  ;;  %10186 = vst [vmem:[#allocation3_spill] sm:$0xff] %v5330_v13  ;;  %v107_v15 = vpop.permute.xlu1 %106  ;;  %v101_v16 = vpop.permute.xlu0 %100  ;;  %v5342_v17 = vsel %vm288_vm4, 0.0, %v9678_v10  ;;  %v5347_v18 = vsel %vm289_vm5, 0.0, %v9678_v10  ;;  %v5352_v19 = vsel %vm290_vm6, 0.0, %v9678_v10  ;;  %v5357_v20 = vsel %vm291_vm7, 0.0, %v9678_v10 }
  0x82   :  { %vm300_vm8 = vcmp.eq.s32.totalorder %v107_v15, %v5286_v62  ;;  %vm301_vm9 = vcmp.eq.s32.totalorder %v107_v15, %v5295_v1  ;;  %vm302_vm10 = vcmp.eq.s32.totalorder %v107_v15, %v5298_v2  ;;  %vm303_vm11 = vcmp.eq.s32.totalorder %v107_v15, %v5301_v3  ;;  %871 = vperm.xlu1 %4948, %v801_v8   ;;  %v810_v15 = vld [vmem:[%s9470_s1 + $0x50] sm:$0xff] }
  0x83   :  { %10187 = vst [vmem:[#allocation4_spill] sm:$0xff] %v5342_v17  ;;  %10188 = vst [vmem:[#allocation5_spill] sm:$0xff] %v5347_v18  ;;  %866 = vperm.xlu0 %4947, %v800_v9   ;;  %vm292_vm12 = vcmp.eq.s32.totalorder %v101_v16, %v5286_v62  ;;  %vm293_vm13 = vcmp.eq.s32.totalorder %v101_v16, %v5295_v1  ;;  %vm294_vm14 = vcmp.eq.s32.totalorder %v101_v16, %v5298_v2  ;;  %v811_v9 = vld [vmem:[%s9470_s1 + $0x58] sm:$0xff] }
  0x84   :  { %10189 = vst [vmem:[#allocation6_spill] sm:$0xff] %v5352_v19  ;;  %vm295_vm15 = vcmp.eq.s32.totalorder %v101_v16, %v5301_v3  ;;  %v5372_v23 = vsel %vm300_vm8, 0.0, %v9678_v10  ;;  %v5377_v24 = vsel %vm301_vm9, 0.0, %v9678_v10  ;;  %v5382_v25 = vsel %vm302_vm10, 0.0, %v9678_v10 }
  0x85   :  { %10190 = vst [vmem:[#allocation7_spill] sm:$0xff] %v5372_v23  ;;  %10191 = vst [vmem:[#allocation8_spill] sm:$0xff] %v5377_v24  ;;  %v5387_v26 = vsel %vm303_vm11, 0.0, %v9678_v10  ;;  %v113_v27 = vpop.permute.xlu1 %112  ;;  %v110_v28 = vpop.permute.xlu0 %109  ;;  %v5396_v29 = vsel %vm292_vm12, 0.0, %v9678_v10  ;;  %v5401_v30 = vsel %vm293_vm13, 0.0, %v9678_v10  ;;  %v5406_v31 = vsel %vm294_vm14, 0.0, %v9678_v10 }
  0x86   :  { %10192 = vst [vmem:[#allocation9_spill] sm:$0xff] %v5382_v25  ;;  %10193 = vst [vmem:[#allocation10_spill] sm:$0xff] %v5387_v26  ;;  %vm308_vm0 = vcmp.eq.s32.totalorder %v113_v27, %v5286_v62  ;;  %vm309_vm1 = vcmp.eq.s32.totalorder %v113_v27, %v5295_v1  ;;  %vm310_vm2 = vcmp.eq.s32.totalorder %v113_v27, %v5298_v2  ;;  %881 = vperm.xlu1 %4948, %v803_v21  }
  0x87   :  { %vm311_vm3 = vcmp.eq.s32.totalorder %v113_v27, %v5301_v3  ;;  %10194 = vst [vmem:[#allocation11_spill] sm:$0xff] %v5396_v29  ;;  %10195 = vst [vmem:[#allocation12_spill] sm:$0xff] %v5401_v30  ;;  %v5411_v32 = vsel %vm295_vm15, 0.0, %v9678_v10  ;;  %876 = vperm.xlu0 %4947, %v802_v22   ;;  %vm304_vm4 = vcmp.eq.s32.totalorder %v110_v28, %v5286_v62  ;;  %v5426_v35 = vsel %vm308_vm0, 0.0, %v9678_v10 }
  0x88   :  { %10196 = vst [vmem:[#allocation13_spill] sm:$0xff] %v5406_v31  ;;  %10197 = vst [vmem:[#allocation14_spill] sm:$0xff] %v5411_v32  ;;  %vm305_vm5 = vcmp.eq.s32.totalorder %v110_v28, %v5295_v1  ;;  %vm306_vm6 = vcmp.eq.s32.totalorder %v110_v28, %v5298_v2  ;;  %vm307_vm7 = vcmp.eq.s32.totalorder %v110_v28, %v5301_v3  ;;  %v5431_v36 = vsel %vm309_vm1, 0.0, %v9678_v10 }
  0x89   :  { %10198 = vst [vmem:[#allocation15_spill] sm:$0xff] %v5426_v35  ;;  %10199 = vst [vmem:[#allocation16_spill] sm:$0xff] %v5431_v36  ;;  %v5436_v37 = vsel %vm310_vm2, 0.0, %v9678_v10  ;;  %v5441_v38 = vsel %vm311_vm3, 0.0, %v9678_v10  ;;  %v119_v39 = vpop.permute.xlu1 %118  ;;  %v116_v40 = vpop.permute.xlu0 %115  ;;  %v5450_v41 = vsel %vm304_vm4, 0.0, %v9678_v10  ;;  %v5455_v42 = vsel %vm305_vm5, 0.0, %v9678_v10 }
  0x8a   :  { %10200 = vst [vmem:[#allocation17_spill] sm:$0xff] %v5436_v37  ;;  %10201 = vst [vmem:[#allocation18_spill] sm:$0xff] %v5441_v38  ;;  %vm316_vm8 = vcmp.eq.s32.totalorder %v119_v39, %v5286_v62  ;;  %vm317_vm9 = vcmp.eq.s32.totalorder %v119_v39, %v5295_v1  ;;  %vm318_vm10 = vcmp.eq.s32.totalorder %v119_v39, %v5298_v2  ;;  %891 = vperm.xlu1 %4948, %v805_v33  }
  0x8b   :  { %vm319_vm11 = vcmp.eq.s32.totalorder %v119_v39, %v5301_v3  ;;  %v5460_v43 = vsel %vm306_vm6, 0.0, %v9678_v10  ;;  %v5465_v44 = vsel %vm307_vm7, 0.0, %v9678_v10  ;;  %886 = vperm.xlu0 %4947, %v804_v34   ;;  %vm312_vm12 = vcmp.eq.s32.totalorder %v116_v40, %v5286_v62 }
  0x8c   :  { %vm313_vm13 = vcmp.eq.s32.totalorder %v116_v40, %v5295_v1  ;;  %vm314_vm14 = vcmp.eq.s32.totalorder %v116_v40, %v5298_v2  ;;  %vm315_vm15 = vcmp.eq.s32.totalorder %v116_v40, %v5301_v3  ;;  %v5480_v47 = vsel %vm316_vm8, 0.0, %v9678_v10 }
  0x8d   :  { %10202 = vst [vmem:[#allocation19_spill] sm:$0xff] %v5480_v47  ;;  %v5485_v48 = vsel %vm317_vm9, 0.0, %v9678_v10  ;;  %v5490_v49 = vsel %vm318_vm10, 0.0, %v9678_v10  ;;  %v5495_v50 = vsel %vm319_vm11, 0.0, %v9678_v10  ;;  %v125_v51 = vpop.permute.xlu1 %124  ;;  %v122_v52 = vpop.permute.xlu0 %121  ;;  %v5504_v53 = vsel %vm312_vm12, 0.0, %v9678_v10 }
  0x8e   :  { %10203 = vst [vmem:[#allocation20_spill] sm:$0xff] %v5485_v48  ;;  %10204 = vst [vmem:[#allocation21_spill] sm:$0xff] %v5490_v49  ;;  %vm324_vm0 = vcmp.eq.s32.totalorder %v125_v51, %v5286_v62  ;;  %vm325_vm1 = vcmp.eq.s32.totalorder %v125_v51, %v5295_v1  ;;  %vm326_vm2 = vcmp.eq.s32.totalorder %v125_v51, %v5298_v2  ;;  %901 = vperm.xlu1 %4948, %v807_v45  }
  0x8f   :  { %10205 = vst [vmem:[#allocation22_spill] sm:$0xff] %v5495_v50  ;;  %vm327_vm3 = vcmp.eq.s32.totalorder %v125_v51, %v5301_v3  ;;  %v5509_v54 = vsel %vm313_vm13, 0.0, %v9678_v10  ;;  %v5514_v55 = vsel %vm314_vm14, 0.0, %v9678_v10  ;;  %v5519_v56 = vsel %vm315_vm15, 0.0, %v9678_v10  ;;  %896 = vperm.xlu0 %4947, %v806_v46   ;;  %v813_v46 = vld [vmem:[%s9470_s1 + $0x68] sm:$0xff]  ;;  %v812_v51 = vld [vmem:[%s9470_s1 + $0x60] sm:$0xff] }
  0x90   :  { %vm320_vm4 = vcmp.eq.s32.totalorder %v122_v52, %v5286_v62  ;;  %vm321_vm5 = vcmp.eq.s32.totalorder %v122_v52, %v5295_v1  ;;  %vm322_vm6 = vcmp.eq.s32.totalorder %v122_v52, %v5298_v2  ;;  %vm323_vm7 = vcmp.eq.s32.totalorder %v122_v52, %v5301_v3 }
  0x91   :  { %v5534_v59 = vsel %vm324_vm0, 0.0, %v9678_v10  ;;  %v5539_v60 = vsel %vm325_vm1, 0.0, %v9678_v10  ;;  %v5544_v61 = vsel %vm326_vm2, 0.0, %v9678_v10  ;;  %v5549_v63 = vsel %vm327_vm3, 0.0, %v9678_v10  ;;  %v131_v0 = vpop.permute.xlu1 %130  ;;  %v128_v4 = vpop.permute.xlu0 %127 }
  0x92   :  { %10206 = vst [vmem:[#allocation23_spill] sm:$0xff] %v5534_v59  ;;  %10207 = vst [vmem:[#allocation24_spill] sm:$0xff] %v5539_v60  ;;  %vm332_vm8 = vcmp.eq.s32.totalorder %v131_v0, %v5286_v62  ;;  %vm333_vm9 = vcmp.eq.s32.totalorder %v131_v0, %v5295_v1  ;;  %vm334_vm10 = vcmp.eq.s32.totalorder %v131_v0, %v5298_v2  ;;  %911 = vperm.xlu1 %4948, %v809_v57  }
  0x93   :  { %10208 = vst [vmem:[#allocation25_spill] sm:$0xff] %v5544_v61  ;;  %10209 = vst [vmem:[#allocation26_spill] sm:$0xff] %v5549_v63  ;;  %vm335_vm11 = vcmp.eq.s32.totalorder %v131_v0, %v5301_v3  ;;  %v5558_v5 = vsel %vm320_vm4, 0.0, %v9678_v10  ;;  %v5563_v6 = vsel %vm321_vm5, 0.0, %v9678_v10  ;;  %v5568_v7 = vsel %vm322_vm6, 0.0, %v9678_v10  ;;  %906 = vperm.xlu0 %4947, %v808_v58  }
  0x94   :  { %10210 = vst [vmem:[#allocation27_spill] sm:$0xff] %v5558_v5  ;;  %10211 = vst [vmem:[#allocation28_spill] sm:$0xff] %v5563_v6  ;;  %v5573_v8 = vsel %vm323_vm7, 0.0, %v9678_v10  ;;  %vm328_vm12 = vcmp.eq.s32.totalorder %v128_v4, %v5286_v62  ;;  %vm329_vm13 = vcmp.eq.s32.totalorder %v128_v4, %v5295_v1  ;;  %vm330_vm14 = vcmp.eq.s32.totalorder %v128_v4, %v5298_v2 }
  0x95   :  { %10212 = vst [vmem:[#allocation29_spill] sm:$0xff] %v5568_v7  ;;  %10213 = vst [vmem:[#allocation30_spill] sm:$0xff] %v5573_v8  ;;  %vm331_vm15 = vcmp.eq.s32.totalorder %v128_v4, %v5301_v3  ;;  %v5588_v16 = vsel %vm332_vm8, 0.0, %v9678_v10  ;;  %v5593_v21 = vsel %vm333_vm9, 0.0, %v9678_v10  ;;  %v5598_v22 = vsel %vm334_vm10, 0.0, %v9678_v10  ;;  %v137_v28 = vpop.permute.xlu1 %136  ;;  %v134_v33 = vpop.permute.xlu0 %133 }
  0x96   :  { %10214 = vst [vmem:[#allocation31_spill] sm:$0xff] %v5588_v16  ;;  %10215 = vst [vmem:[#allocation32_spill] sm:$0xff] %v5593_v21  ;;  %v5603_v27 = vsel %vm335_vm11, 0.0, %v9678_v10  ;;  %vm340_vm0 = vcmp.eq.s32.totalorder %v137_v28, %v5286_v62  ;;  %vm341_vm1 = vcmp.eq.s32.totalorder %v137_v28, %v5295_v1  ;;  %vm342_vm2 = vcmp.eq.s32.totalorder %v137_v28, %v5298_v2 }
  0x97   :  { %10216 = vst [vmem:[#allocation33_spill] sm:$0xff] %v5598_v22  ;;  %10217 = vst [vmem:[#allocation34_spill] sm:$0xff] %v5603_v27  ;;  %vm343_vm3 = vcmp.eq.s32.totalorder %v137_v28, %v5301_v3  ;;  %921 = vperm.xlu1 %4948, %v811_v9   ;;  %v5612_v34 = vsel %vm328_vm12, 0.0, %v9678_v10  ;;  %v5617_v39 = vsel %vm329_vm13, 0.0, %v9678_v10  ;;  %v5622_v40 = vsel %vm330_vm14, 0.0, %v9678_v10  ;;  %916 = vperm.xlu0 %4947, %v810_v15  }
  0x98   :  { %10218 = vst [vmem:[#allocation35_spill] sm:$0xff] %v5612_v34  ;;  %10219 = vst [vmem:[#allocation36_spill] sm:$0xff] %v5617_v39  ;;  %v5627_v45 = vsel %vm331_vm15, 0.0, %v9678_v10  ;;  %vm336_vm4 = vcmp.eq.s32.totalorder %v134_v33, %v5286_v62  ;;  %vm337_vm5 = vcmp.eq.s32.totalorder %v134_v33, %v5295_v1  ;;  %vm338_vm6 = vcmp.eq.s32.totalorder %v134_v33, %v5298_v2 }
  0x99   :  { %10220 = vst [vmem:[#allocation37_spill] sm:$0xff] %v5622_v40  ;;  %10221 = vst [vmem:[#allocation38_spill] sm:$0xff] %v5627_v45  ;;  %vm339_vm7 = vcmp.eq.s32.totalorder %v134_v33, %v5301_v3  ;;  %v5642_v52 = vsel %vm340_vm0, 0.0, %v9678_v10  ;;  %v5647_v57 = vsel %vm341_vm1, 0.0, %v9678_v10  ;;  %v5652_v58 = vsel %vm342_vm2, 0.0, %v9678_v10  ;;  %v143_v4 = vpop.permute.xlu1 %142  ;;  %v140_v9 = vpop.permute.xlu0 %139 }
  0x9a   :  { %10222 = vst [vmem:[#allocation39_spill] sm:$0xff] %v5642_v52  ;;  %10223 = vst [vmem:[#allocation40_spill] sm:$0xff] %v5647_v57  ;;  %v5657_v0 = vsel %vm343_vm3, 0.0, %v9678_v10  ;;  %vm348_vm8 = vcmp.eq.s32.totalorder %v143_v4, %v5286_v62  ;;  %vm349_vm9 = vcmp.eq.s32.totalorder %v143_v4, %v5295_v1  ;;  %vm350_vm10 = vcmp.eq.s32.totalorder %v143_v4, %v5298_v2 }
  0x9b   :  { %10224 = vst [vmem:[#allocation41_spill] sm:$0xff] %v5652_v58  ;;  %10225 = vst [vmem:[#allocation42_spill] sm:$0xff] %v5657_v0  ;;  %vm351_vm11 = vcmp.eq.s32.totalorder %v143_v4, %v5301_v3  ;;  %931 = vperm.xlu1 %4948, %v813_v46   ;;  %v5666_v15 = vsel %vm336_vm4, 0.0, %v9678_v10  ;;  %v5671_v28 = vsel %vm337_vm5, 0.0, %v9678_v10  ;;  %v5676_v0 = vsel %vm338_vm6, 0.0, %v9678_v10  ;;  %926 = vperm.xlu0 %4947, %v812_v51   ;;  %v815_v46 = vld [vmem:[%s9470_s1 + $0x78] sm:$0xff] }
  0x9c   :  { %10226 = vst [vmem:[#allocation43_spill] sm:$0xff] %v5666_v15  ;;  %10227 = vst [vmem:[#allocation44_spill] sm:$0xff] %v5671_v28  ;;  %v5681_v58 = vsel %vm339_vm7, 0.0, %v9678_v10  ;;  %vm344_vm12 = vcmp.eq.s32.totalorder %v140_v9, %v5286_v62  ;;  %vm345_vm13 = vcmp.eq.s32.totalorder %v140_v9, %v5295_v1  ;;  %vm346_vm14 = vcmp.eq.s32.totalorder %v140_v9, %v5298_v2 }
  0x9d   :  { %10228 = vst [vmem:[#allocation45_spill] sm:$0xff] %v5676_v0  ;;  %10229 = vst [vmem:[#allocation46_spill] sm:$0xff] %v5681_v58  ;;  %vm347_vm15 = vcmp.eq.s32.totalorder %v140_v9, %v5301_v3  ;;  %v814_v0 = vld [vmem:[%s9470_s1 + $0x70] sm:$0xff]  ;;  %v5696_v33 = vsel %vm348_vm8, 0.0, %v9678_v10  ;;  %v5701_v51 = vsel %vm349_vm9, 0.0, %v9678_v10  ;;  %v5706_v58 = vsel %vm350_vm10, 0.0, %v9678_v10  ;;  %v149_v15 = vpop.permute.xlu1 %148  ;;  %v146_v57 = vpop.permute.xlu0 %145 }
  0x9e   :  { %10230 = vst [vmem:[#allocation47_spill] sm:$0xff] %v5696_v33  ;;  %10231 = vst [vmem:[#allocation48_spill] sm:$0xff] %v5701_v51  ;;  %v5711_v28 = vsel %vm351_vm11, 0.0, %v9678_v10  ;;  %vm356_vm0 = vcmp.eq.s32.totalorder %v149_v15, %v5286_v62  ;;  %vm357_vm1 = vcmp.eq.s32.totalorder %v149_v15, %v5295_v1  ;;  %vm358_vm2 = vcmp.eq.s32.totalorder %v149_v15, %v5298_v2 }
  0x9f   :  { %10232 = vst [vmem:[#allocation49_spill] sm:$0xff] %v5706_v58  ;;  %10233 = vst [vmem:[#allocation50_spill] sm:$0xff] %v5711_v28  ;;  %vm359_vm3 = vcmp.eq.s32.totalorder %v149_v15, %v5301_v3  ;;  %941 = vperm.xlu1 %4948, %v815_v46   ;;  %v5720_v58 = vsel %vm344_vm12, 0.0, %v9678_v10  ;;  %v5725_v4 = vsel %vm345_vm13, 0.0, %v9678_v10  ;;  %v5730_v28 = vsel %vm346_vm14, 0.0, %v9678_v10  ;;  %936 = vperm.xlu0 %4947, %v814_v0   ;;  %v817_v46 = vld [vmem:[%s9470_s1 + $0x88] sm:$0xff] }
  0xa0   :  { %10234 = vst [vmem:[#allocation51_spill] sm:$0xff] %v5720_v58  ;;  %10235 = vst [vmem:[#allocation52_spill] sm:$0xff] %v5725_v4  ;;  %v5735_v51 = vsel %vm347_vm15, 0.0, %v9678_v10  ;;  %vm352_vm4 = vcmp.eq.s32.totalorder %v146_v57, %v5286_v62  ;;  %vm353_vm5 = vcmp.eq.s32.totalorder %v146_v57, %v5295_v1  ;;  %vm354_vm6 = vcmp.eq.s32.totalorder %v146_v57, %v5298_v2 }
  0xa1   :  { %10236 = vst [vmem:[#allocation53_spill] sm:$0xff] %v5730_v28  ;;  %10237 = vst [vmem:[#allocation54_spill] sm:$0xff] %v5735_v51  ;;  %vm355_vm7 = vcmp.eq.s32.totalorder %v146_v57, %v5301_v3  ;;  %v816_v28 = vld [vmem:[%s9470_s1 + $0x80] sm:$0xff]  ;;  %v5750_v0 = vsel %vm356_vm0, 0.0, %v9678_v10  ;;  %v5755_v9 = vsel %vm357_vm1, 0.0, %v9678_v10  ;;  %v5760_v51 = vsel %vm358_vm2, 0.0, %v9678_v10  ;;  %v155_v58 = vpop.permute.xlu1 %154  ;;  %v152_v33 = vpop.permute.xlu0 %151 }
  0xa2   :  { %10238 = vst [vmem:[#allocation55_spill] sm:$0xff] %v5750_v0  ;;  %10239 = vst [vmem:[#allocation56_spill] sm:$0xff] %v5755_v9  ;;  %v5765_v4 = vsel %vm359_vm3, 0.0, %v9678_v10  ;;  %vm364_vm8 = vcmp.eq.s32.totalorder %v155_v58, %v5286_v62  ;;  %vm365_vm9 = vcmp.eq.s32.totalorder %v155_v58, %v5295_v1  ;;  %vm366_vm10 = vcmp.eq.s32.totalorder %v155_v58, %v5298_v2 }
  0xa3   :  { %10240 = vst [vmem:[#allocation57_spill] sm:$0xff] %v5760_v51  ;;  %10241 = vst [vmem:[#allocation58_spill] sm:$0xff] %v5765_v4  ;;  %vm367_vm11 = vcmp.eq.s32.totalorder %v155_v58, %v5301_v3  ;;  %951 = vperm.xlu1 %4948, %v817_v46   ;;  %v5774_v51 = vsel %vm352_vm4, 0.0, %v9678_v10  ;;  %v5779_v15 = vsel %vm353_vm5, 0.0, %v9678_v10  ;;  %v5784_v4 = vsel %vm354_vm6, 0.0, %v9678_v10  ;;  %946 = vperm.xlu0 %4947, %v816_v28   ;;  %v819_v46 = vld [vmem:[%s9470_s1 + $0x98] sm:$0xff] }
  0xa4   :  { %10242 = vst [vmem:[#allocation59_spill] sm:$0xff] %v5774_v51  ;;  %10243 = vst [vmem:[#allocation60_spill] sm:$0xff] %v5779_v15  ;;  %v5789_v9 = vsel %vm355_vm7, 0.0, %v9678_v10  ;;  %vm360_vm12 = vcmp.eq.s32.totalorder %v152_v33, %v5286_v62  ;;  %vm361_vm13 = vcmp.eq.s32.totalorder %v152_v33, %v5295_v1  ;;  %vm362_vm14 = vcmp.eq.s32.totalorder %v152_v33, %v5298_v2 }
  0xa5   :  { %10244 = vst [vmem:[#allocation61_spill] sm:$0xff] %v5784_v4  ;;  %10245 = vst [vmem:[#allocation62_spill] sm:$0xff] %v5789_v9  ;;  %vm363_vm15 = vcmp.eq.s32.totalorder %v152_v33, %v5301_v3  ;;  %v818_v4 = vld [vmem:[%s9470_s1 + $0x90] sm:$0xff]  ;;  %v5804_v57 = vsel %vm364_vm8, 0.0, %v9678_v10  ;;  %v5809_v28 = vsel %vm365_vm9, 0.0, %v9678_v10  ;;  %v5814_v9 = vsel %vm366_vm10, 0.0, %v9678_v10  ;;  %v161_v51 = vpop.permute.xlu1 %160  ;;  %v158_v0 = vpop.permute.xlu0 %157 }
  0xa6   :  { %10246 = vst [vmem:[#allocation63_spill] sm:$0xff] %v5804_v57  ;;  %10247 = vst [vmem:[#allocation64_spill] sm:$0xff] %v5809_v28  ;;  %v5819_v15 = vsel %vm367_vm11, 0.0, %v9678_v10  ;;  %vm372_vm0 = vcmp.eq.s32.totalorder %v161_v51, %v5286_v62  ;;  %vm373_vm1 = vcmp.eq.s32.totalorder %v161_v51, %v5295_v1  ;;  %vm374_vm2 = vcmp.eq.s32.totalorder %v161_v51, %v5298_v2 }
  0xa7   :  { %10248 = vst [vmem:[#allocation65_spill] sm:$0xff] %v5814_v9  ;;  %10249 = vst [vmem:[#allocation66_spill] sm:$0xff] %v5819_v15  ;;  %vm375_vm3 = vcmp.eq.s32.totalorder %v161_v51, %v5301_v3  ;;  %961 = vperm.xlu1 %4948, %v819_v46   ;;  %v5828_v9 = vsel %vm360_vm12, 0.0, %v9678_v10  ;;  %v5833_v58 = vsel %vm361_vm13, 0.0, %v9678_v10  ;;  %v5838_v15 = vsel %vm362_vm14, 0.0, %v9678_v10  ;;  %956 = vperm.xlu0 %4947, %v818_v4   ;;  %v821_v46 = vld [vmem:[%s9470_s1 + $0xa8] sm:$0xff] }
  0xa8   :  { %10250 = vst [vmem:[#allocation67_spill] sm:$0xff] %v5828_v9  ;;  %10251 = vst [vmem:[#allocation68_spill] sm:$0xff] %v5833_v58  ;;  %v5843_v28 = vsel %vm363_vm15, 0.0, %v9678_v10  ;;  %vm368_vm4 = vcmp.eq.s32.totalorder %v158_v0, %v5286_v62  ;;  %vm369_vm5 = vcmp.eq.s32.totalorder %v158_v0, %v5295_v1  ;;  %vm370_vm6 = vcmp.eq.s32.totalorder %v158_v0, %v5298_v2 }
  0xa9   :  { %10252 = vst [vmem:[#allocation69_spill] sm:$0xff] %v5838_v15  ;;  %10253 = vst [vmem:[#allocation70_spill] sm:$0xff] %v5843_v28  ;;  %vm371_vm7 = vcmp.eq.s32.totalorder %v158_v0, %v5301_v3  ;;  %v820_v15 = vld [vmem:[%s9470_s1 + $0xa0] sm:$0xff]  ;;  %v5858_v33 = vsel %vm372_vm0, 0.0, %v9678_v10  ;;  %v5863_v4 = vsel %vm373_vm1, 0.0, %v9678_v10  ;;  %v5868_v28 = vsel %vm374_vm2, 0.0, %v9678_v10  ;;  %v167_v9 = vpop.permute.xlu1 %166  ;;  %v164_v57 = vpop.permute.xlu0 %163 }
  0xaa   :  { %10254 = vst [vmem:[#allocation71_spill] sm:$0xff] %v5858_v33  ;;  %10255 = vst [vmem:[#allocation72_spill] sm:$0xff] %v5863_v4  ;;  %v5873_v58 = vsel %vm375_vm3, 0.0, %v9678_v10  ;;  %vm380_vm8 = vcmp.eq.s32.totalorder %v167_v9, %v5286_v62  ;;  %vm381_vm9 = vcmp.eq.s32.totalorder %v167_v9, %v5295_v1  ;;  %vm382_vm10 = vcmp.eq.s32.totalorder %v167_v9, %v5298_v2 }
  0xab   :  { %10256 = vst [vmem:[#allocation73_spill] sm:$0xff] %v5868_v28  ;;  %10257 = vst [vmem:[#allocation74_spill] sm:$0xff] %v5873_v58  ;;  %vm383_vm11 = vcmp.eq.s32.totalorder %v167_v9, %v5301_v3  ;;  %971 = vperm.xlu1 %4948, %v821_v46   ;;  %v5882_v28 = vsel %vm368_vm4, 0.0, %v9678_v10  ;;  %v5887_v51 = vsel %vm369_vm5, 0.0, %v9678_v10  ;;  %v5892_v58 = vsel %vm370_vm6, 0.0, %v9678_v10  ;;  %966 = vperm.xlu0 %4947, %v820_v15   ;;  %v823_v46 = vld [vmem:[%s9470_s1 + $0xb8] sm:$0xff] }
  0xac   :  { %10258 = vst [vmem:[#allocation75_spill] sm:$0xff] %v5882_v28  ;;  %10259 = vst [vmem:[#allocation76_spill] sm:$0xff] %v5887_v51  ;;  %v5897_v4 = vsel %vm371_vm7, 0.0, %v9678_v10  ;;  %vm376_vm12 = vcmp.eq.s32.totalorder %v164_v57, %v5286_v62  ;;  %vm377_vm13 = vcmp.eq.s32.totalorder %v164_v57, %v5295_v1  ;;  %vm378_vm14 = vcmp.eq.s32.totalorder %v164_v57, %v5298_v2 }
  0xad   :  { %10260 = vst [vmem:[#allocation77_spill] sm:$0xff] %v5892_v58  ;;  %10261 = vst [vmem:[#allocation78_spill] sm:$0xff] %v5897_v4  ;;  %vm379_vm15 = vcmp.eq.s32.totalorder %v164_v57, %v5301_v3  ;;  %v822_v58 = vld [vmem:[%s9470_s1 + $0xb0] sm:$0xff]  ;;  %v5912_v0 = vsel %vm380_vm8, 0.0, %v9678_v10  ;;  %v5917_v15 = vsel %vm381_vm9, 0.0, %v9678_v10  ;;  %v5922_v4 = vsel %vm382_vm10, 0.0, %v9678_v10  ;;  %v173_v28 = vpop.permute.xlu1 %172  ;;  %v170_v33 = vpop.permute.xlu0 %169 }
  0xae   :  { %10262 = vst [vmem:[#allocation79_spill] sm:$0xff] %v5912_v0  ;;  %10263 = vst [vmem:[#allocation80_spill] sm:$0xff] %v5917_v15  ;;  %v5927_v51 = vsel %vm383_vm11, 0.0, %v9678_v10  ;;  %vm388_vm0 = vcmp.eq.s32.totalorder %v173_v28, %v5286_v62  ;;  %vm389_vm1 = vcmp.eq.s32.totalorder %v173_v28, %v5295_v1  ;;  %vm390_vm2 = vcmp.eq.s32.totalorder %v173_v28, %v5298_v2 }
  0xaf   :  { %10264 = vst [vmem:[#allocation81_spill] sm:$0xff] %v5922_v4  ;;  %10265 = vst [vmem:[#allocation82_spill] sm:$0xff] %v5927_v51  ;;  %vm391_vm3 = vcmp.eq.s32.totalorder %v173_v28, %v5301_v3  ;;  %981 = vperm.xlu1 %4948, %v823_v46   ;;  %v5936_v4 = vsel %vm376_vm12, 0.0, %v9678_v10  ;;  %v5941_v9 = vsel %vm377_vm13, 0.0, %v9678_v10  ;;  %v5946_v51 = vsel %vm378_vm14, 0.0, %v9678_v10  ;;  %976 = vperm.xlu0 %4947, %v822_v58   ;;  %v825_v46 = vld [vmem:[%s9470_s1 + $0xc8] sm:$0xff] }
  0xb0   :  { %10266 = vst [vmem:[#allocation83_spill] sm:$0xff] %v5936_v4  ;;  %10267 = vst [vmem:[#allocation84_spill] sm:$0xff] %v5941_v9  ;;  %v5951_v15 = vsel %vm379_vm15, 0.0, %v9678_v10  ;;  %vm384_vm4 = vcmp.eq.s32.totalorder %v170_v33, %v5286_v62  ;;  %vm385_vm5 = vcmp.eq.s32.totalorder %v170_v33, %v5295_v1  ;;  %vm386_vm6 = vcmp.eq.s32.totalorder %v170_v33, %v5298_v2 }
  0xb1   :  { %10268 = vst [vmem:[#allocation85_spill] sm:$0xff] %v5946_v51  ;;  %10269 = vst [vmem:[#allocation86_spill] sm:$0xff] %v5951_v15  ;;  %vm387_vm7 = vcmp.eq.s32.totalorder %v170_v33, %v5301_v3  ;;  %v824_v51 = vld [vmem:[%s9470_s1 + $0xc0] sm:$0xff]  ;;  %v5966_v57 = vsel %vm388_vm0, 0.0, %v9678_v10  ;;  %v5971_v58 = vsel %vm389_vm1, 0.0, %v9678_v10  ;;  %v5976_v15 = vsel %vm390_vm2, 0.0, %v9678_v10  ;;  %v179_v4 = vpop.permute.xlu1 %178  ;;  %v176_v0 = vpop.permute.xlu0 %175 }
  0xb2   :  { %10270 = vst [vmem:[#allocation87_spill] sm:$0xff] %v5966_v57  ;;  %10271 = vst [vmem:[#allocation88_spill] sm:$0xff] %v5971_v58  ;;  %v5981_v9 = vsel %vm391_vm3, 0.0, %v9678_v10  ;;  %vm396_vm8 = vcmp.eq.s32.totalorder %v179_v4, %v5286_v62  ;;  %vm397_vm9 = vcmp.eq.s32.totalorder %v179_v4, %v5295_v1  ;;  %vm398_vm10 = vcmp.eq.s32.totalorder %v179_v4, %v5298_v2 }
  0xb3   :  { %10272 = vst [vmem:[#allocation89_spill] sm:$0xff] %v5976_v15  ;;  %10273 = vst [vmem:[#allocation90_spill] sm:$0xff] %v5981_v9  ;;  %vm399_vm11 = vcmp.eq.s32.totalorder %v179_v4, %v5301_v3  ;;  %991 = vperm.xlu1 %4948, %v825_v46   ;;  %v5990_v15 = vsel %vm384_vm4, 0.0, %v9678_v10  ;;  %v5995_v28 = vsel %vm385_vm5, 0.0, %v9678_v10  ;;  %v6000_v9 = vsel %vm386_vm6, 0.0, %v9678_v10  ;;  %986 = vperm.xlu0 %4947, %v824_v51   ;;  %v827_v46 = vld [vmem:[%s9470_s1 + $0xd8] sm:$0xff] }
  0xb4   :  { %10274 = vst [vmem:[#allocation91_spill] sm:$0xff] %v5990_v15  ;;  %10275 = vst [vmem:[#allocation92_spill] sm:$0xff] %v5995_v28  ;;  %v6005_v58 = vsel %vm387_vm7, 0.0, %v9678_v10  ;;  %vm392_vm12 = vcmp.eq.s32.totalorder %v176_v0, %v5286_v62  ;;  %vm393_vm13 = vcmp.eq.s32.totalorder %v176_v0, %v5295_v1  ;;  %vm394_vm14 = vcmp.eq.s32.totalorder %v176_v0, %v5298_v2 }
  0xb5   :  { %10276 = vst [vmem:[#allocation93_spill] sm:$0xff] %v6000_v9  ;;  %10277 = vst [vmem:[#allocation94_spill] sm:$0xff] %v6005_v58  ;;  %vm395_vm15 = vcmp.eq.s32.totalorder %v176_v0, %v5301_v3  ;;  %v826_v9 = vld [vmem:[%s9470_s1 + $0xd0] sm:$0xff]  ;;  %v6020_v33 = vsel %vm396_vm8, 0.0, %v9678_v10  ;;  %v6025_v51 = vsel %vm397_vm9, 0.0, %v9678_v10  ;;  %v6030_v58 = vsel %vm398_vm10, 0.0, %v9678_v10  ;;  %v185_v15 = vpop.permute.xlu1 %184  ;;  %v182_v57 = vpop.permute.xlu0 %181 }
  0xb6   :  { %10278 = vst [vmem:[#allocation95_spill] sm:$0xff] %v6020_v33  ;;  %10279 = vst [vmem:[#allocation96_spill] sm:$0xff] %v6025_v51  ;;  %v6035_v28 = vsel %vm399_vm11, 0.0, %v9678_v10  ;;  %vm404_vm0 = vcmp.eq.s32.totalorder %v185_v15, %v5286_v62  ;;  %vm405_vm1 = vcmp.eq.s32.totalorder %v185_v15, %v5295_v1  ;;  %vm406_vm2 = vcmp.eq.s32.totalorder %v185_v15, %v5298_v2 }
  0xb7   :  { %10280 = vst [vmem:[#allocation97_spill] sm:$0xff] %v6030_v58  ;;  %10281 = vst [vmem:[#allocation98_spill] sm:$0xff] %v6035_v28  ;;  %vm407_vm3 = vcmp.eq.s32.totalorder %v185_v15, %v5301_v3  ;;  %1001 = vperm.xlu1 %4948, %v827_v46   ;;  %v6044_v58 = vsel %vm392_vm12, 0.0, %v9678_v10  ;;  %v6049_v4 = vsel %vm393_vm13, 0.0, %v9678_v10  ;;  %v6054_v28 = vsel %vm394_vm14, 0.0, %v9678_v10  ;;  %996 = vperm.xlu0 %4947, %v826_v9   ;;  %v829_v46 = vld [vmem:[%s9470_s1 + $0xe8] sm:$0xff] }
  0xb8   :  { %10282 = vst [vmem:[#allocation99_spill] sm:$0xff] %v6044_v58  ;;  %10283 = vst [vmem:[#allocation100_spill] sm:$0xff] %v6049_v4  ;;  %v6059_v51 = vsel %vm395_vm15, 0.0, %v9678_v10  ;;  %vm400_vm4 = vcmp.eq.s32.totalorder %v182_v57, %v5286_v62  ;;  %vm401_vm5 = vcmp.eq.s32.totalorder %v182_v57, %v5295_v1  ;;  %vm402_vm6 = vcmp.eq.s32.totalorder %v182_v57, %v5298_v2 }
  0xb9   :  { %10284 = vst [vmem:[#allocation101_spill] sm:$0xff] %v6054_v28  ;;  %10285 = vst [vmem:[#allocation102_spill] sm:$0xff] %v6059_v51  ;;  %vm403_vm7 = vcmp.eq.s32.totalorder %v182_v57, %v5301_v3  ;;  %v828_v28 = vld [vmem:[%s9470_s1 + $0xe0] sm:$0xff]  ;;  %v6074_v0 = vsel %vm404_vm0, 0.0, %v9678_v10  ;;  %v6079_v9 = vsel %vm405_vm1, 0.0, %v9678_v10  ;;  %v6084_v51 = vsel %vm406_vm2, 0.0, %v9678_v10  ;;  %v191_v58 = vpop.permute.xlu1 %190  ;;  %v188_v33 = vpop.permute.xlu0 %187 }
  0xba   :  { %10286 = vst [vmem:[#allocation103_spill] sm:$0xff] %v6074_v0  ;;  %10287 = vst [vmem:[#allocation104_spill] sm:$0xff] %v6079_v9  ;;  %v6089_v4 = vsel %vm407_vm3, 0.0, %v9678_v10  ;;  %vm412_vm8 = vcmp.eq.s32.totalorder %v191_v58, %v5286_v62  ;;  %vm413_vm9 = vcmp.eq.s32.totalorder %v191_v58, %v5295_v1  ;;  %vm414_vm10 = vcmp.eq.s32.totalorder %v191_v58, %v5298_v2 }
  0xbb   :  { %10288 = vst [vmem:[#allocation105_spill] sm:$0xff] %v6084_v51  ;;  %10289 = vst [vmem:[#allocation106_spill] sm:$0xff] %v6089_v4  ;;  %vm415_vm11 = vcmp.eq.s32.totalorder %v191_v58, %v5301_v3  ;;  %1011 = vperm.xlu1 %4948, %v829_v46   ;;  %v6098_v51 = vsel %vm400_vm4, 0.0, %v9678_v10  ;;  %v6103_v15 = vsel %vm401_vm5, 0.0, %v9678_v10  ;;  %v6108_v4 = vsel %vm402_vm6, 0.0, %v9678_v10  ;;  %1006 = vperm.xlu0 %4947, %v828_v28   ;;  %v831_v46 = vld [vmem:[%s9470_s1 + $0xf8] sm:$0xff] }
  0xbc   :  { %10290 = vst [vmem:[#allocation107_spill] sm:$0xff] %v6098_v51  ;;  %10291 = vst [vmem:[#allocation108_spill] sm:$0xff] %v6103_v15  ;;  %v6113_v9 = vsel %vm403_vm7, 0.0, %v9678_v10  ;;  %vm408_vm12 = vcmp.eq.s32.totalorder %v188_v33, %v5286_v62  ;;  %vm409_vm13 = vcmp.eq.s32.totalorder %v188_v33, %v5295_v1  ;;  %vm410_vm14 = vcmp.eq.s32.totalorder %v188_v33, %v5298_v2 }
  0xbd   :  { %10292 = vst [vmem:[#allocation109_spill] sm:$0xff] %v6108_v4  ;;  %10293 = vst [vmem:[#allocation110_spill] sm:$0xff] %v6113_v9  ;;  %vm411_vm15 = vcmp.eq.s32.totalorder %v188_v33, %v5301_v3  ;;  %v830_v4 = vld [vmem:[%s9470_s1 + $0xf0] sm:$0xff]  ;;  %v6128_v57 = vsel %vm412_vm8, 0.0, %v9678_v10  ;;  %v6133_v28 = vsel %vm413_vm9, 0.0, %v9678_v10  ;;  %v6138_v9 = vsel %vm414_vm10, 0.0, %v9678_v10  ;;  %v197_v51 = vpop.permute.xlu1 %196  ;;  %v194_v0 = vpop.permute.xlu0 %193 }
  0xbe   :  { %10294 = vst [vmem:[#allocation111_spill] sm:$0xff] %v6128_v57  ;;  %10295 = vst [vmem:[#allocation112_spill] sm:$0xff] %v6133_v28  ;;  %v6143_v15 = vsel %vm415_vm11, 0.0, %v9678_v10  ;;  %vm420_vm0 = vcmp.eq.s32.totalorder %v197_v51, %v5286_v62  ;;  %vm421_vm1 = vcmp.eq.s32.totalorder %v197_v51, %v5295_v1  ;;  %vm422_vm2 = vcmp.eq.s32.totalorder %v197_v51, %v5298_v2 }
  0xbf   :  { %10296 = vst [vmem:[#allocation113_spill] sm:$0xff] %v6138_v9  ;;  %10297 = vst [vmem:[#allocation114_spill] sm:$0xff] %v6143_v15  ;;  %vm423_vm3 = vcmp.eq.s32.totalorder %v197_v51, %v5301_v3  ;;  %1021 = vperm.xlu1 %4948, %v831_v46   ;;  %v6152_v9 = vsel %vm408_vm12, 0.0, %v9678_v10  ;;  %v6157_v58 = vsel %vm409_vm13, 0.0, %v9678_v10  ;;  %v6162_v15 = vsel %vm410_vm14, 0.0, %v9678_v10  ;;  %1016 = vperm.xlu0 %4947, %v830_v4   ;;  %v833_v46 = vld [vmem:[%s9470_s1 + $0x108] sm:$0xff] }
  0xc0   :  { %10298 = vst [vmem:[#allocation115_spill] sm:$0xff] %v6152_v9  ;;  %10299 = vst [vmem:[#allocation116_spill] sm:$0xff] %v6157_v58  ;;  %v6167_v28 = vsel %vm411_vm15, 0.0, %v9678_v10  ;;  %vm416_vm4 = vcmp.eq.s32.totalorder %v194_v0, %v5286_v62  ;;  %vm417_vm5 = vcmp.eq.s32.totalorder %v194_v0, %v5295_v1  ;;  %vm418_vm6 = vcmp.eq.s32.totalorder %v194_v0, %v5298_v2 }
  0xc1   :  { %10300 = vst [vmem:[#allocation117_spill] sm:$0xff] %v6162_v15  ;;  %10301 = vst [vmem:[#allocation118_spill] sm:$0xff] %v6167_v28  ;;  %vm419_vm7 = vcmp.eq.s32.totalorder %v194_v0, %v5301_v3  ;;  %v832_v15 = vld [vmem:[%s9470_s1 + $0x100] sm:$0xff]  ;;  %v6182_v33 = vsel %vm420_vm0, 0.0, %v9678_v10  ;;  %v6187_v4 = vsel %vm421_vm1, 0.0, %v9678_v10  ;;  %v6192_v28 = vsel %vm422_vm2, 0.0, %v9678_v10  ;;  %v203_v9 = vpop.permute.xlu1 %202  ;;  %v200_v57 = vpop.permute.xlu0 %199 }
  0xc2   :  { %10302 = vst [vmem:[#allocation119_spill] sm:$0xff] %v6182_v33  ;;  %10303 = vst [vmem:[#allocation120_spill] sm:$0xff] %v6187_v4  ;;  %v6197_v58 = vsel %vm423_vm3, 0.0, %v9678_v10  ;;  %vm428_vm8 = vcmp.eq.s32.totalorder %v203_v9, %v5286_v62  ;;  %vm429_vm9 = vcmp.eq.s32.totalorder %v203_v9, %v5295_v1  ;;  %vm430_vm10 = vcmp.eq.s32.totalorder %v203_v9, %v5298_v2 }
  0xc3   :  { %10304 = vst [vmem:[#allocation121_spill] sm:$0xff] %v6192_v28  ;;  %10305 = vst [vmem:[#allocation122_spill] sm:$0xff] %v6197_v58  ;;  %vm431_vm11 = vcmp.eq.s32.totalorder %v203_v9, %v5301_v3  ;;  %1031 = vperm.xlu1 %4948, %v833_v46   ;;  %v6206_v28 = vsel %vm416_vm4, 0.0, %v9678_v10  ;;  %v6211_v51 = vsel %vm417_vm5, 0.0, %v9678_v10  ;;  %v6216_v58 = vsel %vm418_vm6, 0.0, %v9678_v10  ;;  %1026 = vperm.xlu0 %4947, %v832_v15   ;;  %v835_v46 = vld [vmem:[%s9470_s1 + $0x118] sm:$0xff] }
  0xc4   :  { %10306 = vst [vmem:[#allocation123_spill] sm:$0xff] %v6206_v28  ;;  %10307 = vst [vmem:[#allocation124_spill] sm:$0xff] %v6211_v51  ;;  %v6221_v4 = vsel %vm419_vm7, 0.0, %v9678_v10  ;;  %vm424_vm12 = vcmp.eq.s32.totalorder %v200_v57, %v5286_v62  ;;  %vm425_vm13 = vcmp.eq.s32.totalorder %v200_v57, %v5295_v1  ;;  %vm426_vm14 = vcmp.eq.s32.totalorder %v200_v57, %v5298_v2 }
  0xc5   :  { %10308 = vst [vmem:[#allocation125_spill] sm:$0xff] %v6216_v58  ;;  %10309 = vst [vmem:[#allocation126_spill] sm:$0xff] %v6221_v4  ;;  %vm427_vm15 = vcmp.eq.s32.totalorder %v200_v57, %v5301_v3  ;;  %v834_v58 = vld [vmem:[%s9470_s1 + $0x110] sm:$0xff]  ;;  %v6236_v0 = vsel %vm428_vm8, 0.0, %v9678_v10  ;;  %v6241_v15 = vsel %vm429_vm9, 0.0, %v9678_v10  ;;  %v6246_v4 = vsel %vm430_vm10, 0.0, %v9678_v10  ;;  %v209_v28 = vpop.permute.xlu1 %208  ;;  %v206_v33 = vpop.permute.xlu0 %205 }
  0xc6   :  { %10310 = vst [vmem:[#allocation127_spill] sm:$0xff] %v6236_v0  ;;  %10311 = vst [vmem:[#allocation128_spill] sm:$0xff] %v6241_v15  ;;  %v6251_v51 = vsel %vm431_vm11, 0.0, %v9678_v10  ;;  %vm436_vm0 = vcmp.eq.s32.totalorder %v209_v28, %v5286_v62  ;;  %vm437_vm1 = vcmp.eq.s32.totalorder %v209_v28, %v5295_v1  ;;  %vm438_vm2 = vcmp.eq.s32.totalorder %v209_v28, %v5298_v2 }
  0xc7   :  { %10312 = vst [vmem:[#allocation129_spill] sm:$0xff] %v6246_v4  ;;  %10313 = vst [vmem:[#allocation130_spill] sm:$0xff] %v6251_v51  ;;  %vm439_vm3 = vcmp.eq.s32.totalorder %v209_v28, %v5301_v3  ;;  %1041 = vperm.xlu1 %4948, %v835_v46   ;;  %v6260_v4 = vsel %vm424_vm12, 0.0, %v9678_v10  ;;  %v6265_v9 = vsel %vm425_vm13, 0.0, %v9678_v10  ;;  %v6270_v51 = vsel %vm426_vm14, 0.0, %v9678_v10  ;;  %1036 = vperm.xlu0 %4947, %v834_v58   ;;  %v837_v46 = vld [vmem:[%s9470_s1 + $0x128] sm:$0xff] }
  0xc8   :  { %10314 = vst [vmem:[#allocation131_spill] sm:$0xff] %v6260_v4  ;;  %10315 = vst [vmem:[#allocation132_spill] sm:$0xff] %v6265_v9  ;;  %v6275_v15 = vsel %vm427_vm15, 0.0, %v9678_v10  ;;  %vm432_vm4 = vcmp.eq.s32.totalorder %v206_v33, %v5286_v62  ;;  %vm433_vm5 = vcmp.eq.s32.totalorder %v206_v33, %v5295_v1  ;;  %vm434_vm6 = vcmp.eq.s32.totalorder %v206_v33, %v5298_v2 }
  0xc9   :  { %10316 = vst [vmem:[#allocation133_spill] sm:$0xff] %v6270_v51  ;;  %10317 = vst [vmem:[#allocation134_spill] sm:$0xff] %v6275_v15  ;;  %vm435_vm7 = vcmp.eq.s32.totalorder %v206_v33, %v5301_v3  ;;  %v836_v51 = vld [vmem:[%s9470_s1 + $0x120] sm:$0xff]  ;;  %v6290_v57 = vsel %vm436_vm0, 0.0, %v9678_v10  ;;  %v6295_v58 = vsel %vm437_vm1, 0.0, %v9678_v10  ;;  %v6300_v15 = vsel %vm438_vm2, 0.0, %v9678_v10  ;;  %v215_v4 = vpop.permute.xlu1 %214  ;;  %v212_v0 = vpop.permute.xlu0 %211 }
  0xca   :  { %10318 = vst [vmem:[#allocation135_spill] sm:$0xff] %v6290_v57  ;;  %10319 = vst [vmem:[#allocation136_spill] sm:$0xff] %v6295_v58  ;;  %v6305_v9 = vsel %vm439_vm3, 0.0, %v9678_v10  ;;  %vm444_vm8 = vcmp.eq.s32.totalorder %v215_v4, %v5286_v62  ;;  %vm445_vm9 = vcmp.eq.s32.totalorder %v215_v4, %v5295_v1  ;;  %vm446_vm10 = vcmp.eq.s32.totalorder %v215_v4, %v5298_v2 }
  0xcb   :  { %10320 = vst [vmem:[#allocation137_spill] sm:$0xff] %v6300_v15  ;;  %10321 = vst [vmem:[#allocation138_spill] sm:$0xff] %v6305_v9  ;;  %vm447_vm11 = vcmp.eq.s32.totalorder %v215_v4, %v5301_v3  ;;  %1051 = vperm.xlu1 %4948, %v837_v46   ;;  %v6314_v15 = vsel %vm432_vm4, 0.0, %v9678_v10  ;;  %v6319_v28 = vsel %vm433_vm5, 0.0, %v9678_v10  ;;  %v6324_v9 = vsel %vm434_vm6, 0.0, %v9678_v10  ;;  %1046 = vperm.xlu0 %4947, %v836_v51   ;;  %v839_v46 = vld [vmem:[%s9470_s1 + $0x138] sm:$0xff] }
  0xcc   :  { %10322 = vst [vmem:[#allocation139_spill] sm:$0xff] %v6314_v15  ;;  %10323 = vst [vmem:[#allocation140_spill] sm:$0xff] %v6319_v28  ;;  %v6329_v58 = vsel %vm435_vm7, 0.0, %v9678_v10  ;;  %vm440_vm12 = vcmp.eq.s32.totalorder %v212_v0, %v5286_v62  ;;  %vm441_vm13 = vcmp.eq.s32.totalorder %v212_v0, %v5295_v1  ;;  %vm442_vm14 = vcmp.eq.s32.totalorder %v212_v0, %v5298_v2 }
  0xcd   :  { %10324 = vst [vmem:[#allocation141_spill] sm:$0xff] %v6324_v9  ;;  %10325 = vst [vmem:[#allocation142_spill] sm:$0xff] %v6329_v58  ;;  %vm443_vm15 = vcmp.eq.s32.totalorder %v212_v0, %v5301_v3  ;;  %v838_v9 = vld [vmem:[%s9470_s1 + $0x130] sm:$0xff]  ;;  %v6344_v33 = vsel %vm444_vm8, 0.0, %v9678_v10  ;;  %v6349_v51 = vsel %vm445_vm9, 0.0, %v9678_v10  ;;  %v6354_v58 = vsel %vm446_vm10, 0.0, %v9678_v10  ;;  %v221_v15 = vpop.permute.xlu1 %220  ;;  %v218_v57 = vpop.permute.xlu0 %217 }
  0xce   :  { %10326 = vst [vmem:[#allocation143_spill] sm:$0xff] %v6344_v33  ;;  %10327 = vst [vmem:[#allocation144_spill] sm:$0xff] %v6349_v51  ;;  %v6359_v28 = vsel %vm447_vm11, 0.0, %v9678_v10  ;;  %vm452_vm0 = vcmp.eq.s32.totalorder %v221_v15, %v5286_v62  ;;  %vm453_vm1 = vcmp.eq.s32.totalorder %v221_v15, %v5295_v1  ;;  %vm454_vm2 = vcmp.eq.s32.totalorder %v221_v15, %v5298_v2 }
  0xcf   :  { %10328 = vst [vmem:[#allocation145_spill] sm:$0xff] %v6354_v58  ;;  %10329 = vst [vmem:[#allocation146_spill] sm:$0xff] %v6359_v28  ;;  %vm455_vm3 = vcmp.eq.s32.totalorder %v221_v15, %v5301_v3  ;;  %1061 = vperm.xlu1 %4948, %v839_v46   ;;  %v6368_v58 = vsel %vm440_vm12, 0.0, %v9678_v10  ;;  %v6373_v4 = vsel %vm441_vm13, 0.0, %v9678_v10  ;;  %v6378_v28 = vsel %vm442_vm14, 0.0, %v9678_v10  ;;  %1056 = vperm.xlu0 %4947, %v838_v9   ;;  %v841_v46 = vld [vmem:[%s9470_s1 + $0x148] sm:$0xff] }
  0xd0   :  { %10330 = vst [vmem:[#allocation147_spill] sm:$0xff] %v6368_v58  ;;  %10331 = vst [vmem:[#allocation148_spill] sm:$0xff] %v6373_v4  ;;  %v6383_v51 = vsel %vm443_vm15, 0.0, %v9678_v10  ;;  %vm448_vm4 = vcmp.eq.s32.totalorder %v218_v57, %v5286_v62  ;;  %vm449_vm5 = vcmp.eq.s32.totalorder %v218_v57, %v5295_v1  ;;  %vm450_vm6 = vcmp.eq.s32.totalorder %v218_v57, %v5298_v2 }
  0xd1   :  { %10332 = vst [vmem:[#allocation149_spill] sm:$0xff] %v6378_v28  ;;  %10333 = vst [vmem:[#allocation150_spill] sm:$0xff] %v6383_v51  ;;  %vm451_vm7 = vcmp.eq.s32.totalorder %v218_v57, %v5301_v3  ;;  %v840_v28 = vld [vmem:[%s9470_s1 + $0x140] sm:$0xff]  ;;  %v6398_v0 = vsel %vm452_vm0, 0.0, %v9678_v10  ;;  %v6403_v9 = vsel %vm453_vm1, 0.0, %v9678_v10  ;;  %v6408_v51 = vsel %vm454_vm2, 0.0, %v9678_v10  ;;  %v227_v58 = vpop.permute.xlu1 %226  ;;  %v224_v33 = vpop.permute.xlu0 %223 }
  0xd2   :  { %10334 = vst [vmem:[#allocation151_spill] sm:$0xff] %v6398_v0  ;;  %10335 = vst [vmem:[#allocation152_spill] sm:$0xff] %v6403_v9  ;;  %v6413_v4 = vsel %vm455_vm3, 0.0, %v9678_v10  ;;  %vm460_vm8 = vcmp.eq.s32.totalorder %v227_v58, %v5286_v62  ;;  %vm461_vm9 = vcmp.eq.s32.totalorder %v227_v58, %v5295_v1  ;;  %vm462_vm10 = vcmp.eq.s32.totalorder %v227_v58, %v5298_v2 }
  0xd3   :  { %10336 = vst [vmem:[#allocation153_spill] sm:$0xff] %v6408_v51  ;;  %10337 = vst [vmem:[#allocation154_spill] sm:$0xff] %v6413_v4  ;;  %vm463_vm11 = vcmp.eq.s32.totalorder %v227_v58, %v5301_v3  ;;  %1071 = vperm.xlu1 %4948, %v841_v46   ;;  %v6422_v51 = vsel %vm448_vm4, 0.0, %v9678_v10  ;;  %v6427_v15 = vsel %vm449_vm5, 0.0, %v9678_v10  ;;  %v6432_v4 = vsel %vm450_vm6, 0.0, %v9678_v10  ;;  %1066 = vperm.xlu0 %4947, %v840_v28   ;;  %v843_v46 = vld [vmem:[%s9470_s1 + $0x158] sm:$0xff] }
  0xd4   :  { %10338 = vst [vmem:[#allocation155_spill] sm:$0xff] %v6422_v51  ;;  %10339 = vst [vmem:[#allocation156_spill] sm:$0xff] %v6427_v15  ;;  %v6437_v9 = vsel %vm451_vm7, 0.0, %v9678_v10  ;;  %vm456_vm12 = vcmp.eq.s32.totalorder %v224_v33, %v5286_v62  ;;  %vm457_vm13 = vcmp.eq.s32.totalorder %v224_v33, %v5295_v1  ;;  %vm458_vm14 = vcmp.eq.s32.totalorder %v224_v33, %v5298_v2 }
  0xd5   :  { %10340 = vst [vmem:[#allocation157_spill] sm:$0xff] %v6432_v4  ;;  %10341 = vst [vmem:[#allocation158_spill] sm:$0xff] %v6437_v9  ;;  %vm459_vm15 = vcmp.eq.s32.totalorder %v224_v33, %v5301_v3  ;;  %v842_v4 = vld [vmem:[%s9470_s1 + $0x150] sm:$0xff]  ;;  %v6452_v57 = vsel %vm460_vm8, 0.0, %v9678_v10  ;;  %v6457_v28 = vsel %vm461_vm9, 0.0, %v9678_v10  ;;  %v6462_v9 = vsel %vm462_vm10, 0.0, %v9678_v10  ;;  %v233_v51 = vpop.permute.xlu1 %232  ;;  %v230_v0 = vpop.permute.xlu0 %229 }
  0xd6   :  { %10342 = vst [vmem:[#allocation159_spill] sm:$0xff] %v6452_v57  ;;  %10343 = vst [vmem:[#allocation160_spill] sm:$0xff] %v6457_v28  ;;  %v6467_v15 = vsel %vm463_vm11, 0.0, %v9678_v10  ;;  %vm468_vm0 = vcmp.eq.s32.totalorder %v233_v51, %v5286_v62  ;;  %vm469_vm1 = vcmp.eq.s32.totalorder %v233_v51, %v5295_v1  ;;  %vm470_vm2 = vcmp.eq.s32.totalorder %v233_v51, %v5298_v2 }
  0xd7   :  { %10344 = vst [vmem:[#allocation161_spill] sm:$0xff] %v6462_v9  ;;  %10345 = vst [vmem:[#allocation162_spill] sm:$0xff] %v6467_v15  ;;  %vm471_vm3 = vcmp.eq.s32.totalorder %v233_v51, %v5301_v3  ;;  %1081 = vperm.xlu1 %4948, %v843_v46   ;;  %v6476_v9 = vsel %vm456_vm12, 0.0, %v9678_v10  ;;  %v6481_v58 = vsel %vm457_vm13, 0.0, %v9678_v10  ;;  %v6486_v15 = vsel %vm458_vm14, 0.0, %v9678_v10  ;;  %1076 = vperm.xlu0 %4947, %v842_v4   ;;  %v845_v46 = vld [vmem:[%s9470_s1 + $0x168] sm:$0xff] }
  0xd8   :  { %10346 = vst [vmem:[#allocation163_spill] sm:$0xff] %v6476_v9  ;;  %10347 = vst [vmem:[#allocation164_spill] sm:$0xff] %v6481_v58  ;;  %v6491_v28 = vsel %vm459_vm15, 0.0, %v9678_v10  ;;  %vm464_vm4 = vcmp.eq.s32.totalorder %v230_v0, %v5286_v62  ;;  %vm465_vm5 = vcmp.eq.s32.totalorder %v230_v0, %v5295_v1  ;;  %vm466_vm6 = vcmp.eq.s32.totalorder %v230_v0, %v5298_v2 }
  0xd9   :  { %10348 = vst [vmem:[#allocation165_spill] sm:$0xff] %v6486_v15  ;;  %10349 = vst [vmem:[#allocation166_spill] sm:$0xff] %v6491_v28  ;;  %vm467_vm7 = vcmp.eq.s32.totalorder %v230_v0, %v5301_v3  ;;  %v844_v15 = vld [vmem:[%s9470_s1 + $0x160] sm:$0xff]  ;;  %v6506_v33 = vsel %vm468_vm0, 0.0, %v9678_v10  ;;  %v6511_v4 = vsel %vm469_vm1, 0.0, %v9678_v10  ;;  %v6516_v28 = vsel %vm470_vm2, 0.0, %v9678_v10  ;;  %v239_v9 = vpop.permute.xlu1 %238  ;;  %v236_v57 = vpop.permute.xlu0 %235 }
  0xda   :  { %10350 = vst [vmem:[#allocation167_spill] sm:$0xff] %v6506_v33  ;;  %10351 = vst [vmem:[#allocation168_spill] sm:$0xff] %v6511_v4  ;;  %v6521_v58 = vsel %vm471_vm3, 0.0, %v9678_v10  ;;  %vm476_vm8 = vcmp.eq.s32.totalorder %v239_v9, %v5286_v62  ;;  %vm477_vm9 = vcmp.eq.s32.totalorder %v239_v9, %v5295_v1  ;;  %vm478_vm10 = vcmp.eq.s32.totalorder %v239_v9, %v5298_v2 }
  0xdb   :  { %10352 = vst [vmem:[#allocation169_spill] sm:$0xff] %v6516_v28  ;;  %10353 = vst [vmem:[#allocation170_spill] sm:$0xff] %v6521_v58  ;;  %vm479_vm11 = vcmp.eq.s32.totalorder %v239_v9, %v5301_v3  ;;  %1091 = vperm.xlu1 %4948, %v845_v46   ;;  %v6530_v28 = vsel %vm464_vm4, 0.0, %v9678_v10  ;;  %v6535_v51 = vsel %vm465_vm5, 0.0, %v9678_v10  ;;  %v6540_v58 = vsel %vm466_vm6, 0.0, %v9678_v10  ;;  %1086 = vperm.xlu0 %4947, %v844_v15   ;;  %v847_v46 = vld [vmem:[%s9470_s1 + $0x178] sm:$0xff] }
  0xdc   :  { %10354 = vst [vmem:[#allocation171_spill] sm:$0xff] %v6530_v28  ;;  %10355 = vst [vmem:[#allocation172_spill] sm:$0xff] %v6535_v51  ;;  %v6545_v4 = vsel %vm467_vm7, 0.0, %v9678_v10  ;;  %vm472_vm12 = vcmp.eq.s32.totalorder %v236_v57, %v5286_v62  ;;  %vm473_vm13 = vcmp.eq.s32.totalorder %v236_v57, %v5295_v1  ;;  %vm474_vm14 = vcmp.eq.s32.totalorder %v236_v57, %v5298_v2 }
  0xdd   :  { %10356 = vst [vmem:[#allocation173_spill] sm:$0xff] %v6540_v58  ;;  %10357 = vst [vmem:[#allocation174_spill] sm:$0xff] %v6545_v4  ;;  %vm475_vm15 = vcmp.eq.s32.totalorder %v236_v57, %v5301_v3  ;;  %v846_v58 = vld [vmem:[%s9470_s1 + $0x170] sm:$0xff]  ;;  %v6560_v0 = vsel %vm476_vm8, 0.0, %v9678_v10  ;;  %v6565_v15 = vsel %vm477_vm9, 0.0, %v9678_v10  ;;  %v6570_v4 = vsel %vm478_vm10, 0.0, %v9678_v10  ;;  %v245_v28 = vpop.permute.xlu1 %244  ;;  %v242_v33 = vpop.permute.xlu0 %241 }
  0xde   :  { %10358 = vst [vmem:[#allocation175_spill] sm:$0xff] %v6560_v0  ;;  %10359 = vst [vmem:[#allocation176_spill] sm:$0xff] %v6565_v15  ;;  %v6575_v51 = vsel %vm479_vm11, 0.0, %v9678_v10  ;;  %vm484_vm0 = vcmp.eq.s32.totalorder %v245_v28, %v5286_v62  ;;  %vm485_vm1 = vcmp.eq.s32.totalorder %v245_v28, %v5295_v1  ;;  %vm486_vm2 = vcmp.eq.s32.totalorder %v245_v28, %v5298_v2 }
  0xdf   :  { %10360 = vst [vmem:[#allocation177_spill] sm:$0xff] %v6570_v4  ;;  %10361 = vst [vmem:[#allocation178_spill] sm:$0xff] %v6575_v51  ;;  %vm487_vm3 = vcmp.eq.s32.totalorder %v245_v28, %v5301_v3  ;;  %1101 = vperm.xlu1 %4948, %v847_v46   ;;  %v6584_v4 = vsel %vm472_vm12, 0.0, %v9678_v10  ;;  %v6589_v9 = vsel %vm473_vm13, 0.0, %v9678_v10  ;;  %v6594_v51 = vsel %vm474_vm14, 0.0, %v9678_v10  ;;  %1096 = vperm.xlu0 %4947, %v846_v58   ;;  %v849_v46 = vld [vmem:[%s9470_s1 + $0x188] sm:$0xff] }
  0xe0   :  { %10362 = vst [vmem:[#allocation179_spill] sm:$0xff] %v6584_v4  ;;  %10363 = vst [vmem:[#allocation180_spill] sm:$0xff] %v6589_v9  ;;  %v6599_v15 = vsel %vm475_vm15, 0.0, %v9678_v10  ;;  %vm480_vm4 = vcmp.eq.s32.totalorder %v242_v33, %v5286_v62  ;;  %vm481_vm5 = vcmp.eq.s32.totalorder %v242_v33, %v5295_v1  ;;  %vm482_vm6 = vcmp.eq.s32.totalorder %v242_v33, %v5298_v2 }
  0xe1   :  { %10364 = vst [vmem:[#allocation181_spill] sm:$0xff] %v6594_v51  ;;  %10365 = vst [vmem:[#allocation182_spill] sm:$0xff] %v6599_v15  ;;  %vm483_vm7 = vcmp.eq.s32.totalorder %v242_v33, %v5301_v3  ;;  %v848_v51 = vld [vmem:[%s9470_s1 + $0x180] sm:$0xff]  ;;  %v6614_v57 = vsel %vm484_vm0, 0.0, %v9678_v10  ;;  %v6619_v58 = vsel %vm485_vm1, 0.0, %v9678_v10  ;;  %v6624_v15 = vsel %vm486_vm2, 0.0, %v9678_v10  ;;  %v251_v4 = vpop.permute.xlu1 %250  ;;  %v248_v0 = vpop.permute.xlu0 %247 }
  0xe2   :  { %10366 = vst [vmem:[#allocation183_spill] sm:$0xff] %v6614_v57  ;;  %10367 = vst [vmem:[#allocation184_spill] sm:$0xff] %v6619_v58  ;;  %v6629_v9 = vsel %vm487_vm3, 0.0, %v9678_v10  ;;  %vm492_vm8 = vcmp.eq.s32.totalorder %v251_v4, %v5286_v62  ;;  %vm493_vm9 = vcmp.eq.s32.totalorder %v251_v4, %v5295_v1  ;;  %vm494_vm10 = vcmp.eq.s32.totalorder %v251_v4, %v5298_v2 }
  0xe3   :  { %10368 = vst [vmem:[#allocation185_spill] sm:$0xff] %v6624_v15  ;;  %10369 = vst [vmem:[#allocation186_spill] sm:$0xff] %v6629_v9  ;;  %vm495_vm11 = vcmp.eq.s32.totalorder %v251_v4, %v5301_v3  ;;  %1111 = vperm.xlu1 %4948, %v849_v46   ;;  %v6638_v15 = vsel %vm480_vm4, 0.0, %v9678_v10  ;;  %v6643_v28 = vsel %vm481_vm5, 0.0, %v9678_v10  ;;  %v6648_v9 = vsel %vm482_vm6, 0.0, %v9678_v10  ;;  %1106 = vperm.xlu0 %4947, %v848_v51   ;;  %v851_v46 = vld [vmem:[%s9470_s1 + $0x198] sm:$0xff] }
  0xe4   :  { %10370 = vst [vmem:[#allocation187_spill] sm:$0xff] %v6638_v15  ;;  %10371 = vst [vmem:[#allocation188_spill] sm:$0xff] %v6643_v28  ;;  %v6653_v58 = vsel %vm483_vm7, 0.0, %v9678_v10  ;;  %vm488_vm12 = vcmp.eq.s32.totalorder %v248_v0, %v5286_v62  ;;  %vm489_vm13 = vcmp.eq.s32.totalorder %v248_v0, %v5295_v1  ;;  %vm490_vm14 = vcmp.eq.s32.totalorder %v248_v0, %v5298_v2 }
  0xe5   :  { %10372 = vst [vmem:[#allocation189_spill] sm:$0xff] %v6648_v9  ;;  %10373 = vst [vmem:[#allocation190_spill] sm:$0xff] %v6653_v58  ;;  %vm491_vm15 = vcmp.eq.s32.totalorder %v248_v0, %v5301_v3  ;;  %v850_v9 = vld [vmem:[%s9470_s1 + $0x190] sm:$0xff]  ;;  %v6668_v33 = vsel %vm492_vm8, 0.0, %v9678_v10  ;;  %v6673_v51 = vsel %vm493_vm9, 0.0, %v9678_v10  ;;  %v6678_v58 = vsel %vm494_vm10, 0.0, %v9678_v10  ;;  %v257_v15 = vpop.permute.xlu1 %256  ;;  %v254_v57 = vpop.permute.xlu0 %253 }
  0xe6   :  { %10374 = vst [vmem:[#allocation191_spill] sm:$0xff] %v6668_v33  ;;  %10375 = vst [vmem:[#allocation192_spill] sm:$0xff] %v6673_v51  ;;  %v6683_v28 = vsel %vm495_vm11, 0.0, %v9678_v10  ;;  %vm500_vm0 = vcmp.eq.s32.totalorder %v257_v15, %v5286_v62  ;;  %vm501_vm1 = vcmp.eq.s32.totalorder %v257_v15, %v5295_v1  ;;  %vm502_vm2 = vcmp.eq.s32.totalorder %v257_v15, %v5298_v2 }
  0xe7   :  { %10376 = vst [vmem:[#allocation193_spill] sm:$0xff] %v6678_v58  ;;  %10377 = vst [vmem:[#allocation194_spill] sm:$0xff] %v6683_v28  ;;  %vm503_vm3 = vcmp.eq.s32.totalorder %v257_v15, %v5301_v3  ;;  %1121 = vperm.xlu1 %4948, %v851_v46   ;;  %v6692_v58 = vsel %vm488_vm12, 0.0, %v9678_v10  ;;  %v6697_v4 = vsel %vm489_vm13, 0.0, %v9678_v10  ;;  %v6702_v28 = vsel %vm490_vm14, 0.0, %v9678_v10  ;;  %1116 = vperm.xlu0 %4947, %v850_v9   ;;  %v853_v46 = vld [vmem:[%s9470_s1 + $0x1a8] sm:$0xff] }
  0xe8   :  { %10378 = vst [vmem:[#allocation195_spill] sm:$0xff] %v6692_v58  ;;  %10379 = vst [vmem:[#allocation196_spill] sm:$0xff] %v6697_v4  ;;  %v6707_v51 = vsel %vm491_vm15, 0.0, %v9678_v10  ;;  %vm496_vm4 = vcmp.eq.s32.totalorder %v254_v57, %v5286_v62  ;;  %vm497_vm5 = vcmp.eq.s32.totalorder %v254_v57, %v5295_v1  ;;  %vm498_vm6 = vcmp.eq.s32.totalorder %v254_v57, %v5298_v2 }
  0xe9   :  { %10380 = vst [vmem:[#allocation197_spill] sm:$0xff] %v6702_v28  ;;  %10381 = vst [vmem:[#allocation198_spill] sm:$0xff] %v6707_v51  ;;  %vm499_vm7 = vcmp.eq.s32.totalorder %v254_v57, %v5301_v3  ;;  %v852_v28 = vld [vmem:[%s9470_s1 + $0x1a0] sm:$0xff]  ;;  %v6722_v0 = vsel %vm500_vm0, 0.0, %v9678_v10  ;;  %v6727_v9 = vsel %vm501_vm1, 0.0, %v9678_v10  ;;  %v6732_v51 = vsel %vm502_vm2, 0.0, %v9678_v10  ;;  %v263_v58 = vpop.permute.xlu1 %262  ;;  %v260_v33 = vpop.permute.xlu0 %259 }
  0xea   :  { %10382 = vst [vmem:[#allocation199_spill] sm:$0xff] %v6722_v0  ;;  %10383 = vst [vmem:[#allocation200_spill] sm:$0xff] %v6727_v9  ;;  %v6737_v4 = vsel %vm503_vm3, 0.0, %v9678_v10  ;;  %vm508_vm8 = vcmp.eq.s32.totalorder %v263_v58, %v5286_v62  ;;  %vm509_vm9 = vcmp.eq.s32.totalorder %v263_v58, %v5295_v1  ;;  %vm510_vm10 = vcmp.eq.s32.totalorder %v263_v58, %v5298_v2 }
  0xeb   :  { %10384 = vst [vmem:[#allocation201_spill] sm:$0xff] %v6732_v51  ;;  %10385 = vst [vmem:[#allocation202_spill] sm:$0xff] %v6737_v4  ;;  %vm511_vm11 = vcmp.eq.s32.totalorder %v263_v58, %v5301_v3  ;;  %1131 = vperm.xlu1 %4948, %v853_v46   ;;  %v6746_v51 = vsel %vm496_vm4, 0.0, %v9678_v10  ;;  %v6751_v15 = vsel %vm497_vm5, 0.0, %v9678_v10  ;;  %v6756_v4 = vsel %vm498_vm6, 0.0, %v9678_v10  ;;  %1126 = vperm.xlu0 %4947, %v852_v28   ;;  %v855_v46 = vld [vmem:[%s9470_s1 + $0x1b8] sm:$0xff] }
  0xec   :  { %10386 = vst [vmem:[#allocation203_spill] sm:$0xff] %v6746_v51  ;;  %10387 = vst [vmem:[#allocation204_spill] sm:$0xff] %v6751_v15  ;;  %v6761_v9 = vsel %vm499_vm7, 0.0, %v9678_v10  ;;  %vm504_vm12 = vcmp.eq.s32.totalorder %v260_v33, %v5286_v62  ;;  %vm505_vm13 = vcmp.eq.s32.totalorder %v260_v33, %v5295_v1  ;;  %vm506_vm14 = vcmp.eq.s32.totalorder %v260_v33, %v5298_v2 }
  0xed   :  { %10388 = vst [vmem:[#allocation205_spill] sm:$0xff] %v6756_v4  ;;  %10389 = vst [vmem:[#allocation206_spill] sm:$0xff] %v6761_v9  ;;  %vm507_vm15 = vcmp.eq.s32.totalorder %v260_v33, %v5301_v3  ;;  %v854_v4 = vld [vmem:[%s9470_s1 + $0x1b0] sm:$0xff]  ;;  %v6776_v57 = vsel %vm508_vm8, 0.0, %v9678_v10  ;;  %v6781_v28 = vsel %vm509_vm9, 0.0, %v9678_v10  ;;  %v6786_v9 = vsel %vm510_vm10, 0.0, %v9678_v10  ;;  %v269_v51 = vpop.permute.xlu1 %268  ;;  %v266_v0 = vpop.permute.xlu0 %265 }
  0xee   :  { %10390 = vst [vmem:[#allocation207_spill] sm:$0xff] %v6776_v57  ;;  %10391 = vst [vmem:[#allocation208_spill] sm:$0xff] %v6781_v28  ;;  %v6791_v15 = vsel %vm511_vm11, 0.0, %v9678_v10  ;;  %vm516_vm0 = vcmp.eq.s32.totalorder %v269_v51, %v5286_v62  ;;  %vm517_vm1 = vcmp.eq.s32.totalorder %v269_v51, %v5295_v1  ;;  %vm518_vm2 = vcmp.eq.s32.totalorder %v269_v51, %v5298_v2 }
  0xef   :  { %10392 = vst [vmem:[#allocation209_spill] sm:$0xff] %v6786_v9  ;;  %10393 = vst [vmem:[#allocation210_spill] sm:$0xff] %v6791_v15  ;;  %vm519_vm3 = vcmp.eq.s32.totalorder %v269_v51, %v5301_v3  ;;  %1141 = vperm.xlu1 %4948, %v855_v46   ;;  %v6800_v9 = vsel %vm504_vm12, 0.0, %v9678_v10  ;;  %v6805_v58 = vsel %vm505_vm13, 0.0, %v9678_v10  ;;  %v6810_v15 = vsel %vm506_vm14, 0.0, %v9678_v10  ;;  %1136 = vperm.xlu0 %4947, %v854_v4   ;;  %v857_v46 = vld [vmem:[%s9470_s1 + $0x1c8] sm:$0xff] }
  0xf0   :  { %10394 = vst [vmem:[#allocation211_spill] sm:$0xff] %v6800_v9  ;;  %10395 = vst [vmem:[#allocation212_spill] sm:$0xff] %v6805_v58  ;;  %v6815_v28 = vsel %vm507_vm15, 0.0, %v9678_v10  ;;  %vm512_vm4 = vcmp.eq.s32.totalorder %v266_v0, %v5286_v62  ;;  %vm513_vm5 = vcmp.eq.s32.totalorder %v266_v0, %v5295_v1  ;;  %vm514_vm6 = vcmp.eq.s32.totalorder %v266_v0, %v5298_v2 }
  0xf1   :  { %10396 = vst [vmem:[#allocation213_spill] sm:$0xff] %v6810_v15  ;;  %10397 = vst [vmem:[#allocation214_spill] sm:$0xff] %v6815_v28  ;;  %vm515_vm7 = vcmp.eq.s32.totalorder %v266_v0, %v5301_v3  ;;  %v856_v15 = vld [vmem:[%s9470_s1 + $0x1c0] sm:$0xff]  ;;  %v6830_v33 = vsel %vm516_vm0, 0.0, %v9678_v10  ;;  %v6835_v4 = vsel %vm517_vm1, 0.0, %v9678_v10  ;;  %v6840_v28 = vsel %vm518_vm2, 0.0, %v9678_v10  ;;  %v275_v9 = vpop.permute.xlu1 %274  ;;  %v272_v57 = vpop.permute.xlu0 %271 }
  0xf2   :  { %10398 = vst [vmem:[#allocation215_spill] sm:$0xff] %v6830_v33  ;;  %10399 = vst [vmem:[#allocation216_spill] sm:$0xff] %v6835_v4  ;;  %v6845_v58 = vsel %vm519_vm3, 0.0, %v9678_v10  ;;  %vm524_vm8 = vcmp.eq.s32.totalorder %v275_v9, %v5286_v62  ;;  %vm525_vm9 = vcmp.eq.s32.totalorder %v275_v9, %v5295_v1  ;;  %vm526_vm10 = vcmp.eq.s32.totalorder %v275_v9, %v5298_v2 }
  0xf3   :  { %10400 = vst [vmem:[#allocation217_spill] sm:$0xff] %v6840_v28  ;;  %10401 = vst [vmem:[#allocation218_spill] sm:$0xff] %v6845_v58  ;;  %vm527_vm11 = vcmp.eq.s32.totalorder %v275_v9, %v5301_v3  ;;  %1151 = vperm.xlu1 %4948, %v857_v46   ;;  %v6854_v28 = vsel %vm512_vm4, 0.0, %v9678_v10  ;;  %v6859_v51 = vsel %vm513_vm5, 0.0, %v9678_v10  ;;  %v6864_v58 = vsel %vm514_vm6, 0.0, %v9678_v10  ;;  %1146 = vperm.xlu0 %4947, %v856_v15   ;;  %v859_v46 = vld [vmem:[%s9470_s1 + $0x1d8] sm:$0xff] }
  0xf4   :  { %10402 = vst [vmem:[#allocation219_spill] sm:$0xff] %v6854_v28  ;;  %10403 = vst [vmem:[#allocation220_spill] sm:$0xff] %v6859_v51  ;;  %v6869_v4 = vsel %vm515_vm7, 0.0, %v9678_v10  ;;  %vm520_vm12 = vcmp.eq.s32.totalorder %v272_v57, %v5286_v62  ;;  %vm521_vm13 = vcmp.eq.s32.totalorder %v272_v57, %v5295_v1  ;;  %vm522_vm14 = vcmp.eq.s32.totalorder %v272_v57, %v5298_v2 }
  0xf5   :  { %10404 = vst [vmem:[#allocation221_spill] sm:$0xff] %v6864_v58  ;;  %10405 = vst [vmem:[#allocation222_spill] sm:$0xff] %v6869_v4  ;;  %vm523_vm15 = vcmp.eq.s32.totalorder %v272_v57, %v5301_v3  ;;  %v858_v58 = vld [vmem:[%s9470_s1 + $0x1d0] sm:$0xff]  ;;  %v6884_v0 = vsel %vm524_vm8, 0.0, %v9678_v10  ;;  %v6889_v15 = vsel %vm525_vm9, 0.0, %v9678_v10  ;;  %v6894_v4 = vsel %vm526_vm10, 0.0, %v9678_v10  ;;  %v281_v28 = vpop.permute.xlu1 %280  ;;  %v278_v33 = vpop.permute.xlu0 %277 }
  0xf6   :  { %10406 = vst [vmem:[#allocation223_spill] sm:$0xff] %v6884_v0  ;;  %10407 = vst [vmem:[#allocation224_spill] sm:$0xff] %v6889_v15  ;;  %v6899_v51 = vsel %vm527_vm11, 0.0, %v9678_v10  ;;  %vm532_vm0 = vcmp.eq.s32.totalorder %v281_v28, %v5286_v62  ;;  %vm533_vm1 = vcmp.eq.s32.totalorder %v281_v28, %v5295_v1  ;;  %vm534_vm2 = vcmp.eq.s32.totalorder %v281_v28, %v5298_v2 }
  0xf7   :  { %10408 = vst [vmem:[#allocation225_spill] sm:$0xff] %v6894_v4  ;;  %10409 = vst [vmem:[#allocation226_spill] sm:$0xff] %v6899_v51  ;;  %vm535_vm3 = vcmp.eq.s32.totalorder %v281_v28, %v5301_v3  ;;  %1161 = vperm.xlu1 %4948, %v859_v46   ;;  %v6908_v4 = vsel %vm520_vm12, 0.0, %v9678_v10  ;;  %v6913_v9 = vsel %vm521_vm13, 0.0, %v9678_v10  ;;  %v6918_v51 = vsel %vm522_vm14, 0.0, %v9678_v10  ;;  %1156 = vperm.xlu0 %4947, %v858_v58   ;;  %v861_v46 = vld [vmem:[%s9470_s1 + $0x1e8] sm:$0xff] }
  0xf8   :  { %10410 = vst [vmem:[#allocation227_spill] sm:$0xff] %v6908_v4  ;;  %10411 = vst [vmem:[#allocation228_spill] sm:$0xff] %v6913_v9  ;;  %v6923_v15 = vsel %vm523_vm15, 0.0, %v9678_v10  ;;  %vm528_vm4 = vcmp.eq.s32.totalorder %v278_v33, %v5286_v62  ;;  %vm529_vm5 = vcmp.eq.s32.totalorder %v278_v33, %v5295_v1  ;;  %vm530_vm6 = vcmp.eq.s32.totalorder %v278_v33, %v5298_v2 }
  0xf9   :  { %10412 = vst [vmem:[#allocation229_spill] sm:$0xff] %v6918_v51  ;;  %10413 = vst [vmem:[#allocation230_spill] sm:$0xff] %v6923_v15  ;;  %vm531_vm7 = vcmp.eq.s32.totalorder %v278_v33, %v5301_v3  ;;  %v860_v51 = vld [vmem:[%s9470_s1 + $0x1e0] sm:$0xff]  ;;  %v6938_v57 = vsel %vm532_vm0, 0.0, %v9678_v10  ;;  %v6943_v58 = vsel %vm533_vm1, 0.0, %v9678_v10  ;;  %v6948_v15 = vsel %vm534_vm2, 0.0, %v9678_v10  ;;  %v287_v4 = vpop.permute.xlu1 %286 }
  0xfa   :  { %10414 = vst [vmem:[#allocation231_spill] sm:$0xff] %v6938_v57  ;;  %10415 = vst [vmem:[#allocation232_spill] sm:$0xff] %v6943_v58  ;;  %v6953_v9 = vsel %vm535_vm3, 0.0, %v9678_v10  ;;  %vm540_vm8 = vcmp.eq.s32.totalorder %v287_v4, %v5286_v62  ;;  %vm541_vm9 = vcmp.eq.s32.totalorder %v287_v4, %v5295_v1  ;;  %vm542_vm10 = vcmp.eq.s32.totalorder %v287_v4, %v5298_v2  ;;  %v6959_v58 = vpop.permute.xlu0 %283  ;;  %v862_v33 = vld [vmem:[%s9470_s1 + $0x1f0] sm:$0xff] }
  0xfb   :  { %10416 = vst [vmem:[#allocation233_spill] sm:$0xff] %v6948_v15  ;;  %10417 = vst [vmem:[#allocation234_spill] sm:$0xff] %v6953_v9  ;;  %vm543_vm11 = vcmp.eq.s32.totalorder %v287_v4, %v5301_v3  ;;  %1171 = vperm.xlu1 %4948, %v861_v46   ;;  %v6964_v15 = vsel %vm528_vm4, 0.0, %v9678_v10  ;;  %v6969_v28 = vsel %vm529_vm5, 0.0, %v9678_v10  ;;  %v6974_v9 = vsel %vm530_vm6, 0.0, %v9678_v10  ;;  %1166 = vperm.xlu0 %4947, %v860_v51   ;;  %v863_v46 = vld [vmem:[%s9470_s1 + $0x1f8] sm:$0xff] }
  0xfc   :  { %10418 = vst [vmem:[#allocation235_spill] sm:$0xff] %v6964_v15  ;;  %10419 = vst [vmem:[#allocation236_spill] sm:$0xff] %v6969_v28  ;;  %v6979_v4 = vsel %vm531_vm7, 0.0, %v9678_v10  ;;  %v6985_v15 = vsel %vm540_vm8, 0.0, %v9678_v10  ;;  %v6988_v28 = vsel %vm541_vm9, 0.0, %v9678_v10  ;;  %vm536_vm12 = vcmp.eq.s32.totalorder %v6959_v58, %v5286_v62 }
  0xfd   :  { %10420 = vst [vmem:[#allocation237_spill] sm:$0xff] %v6974_v9  ;;  %10421 = vst [vmem:[#allocation238_spill] sm:$0xff] %v6979_v4  ;;  %vm537_vm13 = vcmp.eq.s32.totalorder %v6959_v58, %v5295_v1  ;;  %v6998_v51 = vsel %vm542_vm10, 0.0, %v9678_v10  ;;  %v7001_v4 = vsel %vm543_vm11, 0.0, %v9678_v10  ;;  %v872_v62 = vpop.permute.xlu1 %871  ;;  %vm538_vm14 = vcmp.eq.s32.totalorder %v6959_v58, %v5298_v2 }
  0xfe   :  { %10422 = vst [vmem:[#allocation239_spill] sm:$0xff] %v6985_v15  ;;  %10423 = vst [vmem:[#allocation240_spill] sm:$0xff] %v6988_v28  ;;  %v7004_v15 = vsel %vm536_vm12, 0.0, %v9678_v10  ;;  %v7007_v28 = vsel %vm537_vm13, 0.0, %v9678_v10  ;;  %v1188_v9 = vsub.f32 %v872_v62, %v5396_v29  ;;  %v1189_v1 = vsub.f32 %v872_v62, %v5401_v30  ;;  %v867_v52 = vpop.permute.xlu0 %866 }
  0xff   :  { %10424 = vst [vmem:[#allocation241_spill] sm:$0xff] %v6998_v51  ;;  %10425 = vst [vmem:[#allocation242_spill] sm:$0xff] %v7001_v4  ;;  %v1190_v57 = vsub.f32 %v872_v62, %v5406_v31  ;;  %v1191_v0 = vsub.f32 %v872_v62, %v5411_v32  ;;  %1181 = vperm.xlu1 %4948, %v863_v46   ;;  %v1720_v51 = vadd.f32 %v872_v62, %v5396_v29  ;;  %vm4890_vm0 = vcmask 1040384  }
 0x100   :  { %10426 = vst [vmem:[#allocation243_spill] sm:$0xff] %v7004_v15  ;;  %10427 = vst [vmem:[#allocation244_spill] sm:$0xff] %v7007_v28  ;;  %v1721_v4 = vadd.f32 %v872_v62, %v5401_v30  ;;  %v1722_v15 = vadd.f32 %v872_v62, %v5406_v31  ;;  %v1723_v10 = vadd.f32 %v872_v62, %v5411_v32  ;;  %1176 = vperm.xlu0 %4947, %v862_v33   ;;  %vm4895_vm1 = vcmask 1041408  }
 0x101   :  { %v1184_v28 = vsub.f32 %v867_v52, %v5342_v17  ;;  %v1185_v45 = vsub.f32 %v867_v52, %v5347_v18  ;;  %v1186_v40 = vsub.f32 %v867_v52, %v5352_v19  ;;  %v1187_v46 = vsub.f32 %v867_v52, %v5357_v20  ;;  %v882_v32 = vpop.permute.xlu1 %881 }
 0x102   :  { %vm539_vm15 = vcmp.eq.s32.totalorder %v6959_v58, %v5301_v3  ;;  %v1716_v30 = vadd.f32 %v867_v52, %v5342_v17  ;;  %v1717_v31 = vadd.f32 %v867_v52, %v5347_v18  ;;  %v1718_v33 = vadd.f32 %v867_v52, %v5352_v19  ;;  %v877_v7 = vpop.permute.xlu0 %876 }
 0x103   :  { %v1719_v62 = vadd.f32 %v867_v52, %v5357_v20  ;;  %v1440_v29 = vmax.f32 %v1184_v28, %v1188_v9  ;;  %v1509_v39 = vmax.f32 %v1185_v45, %v1189_v1  ;;  %v1578_v34 = vmax.f32 %v1186_v40, %v1190_v57 }
 0x104   :  { %v1647_v27 = vmax.f32 %v1187_v46, %v1191_v0  ;;  %v1972_v22 = vmin.f32 %v1716_v30, %v1720_v51  ;;  %v2041_v21 = vmin.f32 %v1717_v31, %v1721_v4  ;;  %v2110_v16 = vmin.f32 %v1718_v33, %v1722_v15 }
 0x105   :  { %v2179_v8 = vmin.f32 %v1719_v62, %v1723_v10  ;;  %v1196_v6 = vsub.f32 %v882_v32, %v5372_v23  ;;  %v1197_v17 = vsub.f32 %v882_v32, %v5377_v24  ;;  %v1198_v18 = vsub.f32 %v882_v32, %v5382_v25  ;;  %v7053_v51 = vpop.permute.xlu1 %891 }
 0x106   :  { %v1199_v19 = vsub.f32 %v882_v32, %v5387_v26  ;;  %v7034_v52 = vadd.f32 %v882_v32, %v5372_v23  ;;  %v7037_v45 = vadd.f32 %v882_v32, %v5377_v24  ;;  %v7040_v30 = vadd.f32 %v882_v32, %v5382_v25 }
 0x107   :  { %v7043_v10 = vadd.f32 %v882_v32, %v5387_v26  ;;  %v1192_v31 = vsub.f32 %v877_v7, %v5324_v11  ;;  %v1193_v40 = vsub.f32 %v877_v7, %v5327_v12  ;;  %v1194_v0 = vsub.f32 %v877_v7, %v5330_v13 }
 0x108   :  { %v1195_v15 = vsub.f32 %v877_v7, %v5333_v14  ;;  %v1724_v9 = vadd.f32 %v877_v7, %v5324_v11  ;;  %v1725_v57 = vadd.f32 %v877_v7, %v5327_v12  ;;  %v1726_v28 = vadd.f32 %v877_v7, %v5330_v13 }
 0x109   :  { %v1727_v4 = vadd.f32 %v877_v7, %v5333_v14  ;;  %v1441_v32 = vmax.f32 %v1440_v29, %v1192_v31  ;;  %v1510_v1 = vmax.f32 %v1509_v39, %v1193_v40  ;;  %v1579_v46 = vmax.f32 %v1578_v34, %v1194_v0  ;;  %v4953_v34 = vld [vmem:[%s9470_s1 + $0x8] sm:$0xff]  ;;  %v4954_v39 = vld [vmem:[%s9470_s1] sm:$0xff] }
 0x10a   :  { %v1648_v33 = vmax.f32 %v1647_v27, %v1195_v15  ;;  %v1973_v62 = vmin.f32 %v1972_v22, %v1724_v9  ;;  %v2042_v26 = vmin.f32 %v2041_v21, %v1725_v57  ;;  %v2111_v25 = vmin.f32 %v2110_v16, %v1726_v28  ;;  %v887_v22 = vpop.permute.xlu0 %886 }
 0x10b   :  { %v2180_v24 = vmin.f32 %v2179_v8, %v1727_v4  ;;  %v1204_v23 = vsub.f32 %v7053_v51, %v5426_v35  ;;  %v1205_v12 = vsub.f32 %v7053_v51, %v5431_v36  ;;  %v1206_v13 = vsub.f32 %v7053_v51, %v5436_v37 }
 0x10c   :  { %v10428_v7 = vmov inf   ;;  %v5083_v27 = vmov 1   ;;  %v1207_v8 = vsub.f32 %v7053_v51, %v5441_v38  ;;  %v7071_v16 = vadd.f32 %v7053_v51, %v5426_v35 }
 0x10d   :  { %v7065_v29 = vsel %vm538_vm14, 0.0, %v10428_v7  ;;  %4950 = vset.pattern.permute.xlu1 %v5083_v27  ;;  %4949 = vset.pattern.permute.xlu0 %v5083_v27  ;;  %v7075_v21 = vadd.f32 %v7053_v51, %v5431_v36  ;;  %v7081_v2 = vsel %vm539_vm15, 0.0, %v10428_v7  ;;  %v7091_v31 = vadd.f32 %v7053_v51, %v5436_v37  ;;  %v10434_v7 = vld [vmem:[#allocation31_spill] sm:$0xff] }
 0x10e   :  { %10429 = vst [vmem:[#allocation245_spill] sm:$0xff] %v7065_v29  ;;  %10430 = vst [vmem:[#allocation246_spill] sm:$0xff] %v7081_v2  ;;  %2253 = vperm.xlu1 %4950, %v4953_v34   ;;  %2249 = vperm.xlu0 %4949, %v4954_v39   ;;  %v7095_v40 = vadd.f32 %v7053_v51, %v5441_v38  ;;  %v1442_v3 = vmax.f32 %v1441_v32, %v1196_v6  ;;  %v4956_v32 = vld [vmem:[%s9470_s1 + $0x18] sm:$0xff] }
 0x10f   :  { %v1511_v58 = vmax.f32 %v1510_v1, %v1197_v17  ;;  %v1580_v0 = vmax.f32 %v1579_v46, %v1198_v18  ;;  %v1649_v15 = vmax.f32 %v1648_v33, %v1199_v19  ;;  %v1974_v9 = vmin.f32 %v1973_v62, %v7034_v52  ;;  %v7106_v18 = vpop.permute.xlu1 %901 }
 0x110   :  { %v2043_v57 = vmin.f32 %v2042_v26, %v7037_v45  ;;  %v2112_v28 = vmin.f32 %v2111_v25, %v7040_v30  ;;  %v2181_v4 = vmin.f32 %v2180_v24, %v7043_v10  ;;  %v1200_v27 = vsub.f32 %v887_v22, %v5450_v41  ;;  %v4955_v24 = vld [vmem:[%s9470_s1 + $0x10] sm:$0xff] }
 0x111   :  { %v1201_v34 = vsub.f32 %v887_v22, %v5455_v42  ;;  %v1202_v39 = vsub.f32 %v887_v22, %v5460_v43  ;;  %v1203_v51 = vsub.f32 %v887_v22, %v5465_v44  ;;  %v1732_v17 = vadd.f32 %v887_v22, %v5450_v41 }
 0x112   :  { %v1443_v19 = vmax.f32 %v1442_v3, %v1200_v27  ;;  %v1733_v6 = vadd.f32 %v887_v22, %v5455_v42  ;;  %v1734_v26 = vadd.f32 %v887_v22, %v5460_v43  ;;  %v1735_v25 = vadd.f32 %v887_v22, %v5465_v44  ;;  %2257 = vperm.xlu1 %4950, %v4955_v24   ;;  %v4957_v27 = vld [vmem:[%s9470_s1 + $0x20] sm:$0xff] }
 0x113   :  { %v1512_v52 = vmax.f32 %v1511_v58, %v1201_v34  ;;  %v1581_v45 = vmax.f32 %v1580_v0, %v1202_v39  ;;  %v1650_v30 = vmax.f32 %v1649_v15, %v1203_v51  ;;  %v1975_v10 = vmin.f32 %v1974_v9, %v1732_v17  ;;  %2261 = vperm.xlu0 %4949, %v4956_v32   ;;  %v897_v15 = vpop.permute.xlu0 %896 }
 0x114   :  { %v2044_v1 = vmin.f32 %v2043_v57, %v1733_v6  ;;  %v2113_v46 = vmin.f32 %v2112_v28, %v1734_v26  ;;  %v2182_v33 = vmin.f32 %v2181_v4, %v1735_v25  ;;  %v1212_v62 = vsub.f32 %v7106_v18, %v5480_v47  ;;  %v4958_v6 = vld [vmem:[%s9470_s1 + $0x28] sm:$0xff] }
 0x115   :  { %v1213_v22 = vsub.f32 %v7106_v18, %v5485_v48  ;;  %v1214_v3 = vsub.f32 %v7106_v18, %v5490_v49  ;;  %v1215_v58 = vsub.f32 %v7106_v18, %v5495_v50  ;;  %v7127_v0 = vadd.f32 %v7106_v18, %v5480_v47 }
 0x116   :  { %v7131_v9 = vadd.f32 %v7106_v18, %v5485_v48  ;;  %v7135_v57 = vadd.f32 %v7106_v18, %v5490_v49  ;;  %v7139_v28 = vadd.f32 %v7106_v18, %v5495_v50  ;;  %v1444_v4 = vmax.f32 %v1443_v19, %v1204_v23  ;;  %2265 = vperm.xlu1 %4950, %v4957_v27   ;;  %v10553_v50 = vld [vmem:[#allocation150_spill] sm:$0xff] }
 0x117   :  { %v1513_v34 = vmax.f32 %v1512_v52, %v1205_v12  ;;  %v1582_v39 = vmax.f32 %v1581_v45, %v1206_v13  ;;  %v1651_v51 = vmax.f32 %v1650_v30, %v1207_v8  ;;  %v1976_v17 = vmin.f32 %v1975_v10, %v7071_v16  ;;  %2269 = vperm.xlu0 %4949, %v4958_v6   ;;  %v7156_v16 = vpop.permute.xlu1 %911 }
 0x118   :  { %v2045_v26 = vmin.f32 %v2044_v1, %v7075_v21  ;;  %v2114_v18 = vmin.f32 %v2113_v46, %v7091_v31  ;;  %v2183_v23 = vmin.f32 %v2182_v33, %v7095_v40  ;;  %v1208_v19 = vsub.f32 %v897_v15, %v5504_v53  ;;  %v4959_v40 = vld [vmem:[%s9470_s1 + $0x30] sm:$0xff]  ;;  %v4960_v1 = vld [vmem:[%s9470_s1 + $0x38] sm:$0xff] }
 0x119   :  { %v1209_v25 = vsub.f32 %v897_v15, %v5509_v54  ;;  %v1210_v12 = vsub.f32 %v897_v15, %v5514_v55  ;;  %v1211_v13 = vsub.f32 %v897_v15, %v5519_v56  ;;  %v1740_v8 = vadd.f32 %v897_v15, %v5504_v53 }
 0x11a   :  { %v1445_v24 = vmax.f32 %v1444_v4, %v1208_v19  ;;  %v1741_v52 = vadd.f32 %v897_v15, %v5509_v54  ;;  %v1742_v21 = vadd.f32 %v897_v15, %v5514_v55  ;;  %v1743_v31 = vadd.f32 %v897_v15, %v5519_v56  ;;  %2273 = vperm.xlu1 %4950, %v4959_v40   ;;  %v4961_v19 = vld [vmem:[%s9470_s1 + $0x40] sm:$0xff] }
 0x11b   :  { %v1514_v45 = vmax.f32 %v1513_v34, %v1209_v25  ;;  %v1583_v30 = vmax.f32 %v1582_v39, %v1210_v12  ;;  %v1652_v10 = vmax.f32 %v1651_v51, %v1211_v13  ;;  %v1977_v32 = vmin.f32 %v1976_v17, %v1740_v8  ;;  %2277 = vperm.xlu0 %4949, %v4960_v1   ;;  %v907_v17 = vpop.permute.xlu0 %906 }
 0x11c   :  { %v2046_v46 = vmin.f32 %v2045_v26, %v1741_v52  ;;  %v2115_v33 = vmin.f32 %v2114_v18, %v1742_v21  ;;  %v2184_v4 = vmin.f32 %v2183_v23, %v1743_v31  ;;  %v1220_v15 = vsub.f32 %v7156_v16, %v5534_v59  ;;  %v4962_v52 = vld [vmem:[%s9470_s1 + $0x48] sm:$0xff]  ;;  %v10431_v31 = vld [vmem:[#allocation28_spill] sm:$0xff] }
 0x11d   :  { %v1221_v27 = vsub.f32 %v7156_v16, %v5539_v60  ;;  %v1222_v34 = vsub.f32 %v7156_v16, %v5544_v61  ;;  %v1223_v39 = vsub.f32 %v7156_v16, %v5549_v63  ;;  %v7177_v51 = vadd.f32 %v7156_v16, %v5534_v59  ;;  %v10543_v59 = vld [vmem:[#allocation140_spill] sm:$0xff] }
 0x11e   :  { %v7181_v6 = vadd.f32 %v7156_v16, %v5539_v60  ;;  %v7185_v26 = vadd.f32 %v7156_v16, %v5544_v61  ;;  %v7189_v18 = vadd.f32 %v7156_v16, %v5549_v63  ;;  %v1446_v23 = vmax.f32 %v1445_v24, %v1212_v62  ;;  %2281 = vperm.xlu1 %4950, %v4961_v19   ;;  %v4964_v19 = vld [vmem:[%s9470_s1 + $0x58] sm:$0xff]  ;;  %v10435_v63 = vld [vmem:[#allocation32_spill] sm:$0xff] }
 0x11f   :  { %v1515_v25 = vmax.f32 %v1514_v45, %v1213_v22  ;;  %v1584_v12 = vmax.f32 %v1583_v30, %v1214_v3  ;;  %v1653_v13 = vmax.f32 %v1652_v10, %v1215_v58  ;;  %v1978_v8 = vmin.f32 %v1977_v32, %v7127_v0  ;;  %2285 = vperm.xlu0 %4949, %v4962_v52   ;;  %v10432_v22 = vld [vmem:[#allocation29_spill] sm:$0xff]  ;;  %v10433_v58 = vld [vmem:[#allocation30_spill] sm:$0xff]  ;;  %v7206_v30 = vpop.permute.xlu1 %921 }
 0x120   :  { %v2047_v21 = vmin.f32 %v2046_v46, %v7131_v9  ;;  %v2116_v16 = vmin.f32 %v2115_v33, %v7135_v57  ;;  %v2185_v62 = vmin.f32 %v2184_v4, %v7139_v28  ;;  %v1216_v24 = vsub.f32 %v907_v17, %v5558_v5  ;;  %v4963_v28 = vld [vmem:[%s9470_s1 + $0x50] sm:$0xff]  ;;  %v10436_v60 = vld [vmem:[#allocation33_spill] sm:$0xff] }
 0x121   :  { %v1217_v40 = vsub.f32 %v907_v17, %v10431_v31  ;;  %v1218_v3 = vsub.f32 %v907_v17, %v10432_v22  ;;  %v1219_v45 = vsub.f32 %v907_v17, %v10433_v58  ;;  %v1748_v0 = vadd.f32 %v907_v17, %v5558_v5 }
 0x122   :  { %v1447_v10 = vmax.f32 %v1446_v23, %v1216_v24  ;;  %v1749_v32 = vadd.f32 %v907_v17, %v10431_v31  ;;  %v1750_v9 = vadd.f32 %v907_v17, %v10432_v22  ;;  %v1751_v57 = vadd.f32 %v907_v17, %v10433_v58  ;;  %2289 = vperm.xlu1 %4950, %v4963_v28   ;;  %v4966_v28 = vld [vmem:[%s9470_s1 + $0x68] sm:$0xff]  ;;  %v10545_v31 = vld [vmem:[#allocation142_spill] sm:$0xff] }
 0x123   :  { %v1516_v1 = vmax.f32 %v1515_v25, %v1217_v40  ;;  %v1585_v46 = vmax.f32 %v1584_v12, %v1218_v3  ;;  %v1654_v33 = vmax.f32 %v1653_v13, %v1219_v45  ;;  %v1979_v4 = vmin.f32 %v1978_v8, %v1748_v0  ;;  %2293 = vperm.xlu0 %4949, %v4964_v19   ;;  %v10437_v12 = vld [vmem:[#allocation34_spill] sm:$0xff]  ;;  %v917_v40 = vpop.permute.xlu0 %916 }
 0x124   :  { %v2048_v23 = vmin.f32 %v2047_v21, %v1749_v32  ;;  %v2117_v52 = vmin.f32 %v2116_v16, %v1750_v9  ;;  %v2186_v24 = vmin.f32 %v2185_v62, %v1751_v57  ;;  %v1228_v17 = vsub.f32 %v7206_v30, %v10434_v7  ;;  %v4965_v45 = vld [vmem:[%s9470_s1 + $0x60] sm:$0xff] }
 0x125   :  { %v1229_v61 = vsub.f32 %v7206_v30, %v10435_v63  ;;  %v1230_v25 = vsub.f32 %v7206_v30, %v10436_v60  ;;  %v1231_v13 = vsub.f32 %v7206_v30, %v10437_v12  ;;  %v7227_v8 = vadd.f32 %v7206_v30, %v10434_v7 }
 0x126   :  { %v7231_v21 = vadd.f32 %v7206_v30, %v10435_v63  ;;  %v7235_v16 = vadd.f32 %v7206_v30, %v10436_v60  ;;  %v7239_v62 = vadd.f32 %v7206_v30, %v10437_v12  ;;  %v1448_v3 = vmax.f32 %v1447_v10, %v1220_v15  ;;  %2297 = vperm.xlu1 %4950, %v4965_v45   ;;  %v10438_v10 = vld [vmem:[#allocation35_spill] sm:$0xff]  ;;  %v10439_v60 = vld [vmem:[#allocation36_spill] sm:$0xff]  ;;  %v4968_v63 = vld [vmem:[%s9470_s1 + $0x78] sm:$0xff] }
 0x127   :  { %v1517_v0 = vmax.f32 %v1516_v1, %v1221_v27  ;;  %v1586_v32 = vmax.f32 %v1585_v46, %v1222_v34  ;;  %v1655_v9 = vmax.f32 %v1654_v33, %v1223_v39  ;;  %v1980_v57 = vmin.f32 %v1979_v4, %v7177_v51  ;;  %2301 = vperm.xlu0 %4949, %v4966_v28   ;;  %v10440_v27 = vld [vmem:[#allocation37_spill] sm:$0xff]  ;;  %v10441_v39 = vld [vmem:[#allocation38_spill] sm:$0xff]  ;;  %v7256_v46 = vpop.permute.xlu1 %931 }
 0x128   :  { %v2049_v19 = vmin.f32 %v2048_v23, %v7181_v6  ;;  %v2118_v30 = vmin.f32 %v2117_v52, %v7185_v26  ;;  %v2187_v15 = vmin.f32 %v2186_v24, %v7189_v18  ;;  %v1224_v12 = vsub.f32 %v917_v40, %v10438_v10  ;;  %v4967_v18 = vld [vmem:[%s9470_s1 + $0x70] sm:$0xff] }
 0x129   :  { %v1225_v45 = vsub.f32 %v917_v40, %v10439_v60  ;;  %v1226_v34 = vsub.f32 %v917_v40, %v10440_v27  ;;  %v1227_v1 = vsub.f32 %v917_v40, %v10441_v39  ;;  %v1756_v51 = vadd.f32 %v917_v40, %v10438_v10  ;;  %v10444_v10 = vld [vmem:[#allocation41_spill] sm:$0xff] }
 0x12a   :  { %v1449_v33 = vmax.f32 %v1448_v3, %v1224_v12  ;;  %v1757_v4 = vadd.f32 %v917_v40, %v10439_v60  ;;  %v1758_v6 = vadd.f32 %v917_v40, %v10440_v27  ;;  %v1759_v26 = vadd.f32 %v917_v40, %v10441_v39  ;;  %2305 = vperm.xlu1 %4950, %v4967_v18   ;;  %v10442_v27 = vld [vmem:[#allocation39_spill] sm:$0xff]  ;;  %v10443_v39 = vld [vmem:[#allocation40_spill] sm:$0xff] }
 0x12b   :  { %v1518_v23 = vmax.f32 %v1517_v0, %v1225_v45  ;;  %v1587_v52 = vmax.f32 %v1586_v32, %v1226_v34  ;;  %v1656_v24 = vmax.f32 %v1655_v9, %v1227_v1  ;;  %v1981_v28 = vmin.f32 %v1980_v57, %v1756_v51  ;;  %2309 = vperm.xlu0 %4949, %v4968_v63   ;;  %v10445_v32 = vld [vmem:[#allocation42_spill] sm:$0xff]  ;;  %v927_v63 = vpop.permute.xlu0 %926 }
 0x12c   :  { %v2050_v12 = vmin.f32 %v2049_v19, %v1757_v4  ;;  %v2119_v3 = vmin.f32 %v2118_v30, %v1758_v6  ;;  %v2188_v7 = vmin.f32 %v2187_v15, %v1759_v26  ;;  %v1236_v40 = vsub.f32 %v7256_v46, %v10442_v27  ;;  %v4969_v34 = vld [vmem:[%s9470_s1 + $0x80] sm:$0xff]  ;;  %v4970_v26 = vld [vmem:[%s9470_s1 + $0x88] sm:$0xff] }
 0x12d   :  { %v1237_v60 = vsub.f32 %v7256_v46, %v10443_v39  ;;  %v1238_v0 = vsub.f32 %v7256_v46, %v10444_v10  ;;  %v1239_v9 = vsub.f32 %v7256_v46, %v10445_v32  ;;  %v7277_v57 = vadd.f32 %v7256_v46, %v10442_v27 }
 0x12e   :  { %v7281_v19 = vadd.f32 %v7256_v46, %v10443_v39  ;;  %v7285_v30 = vadd.f32 %v7256_v46, %v10444_v10  ;;  %v7289_v15 = vadd.f32 %v7256_v46, %v10445_v32  ;;  %v1450_v45 = vmax.f32 %v1449_v33, %v1228_v17  ;;  %2313 = vperm.xlu1 %4950, %v4969_v34   ;;  %v10446_v33 = vld [vmem:[#allocation43_spill] sm:$0xff]  ;;  %v10447_v10 = vld [vmem:[#allocation44_spill] sm:$0xff]  ;;  %v4972_v39 = vld [vmem:[%s9470_s1 + $0x98] sm:$0xff] }
 0x12f   :  { %v1519_v1 = vmax.f32 %v1518_v23, %v1229_v61  ;;  %v1588_v51 = vmax.f32 %v1587_v52, %v1230_v25  ;;  %v1657_v4 = vmax.f32 %v1656_v24, %v1231_v13  ;;  %v1982_v6 = vmin.f32 %v1981_v28, %v7227_v8  ;;  %2317 = vperm.xlu0 %4949, %v4970_v26   ;;  %v10448_v61 = vld [vmem:[#allocation45_spill] sm:$0xff]  ;;  %v10449_v13 = vld [vmem:[#allocation46_spill] sm:$0xff]  ;;  %v7306_v52 = vpop.permute.xlu1 %941 }
 0x130   :  { %v2051_v18 = vmin.f32 %v2050_v12, %v7231_v21  ;;  %v2120_v46 = vmin.f32 %v2119_v3, %v7235_v16  ;;  %v2189_v17 = vmin.f32 %v2188_v7, %v7239_v62  ;;  %v1232_v32 = vsub.f32 %v927_v63, %v10446_v33  ;;  %v4971_v7 = vld [vmem:[%s9470_s1 + $0x90] sm:$0xff] }
 0x131   :  { %v1233_v34 = vsub.f32 %v927_v63, %v10447_v10  ;;  %v1234_v25 = vsub.f32 %v927_v63, %v10448_v61  ;;  %v1235_v23 = vsub.f32 %v927_v63, %v10449_v13  ;;  %v1764_v8 = vadd.f32 %v927_v63, %v10446_v33  ;;  %v10452_v33 = vld [vmem:[#allocation49_spill] sm:$0xff] }
 0x132   :  { %v1451_v24 = vmax.f32 %v1450_v45, %v1232_v32  ;;  %v1765_v28 = vadd.f32 %v927_v63, %v10447_v10  ;;  %v1766_v21 = vadd.f32 %v927_v63, %v10448_v61  ;;  %v1767_v16 = vadd.f32 %v927_v63, %v10449_v13  ;;  %2321 = vperm.xlu1 %4950, %v4971_v7   ;;  %v10450_v61 = vld [vmem:[#allocation47_spill] sm:$0xff]  ;;  %v10451_v13 = vld [vmem:[#allocation48_spill] sm:$0xff] }
 0x133   :  { %v1520_v62 = vmax.f32 %v1519_v1, %v1233_v34  ;;  %v1589_v12 = vmax.f32 %v1588_v51, %v1234_v25  ;;  %v1658_v3 = vmax.f32 %v1657_v4, %v1235_v23  ;;  %v1983_v26 = vmin.f32 %v1982_v6, %v1764_v8  ;;  %2325 = vperm.xlu0 %4949, %v4972_v39   ;;  %v10453_v51 = vld [vmem:[#allocation50_spill] sm:$0xff]  ;;  %v937_v39 = vpop.permute.xlu0 %936 }
 0x134   :  { %v2052_v32 = vmin.f32 %v2051_v18, %v1765_v28  ;;  %v2121_v45 = vmin.f32 %v2120_v46, %v1766_v21  ;;  %v2190_v27 = vmin.f32 %v2189_v17, %v1767_v16  ;;  %v1244_v63 = vsub.f32 %v7306_v52, %v10450_v61  ;;  %v4973_v25 = vld [vmem:[%s9470_s1 + $0xa0] sm:$0xff]  ;;  %v4974_v16 = vld [vmem:[%s9470_s1 + $0xa8] sm:$0xff] }
 0x135   :  { %v1245_v10 = vsub.f32 %v7306_v52, %v10451_v13  ;;  %v1246_v1 = vsub.f32 %v7306_v52, %v10452_v33  ;;  %v1247_v4 = vsub.f32 %v7306_v52, %v10453_v51  ;;  %v7327_v6 = vadd.f32 %v7306_v52, %v10450_v61 }
 0x136   :  { %v7331_v18 = vadd.f32 %v7306_v52, %v10451_v13  ;;  %v7335_v46 = vadd.f32 %v7306_v52, %v10452_v33  ;;  %v7339_v17 = vadd.f32 %v7306_v52, %v10453_v51  ;;  %v1452_v34 = vmax.f32 %v1451_v24, %v1236_v40  ;;  %2329 = vperm.xlu1 %4950, %v4973_v25   ;;  %v10454_v24 = vld [vmem:[#allocation51_spill] sm:$0xff]  ;;  %v10455_v33 = vld [vmem:[#allocation52_spill] sm:$0xff]  ;;  %v4976_v13 = vld [vmem:[%s9470_s1 + $0xb8] sm:$0xff] }
 0x137   :  { %v1521_v23 = vmax.f32 %v1520_v62, %v1237_v60  ;;  %v1590_v8 = vmax.f32 %v1589_v12, %v1238_v0  ;;  %v1659_v28 = vmax.f32 %v1658_v3, %v1239_v9  ;;  %v1984_v21 = vmin.f32 %v1983_v26, %v7277_v57  ;;  %2333 = vperm.xlu0 %4949, %v4974_v16   ;;  %v10456_v60 = vld [vmem:[#allocation53_spill] sm:$0xff]  ;;  %v10457_v9 = vld [vmem:[#allocation54_spill] sm:$0xff]  ;;  %v7356_v12 = vpop.permute.xlu1 %951 }
 0x138   :  { %v2053_v7 = vmin.f32 %v2052_v32, %v7281_v19  ;;  %v2122_v52 = vmin.f32 %v2121_v45, %v7285_v30  ;;  %v2191_v40 = vmin.f32 %v2190_v27, %v7289_v15  ;;  %v1240_v51 = vsub.f32 %v937_v39, %v10454_v24  ;;  %v4975_v27 = vld [vmem:[%s9470_s1 + $0xb0] sm:$0xff] }
 0x139   :  { %v1241_v25 = vsub.f32 %v937_v39, %v10455_v33  ;;  %v1242_v0 = vsub.f32 %v937_v39, %v10456_v60  ;;  %v1243_v62 = vsub.f32 %v937_v39, %v10457_v9  ;;  %v1772_v57 = vadd.f32 %v937_v39, %v10454_v24  ;;  %v10460_v24 = vld [vmem:[#allocation57_spill] sm:$0xff] }
 0x13a   :  { %v1453_v3 = vmax.f32 %v1452_v34, %v1240_v51  ;;  %v1773_v26 = vadd.f32 %v937_v39, %v10455_v33  ;;  %v1774_v19 = vadd.f32 %v937_v39, %v10456_v60  ;;  %v1775_v30 = vadd.f32 %v937_v39, %v10457_v9  ;;  %2337 = vperm.xlu1 %4950, %v4975_v27   ;;  %v10458_v60 = vld [vmem:[#allocation55_spill] sm:$0xff]  ;;  %v10459_v9 = vld [vmem:[#allocation56_spill] sm:$0xff] }
 0x13b   :  { %v1522_v15 = vmax.f32 %v1521_v23, %v1241_v25  ;;  %v1591_v32 = vmax.f32 %v1590_v8, %v1242_v0  ;;  %v1660_v45 = vmax.f32 %v1659_v28, %v1243_v62  ;;  %v1985_v16 = vmin.f32 %v1984_v21, %v1772_v57  ;;  %2341 = vperm.xlu0 %4949, %v4976_v13   ;;  %v10461_v8 = vld [vmem:[#allocation58_spill] sm:$0xff]  ;;  %v947_v13 = vpop.permute.xlu0 %946 }
 0x13c   :  { %v2054_v51 = vmin.f32 %v2053_v7, %v1773_v26  ;;  %v2123_v34 = vmin.f32 %v2122_v52, %v1774_v19  ;;  %v2192_v61 = vmin.f32 %v2191_v40, %v1775_v30  ;;  %v1252_v39 = vsub.f32 %v7356_v12, %v10458_v60  ;;  %v4977_v0 = vld [vmem:[%s9470_s1 + $0xc0] sm:$0xff]  ;;  %v4978_v30 = vld [vmem:[%s9470_s1 + $0xc8] sm:$0xff] }
 0x13d   :  { %v1253_v33 = vsub.f32 %v7356_v12, %v10459_v9  ;;  %v1254_v23 = vsub.f32 %v7356_v12, %v10460_v24  ;;  %v1255_v28 = vsub.f32 %v7356_v12, %v10461_v8  ;;  %v7377_v21 = vadd.f32 %v7356_v12, %v10458_v60 }
 0x13e   :  { %v7381_v7 = vadd.f32 %v7356_v12, %v10459_v9  ;;  %v7385_v52 = vadd.f32 %v7356_v12, %v10460_v24  ;;  %v7389_v40 = vadd.f32 %v7356_v12, %v10461_v8  ;;  %v1454_v25 = vmax.f32 %v1453_v3, %v1244_v63  ;;  %2345 = vperm.xlu1 %4950, %v4977_v0   ;;  %v10462_v3 = vld [vmem:[#allocation59_spill] sm:$0xff]  ;;  %v10463_v24 = vld [vmem:[#allocation60_spill] sm:$0xff]  ;;  %v4980_v9 = vld [vmem:[%s9470_s1 + $0xd8] sm:$0xff] }
 0x13f   :  { %v1523_v62 = vmax.f32 %v1522_v15, %v1245_v10  ;;  %v1592_v57 = vmax.f32 %v1591_v32, %v1246_v1  ;;  %v1661_v26 = vmax.f32 %v1660_v45, %v1247_v4  ;;  %v1986_v19 = vmin.f32 %v1985_v16, %v7327_v6  ;;  %2349 = vperm.xlu0 %4949, %v4978_v30   ;;  %v10464_v10 = vld [vmem:[#allocation61_spill] sm:$0xff]  ;;  %v10465_v4 = vld [vmem:[#allocation62_spill] sm:$0xff]  ;;  %v7406_v32 = vpop.permute.xlu1 %961 }
 0x140   :  { %v2055_v27 = vmin.f32 %v2054_v51, %v7331_v18  ;;  %v2124_v12 = vmin.f32 %v2123_v34, %v7335_v46  ;;  %v2193_v63 = vmin.f32 %v2192_v61, %v7339_v17  ;;  %v1248_v8 = vsub.f32 %v947_v13, %v10462_v3  ;;  %v4979_v61 = vld [vmem:[%s9470_s1 + $0xd0] sm:$0xff] }
 0x141   :  { %v1249_v0 = vsub.f32 %v947_v13, %v10463_v24  ;;  %v1250_v1 = vsub.f32 %v947_v13, %v10464_v10  ;;  %v1251_v15 = vsub.f32 %v947_v13, %v10465_v4  ;;  %v1780_v6 = vadd.f32 %v947_v13, %v10462_v3  ;;  %v10468_v3 = vld [vmem:[#allocation65_spill] sm:$0xff] }
 0x142   :  { %v1455_v45 = vmax.f32 %v1454_v25, %v1248_v8  ;;  %v1781_v16 = vadd.f32 %v947_v13, %v10463_v24  ;;  %v1782_v18 = vadd.f32 %v947_v13, %v10464_v10  ;;  %v1783_v46 = vadd.f32 %v947_v13, %v10465_v4  ;;  %2353 = vperm.xlu1 %4950, %v4979_v61   ;;  %v10466_v10 = vld [vmem:[#allocation63_spill] sm:$0xff]  ;;  %v10467_v4 = vld [vmem:[#allocation64_spill] sm:$0xff] }
 0x143   :  { %v1524_v17 = vmax.f32 %v1523_v62, %v1249_v0  ;;  %v1593_v51 = vmax.f32 %v1592_v57, %v1250_v1  ;;  %v1662_v34 = vmax.f32 %v1661_v26, %v1251_v15  ;;  %v1987_v30 = vmin.f32 %v1986_v19, %v1780_v6  ;;  %2357 = vperm.xlu0 %4949, %v4980_v9   ;;  %v10469_v57 = vld [vmem:[#allocation66_spill] sm:$0xff]  ;;  %v957_v9 = vpop.permute.xlu0 %956 }
 0x144   :  { %v2056_v8 = vmin.f32 %v2055_v27, %v1781_v16  ;;  %v2125_v25 = vmin.f32 %v2124_v12, %v1782_v18  ;;  %v2194_v60 = vmin.f32 %v2193_v63, %v1783_v46  ;;  %v1260_v13 = vsub.f32 %v7406_v32, %v10466_v10  ;;  %v4981_v1 = vld [vmem:[%s9470_s1 + $0xe0] sm:$0xff]  ;;  %v4982_v46 = vld [vmem:[%s9470_s1 + $0xe8] sm:$0xff] }
 0x145   :  { %v1261_v24 = vsub.f32 %v7406_v32, %v10467_v4  ;;  %v1262_v62 = vsub.f32 %v7406_v32, %v10468_v3  ;;  %v1263_v26 = vsub.f32 %v7406_v32, %v10469_v57  ;;  %v7427_v19 = vadd.f32 %v7406_v32, %v10466_v10 }
 0x146   :  { %v7431_v27 = vadd.f32 %v7406_v32, %v10467_v4  ;;  %v7435_v12 = vadd.f32 %v7406_v32, %v10468_v3  ;;  %v7439_v63 = vadd.f32 %v7406_v32, %v10469_v57  ;;  %v1456_v0 = vmax.f32 %v1455_v45, %v1252_v39  ;;  %2361 = vperm.xlu1 %4950, %v4981_v1   ;;  %v10470_v45 = vld [vmem:[#allocation67_spill] sm:$0xff]  ;;  %v10471_v3 = vld [vmem:[#allocation68_spill] sm:$0xff]  ;;  %v4984_v4 = vld [vmem:[%s9470_s1 + $0xf8] sm:$0xff] }
 0x147   :  { %v1525_v15 = vmax.f32 %v1524_v17, %v1253_v33  ;;  %v1594_v6 = vmax.f32 %v1593_v51, %v1254_v23  ;;  %v1663_v16 = vmax.f32 %v1662_v34, %v1255_v28  ;;  %v1988_v18 = vmin.f32 %v1987_v30, %v7377_v21  ;;  %2365 = vperm.xlu0 %4949, %v4982_v46   ;;  %v10472_v33 = vld [vmem:[#allocation69_spill] sm:$0xff]  ;;  %v10473_v28 = vld [vmem:[#allocation70_spill] sm:$0xff]  ;;  %v7456_v51 = vpop.permute.xlu1 %971 }
 0x148   :  { %v2057_v61 = vmin.f32 %v2056_v8, %v7381_v7  ;;  %v2126_v32 = vmin.f32 %v2125_v25, %v7385_v52  ;;  %v2195_v39 = vmin.f32 %v2194_v60, %v7389_v40  ;;  %v1256_v57 = vsub.f32 %v957_v9, %v10470_v45  ;;  %v4983_v60 = vld [vmem:[%s9470_s1 + $0xf0] sm:$0xff] }
 0x149   :  { %v1257_v1 = vsub.f32 %v957_v9, %v10471_v3  ;;  %v1258_v23 = vsub.f32 %v957_v9, %v10472_v33  ;;  %v1259_v17 = vsub.f32 %v957_v9, %v10473_v28  ;;  %v1788_v21 = vadd.f32 %v957_v9, %v10470_v45  ;;  %v10476_v45 = vld [vmem:[#allocation73_spill] sm:$0xff] }
 0x14a   :  { %v1457_v34 = vmax.f32 %v1456_v0, %v1256_v57  ;;  %v1789_v30 = vadd.f32 %v957_v9, %v10471_v3  ;;  %v1790_v7 = vadd.f32 %v957_v9, %v10472_v33  ;;  %v1791_v52 = vadd.f32 %v957_v9, %v10473_v28  ;;  %2369 = vperm.xlu1 %4950, %v4983_v60   ;;  %v10474_v33 = vld [vmem:[#allocation71_spill] sm:$0xff]  ;;  %v10475_v28 = vld [vmem:[#allocation72_spill] sm:$0xff] }
 0x14b   :  { %v1526_v40 = vmax.f32 %v1525_v15, %v1257_v1  ;;  %v1595_v8 = vmax.f32 %v1594_v6, %v1258_v23  ;;  %v1664_v25 = vmax.f32 %v1663_v16, %v1259_v17  ;;  %v1989_v46 = vmin.f32 %v1988_v18, %v1788_v21  ;;  %2373 = vperm.xlu0 %4949, %v4984_v4   ;;  %v10477_v6 = vld [vmem:[#allocation74_spill] sm:$0xff]  ;;  %v967_v4 = vpop.permute.xlu0 %966 }
 0x14c   :  { %v2058_v57 = vmin.f32 %v2057_v61, %v1789_v30  ;;  %v2127_v0 = vmin.f32 %v2126_v32, %v1790_v7  ;;  %v2196_v10 = vmin.f32 %v2195_v39, %v1791_v52  ;;  %v1268_v9 = vsub.f32 %v7456_v51, %v10474_v33  ;;  %v4985_v23 = vld [vmem:[%s9470_s1 + $0x100] sm:$0xff]  ;;  %v4986_v52 = vld [vmem:[%s9470_s1 + $0x108] sm:$0xff] }
 0x14d   :  { %v1269_v3 = vsub.f32 %v7456_v51, %v10475_v28  ;;  %v1270_v15 = vsub.f32 %v7456_v51, %v10476_v45  ;;  %v1271_v16 = vsub.f32 %v7456_v51, %v10477_v6  ;;  %v7477_v18 = vadd.f32 %v7456_v51, %v10474_v33 }
 0x14e   :  { %v7481_v61 = vadd.f32 %v7456_v51, %v10475_v28  ;;  %v7485_v32 = vadd.f32 %v7456_v51, %v10476_v45  ;;  %v7489_v39 = vadd.f32 %v7456_v51, %v10477_v6  ;;  %v1458_v1 = vmax.f32 %v1457_v34, %v1260_v13  ;;  %2377 = vperm.xlu1 %4950, %v4985_v23   ;;  %v10478_v34 = vld [vmem:[#allocation75_spill] sm:$0xff]  ;;  %v10479_v45 = vld [vmem:[#allocation76_spill] sm:$0xff]  ;;  %v4988_v28 = vld [vmem:[%s9470_s1 + $0x118] sm:$0xff] }
 0x14f   :  { %v1527_v17 = vmax.f32 %v1526_v40, %v1261_v24  ;;  %v1596_v21 = vmax.f32 %v1595_v8, %v1262_v62  ;;  %v1665_v30 = vmax.f32 %v1664_v25, %v1263_v26  ;;  %v1990_v7 = vmin.f32 %v1989_v46, %v7427_v19  ;;  %2381 = vperm.xlu0 %4949, %v4986_v52   ;;  %v10480_v24 = vld [vmem:[#allocation77_spill] sm:$0xff]  ;;  %v10481_v26 = vld [vmem:[#allocation78_spill] sm:$0xff]  ;;  %v7506_v8 = vpop.permute.xlu1 %981 }
 0x150   :  { %v2059_v60 = vmin.f32 %v2058_v57, %v7431_v27  ;;  %v2128_v51 = vmin.f32 %v2127_v0, %v7435_v12  ;;  %v2197_v13 = vmin.f32 %v2196_v10, %v7439_v63  ;;  %v1264_v6 = vsub.f32 %v967_v4, %v10478_v34  ;;  %v4987_v10 = vld [vmem:[%s9470_s1 + $0x110] sm:$0xff] }
 0x151   :  { %v1265_v23 = vsub.f32 %v967_v4, %v10479_v45  ;;  %v1266_v62 = vsub.f32 %v967_v4, %v10480_v24  ;;  %v1267_v40 = vsub.f32 %v967_v4, %v10481_v26  ;;  %v1796_v19 = vadd.f32 %v967_v4, %v10478_v34  ;;  %v10484_v34 = vld [vmem:[#allocation81_spill] sm:$0xff] }
 0x152   :  { %v1459_v25 = vmax.f32 %v1458_v1, %v1264_v6  ;;  %v1797_v46 = vadd.f32 %v967_v4, %v10479_v45  ;;  %v1798_v27 = vadd.f32 %v967_v4, %v10480_v24  ;;  %v1799_v12 = vadd.f32 %v967_v4, %v10481_v26  ;;  %2385 = vperm.xlu1 %4950, %v4987_v10   ;;  %v10482_v24 = vld [vmem:[#allocation79_spill] sm:$0xff]  ;;  %v10483_v26 = vld [vmem:[#allocation80_spill] sm:$0xff] }
 0x153   :  { %v1528_v63 = vmax.f32 %v1527_v17, %v1265_v23  ;;  %v1597_v57 = vmax.f32 %v1596_v21, %v1266_v62  ;;  %v1666_v0 = vmax.f32 %v1665_v30, %v1267_v40  ;;  %v1991_v52 = vmin.f32 %v1990_v7, %v1796_v19  ;;  %2389 = vperm.xlu0 %4949, %v4988_v28   ;;  %v10485_v21 = vld [vmem:[#allocation82_spill] sm:$0xff]  ;;  %v977_v28 = vpop.permute.xlu0 %976 }
 0x154   :  { %v2060_v6 = vmin.f32 %v2059_v60, %v1797_v46  ;;  %v2129_v1 = vmin.f32 %v2128_v51, %v1798_v27  ;;  %v2198_v33 = vmin.f32 %v2197_v13, %v1799_v12  ;;  %v1276_v4 = vsub.f32 %v7506_v8, %v10482_v24  ;;  %v4989_v62 = vld [vmem:[%s9470_s1 + $0x120] sm:$0xff]  ;;  %v4990_v12 = vld [vmem:[%s9470_s1 + $0x128] sm:$0xff] }
 0x155   :  { %v1277_v45 = vsub.f32 %v7506_v8, %v10483_v26  ;;  %v1278_v17 = vsub.f32 %v7506_v8, %v10484_v34  ;;  %v1279_v30 = vsub.f32 %v7506_v8, %v10485_v21  ;;  %v7527_v7 = vadd.f32 %v7506_v8, %v10482_v24 }
 0x156   :  { %v7531_v60 = vadd.f32 %v7506_v8, %v10483_v26  ;;  %v7535_v51 = vadd.f32 %v7506_v8, %v10484_v34  ;;  %v7539_v13 = vadd.f32 %v7506_v8, %v10485_v21  ;;  %v1460_v23 = vmax.f32 %v1459_v25, %v1268_v9  ;;  %2393 = vperm.xlu1 %4950, %v4989_v62   ;;  %v10486_v25 = vld [vmem:[#allocation83_spill] sm:$0xff]  ;;  %v10487_v34 = vld [vmem:[#allocation84_spill] sm:$0xff]  ;;  %v4992_v26 = vld [vmem:[%s9470_s1 + $0x138] sm:$0xff] }
 0x157   :  { %v1529_v40 = vmax.f32 %v1528_v63, %v1269_v3  ;;  %v1598_v19 = vmax.f32 %v1597_v57, %v1270_v15  ;;  %v1667_v46 = vmax.f32 %v1666_v0, %v1271_v16  ;;  %v1992_v27 = vmin.f32 %v1991_v52, %v7477_v18  ;;  %2397 = vperm.xlu0 %4949, %v4990_v12   ;;  %v10488_v3 = vld [vmem:[#allocation85_spill] sm:$0xff]  ;;  %v10489_v16 = vld [vmem:[#allocation86_spill] sm:$0xff]  ;;  %v7556_v57 = vpop.permute.xlu1 %991 }
 0x158   :  { %v2061_v10 = vmin.f32 %v2060_v6, %v7481_v61  ;;  %v2130_v8 = vmin.f32 %v2129_v1, %v7485_v32  ;;  %v2199_v9 = vmin.f32 %v2198_v33, %v7489_v39  ;;  %v1272_v21 = vsub.f32 %v977_v28, %v10486_v25  ;;  %v4991_v33 = vld [vmem:[%s9470_s1 + $0x130] sm:$0xff] }
 0x159   :  { %v1273_v62 = vsub.f32 %v977_v28, %v10487_v34  ;;  %v1274_v15 = vsub.f32 %v977_v28, %v10488_v3  ;;  %v1275_v63 = vsub.f32 %v977_v28, %v10489_v16  ;;  %v1804_v18 = vadd.f32 %v977_v28, %v10486_v25  ;;  %v10492_v25 = vld [vmem:[#allocation89_spill] sm:$0xff] }
 0x15a   :  { %v1461_v0 = vmax.f32 %v1460_v23, %v1272_v21  ;;  %v1805_v52 = vadd.f32 %v977_v28, %v10487_v34  ;;  %v1806_v61 = vadd.f32 %v977_v28, %v10488_v3  ;;  %v1807_v32 = vadd.f32 %v977_v28, %v10489_v16  ;;  %2401 = vperm.xlu1 %4950, %v4991_v33   ;;  %v10490_v3 = vld [vmem:[#allocation87_spill] sm:$0xff]  ;;  %v10491_v16 = vld [vmem:[#allocation88_spill] sm:$0xff] }
 0x15b   :  { %v1530_v39 = vmax.f32 %v1529_v40, %v1273_v62  ;;  %v1599_v6 = vmax.f32 %v1598_v19, %v1274_v15  ;;  %v1668_v1 = vmax.f32 %v1667_v46, %v1275_v63  ;;  %v1993_v12 = vmin.f32 %v1992_v27, %v1804_v18  ;;  %2405 = vperm.xlu0 %4949, %v4992_v26   ;;  %v10493_v19 = vld [vmem:[#allocation90_spill] sm:$0xff]  ;;  %v987_v26 = vpop.permute.xlu0 %986 }
 0x15c   :  { %v2062_v21 = vmin.f32 %v2061_v10, %v1805_v52  ;;  %v2131_v23 = vmin.f32 %v2130_v8, %v1806_v61  ;;  %v2200_v24 = vmin.f32 %v2199_v9, %v1807_v32  ;;  %v1284_v28 = vsub.f32 %v7556_v57, %v10490_v3  ;;  %v4993_v15 = vld [vmem:[%s9470_s1 + $0x140] sm:$0xff]  ;;  %v4994_v32 = vld [vmem:[%s9470_s1 + $0x148] sm:$0xff] }
 0x15d   :  { %v1285_v34 = vsub.f32 %v7556_v57, %v10491_v16  ;;  %v1286_v40 = vsub.f32 %v7556_v57, %v10492_v25  ;;  %v1287_v46 = vsub.f32 %v7556_v57, %v10493_v19  ;;  %v7577_v27 = vadd.f32 %v7556_v57, %v10490_v3 }
 0x15e   :  { %v7581_v10 = vadd.f32 %v7556_v57, %v10491_v16  ;;  %v7585_v8 = vadd.f32 %v7556_v57, %v10492_v25  ;;  %v7589_v9 = vadd.f32 %v7556_v57, %v10493_v19  ;;  %v1462_v62 = vmax.f32 %v1461_v0, %v1276_v4  ;;  %2409 = vperm.xlu1 %4950, %v4993_v15   ;;  %v10494_v0 = vld [vmem:[#allocation91_spill] sm:$0xff]  ;;  %v10495_v25 = vld [vmem:[#allocation92_spill] sm:$0xff]  ;;  %v4996_v16 = vld [vmem:[%s9470_s1 + $0x158] sm:$0xff] }
 0x15f   :  { %v1531_v63 = vmax.f32 %v1530_v39, %v1277_v45  ;;  %v1600_v18 = vmax.f32 %v1599_v6, %v1278_v17  ;;  %v1669_v52 = vmax.f32 %v1668_v1, %v1279_v30  ;;  %v1994_v61 = vmin.f32 %v1993_v12, %v7527_v7  ;;  %2413 = vperm.xlu0 %4949, %v4994_v32   ;;  %v10496_v45 = vld [vmem:[#allocation93_spill] sm:$0xff]  ;;  %v10497_v30 = vld [vmem:[#allocation94_spill] sm:$0xff]  ;;  %v7606_v6 = vpop.permute.xlu1 %1001 }
 0x160   :  { %v2063_v33 = vmin.f32 %v2062_v21, %v7531_v60  ;;  %v2132_v57 = vmin.f32 %v2131_v23, %v7535_v51  ;;  %v2201_v4 = vmin.f32 %v2200_v24, %v7539_v13  ;;  %v1280_v19 = vsub.f32 %v987_v26, %v10494_v0  ;;  %v4995_v24 = vld [vmem:[%s9470_s1 + $0x150] sm:$0xff] }
 0x161   :  { %v1281_v15 = vsub.f32 %v987_v26, %v10495_v25  ;;  %v1282_v17 = vsub.f32 %v987_v26, %v10496_v45  ;;  %v1283_v39 = vsub.f32 %v987_v26, %v10497_v30  ;;  %v1812_v7 = vadd.f32 %v987_v26, %v10494_v0  ;;  %v10500_v0 = vld [vmem:[#allocation97_spill] sm:$0xff] }
 0x162   :  { %v1463_v1 = vmax.f32 %v1462_v62, %v1280_v19  ;;  %v1813_v12 = vadd.f32 %v987_v26, %v10495_v25  ;;  %v1814_v60 = vadd.f32 %v987_v26, %v10496_v45  ;;  %v1815_v51 = vadd.f32 %v987_v26, %v10497_v30  ;;  %2417 = vperm.xlu1 %4950, %v4995_v24   ;;  %v10498_v45 = vld [vmem:[#allocation95_spill] sm:$0xff]  ;;  %v10499_v30 = vld [vmem:[#allocation96_spill] sm:$0xff] }
 0x163   :  { %v1532_v13 = vmax.f32 %v1531_v63, %v1281_v15  ;;  %v1601_v21 = vmax.f32 %v1600_v18, %v1282_v17  ;;  %v1670_v23 = vmax.f32 %v1669_v52, %v1283_v39  ;;  %v1995_v32 = vmin.f32 %v1994_v61, %v1812_v7  ;;  %2421 = vperm.xlu0 %4949, %v4996_v16   ;;  %v10501_v18 = vld [vmem:[#allocation98_spill] sm:$0xff]  ;;  %v997_v16 = vpop.permute.xlu0 %996 }
 0x164   :  { %v2064_v19 = vmin.f32 %v2063_v33, %v1813_v12  ;;  %v2133_v62 = vmin.f32 %v2132_v57, %v1814_v60  ;;  %v2202_v3 = vmin.f32 %v2201_v4, %v1815_v51  ;;  %v1292_v26 = vsub.f32 %v7606_v6, %v10498_v45  ;;  %v4997_v17 = vld [vmem:[%s9470_s1 + $0x160] sm:$0xff]  ;;  %v4998_v51 = vld [vmem:[%s9470_s1 + $0x168] sm:$0xff] }
 0x165   :  { %v1293_v25 = vsub.f32 %v7606_v6, %v10499_v30  ;;  %v1294_v63 = vsub.f32 %v7606_v6, %v10500_v0  ;;  %v1295_v52 = vsub.f32 %v7606_v6, %v10501_v18  ;;  %v7627_v61 = vadd.f32 %v7606_v6, %v10498_v45 }
 0x166   :  { %v7631_v33 = vadd.f32 %v7606_v6, %v10499_v30  ;;  %v7635_v57 = vadd.f32 %v7606_v6, %v10500_v0  ;;  %v7639_v4 = vadd.f32 %v7606_v6, %v10501_v18  ;;  %v1464_v15 = vmax.f32 %v1463_v1, %v1284_v28  ;;  %2425 = vperm.xlu1 %4950, %v4997_v17   ;;  %v10502_v1 = vld [vmem:[#allocation99_spill] sm:$0xff]  ;;  %v10503_v0 = vld [vmem:[#allocation100_spill] sm:$0xff]  ;;  %v5000_v30 = vld [vmem:[%s9470_s1 + $0x178] sm:$0xff] }
 0x167   :  { %v1533_v39 = vmax.f32 %v1532_v13, %v1285_v34  ;;  %v1602_v7 = vmax.f32 %v1601_v21, %v1286_v40  ;;  %v1671_v12 = vmax.f32 %v1670_v23, %v1287_v46  ;;  %v1996_v60 = vmin.f32 %v1995_v32, %v7577_v27  ;;  %2429 = vperm.xlu0 %4949, %v4998_v51   ;;  %v10504_v34 = vld [vmem:[#allocation101_spill] sm:$0xff]  ;;  %v10505_v46 = vld [vmem:[#allocation102_spill] sm:$0xff]  ;;  %v7656_v21 = vpop.permute.xlu1 %1011 }
 0x168   :  { %v2065_v24 = vmin.f32 %v2064_v19, %v7581_v10  ;;  %v2134_v6 = vmin.f32 %v2133_v62, %v7585_v8  ;;  %v2203_v28 = vmin.f32 %v2202_v3, %v7589_v9  ;;  %v1288_v18 = vsub.f32 %v997_v16, %v10502_v1  ;;  %v4999_v3 = vld [vmem:[%s9470_s1 + $0x170] sm:$0xff] }
 0x169   :  { %v1289_v17 = vsub.f32 %v997_v16, %v10503_v0  ;;  %v1290_v40 = vsub.f32 %v997_v16, %v10504_v34  ;;  %v1291_v13 = vsub.f32 %v997_v16, %v10505_v46  ;;  %v1820_v27 = vadd.f32 %v997_v16, %v10502_v1  ;;  %v10508_v1 = vld [vmem:[#allocation105_spill] sm:$0xff] }
 0x16a   :  { %v1465_v23 = vmax.f32 %v1464_v15, %v1288_v18  ;;  %v1821_v32 = vadd.f32 %v997_v16, %v10503_v0  ;;  %v1822_v10 = vadd.f32 %v997_v16, %v10504_v34  ;;  %v1823_v8 = vadd.f32 %v997_v16, %v10505_v46  ;;  %2433 = vperm.xlu1 %4950, %v4999_v3   ;;  %v10506_v34 = vld [vmem:[#allocation103_spill] sm:$0xff]  ;;  %v10507_v46 = vld [vmem:[#allocation104_spill] sm:$0xff] }
 0x16b   :  { %v1534_v9 = vmax.f32 %v1533_v39, %v1289_v17  ;;  %v1603_v19 = vmax.f32 %v1602_v7, %v1290_v40  ;;  %v1672_v62 = vmax.f32 %v1671_v12, %v1291_v13  ;;  %v1997_v51 = vmin.f32 %v1996_v60, %v1820_v27  ;;  %2437 = vperm.xlu0 %4949, %v5000_v30   ;;  %v10509_v7 = vld [vmem:[#allocation106_spill] sm:$0xff]  ;;  %v1007_v30 = vpop.permute.xlu0 %1006 }
 0x16c   :  { %v2066_v18 = vmin.f32 %v2065_v24, %v1821_v32  ;;  %v2135_v15 = vmin.f32 %v2134_v6, %v1822_v10  ;;  %v2204_v45 = vmin.f32 %v2203_v28, %v1823_v8  ;;  %v1300_v16 = vsub.f32 %v7656_v21, %v10506_v34  ;;  %v5001_v40 = vld [vmem:[%s9470_s1 + $0x180] sm:$0xff]  ;;  %v5002_v8 = vld [vmem:[%s9470_s1 + $0x188] sm:$0xff] }
 0x16d   :  { %v1301_v0 = vsub.f32 %v7656_v21, %v10507_v46  ;;  %v1302_v39 = vsub.f32 %v7656_v21, %v10508_v1  ;;  %v1303_v12 = vsub.f32 %v7656_v21, %v10509_v7  ;;  %v7677_v60 = vadd.f32 %v7656_v21, %v10506_v34 }
 0x16e   :  { %v7681_v24 = vadd.f32 %v7656_v21, %v10507_v46  ;;  %v7685_v6 = vadd.f32 %v7656_v21, %v10508_v1  ;;  %v7689_v28 = vadd.f32 %v7656_v21, %v10509_v7  ;;  %v1466_v17 = vmax.f32 %v1465_v23, %v1292_v26  ;;  %2441 = vperm.xlu1 %4950, %v5001_v40   ;;  %v10510_v23 = vld [vmem:[#allocation107_spill] sm:$0xff]  ;;  %v10511_v1 = vld [vmem:[#allocation108_spill] sm:$0xff]  ;;  %v5004_v46 = vld [vmem:[%s9470_s1 + $0x198] sm:$0xff] }
 0x16f   :  { %v1535_v13 = vmax.f32 %v1534_v9, %v1293_v25  ;;  %v1604_v27 = vmax.f32 %v1603_v19, %v1294_v63  ;;  %v1673_v32 = vmax.f32 %v1672_v62, %v1295_v52  ;;  %v1998_v10 = vmin.f32 %v1997_v51, %v7627_v61  ;;  %2445 = vperm.xlu0 %4949, %v5002_v8   ;;  %v10512_v25 = vld [vmem:[#allocation109_spill] sm:$0xff]  ;;  %v10513_v52 = vld [vmem:[#allocation110_spill] sm:$0xff]  ;;  %v7706_v19 = vpop.permute.xlu1 %1021 }
 0x170   :  { %v2067_v3 = vmin.f32 %v2066_v18, %v7631_v33  ;;  %v2136_v21 = vmin.f32 %v2135_v15, %v7635_v57  ;;  %v2205_v26 = vmin.f32 %v2204_v45, %v7639_v4  ;;  %v1296_v7 = vsub.f32 %v1007_v30, %v10510_v23  ;;  %v5003_v45 = vld [vmem:[%s9470_s1 + $0x190] sm:$0xff] }
 0x171   :  { %v1297_v40 = vsub.f32 %v1007_v30, %v10511_v1  ;;  %v1298_v63 = vsub.f32 %v1007_v30, %v10512_v25  ;;  %v1299_v9 = vsub.f32 %v1007_v30, %v10513_v52  ;;  %v1828_v61 = vadd.f32 %v1007_v30, %v10510_v23  ;;  %v10516_v23 = vld [vmem:[#allocation113_spill] sm:$0xff] }
 0x172   :  { %v1467_v62 = vmax.f32 %v1466_v17, %v1296_v7  ;;  %v1829_v51 = vadd.f32 %v1007_v30, %v10511_v1  ;;  %v1830_v33 = vadd.f32 %v1007_v30, %v10512_v25  ;;  %v1831_v57 = vadd.f32 %v1007_v30, %v10513_v52  ;;  %2449 = vperm.xlu1 %4950, %v5003_v45   ;;  %v10514_v25 = vld [vmem:[#allocation111_spill] sm:$0xff]  ;;  %v10515_v52 = vld [vmem:[#allocation112_spill] sm:$0xff] }
 0x173   :  { %v1536_v4 = vmax.f32 %v1535_v13, %v1297_v40  ;;  %v1605_v18 = vmax.f32 %v1604_v27, %v1298_v63  ;;  %v1674_v15 = vmax.f32 %v1673_v32, %v1299_v9  ;;  %v1999_v8 = vmin.f32 %v1998_v10, %v1828_v61  ;;  %2453 = vperm.xlu0 %4949, %v5004_v46   ;;  %v10517_v27 = vld [vmem:[#allocation114_spill] sm:$0xff]  ;;  %v1017_v46 = vpop.permute.xlu0 %1016 }
 0x174   :  { %v2068_v7 = vmin.f32 %v2067_v3, %v1829_v51  ;;  %v2137_v17 = vmin.f32 %v2136_v21, %v1830_v33  ;;  %v2206_v34 = vmin.f32 %v2205_v26, %v1831_v57  ;;  %v1308_v30 = vsub.f32 %v7706_v19, %v10514_v25  ;;  %v5005_v63 = vld [vmem:[%s9470_s1 + $0x1a0] sm:$0xff]  ;;  %v5006_v57 = vld [vmem:[%s9470_s1 + $0x1a8] sm:$0xff] }
 0x175   :  { %v1309_v1 = vsub.f32 %v7706_v19, %v10515_v52  ;;  %v1310_v13 = vsub.f32 %v7706_v19, %v10516_v23  ;;  %v1311_v32 = vsub.f32 %v7706_v19, %v10517_v27  ;;  %v7727_v10 = vadd.f32 %v7706_v19, %v10514_v25 }
 0x176   :  { %v7731_v3 = vadd.f32 %v7706_v19, %v10515_v52  ;;  %v7735_v21 = vadd.f32 %v7706_v19, %v10516_v23  ;;  %v7739_v26 = vadd.f32 %v7706_v19, %v10517_v27  ;;  %v1468_v40 = vmax.f32 %v1467_v62, %v1300_v16  ;;  %2457 = vperm.xlu1 %4950, %v5005_v63   ;;  %v10518_v62 = vld [vmem:[#allocation115_spill] sm:$0xff]  ;;  %v10519_v23 = vld [vmem:[#allocation116_spill] sm:$0xff]  ;;  %v5008_v52 = vld [vmem:[%s9470_s1 + $0x1b8] sm:$0xff] }
 0x177   :  { %v1537_v9 = vmax.f32 %v1536_v4, %v1301_v0  ;;  %v1606_v61 = vmax.f32 %v1605_v18, %v1302_v39  ;;  %v1675_v51 = vmax.f32 %v1674_v15, %v1303_v12  ;;  %v2000_v33 = vmin.f32 %v1999_v8, %v7677_v60  ;;  %2461 = vperm.xlu0 %4949, %v5006_v57   ;;  %v10520_v0 = vld [vmem:[#allocation117_spill] sm:$0xff]  ;;  %v10521_v12 = vld [vmem:[#allocation118_spill] sm:$0xff]  ;;  %v7756_v18 = vpop.permute.xlu1 %1031 }
 0x178   :  { %v2069_v45 = vmin.f32 %v2068_v7, %v7681_v24  ;;  %v2138_v19 = vmin.f32 %v2137_v17, %v7685_v6  ;;  %v2207_v16 = vmin.f32 %v2206_v34, %v7689_v28  ;;  %v1304_v27 = vsub.f32 %v1017_v46, %v10518_v62  ;;  %v5007_v34 = vld [vmem:[%s9470_s1 + $0x1b0] sm:$0xff] }
 0x179   :  { %v1305_v63 = vsub.f32 %v1017_v46, %v10519_v23  ;;  %v1306_v39 = vsub.f32 %v1017_v46, %v10520_v0  ;;  %v1307_v4 = vsub.f32 %v1017_v46, %v10521_v12  ;;  %v1836_v60 = vadd.f32 %v1017_v46, %v10518_v62  ;;  %v10524_v62 = vld [vmem:[#allocation121_spill] sm:$0xff] }
 0x17a   :  { %v1469_v15 = vmax.f32 %v1468_v40, %v1304_v27  ;;  %v1837_v8 = vadd.f32 %v1017_v46, %v10519_v23  ;;  %v1838_v24 = vadd.f32 %v1017_v46, %v10520_v0  ;;  %v1839_v6 = vadd.f32 %v1017_v46, %v10521_v12  ;;  %2465 = vperm.xlu1 %4950, %v5007_v34   ;;  %v10522_v0 = vld [vmem:[#allocation119_spill] sm:$0xff]  ;;  %v10523_v12 = vld [vmem:[#allocation120_spill] sm:$0xff] }
 0x17b   :  { %v1538_v28 = vmax.f32 %v1537_v9, %v1305_v63  ;;  %v1607_v7 = vmax.f32 %v1606_v61, %v1306_v39  ;;  %v1676_v17 = vmax.f32 %v1675_v51, %v1307_v4  ;;  %v2001_v57 = vmin.f32 %v2000_v33, %v1836_v60  ;;  %2469 = vperm.xlu0 %4949, %v5008_v52   ;;  %v10525_v61 = vld [vmem:[#allocation122_spill] sm:$0xff]  ;;  %v1027_v52 = vpop.permute.xlu0 %1026 }
 0x17c   :  { %v2070_v27 = vmin.f32 %v2069_v45, %v1837_v8  ;;  %v2139_v40 = vmin.f32 %v2138_v19, %v1838_v24  ;;  %v2208_v25 = vmin.f32 %v2207_v16, %v1839_v6  ;;  %v1316_v46 = vsub.f32 %v7756_v18, %v10522_v0  ;;  %v5009_v39 = vld [vmem:[%s9470_s1 + $0x1c0] sm:$0xff]  ;;  %v5010_v6 = vld [vmem:[%s9470_s1 + $0x1c8] sm:$0xff] }
 0x17d   :  { %v1317_v23 = vsub.f32 %v7756_v18, %v10523_v12  ;;  %v1318_v9 = vsub.f32 %v7756_v18, %v10524_v62  ;;  %v1319_v51 = vsub.f32 %v7756_v18, %v10525_v61  ;;  %v7777_v33 = vadd.f32 %v7756_v18, %v10522_v0 }
 0x17e   :  { %v7781_v45 = vadd.f32 %v7756_v18, %v10523_v12  ;;  %v7785_v19 = vadd.f32 %v7756_v18, %v10524_v62  ;;  %v7789_v16 = vadd.f32 %v7756_v18, %v10525_v61  ;;  %v1470_v63 = vmax.f32 %v1469_v15, %v1308_v30  ;;  %2473 = vperm.xlu1 %4950, %v5009_v39   ;;  %v10526_v15 = vld [vmem:[#allocation123_spill] sm:$0xff]  ;;  %v10527_v62 = vld [vmem:[#allocation124_spill] sm:$0xff]  ;;  %v5012_v12 = vld [vmem:[%s9470_s1 + $0x1d8] sm:$0xff] }
 0x17f   :  { %v1539_v4 = vmax.f32 %v1538_v28, %v1309_v1  ;;  %v1608_v60 = vmax.f32 %v1607_v7, %v1310_v13  ;;  %v1677_v8 = vmax.f32 %v1676_v17, %v1311_v32  ;;  %v2002_v24 = vmin.f32 %v2001_v57, %v7727_v10  ;;  %2477 = vperm.xlu0 %4949, %v5010_v6   ;;  %v10528_v1 = vld [vmem:[#allocation125_spill] sm:$0xff]  ;;  %v10529_v32 = vld [vmem:[#allocation126_spill] sm:$0xff]  ;;  %v7806_v7 = vpop.permute.xlu1 %1041 }
 0x180   :  { %v2071_v34 = vmin.f32 %v2070_v27, %v7731_v3  ;;  %v2140_v18 = vmin.f32 %v2139_v40, %v7735_v21  ;;  %v2209_v30 = vmin.f32 %v2208_v25, %v7739_v26  ;;  %v1312_v61 = vsub.f32 %v1027_v52, %v10526_v15  ;;  %v5011_v25 = vld [vmem:[%s9470_s1 + $0x1d0] sm:$0xff] }
 0x181   :  { %v1313_v39 = vsub.f32 %v1027_v52, %v10527_v62  ;;  %v1314_v13 = vsub.f32 %v1027_v52, %v10528_v1  ;;  %v1315_v28 = vsub.f32 %v1027_v52, %v10529_v32  ;;  %v1844_v10 = vadd.f32 %v1027_v52, %v10526_v15  ;;  %v10532_v15 = vld [vmem:[#allocation129_spill] sm:$0xff] }
 0x182   :  { %v1471_v17 = vmax.f32 %v1470_v63, %v1312_v61  ;;  %v1845_v57 = vadd.f32 %v1027_v52, %v10527_v62  ;;  %v1846_v3 = vadd.f32 %v1027_v52, %v10528_v1  ;;  %v1847_v21 = vadd.f32 %v1027_v52, %v10529_v32  ;;  %2481 = vperm.xlu1 %4950, %v5011_v25   ;;  %v10530_v1 = vld [vmem:[#allocation127_spill] sm:$0xff]  ;;  %v10531_v32 = vld [vmem:[#allocation128_spill] sm:$0xff] }
 0x183   :  { %v1540_v26 = vmax.f32 %v1539_v4, %v1313_v39  ;;  %v1609_v27 = vmax.f32 %v1608_v60, %v1314_v13  ;;  %v1678_v40 = vmax.f32 %v1677_v8, %v1315_v28  ;;  %v2003_v6 = vmin.f32 %v2002_v24, %v1844_v10  ;;  %2485 = vperm.xlu0 %4949, %v5012_v12   ;;  %v10533_v60 = vld [vmem:[#allocation130_spill] sm:$0xff]  ;;  %v1037_v12 = vpop.permute.xlu0 %1036 }
 0x184   :  { %v2072_v61 = vmin.f32 %v2071_v34, %v1845_v57  ;;  %v2141_v63 = vmin.f32 %v2140_v18, %v1846_v3  ;;  %v2210_v0 = vmin.f32 %v2209_v30, %v1847_v21  ;;  %v1324_v52 = vsub.f32 %v7806_v7, %v10530_v1  ;;  %v5013_v13 = vld [vmem:[%s9470_s1 + $0x1e0] sm:$0xff]  ;;  %v5014_v21 = vld [vmem:[%s9470_s1 + $0x1e8] sm:$0xff] }
 0x185   :  { %v1325_v62 = vsub.f32 %v7806_v7, %v10531_v32  ;;  %v1326_v4 = vsub.f32 %v7806_v7, %v10532_v15  ;;  %v1327_v8 = vsub.f32 %v7806_v7, %v10533_v60  ;;  %v7827_v24 = vadd.f32 %v7806_v7, %v10530_v1 }
 0x186   :  { %v7831_v34 = vadd.f32 %v7806_v7, %v10531_v32  ;;  %v7835_v18 = vadd.f32 %v7806_v7, %v10532_v15  ;;  %v7839_v30 = vadd.f32 %v7806_v7, %v10533_v60  ;;  %v1472_v39 = vmax.f32 %v1471_v17, %v1316_v46  ;;  %2489 = vperm.xlu1 %4950, %v5013_v13   ;;  %v10534_v17 = vld [vmem:[#allocation131_spill] sm:$0xff]  ;;  %v10535_v15 = vld [vmem:[#allocation132_spill] sm:$0xff]  ;;  %v5016_v32 = vld [vmem:[%s9470_s1 + $0x1f8] sm:$0xff] }
 0x187   :  { %v1541_v28 = vmax.f32 %v1540_v26, %v1317_v23  ;;  %v1610_v10 = vmax.f32 %v1609_v27, %v1318_v9  ;;  %v1679_v57 = vmax.f32 %v1678_v40, %v1319_v51  ;;  %v2004_v3 = vmin.f32 %v2003_v6, %v7777_v33  ;;  %2493 = vperm.xlu0 %4949, %v5014_v21   ;;  %v10536_v23 = vld [vmem:[#allocation133_spill] sm:$0xff]  ;;  %v10537_v51 = vld [vmem:[#allocation134_spill] sm:$0xff]  ;;  %v7856_v27 = vpop.permute.xlu1 %1051 }
 0x188   :  { %v2073_v25 = vmin.f32 %v2072_v61, %v7781_v45  ;;  %v2142_v7 = vmin.f32 %v2141_v63, %v7785_v19  ;;  %v2211_v46 = vmin.f32 %v2210_v0, %v7789_v16  ;;  %v1320_v60 = vsub.f32 %v1037_v12, %v10534_v17  ;;  %v5015_v0 = vld [vmem:[%s9470_s1 + $0x1f0] sm:$0xff] }
 0x189   :  { %v1321_v13 = vsub.f32 %v1037_v12, %v10535_v15  ;;  %v1322_v9 = vsub.f32 %v1037_v12, %v10536_v23  ;;  %v1323_v26 = vsub.f32 %v1037_v12, %v10537_v51  ;;  %v1852_v33 = vadd.f32 %v1037_v12, %v10534_v17  ;;  %v10540_v17 = vld [vmem:[#allocation137_spill] sm:$0xff] }
 0x18a   :  { %v1473_v40 = vmax.f32 %v1472_v39, %v1320_v60  ;;  %v1853_v6 = vadd.f32 %v1037_v12, %v10535_v15  ;;  %v1854_v45 = vadd.f32 %v1037_v12, %v10536_v23  ;;  %v1855_v19 = vadd.f32 %v1037_v12, %v10537_v51  ;;  %2497 = vperm.xlu1 %4950, %v5015_v0   ;;  %v10538_v23 = vld [vmem:[#allocation135_spill] sm:$0xff]  ;;  %v10539_v51 = vld [vmem:[#allocation136_spill] sm:$0xff] }
 0x18b   :  { %v1542_v16 = vmax.f32 %v1541_v28, %v1321_v13  ;;  %v1611_v61 = vmax.f32 %v1610_v10, %v1322_v9  ;;  %v1680_v63 = vmax.f32 %v1679_v57, %v1323_v26  ;;  %v2005_v21 = vmin.f32 %v2004_v3, %v1852_v33  ;;  %2501 = vperm.xlu0 %4949, %v5016_v32   ;;  %v10541_v10 = vld [vmem:[#allocation138_spill] sm:$0xff]  ;;  %v1047_v13 = vpop.permute.xlu0 %1046 }
 0x18c   :  { %v2074_v60 = vmin.f32 %v2073_v25, %v1853_v6  ;;  %v2143_v39 = vmin.f32 %v2142_v7, %v1854_v45  ;;  %v2212_v1 = vmin.f32 %v2211_v46, %v1855_v19  ;;  %v1332_v12 = vsub.f32 %v7856_v27, %v10538_v23 }
 0x18d   :  { %v1333_v15 = vsub.f32 %v7856_v27, %v10539_v51  ;;  %v1334_v28 = vsub.f32 %v7856_v27, %v10540_v17  ;;  %v1335_v57 = vsub.f32 %v7856_v27, %v10541_v10  ;;  %v1864_v3 = vadd.f32 %v7856_v27, %v10538_v23  ;;  %v10542_v23 = vld [vmem:[#allocation139_spill] sm:$0xff] }
 0x18e   :  { %v1865_v32 = vadd.f32 %v7856_v27, %v10539_v51  ;;  %v1866_v25 = vadd.f32 %v7856_v27, %v10540_v17  ;;  %v1867_v7 = vadd.f32 %v7856_v27, %v10541_v10  ;;  %v1474_v46 = vmax.f32 %v1473_v40, %v1324_v52  ;;  %v10544_v17 = vld [vmem:[#allocation141_spill] sm:$0xff]  ;;  %v1062_v52 = vpop.permute.xlu1 %1061 }
 0x18f   :  { %v1543_v9 = vmax.f32 %v1542_v16, %v1325_v62  ;;  %v1612_v26 = vmax.f32 %v1611_v61, %v1326_v4  ;;  %v1681_v33 = vmax.f32 %v1680_v63, %v1327_v8  ;;  %v2006_v6 = vmin.f32 %v2005_v21, %v7827_v24  ;;  %v10546_v21 = vld [vmem:[#allocation143_spill] sm:$0xff] }
 0x190   :  { %v2075_v45 = vmin.f32 %v2074_v60, %v7831_v34  ;;  %v2144_v19 = vmin.f32 %v2143_v39, %v7835_v18  ;;  %v2213_v0 = vmin.f32 %v2212_v1, %v7839_v30  ;;  %v1328_v51 = vsub.f32 %v1047_v13, %v10542_v23  ;;  %v10547_v39 = vld [vmem:[#allocation144_spill] sm:$0xff] }
 0x191   :  { %v1329_v58 = vsub.f32 %v1047_v13, %v10543_v59  ;;  %v1330_v22 = vsub.f32 %v1047_v13, %v10544_v17  ;;  %v1331_v27 = vsub.f32 %v1047_v13, %v10545_v31  ;;  %v1860_v62 = vadd.f32 %v1047_v13, %v10542_v23  ;;  %v10548_v23 = vld [vmem:[#allocation145_spill] sm:$0xff] }
 0x192   :  { %v1475_v4 = vmax.f32 %v1474_v46, %v1328_v51  ;;  %v1861_v8 = vadd.f32 %v1047_v13, %v10543_v59  ;;  %v1862_v24 = vadd.f32 %v1047_v13, %v10544_v17  ;;  %v1863_v34 = vadd.f32 %v1047_v13, %v10545_v31  ;;  %v10549_v51 = vld [vmem:[#allocation146_spill] sm:$0xff]  ;;  %v1057_v17 = vpop.permute.xlu0 %1056  ;;  %v1072_v49 = vpop.permute.xlu1 %1071 }
 0x193   :  { %v1544_v18 = vmax.f32 %v1543_v9, %v1329_v58  ;;  %v1613_v1 = vmax.f32 %v1612_v26, %v1330_v22  ;;  %v1682_v30 = vmax.f32 %v1681_v33, %v1331_v27  ;;  %v2007_v40 = vmin.f32 %v2006_v6, %v1860_v62  ;;  %v10550_v62 = vld [vmem:[#allocation147_spill] sm:$0xff] }
 0x194   :  { %v2076_v16 = vmin.f32 %v2075_v45, %v1861_v8  ;;  %v2145_v61 = vmin.f32 %v2144_v19, %v1862_v24  ;;  %v2214_v63 = vmin.f32 %v2213_v0, %v1863_v34  ;;  %v1340_v60 = vsub.f32 %v1062_v52, %v10546_v21  ;;  %v10551_v24 = vld [vmem:[#allocation148_spill] sm:$0xff] }
 0x195   :  { %v1341_v10 = vsub.f32 %v1062_v52, %v10547_v39  ;;  %v1342_v5 = vsub.f32 %v1062_v52, %v10548_v23  ;;  %v1343_v46 = vsub.f32 %v1062_v52, %v10549_v51  ;;  %v1872_v59 = vadd.f32 %v1062_v52, %v10546_v21  ;;  %v10552_v21 = vld [vmem:[#allocation149_spill] sm:$0xff] }
 0x196   :  { %v1873_v13 = vadd.f32 %v1062_v52, %v10547_v39  ;;  %v1874_v22 = vadd.f32 %v1062_v52, %v10548_v23  ;;  %v1875_v58 = vadd.f32 %v1062_v52, %v10549_v51  ;;  %v1476_v9 = vmax.f32 %v1475_v4, %v1332_v12 }
 0x197   :  { %v1545_v26 = vmax.f32 %v1544_v18, %v1333_v15  ;;  %v1614_v33 = vmax.f32 %v1613_v1, %v1334_v28  ;;  %v1683_v6 = vmax.f32 %v1682_v30, %v1335_v57  ;;  %v2008_v45 = vmin.f32 %v2007_v40, %v1864_v3  ;;  %v10554_v1 = vld [vmem:[#allocation151_spill] sm:$0xff]  ;;  %v10555_v40 = vld [vmem:[#allocation152_spill] sm:$0xff] }
 0x198   :  { %v2077_v19 = vmin.f32 %v2076_v16, %v1865_v32  ;;  %v2146_v0 = vmin.f32 %v2145_v61, %v1866_v25  ;;  %v2215_v27 = vmin.f32 %v2214_v63, %v1867_v7  ;;  %v1336_v8 = vsub.f32 %v1057_v17, %v10550_v62  ;;  %v10556_v61 = vld [vmem:[#allocation153_spill] sm:$0xff] }
 0x199   :  { %v1337_v34 = vsub.f32 %v1057_v17, %v10551_v24  ;;  %v1338_v31 = vsub.f32 %v1057_v17, %v10552_v21  ;;  %v1339_v39 = vsub.f32 %v1057_v17, %v10553_v50  ;;  %v1868_v23 = vadd.f32 %v1057_v17, %v10550_v62  ;;  %v1082_v62 = vpop.permute.xlu1 %1081 }
 0x19a   :  { %v1477_v52 = vmax.f32 %v1476_v9, %v1336_v8  ;;  %v1869_v15 = vadd.f32 %v1057_v17, %v10551_v24  ;;  %v1870_v12 = vadd.f32 %v1057_v17, %v10552_v21  ;;  %v1871_v28 = vadd.f32 %v1057_v17, %v10553_v50  ;;  %v10557_v9 = vld [vmem:[#allocation154_spill] sm:$0xff]  ;;  %v1067_v21 = vpop.permute.xlu0 %1066 }
 0x19b   :  { %v1546_v57 = vmax.f32 %v1545_v26, %v1337_v34  ;;  %v1615_v3 = vmax.f32 %v1614_v33, %v1338_v31  ;;  %v1684_v32 = vmax.f32 %v1683_v6, %v1339_v39  ;;  %v2009_v25 = vmin.f32 %v2008_v45, %v1868_v23  ;;  %v10558_v34 = vld [vmem:[#allocation155_spill] sm:$0xff]  ;;  %v10561_v24 = vld [vmem:[#allocation158_spill] sm:$0xff] }
 0x19c   :  { %v2078_v7 = vmin.f32 %v2077_v19, %v1869_v15  ;;  %v2147_v4 = vmin.f32 %v2146_v0, %v1870_v12  ;;  %v2216_v18 = vmin.f32 %v2215_v27, %v1871_v28  ;;  %v1348_v30 = vsub.f32 %v1072_v49, %v10554_v1  ;;  %v10559_v12 = vld [vmem:[#allocation156_spill] sm:$0xff] }
 0x19d   :  { %v1349_v16 = vsub.f32 %v1072_v49, %v10555_v40  ;;  %v1350_v63 = vsub.f32 %v1072_v49, %v10556_v61  ;;  %v1351_v8 = vsub.f32 %v1072_v49, %v10557_v9  ;;  %v1880_v51 = vadd.f32 %v1072_v49, %v10554_v1  ;;  %v10560_v1 = vld [vmem:[#allocation157_spill] sm:$0xff] }
 0x19e   :  { %v1881_v17 = vadd.f32 %v1072_v49, %v10555_v40  ;;  %v1882_v31 = vadd.f32 %v1072_v49, %v10556_v61  ;;  %v1883_v23 = vadd.f32 %v1072_v49, %v10557_v9  ;;  %v1478_v39 = vmax.f32 %v1477_v52, %v1340_v60 }
 0x19f   :  { %v1547_v26 = vmax.f32 %v1546_v57, %v1341_v10  ;;  %v1616_v33 = vmax.f32 %v1615_v3, %v1342_v5  ;;  %v1685_v6 = vmax.f32 %v1684_v32, %v1343_v46  ;;  %v2010_v45 = vmin.f32 %v2009_v25, %v1872_v59  ;;  %v10562_v3 = vld [vmem:[#allocation159_spill] sm:$0xff]  ;;  %v10563_v25 = vld [vmem:[#allocation160_spill] sm:$0xff] }
 0x1a0   :  { %v2079_v19 = vmin.f32 %v2078_v7, %v1873_v13  ;;  %v2148_v0 = vmin.f32 %v2147_v4, %v1874_v22  ;;  %v2217_v27 = vmin.f32 %v2216_v18, %v1875_v58  ;;  %v1344_v15 = vsub.f32 %v1067_v21, %v10558_v34  ;;  %v10564_v4 = vld [vmem:[#allocation161_spill] sm:$0xff] }
 0x1a1   :  { %v1345_v28 = vsub.f32 %v1067_v21, %v10559_v12  ;;  %v1346_v50 = vsub.f32 %v1067_v21, %v10560_v1  ;;  %v1347_v40 = vsub.f32 %v1067_v21, %v10561_v24  ;;  %v1876_v61 = vadd.f32 %v1067_v21, %v10558_v34  ;;  %v1092_v34 = vpop.permute.xlu1 %1091 }
 0x1a2   :  { %v1479_v49 = vmax.f32 %v1478_v39, %v1344_v15  ;;  %v1877_v10 = vadd.f32 %v1067_v21, %v10559_v12  ;;  %v1878_v5 = vadd.f32 %v1067_v21, %v10560_v1  ;;  %v1879_v59 = vadd.f32 %v1067_v21, %v10561_v24  ;;  %v10565_v39 = vld [vmem:[#allocation162_spill] sm:$0xff]  ;;  %v1077_v1 = vpop.permute.xlu0 %1076 }
 0x1a3   :  { %v1548_v60 = vmax.f32 %v1547_v26, %v1345_v28  ;;  %v1617_v46 = vmax.f32 %v1616_v33, %v1346_v50  ;;  %v1686_v13 = vmax.f32 %v1685_v6, %v1347_v40  ;;  %v2011_v22 = vmin.f32 %v2010_v45, %v1876_v61  ;;  %v10566_v28 = vld [vmem:[#allocation163_spill] sm:$0xff]  ;;  %v10569_v12 = vld [vmem:[#allocation166_spill] sm:$0xff] }
 0x1a4   :  { %v2080_v58 = vmin.f32 %v2079_v19, %v1877_v10  ;;  %v2149_v52 = vmin.f32 %v2148_v0, %v1878_v5  ;;  %v2218_v57 = vmin.f32 %v2217_v27, %v1879_v59  ;;  %v1356_v32 = vsub.f32 %v1082_v62, %v10562_v3  ;;  %v10567_v5 = vld [vmem:[#allocation164_spill] sm:$0xff] }
 0x1a5   :  { %v1357_v7 = vsub.f32 %v1082_v62, %v10563_v25  ;;  %v1358_v18 = vsub.f32 %v1082_v62, %v10564_v4  ;;  %v1359_v15 = vsub.f32 %v1082_v62, %v10565_v39  ;;  %v1888_v9 = vadd.f32 %v1082_v62, %v10562_v3  ;;  %v10568_v3 = vld [vmem:[#allocation165_spill] sm:$0xff] }
 0x1a6   :  { %v1889_v21 = vadd.f32 %v1082_v62, %v10563_v25  ;;  %v1890_v50 = vadd.f32 %v1082_v62, %v10564_v4  ;;  %v1891_v40 = vadd.f32 %v1082_v62, %v10565_v39  ;;  %v1480_v61 = vmax.f32 %v1479_v49, %v1348_v30 }
 0x1a7   :  { %v1549_v26 = vmax.f32 %v1548_v60, %v1349_v16  ;;  %v1618_v33 = vmax.f32 %v1617_v46, %v1350_v63  ;;  %v1687_v6 = vmax.f32 %v1686_v13, %v1351_v8  ;;  %v2012_v45 = vmin.f32 %v2011_v22, %v1880_v51  ;;  %v10570_v46 = vld [vmem:[#allocation167_spill] sm:$0xff]  ;;  %v10571_v22 = vld [vmem:[#allocation168_spill] sm:$0xff] }
 0x1a8   :  { %v2081_v19 = vmin.f32 %v2080_v58, %v1881_v17  ;;  %v2150_v0 = vmin.f32 %v2149_v52, %v1882_v31  ;;  %v2219_v27 = vmin.f32 %v2218_v57, %v1883_v23  ;;  %v1352_v10 = vsub.f32 %v1077_v1, %v10566_v28  ;;  %v10572_v52 = vld [vmem:[#allocation169_spill] sm:$0xff] }
 0x1a9   :  { %v1353_v59 = vsub.f32 %v1077_v1, %v10567_v5  ;;  %v1354_v24 = vsub.f32 %v1077_v1, %v10568_v3  ;;  %v1355_v25 = vsub.f32 %v1077_v1, %v10569_v12  ;;  %v1884_v4 = vadd.f32 %v1077_v1, %v10566_v28  ;;  %v1102_v28 = vpop.permute.xlu1 %1101 }
 0x1aa   :  { %v1481_v62 = vmax.f32 %v1480_v61, %v1352_v10  ;;  %v1885_v30 = vadd.f32 %v1077_v1, %v10567_v5  ;;  %v1886_v16 = vadd.f32 %v1077_v1, %v10568_v3  ;;  %v1887_v51 = vadd.f32 %v1077_v1, %v10569_v12  ;;  %v10573_v61 = vld [vmem:[#allocation170_spill] sm:$0xff]  ;;  %v1087_v3 = vpop.permute.xlu0 %1086 }
 0x1ab   :  { %v1550_v63 = vmax.f32 %v1549_v26, %v1353_v59  ;;  %v1619_v8 = vmax.f32 %v1618_v33, %v1354_v24  ;;  %v1688_v17 = vmax.f32 %v1687_v6, %v1355_v25  ;;  %v2013_v31 = vmin.f32 %v2012_v45, %v1884_v4  ;;  %v10574_v59 = vld [vmem:[#allocation171_spill] sm:$0xff]  ;;  %v10577_v5 = vld [vmem:[#allocation174_spill] sm:$0xff] }
 0x1ac   :  { %v2082_v23 = vmin.f32 %v2081_v19, %v1885_v30  ;;  %v2151_v49 = vmin.f32 %v2150_v0, %v1886_v16  ;;  %v2220_v60 = vmin.f32 %v2219_v27, %v1887_v51  ;;  %v1364_v13 = vsub.f32 %v1092_v34, %v10570_v46  ;;  %v10575_v16 = vld [vmem:[#allocation172_spill] sm:$0xff] }
 0x1ad   :  { %v1365_v58 = vsub.f32 %v1092_v34, %v10571_v22  ;;  %v1366_v57 = vsub.f32 %v1092_v34, %v10572_v52  ;;  %v1367_v10 = vsub.f32 %v1092_v34, %v10573_v61  ;;  %v1896_v39 = vadd.f32 %v1092_v34, %v10570_v46  ;;  %v10576_v46 = vld [vmem:[#allocation173_spill] sm:$0xff] }
 0x1ae   :  { %v1897_v1 = vadd.f32 %v1092_v34, %v10571_v22  ;;  %v1898_v24 = vadd.f32 %v1092_v34, %v10572_v52  ;;  %v1899_v25 = vadd.f32 %v1092_v34, %v10573_v61  ;;  %v1482_v4 = vmax.f32 %v1481_v62, %v1356_v32 }
 0x1af   :  { %v1551_v26 = vmax.f32 %v1550_v63, %v1357_v7  ;;  %v1620_v33 = vmax.f32 %v1619_v8, %v1358_v18  ;;  %v1689_v6 = vmax.f32 %v1688_v17, %v1359_v15  ;;  %v2014_v45 = vmin.f32 %v2013_v31, %v1888_v9  ;;  %v10578_v8 = vld [vmem:[#allocation175_spill] sm:$0xff]  ;;  %v10579_v31 = vld [vmem:[#allocation176_spill] sm:$0xff] }
 0x1b0   :  { %v2083_v19 = vmin.f32 %v2082_v23, %v1889_v21  ;;  %v2152_v0 = vmin.f32 %v2151_v49, %v1890_v50  ;;  %v2221_v27 = vmin.f32 %v2220_v60, %v1891_v40  ;;  %v1360_v30 = vsub.f32 %v1087_v3, %v10574_v59  ;;  %v10580_v49 = vld [vmem:[#allocation177_spill] sm:$0xff] }
 0x1b1   :  { %v1361_v51 = vsub.f32 %v1087_v3, %v10575_v16  ;;  %v1362_v12 = vsub.f32 %v1087_v3, %v10576_v46  ;;  %v1363_v22 = vsub.f32 %v1087_v3, %v10577_v5  ;;  %v1892_v52 = vadd.f32 %v1087_v3, %v10574_v59  ;;  %v1112_v59 = vpop.permute.xlu1 %1111 }
 0x1b2   :  { %v1483_v34 = vmax.f32 %v1482_v4, %v1360_v30  ;;  %v1893_v32 = vadd.f32 %v1087_v3, %v10575_v16  ;;  %v1894_v7 = vadd.f32 %v1087_v3, %v10576_v46  ;;  %v1895_v9 = vadd.f32 %v1087_v3, %v10577_v5  ;;  %v10581_v4 = vld [vmem:[#allocation178_spill] sm:$0xff]  ;;  %v1097_v46 = vpop.permute.xlu0 %1096 }
 0x1b3   :  { %v1552_v18 = vmax.f32 %v1551_v26, %v1361_v51  ;;  %v1621_v15 = vmax.f32 %v1620_v33, %v1362_v12  ;;  %v1690_v21 = vmax.f32 %v1689_v6, %v1363_v22  ;;  %v2015_v50 = vmin.f32 %v2014_v45, %v1892_v52  ;;  %v10582_v51 = vld [vmem:[#allocation179_spill] sm:$0xff]  ;;  %v10585_v16 = vld [vmem:[#allocation182_spill] sm:$0xff] }
 0x1b4   :  { %v2084_v40 = vmin.f32 %v2083_v19, %v1893_v32  ;;  %v2153_v62 = vmin.f32 %v2152_v0, %v1894_v7  ;;  %v2222_v63 = vmin.f32 %v2221_v27, %v1895_v9  ;;  %v1372_v17 = vsub.f32 %v1102_v28, %v10578_v8  ;;  %v10583_v7 = vld [vmem:[#allocation180_spill] sm:$0xff] }
 0x1b5   :  { %v1373_v23 = vsub.f32 %v1102_v28, %v10579_v31  ;;  %v1374_v60 = vsub.f32 %v1102_v28, %v10580_v49  ;;  %v1375_v30 = vsub.f32 %v1102_v28, %v10581_v4  ;;  %v1904_v61 = vadd.f32 %v1102_v28, %v10578_v8  ;;  %v10584_v8 = vld [vmem:[#allocation181_spill] sm:$0xff] }
 0x1b6   :  { %v1905_v3 = vadd.f32 %v1102_v28, %v10579_v31  ;;  %v1906_v12 = vadd.f32 %v1102_v28, %v10580_v49  ;;  %v1907_v22 = vadd.f32 %v1102_v28, %v10581_v4  ;;  %v1484_v52 = vmax.f32 %v1483_v34, %v1364_v13 }
 0x1b7   :  { %v1553_v26 = vmax.f32 %v1552_v18, %v1365_v58  ;;  %v1622_v33 = vmax.f32 %v1621_v15, %v1366_v57  ;;  %v1691_v6 = vmax.f32 %v1690_v21, %v1367_v10  ;;  %v2016_v45 = vmin.f32 %v2015_v50, %v1896_v39  ;;  %v10586_v15 = vld [vmem:[#allocation183_spill] sm:$0xff]  ;;  %v10587_v50 = vld [vmem:[#allocation184_spill] sm:$0xff] }
 0x1b8   :  { %v2085_v19 = vmin.f32 %v2084_v40, %v1897_v1  ;;  %v2154_v0 = vmin.f32 %v2153_v62, %v1898_v24  ;;  %v2223_v27 = vmin.f32 %v2222_v63, %v1899_v25  ;;  %v1368_v32 = vsub.f32 %v1097_v46, %v10582_v51  ;;  %v10588_v62 = vld [vmem:[#allocation185_spill] sm:$0xff] }
 0x1b9   :  { %v1369_v9 = vsub.f32 %v1097_v46, %v10583_v7  ;;  %v1370_v5 = vsub.f32 %v1097_v46, %v10584_v8  ;;  %v1371_v31 = vsub.f32 %v1097_v46, %v10585_v16  ;;  %v1900_v49 = vadd.f32 %v1097_v46, %v10582_v51  ;;  %v1122_v51 = vpop.permute.xlu1 %1121 }
 0x1ba   :  { %v1485_v28 = vmax.f32 %v1484_v52, %v1368_v32  ;;  %v1901_v13 = vadd.f32 %v1097_v46, %v10583_v7  ;;  %v1902_v58 = vadd.f32 %v1097_v46, %v10584_v8  ;;  %v1903_v39 = vadd.f32 %v1097_v46, %v10585_v16  ;;  %v10589_v52 = vld [vmem:[#allocation186_spill] sm:$0xff]  ;;  %v1107_v8 = vpop.permute.xlu0 %1106 }
 0x1bb   :  { %v1554_v57 = vmax.f32 %v1553_v26, %v1369_v9  ;;  %v1623_v10 = vmax.f32 %v1622_v33, %v1370_v5  ;;  %v1692_v1 = vmax.f32 %v1691_v6, %v1371_v31  ;;  %v2017_v24 = vmin.f32 %v2016_v45, %v1900_v49  ;;  %v10590_v9 = vld [vmem:[#allocation187_spill] sm:$0xff]  ;;  %v10593_v7 = vld [vmem:[#allocation190_spill] sm:$0xff] }
 0x1bc   :  { %v2086_v25 = vmin.f32 %v2085_v19, %v1901_v13  ;;  %v2155_v34 = vmin.f32 %v2154_v0, %v1902_v58  ;;  %v2224_v18 = vmin.f32 %v2223_v27, %v1903_v39  ;;  %v1380_v21 = vsub.f32 %v1112_v59, %v10586_v15  ;;  %v10591_v58 = vld [vmem:[#allocation188_spill] sm:$0xff] }
 0x1bd   :  { %v1381_v40 = vsub.f32 %v1112_v59, %v10587_v50  ;;  %v1382_v63 = vsub.f32 %v1112_v59, %v10588_v62  ;;  %v1383_v32 = vsub.f32 %v1112_v59, %v10589_v52  ;;  %v1912_v4 = vadd.f32 %v1112_v59, %v10586_v15  ;;  %v10592_v15 = vld [vmem:[#allocation189_spill] sm:$0xff] }
 0x1be   :  { %v1913_v46 = vadd.f32 %v1112_v59, %v10587_v50  ;;  %v1914_v5 = vadd.f32 %v1112_v59, %v10588_v62  ;;  %v1915_v31 = vadd.f32 %v1112_v59, %v10589_v52  ;;  %v1486_v49 = vmax.f32 %v1485_v28, %v1372_v17 }
 0x1bf   :  { %v1555_v26 = vmax.f32 %v1554_v57, %v1373_v23  ;;  %v1624_v33 = vmax.f32 %v1623_v10, %v1374_v60  ;;  %v1693_v6 = vmax.f32 %v1692_v1, %v1375_v30  ;;  %v2018_v45 = vmin.f32 %v2017_v24, %v1904_v61  ;;  %v10594_v10 = vld [vmem:[#allocation191_spill] sm:$0xff]  ;;  %v10595_v24 = vld [vmem:[#allocation192_spill] sm:$0xff] }
 0x1c0   :  { %v2087_v19 = vmin.f32 %v2086_v25, %v1905_v3  ;;  %v2156_v0 = vmin.f32 %v2155_v34, %v1906_v12  ;;  %v2225_v27 = vmin.f32 %v2224_v18, %v1907_v22  ;;  %v1376_v13 = vsub.f32 %v1107_v8, %v10590_v9  ;;  %v10596_v34 = vld [vmem:[#allocation193_spill] sm:$0xff] }
 0x1c1   :  { %v1377_v39 = vsub.f32 %v1107_v8, %v10591_v58  ;;  %v1378_v16 = vsub.f32 %v1107_v8, %v10592_v15  ;;  %v1379_v50 = vsub.f32 %v1107_v8, %v10593_v7  ;;  %v1908_v62 = vadd.f32 %v1107_v8, %v10590_v9  ;;  %v1132_v9 = vpop.permute.xlu1 %1131 }
 0x1c2   :  { %v1487_v59 = vmax.f32 %v1486_v49, %v1376_v13  ;;  %v1909_v17 = vadd.f32 %v1107_v8, %v10591_v58  ;;  %v1910_v23 = vadd.f32 %v1107_v8, %v10592_v15  ;;  %v1911_v61 = vadd.f32 %v1107_v8, %v10593_v7  ;;  %v10597_v49 = vld [vmem:[#allocation194_spill] sm:$0xff]  ;;  %v1117_v15 = vpop.permute.xlu0 %1116 }
 0x1c3   :  { %v1556_v60 = vmax.f32 %v1555_v26, %v1377_v39  ;;  %v1625_v30 = vmax.f32 %v1624_v33, %v1378_v16  ;;  %v1694_v3 = vmax.f32 %v1693_v6, %v1379_v50  ;;  %v2019_v12 = vmin.f32 %v2018_v45, %v1908_v62  ;;  %v10598_v39 = vld [vmem:[#allocation195_spill] sm:$0xff]  ;;  %v10601_v58 = vld [vmem:[#allocation198_spill] sm:$0xff] }
 0x1c4   :  { %v2088_v22 = vmin.f32 %v2087_v19, %v1909_v17  ;;  %v2157_v28 = vmin.f32 %v2156_v0, %v1910_v23  ;;  %v2226_v57 = vmin.f32 %v2225_v27, %v1911_v61  ;;  %v1388_v1 = vsub.f32 %v1122_v51, %v10594_v10  ;;  %v10599_v23 = vld [vmem:[#allocation196_spill] sm:$0xff] }
 0x1c5   :  { %v1389_v25 = vsub.f32 %v1122_v51, %v10595_v24  ;;  %v1390_v18 = vsub.f32 %v1122_v51, %v10596_v34  ;;  %v1391_v13 = vsub.f32 %v1122_v51, %v10597_v49  ;;  %v1920_v52 = vadd.f32 %v1122_v51, %v10594_v10  ;;  %v10600_v10 = vld [vmem:[#allocation197_spill] sm:$0xff] }
 0x1c6   :  { %v1921_v8 = vadd.f32 %v1122_v51, %v10595_v24  ;;  %v1922_v16 = vadd.f32 %v1122_v51, %v10596_v34  ;;  %v1923_v50 = vadd.f32 %v1122_v51, %v10597_v49  ;;  %v1488_v62 = vmax.f32 %v1487_v59, %v1380_v21 }
 0x1c7   :  { %v1557_v26 = vmax.f32 %v1556_v60, %v1381_v40  ;;  %v1626_v33 = vmax.f32 %v1625_v30, %v1382_v63  ;;  %v1695_v6 = vmax.f32 %v1694_v3, %v1383_v32  ;;  %v2020_v45 = vmin.f32 %v2019_v12, %v1912_v4  ;;  %v10602_v30 = vld [vmem:[#allocation199_spill] sm:$0xff]  ;;  %v10603_v12 = vld [vmem:[#allocation200_spill] sm:$0xff] }
 0x1c8   :  { %v2089_v19 = vmin.f32 %v2088_v22, %v1913_v46  ;;  %v2158_v0 = vmin.f32 %v2157_v28, %v1914_v5  ;;  %v2227_v27 = vmin.f32 %v2226_v57, %v1915_v31  ;;  %v1384_v17 = vsub.f32 %v1117_v15, %v10598_v39  ;;  %v10604_v28 = vld [vmem:[#allocation201_spill] sm:$0xff] }
 0x1c9   :  { %v1385_v61 = vsub.f32 %v1117_v15, %v10599_v23  ;;  %v1386_v7 = vsub.f32 %v1117_v15, %v10600_v10  ;;  %v1387_v24 = vsub.f32 %v1117_v15, %v10601_v58  ;;  %v1916_v34 = vadd.f32 %v1117_v15, %v10598_v39  ;;  %v1142_v39 = vpop.permute.xlu1 %1141 }
 0x1ca   :  { %v1489_v51 = vmax.f32 %v1488_v62, %v1384_v17  ;;  %v1917_v21 = vadd.f32 %v1117_v15, %v10599_v23  ;;  %v1918_v40 = vadd.f32 %v1117_v15, %v10600_v10  ;;  %v1919_v4 = vadd.f32 %v1117_v15, %v10601_v58  ;;  %v10605_v62 = vld [vmem:[#allocation202_spill] sm:$0xff]  ;;  %v1127_v10 = vpop.permute.xlu0 %1126 }
 0x1cb   :  { %v1558_v63 = vmax.f32 %v1557_v26, %v1385_v61  ;;  %v1627_v32 = vmax.f32 %v1626_v33, %v1386_v7  ;;  %v1696_v46 = vmax.f32 %v1695_v6, %v1387_v24  ;;  %v2021_v5 = vmin.f32 %v2020_v45, %v1916_v34  ;;  %v10606_v61 = vld [vmem:[#allocation203_spill] sm:$0xff]  ;;  %v10609_v23 = vld [vmem:[#allocation206_spill] sm:$0xff] }
 0x1cc   :  { %v2090_v31 = vmin.f32 %v2089_v19, %v1917_v21  ;;  %v2159_v59 = vmin.f32 %v2158_v0, %v1918_v40  ;;  %v2228_v60 = vmin.f32 %v2227_v27, %v1919_v4  ;;  %v1396_v3 = vsub.f32 %v1132_v9, %v10602_v30  ;;  %v10607_v40 = vld [vmem:[#allocation204_spill] sm:$0xff] }
 0x1cd   :  { %v1397_v22 = vsub.f32 %v1132_v9, %v10603_v12  ;;  %v1398_v57 = vsub.f32 %v1132_v9, %v10604_v28  ;;  %v1399_v17 = vsub.f32 %v1132_v9, %v10605_v62  ;;  %v1928_v49 = vadd.f32 %v1132_v9, %v10602_v30  ;;  %v10608_v30 = vld [vmem:[#allocation205_spill] sm:$0xff] }
 0x1ce   :  { %v1929_v15 = vadd.f32 %v1132_v9, %v10603_v12  ;;  %v1930_v7 = vadd.f32 %v1132_v9, %v10604_v28  ;;  %v1931_v24 = vadd.f32 %v1132_v9, %v10605_v62  ;;  %v1490_v34 = vmax.f32 %v1489_v51, %v1388_v1 }
 0x1cf   :  { %v1559_v26 = vmax.f32 %v1558_v63, %v1389_v25  ;;  %v1628_v33 = vmax.f32 %v1627_v32, %v1390_v18  ;;  %v1697_v6 = vmax.f32 %v1696_v46, %v1391_v13  ;;  %v2022_v45 = vmin.f32 %v2021_v5, %v1920_v52  ;;  %v10610_v32 = vld [vmem:[#allocation207_spill] sm:$0xff]  ;;  %v10611_v5 = vld [vmem:[#allocation208_spill] sm:$0xff] }
 0x1d0   :  { %v2091_v19 = vmin.f32 %v2090_v31, %v1921_v8  ;;  %v2160_v0 = vmin.f32 %v2159_v59, %v1922_v16  ;;  %v2229_v27 = vmin.f32 %v2228_v60, %v1923_v50  ;;  %v1392_v21 = vsub.f32 %v1127_v10, %v10606_v61  ;;  %v10612_v59 = vld [vmem:[#allocation209_spill] sm:$0xff] }
 0x1d1   :  { %v1393_v4 = vsub.f32 %v1127_v10, %v10607_v40  ;;  %v1394_v58 = vsub.f32 %v1127_v10, %v10608_v30  ;;  %v1395_v12 = vsub.f32 %v1127_v10, %v10609_v23  ;;  %v1924_v28 = vadd.f32 %v1127_v10, %v10606_v61  ;;  %v1152_v61 = vpop.permute.xlu1 %1151 }
 0x1d2   :  { %v1491_v9 = vmax.f32 %v1490_v34, %v1392_v21  ;;  %v1925_v1 = vadd.f32 %v1127_v10, %v10607_v40  ;;  %v1926_v25 = vadd.f32 %v1127_v10, %v10608_v30  ;;  %v1927_v52 = vadd.f32 %v1127_v10, %v10609_v23  ;;  %v10613_v34 = vld [vmem:[#allocation210_spill] sm:$0xff]  ;;  %v1137_v30 = vpop.permute.xlu0 %1136 }
 0x1d3   :  { %v1560_v18 = vmax.f32 %v1559_v26, %v1393_v4  ;;  %v1629_v13 = vmax.f32 %v1628_v33, %v1394_v58  ;;  %v1698_v8 = vmax.f32 %v1697_v6, %v1395_v12  ;;  %v2023_v16 = vmin.f32 %v2022_v45, %v1924_v28  ;;  %v10614_v4 = vld [vmem:[#allocation211_spill] sm:$0xff]  ;;  %v10617_v40 = vld [vmem:[#allocation214_spill] sm:$0xff] }
 0x1d4   :  { %v2092_v50 = vmin.f32 %v2091_v19, %v1925_v1  ;;  %v2161_v51 = vmin.f32 %v2160_v0, %v1926_v25  ;;  %v2230_v63 = vmin.f32 %v2229_v27, %v1927_v52  ;;  %v1404_v46 = vsub.f32 %v1142_v39, %v10610_v32  ;;  %v10615_v25 = vld [vmem:[#allocation212_spill] sm:$0xff] }
 0x1d5   :  { %v1405_v31 = vsub.f32 %v1142_v39, %v10611_v5  ;;  %v1406_v60 = vsub.f32 %v1142_v39, %v10612_v59  ;;  %v1407_v21 = vsub.f32 %v1142_v39, %v10613_v34  ;;  %v1936_v62 = vadd.f32 %v1142_v39, %v10610_v32  ;;  %v10616_v32 = vld [vmem:[#allocation213_spill] sm:$0xff] }
 0x1d6   :  { %v1937_v10 = vadd.f32 %v1142_v39, %v10611_v5  ;;  %v1938_v58 = vadd.f32 %v1142_v39, %v10612_v59  ;;  %v1939_v12 = vadd.f32 %v1142_v39, %v10613_v34  ;;  %v1492_v28 = vmax.f32 %v1491_v9, %v1396_v3 }
 0x1d7   :  { %v1561_v26 = vmax.f32 %v1560_v18, %v1397_v22  ;;  %v1630_v33 = vmax.f32 %v1629_v13, %v1398_v57  ;;  %v1699_v6 = vmax.f32 %v1698_v8, %v1399_v17  ;;  %v2024_v45 = vmin.f32 %v2023_v16, %v1928_v49  ;;  %v10618_v13 = vld [vmem:[#allocation215_spill] sm:$0xff]  ;;  %v10619_v16 = vld [vmem:[#allocation216_spill] sm:$0xff] }
 0x1d8   :  { %v2093_v19 = vmin.f32 %v2092_v50, %v1929_v15  ;;  %v2162_v0 = vmin.f32 %v2161_v51, %v1930_v7  ;;  %v2231_v27 = vmin.f32 %v2230_v63, %v1931_v24  ;;  %v1400_v1 = vsub.f32 %v1137_v30, %v10614_v4  ;;  %v10620_v51 = vld [vmem:[#allocation217_spill] sm:$0xff] }
 0x1d9   :  { %v1401_v52 = vsub.f32 %v1137_v30, %v10615_v25  ;;  %v1402_v23 = vsub.f32 %v1137_v30, %v10616_v32  ;;  %v1403_v5 = vsub.f32 %v1137_v30, %v10617_v40  ;;  %v1932_v59 = vadd.f32 %v1137_v30, %v10614_v4  ;;  %v1162_v4 = vpop.permute.xlu1 %1161 }
 0x1da   :  { %v1493_v39 = vmax.f32 %v1492_v28, %v1400_v1  ;;  %v1933_v3 = vadd.f32 %v1137_v30, %v10615_v25  ;;  %v1934_v22 = vadd.f32 %v1137_v30, %v10616_v32  ;;  %v1935_v49 = vadd.f32 %v1137_v30, %v10617_v40  ;;  %v10621_v28 = vld [vmem:[#allocation218_spill] sm:$0xff]  ;;  %v1147_v32 = vpop.permute.xlu0 %1146 }
 0x1db   :  { %v1562_v57 = vmax.f32 %v1561_v26, %v1401_v52  ;;  %v1631_v17 = vmax.f32 %v1630_v33, %v1402_v23  ;;  %v1700_v15 = vmax.f32 %v1699_v6, %v1403_v5  ;;  %v2025_v7 = vmin.f32 %v2024_v45, %v1932_v59  ;;  %v10622_v52 = vld [vmem:[#allocation219_spill] sm:$0xff]  ;;  %v10625_v25 = vld [vmem:[#allocation222_spill] sm:$0xff] }
 0x1dc   :  { %v2094_v24 = vmin.f32 %v2093_v19, %v1933_v3  ;;  %v2163_v9 = vmin.f32 %v2162_v0, %v1934_v22  ;;  %v2232_v18 = vmin.f32 %v2231_v27, %v1935_v49  ;;  %v1412_v8 = vsub.f32 %v1152_v61, %v10618_v13  ;;  %v10623_v22 = vld [vmem:[#allocation220_spill] sm:$0xff] }
 0x1dd   :  { %v1413_v50 = vsub.f32 %v1152_v61, %v10619_v16  ;;  %v1414_v63 = vsub.f32 %v1152_v61, %v10620_v51  ;;  %v1415_v1 = vsub.f32 %v1152_v61, %v10621_v28  ;;  %v1944_v34 = vadd.f32 %v1152_v61, %v10618_v13  ;;  %v10624_v13 = vld [vmem:[#allocation221_spill] sm:$0xff] }
 0x1de   :  { %v1945_v30 = vadd.f32 %v1152_v61, %v10619_v16  ;;  %v1946_v23 = vadd.f32 %v1152_v61, %v10620_v51  ;;  %v1947_v5 = vadd.f32 %v1152_v61, %v10621_v28  ;;  %v1494_v59 = vmax.f32 %v1493_v39, %v1404_v46 }
 0x1df   :  { %v1563_v26 = vmax.f32 %v1562_v57, %v1405_v31  ;;  %v1632_v33 = vmax.f32 %v1631_v17, %v1406_v60  ;;  %v1701_v6 = vmax.f32 %v1700_v15, %v1407_v21  ;;  %v2026_v45 = vmin.f32 %v2025_v7, %v1936_v62  ;;  %v10626_v17 = vld [vmem:[#allocation223_spill] sm:$0xff]  ;;  %v10627_v7 = vld [vmem:[#allocation224_spill] sm:$0xff] }
 0x1e0   :  { %v2095_v19 = vmin.f32 %v2094_v24, %v1937_v10  ;;  %v2164_v0 = vmin.f32 %v2163_v9, %v1938_v58  ;;  %v2233_v27 = vmin.f32 %v2232_v18, %v1939_v12  ;;  %v1408_v3 = vsub.f32 %v1147_v32, %v10622_v52  ;;  %v10628_v9 = vld [vmem:[#allocation225_spill] sm:$0xff] }
 0x1e1   :  { %v1409_v49 = vsub.f32 %v1147_v32, %v10623_v22  ;;  %v1410_v40 = vsub.f32 %v1147_v32, %v10624_v13  ;;  %v1411_v16 = vsub.f32 %v1147_v32, %v10625_v25  ;;  %v1940_v51 = vadd.f32 %v1147_v32, %v10622_v52  ;;  %v1172_v52 = vpop.permute.xlu1 %1171 }
 0x1e2   :  { %v1495_v61 = vmax.f32 %v1494_v59, %v1408_v3  ;;  %v1941_v46 = vadd.f32 %v1147_v32, %v10623_v22  ;;  %v1942_v31 = vadd.f32 %v1147_v32, %v10624_v13  ;;  %v1943_v62 = vadd.f32 %v1147_v32, %v10625_v25  ;;  %v10629_v59 = vld [vmem:[#allocation226_spill] sm:$0xff]  ;;  %v1157_v13 = vpop.permute.xlu0 %1156 }
 0x1e3   :  { %v1564_v60 = vmax.f32 %v1563_v26, %v1409_v49  ;;  %v1633_v21 = vmax.f32 %v1632_v33, %v1410_v40  ;;  %v1702_v10 = vmax.f32 %v1701_v6, %v1411_v16  ;;  %v2027_v58 = vmin.f32 %v2026_v45, %v1940_v51  ;;  %v10630_v49 = vld [vmem:[#allocation227_spill] sm:$0xff]  ;;  %v10633_v22 = vld [vmem:[#allocation230_spill] sm:$0xff] }
 0x1e4   :  { %v2096_v12 = vmin.f32 %v2095_v19, %v1941_v46  ;;  %v2165_v39 = vmin.f32 %v2164_v0, %v1942_v31  ;;  %v2234_v57 = vmin.f32 %v2233_v27, %v1943_v62  ;;  %v1420_v15 = vsub.f32 %v1162_v4, %v10626_v17  ;;  %v10631_v31 = vld [vmem:[#allocation228_spill] sm:$0xff] }
 0x1e5   :  { %v1421_v24 = vsub.f32 %v1162_v4, %v10627_v7  ;;  %v1422_v18 = vsub.f32 %v1162_v4, %v10628_v9  ;;  %v1423_v3 = vsub.f32 %v1162_v4, %v10629_v59  ;;  %v1952_v28 = vadd.f32 %v1162_v4, %v10626_v17  ;;  %v10632_v17 = vld [vmem:[#allocation229_spill] sm:$0xff] }
 0x1e6   :  { %v1953_v32 = vadd.f32 %v1162_v4, %v10627_v7  ;;  %v1954_v40 = vadd.f32 %v1162_v4, %v10628_v9  ;;  %v1955_v16 = vadd.f32 %v1162_v4, %v10629_v59  ;;  %v1496_v51 = vmax.f32 %v1495_v61, %v1412_v8 }
 0x1e7   :  { %v1565_v26 = vmax.f32 %v1564_v60, %v1413_v50  ;;  %v1634_v33 = vmax.f32 %v1633_v21, %v1414_v63  ;;  %v1703_v6 = vmax.f32 %v1702_v10, %v1415_v1  ;;  %v2028_v45 = vmin.f32 %v2027_v58, %v1944_v34  ;;  %v10634_v21 = vld [vmem:[#allocation231_spill] sm:$0xff]  ;;  %v10635_v58 = vld [vmem:[#allocation232_spill] sm:$0xff] }
 0x1e8   :  { %v2097_v19 = vmin.f32 %v2096_v12, %v1945_v30  ;;  %v2166_v0 = vmin.f32 %v2165_v39, %v1946_v23  ;;  %v2235_v27 = vmin.f32 %v2234_v57, %v1947_v5  ;;  %v1416_v46 = vsub.f32 %v1157_v13, %v10630_v49  ;;  %v10636_v39 = vld [vmem:[#allocation233_spill] sm:$0xff] }
 0x1e9   :  { %v1417_v62 = vsub.f32 %v1157_v13, %v10631_v31  ;;  %v1418_v25 = vsub.f32 %v1157_v13, %v10632_v17  ;;  %v1419_v7 = vsub.f32 %v1157_v13, %v10633_v22  ;;  %v1948_v9 = vadd.f32 %v1157_v13, %v10630_v49  ;;  %v1182_v49 = vpop.permute.xlu1 %1181 }
 0x1ea   :  { %v1497_v4 = vmax.f32 %v1496_v51, %v1416_v46  ;;  %v1949_v8 = vadd.f32 %v1157_v13, %v10631_v31  ;;  %v1950_v50 = vadd.f32 %v1157_v13, %v10632_v17  ;;  %v1951_v34 = vadd.f32 %v1157_v13, %v10633_v22  ;;  %v10637_v51 = vld [vmem:[#allocation234_spill] sm:$0xff]  ;;  %v1167_v17 = vpop.permute.xlu0 %1166 }
 0x1eb   :  { %v1566_v63 = vmax.f32 %v1565_v26, %v1417_v62  ;;  %v1635_v1 = vmax.f32 %v1634_v33, %v1418_v25  ;;  %v1704_v30 = vmax.f32 %v1703_v6, %v1419_v7  ;;  %v2029_v23 = vmin.f32 %v2028_v45, %v1948_v9  ;;  %v10638_v62 = vld [vmem:[#allocation235_spill] sm:$0xff]  ;;  %v10641_v31 = vld [vmem:[#allocation238_spill] sm:$0xff] }
 0x1ec   :  { %v2098_v5 = vmin.f32 %v2097_v19, %v1949_v8  ;;  %v2167_v61 = vmin.f32 %v2166_v0, %v1950_v50  ;;  %v2236_v60 = vmin.f32 %v2235_v27, %v1951_v34  ;;  %v1428_v10 = vsub.f32 %v1172_v52, %v10634_v21  ;;  %v10639_v50 = vld [vmem:[#allocation236_spill] sm:$0xff] }
 0x1ed   :  { %v1429_v12 = vsub.f32 %v1172_v52, %v10635_v58  ;;  %v1430_v57 = vsub.f32 %v1172_v52, %v10636_v39  ;;  %v1431_v46 = vsub.f32 %v1172_v52, %v10637_v51  ;;  %v1960_v59 = vadd.f32 %v1172_v52, %v10634_v21  ;;  %v10640_v21 = vld [vmem:[#allocation237_spill] sm:$0xff] }
 0x1ee   :  { %v1961_v13 = vadd.f32 %v1172_v52, %v10635_v58  ;;  %v1962_v25 = vadd.f32 %v1172_v52, %v10636_v39  ;;  %v1963_v7 = vadd.f32 %v1172_v52, %v10637_v51  ;;  %v1498_v9 = vmax.f32 %v1497_v4, %v1420_v15 }
 0x1ef   :  { %v1567_v26 = vmax.f32 %v1566_v63, %v1421_v24  ;;  %v1636_v33 = vmax.f32 %v1635_v1, %v1422_v18  ;;  %v1705_v6 = vmax.f32 %v1704_v30, %v1423_v3  ;;  %v2030_v45 = vmin.f32 %v2029_v23, %v1952_v28  ;;  %v10642_v1 = vld [vmem:[#allocation239_spill] sm:$0xff]  ;;  %v10643_v23 = vld [vmem:[#allocation240_spill] sm:$0xff] }
 0x1f0   :  { %v2099_v19 = vmin.f32 %v2098_v5, %v1953_v32  ;;  %v2168_v0 = vmin.f32 %v2167_v61, %v1954_v40  ;;  %v2237_v27 = vmin.f32 %v2236_v60, %v1955_v16  ;;  %v1424_v8 = vsub.f32 %v1167_v17, %v10638_v62  ;;  %v10644_v61 = vld [vmem:[#allocation241_spill] sm:$0xff] }
 0x1f1   :  { %v1425_v34 = vsub.f32 %v1167_v17, %v10639_v50  ;;  %v1426_v22 = vsub.f32 %v1167_v17, %v10640_v21  ;;  %v1427_v58 = vsub.f32 %v1167_v17, %v10641_v31  ;;  %v1956_v39 = vadd.f32 %v1167_v17, %v10638_v62 }
 0x1f2   :  { %v1499_v52 = vmax.f32 %v1498_v9, %v1424_v8  ;;  %v1957_v15 = vadd.f32 %v1167_v17, %v10639_v50  ;;  %v1958_v24 = vadd.f32 %v1167_v17, %v10640_v21  ;;  %v1959_v28 = vadd.f32 %v1167_v17, %v10641_v31  ;;  %v10645_v9 = vld [vmem:[#allocation242_spill] sm:$0xff]  ;;  %v1177_v21 = vpop.permute.xlu0 %1176 }
 0x1f3   :  { %v1568_v18 = vmax.f32 %v1567_v26, %v1425_v34  ;;  %v1637_v3 = vmax.f32 %v1636_v33, %v1426_v22  ;;  %v1706_v32 = vmax.f32 %v1705_v6, %v1427_v58  ;;  %v2031_v40 = vmin.f32 %v2030_v45, %v1956_v39  ;;  %v10646_v34 = vld [vmem:[#allocation243_spill] sm:$0xff] }
 0x1f4   :  { %v2100_v16 = vmin.f32 %v2099_v19, %v1957_v15  ;;  %v2169_v4 = vmin.f32 %v2168_v0, %v1958_v24  ;;  %v2238_v63 = vmin.f32 %v2237_v27, %v1959_v28  ;;  %v1436_v30 = vsub.f32 %v1182_v49, %v10642_v1  ;;  %v10647_v24 = vld [vmem:[#allocation244_spill] sm:$0xff] }
 0x1f5   :  { %v1437_v5 = vsub.f32 %v1182_v49, %v10643_v23  ;;  %v1438_v60 = vsub.f32 %v1182_v49, %v10644_v61  ;;  %v1439_v8 = vsub.f32 %v1182_v49, %v10645_v9  ;;  %v1968_v51 = vadd.f32 %v1182_v49, %v10642_v1 }
 0x1f6   :  { %v1969_v17 = vadd.f32 %v1182_v49, %v10643_v23  ;;  %v1970_v22 = vadd.f32 %v1182_v49, %v10644_v61  ;;  %v1971_v58 = vadd.f32 %v1182_v49, %v10645_v9  ;;  %v1500_v39 = vmax.f32 %v1499_v52, %v1428_v10 }
 0x1f7   :  { %v1569_v26 = vmax.f32 %v1568_v18, %v1429_v12  ;;  %v1638_v33 = vmax.f32 %v1637_v3, %v1430_v57  ;;  %v1707_v6 = vmax.f32 %v1706_v32, %v1431_v46  ;;  %v2032_v45 = vmin.f32 %v2031_v40, %v1960_v59 }
 0x1f8   :  { %v2101_v19 = vmin.f32 %v2100_v16, %v1961_v13  ;;  %v2170_v0 = vmin.f32 %v2169_v4, %v1962_v25  ;;  %v2239_v27 = vmin.f32 %v2238_v63, %v1963_v7  ;;  %v1432_v15 = vsub.f32 %v1177_v21, %v10646_v34 }
 0x1f9   :  { %v1433_v28 = vsub.f32 %v1177_v21, %v10647_v24  ;;  %v1434_v1 = vsub.f32 %v1177_v21, %v7065_v29  ;;  %v1435_v23 = vsub.f32 %v1177_v21, %v7081_v2  ;;  %v1964_v61 = vadd.f32 %v1177_v21, %v10646_v34 }
 0x1fa   :  { %v1501_v31 = vmax.f32 %v1500_v39, %v1432_v15  ;;  %v1965_v49 = vadd.f32 %v1177_v21, %v10647_v24  ;;  %v1966_v10 = vadd.f32 %v1177_v21, %v7065_v29  ;;  %v1967_v59 = vadd.f32 %v1177_v21, %v7081_v2 }
 0x1fb   :  { %v1570_v12 = vmax.f32 %v1569_v26, %v1433_v28  ;;  %v1639_v57 = vmax.f32 %v1638_v33, %v1434_v1  ;;  %v1708_v46 = vmax.f32 %v1707_v6, %v1435_v23  ;;  %v2033_v13 = vmin.f32 %v2032_v45, %v1964_v61 }
 0x1fc   :  { %v1502_v25 = vmax.f32 %v1501_v31, %v1436_v30  ;;  %v2102_v7 = vmin.f32 %v2101_v19, %v1965_v49  ;;  %v2171_v52 = vmin.f32 %v2170_v0, %v1966_v10  ;;  %v2240_v18 = vmin.f32 %v2239_v27, %v1967_v59 }
 0x1fd   :  { %v1571_v3 = vmax.f32 %v1570_v12, %v1437_v5  ;;  %v1640_v32 = vmax.f32 %v1639_v57, %v1438_v60  ;;  %v1709_v40 = vmax.f32 %v1708_v46, %v1439_v8  ;;  %v2034_v16 = vmin.f32 %v2033_v13, %v1968_v51 }
 0x1fe   :  { %v1503_v4 = vrot.slane %v1502_v25, 4  ;;  %v2103_v63 = vmin.f32 %v2102_v7, %v1969_v17  ;;  %v2172_v39 = vmin.f32 %v2171_v52, %v1970_v22  ;;  %v2241_v15 = vmin.f32 %v2240_v18, %v1971_v58 }
 0x1ff   :  { %v1572_v9 = vrot.slane %v1571_v3, 4  ;;  %v1641_v29 = vrot.slane %v1640_v32, 4  ;;  %v1710_v24 = vrot.slane %v1709_v40, 4  ;;  %v2035_v21 = vrot.slane %v2034_v16, 4 }
 0x200   :  { %v1504_v26 = vmax.f32 %v1502_v25, %v1503_v4  ;;  %v2104_v1 = vrot.slane %v2103_v63, 4  ;;  %v2173_v23 = vrot.slane %v2172_v39, 4  ;;  %v2242_v61 = vrot.slane %v2241_v15, 4  ;;  %v2254_v25 = vpop.permute.xlu1 %2253 }
 0x201   :  { %v1573_v31 = vmax.f32 %v1571_v3, %v1572_v9  ;;  %v1642_v30 = vmax.f32 %v1640_v32, %v1641_v29  ;;  %v1711_v33 = vmax.f32 %v1709_v40, %v1710_v24  ;;  %v2036_v6 = vmin.f32 %v2034_v16, %v2035_v21  ;;  %v2250_v16 = vpop.permute.xlu0 %2249 }
 0x202   :  { %v1505_v5 = vrot.slane %v1504_v26, 2  ;;  %v2105_v60 = vmin.f32 %v2103_v63, %v2104_v1  ;;  %v2174_v8 = vmin.f32 %v2172_v39, %v2173_v23  ;;  %v2243_v51 = vmin.f32 %v2241_v15, %v2242_v61  ;;  %v10654_v15 = vld [vmem:[#allocation11_spill] sm:$0xff]  ;;  %v10656_v23 = vld [vmem:[#allocation13_spill] sm:$0xff] }
 0x203   :  { %v1574_v45 = vrot.slane %v1573_v31, 2  ;;  %v1643_v17 = vrot.slane %v1642_v30, 2  ;;  %v1712_v22 = vrot.slane %v1711_v33, 2  ;;  %v2037_v58 = vrot.slane %v2036_v6, 2 }
 0x204   :  { %v1506_v19 = vmax.f32 %v1504_v26, %v1505_v5  ;;  %v2106_v0 = vrot.slane %v2105_v60, 2  ;;  %v2175_v27 = vrot.slane %v2174_v8, 2  ;;  %v2244_v28 = vrot.slane %v2243_v51, 2  ;;  %v10655_v26 = vld [vmem:[#allocation12_spill] sm:$0xff] }
 0x205   :  { %v1575_v49 = vmax.f32 %v1573_v31, %v1574_v45  ;;  %v1644_v10 = vmax.f32 %v1642_v30, %v1643_v17  ;;  %v1713_v59 = vmax.f32 %v1711_v33, %v1712_v22  ;;  %v2038_v12 = vmin.f32 %v2036_v6, %v2037_v58  ;;  %v10657_v31 = vld [vmem:[#allocation14_spill] sm:$0xff]  ;;  %v10659_v45 = vld [vmem:[#allocation5_spill] sm:$0xff] }
 0x206   :  { %v1507_v9 = vrot.slane %v1506_v19, 1  ;;  %v2107_v29 = vmin.f32 %v2105_v60, %v2106_v0  ;;  %v8103_v52 = vmin.f32 %v2174_v8, %v2175_v27  ;;  %v8111_v40 = vmin.f32 %v2243_v51, %v2244_v28  ;;  %v10658_v8 = vld [vmem:[#allocation4_spill] sm:$0xff]  ;;  %v10660_v22 = vld [vmem:[#allocation6_spill] sm:$0xff]  ;;  %v2258_v27 = vpop.permute.xlu1 %2257 }
 0x207   :  { %v1576_v24 = vrot.slane %v1575_v49, 1  ;;  %v1645_v57 = vrot.slane %v1644_v10, 1  ;;  %v1714_v46 = vrot.slane %v1713_v59, 1  ;;  %v2039_v13 = vrot.slane %v2038_v12, 1 }
 0x208   :  { %v2108_v7 = vrot.slane %v2107_v29, 1  ;;  %v8105_v18 = vmax.f32 %v1506_v19, %v1507_v9  ;;  %v2508_v21 = vsub.f32 %v2254_v25, %v10654_v15  ;;  %v2509_v1 = vsub.f32 %v2254_v25, %v10655_v26 }
 0x209   :  { %v8107_v3 = vmax.f32 %v1575_v49, %v1576_v24  ;;  %v8109_v32 = vmax.f32 %v1644_v10, %v1645_v57  ;;  %v8113_v4 = vmax.f32 %v1713_v59, %v1714_v46  ;;  %v8115_v63 = vmin.f32 %v2038_v12, %v2039_v13 }
 0x20a   :  { %10648 = vst [vmem:[#allocation247_spill] sm:$0xff] %v8105_v18  ;;  %v8117_v39 = vmin.f32 %v2107_v29, %v2108_v7  ;;  %v2510_v61 = vsub.f32 %v2254_v25, %v10656_v23  ;;  %v2511_v30 = vsub.f32 %v2254_v25, %v10657_v31  ;;  %v3040_v33 = vadd.f32 %v2254_v25, %v10654_v15  ;;  %v10661_v7 = vld [vmem:[#allocation2_spill] sm:$0xff] }
 0x20b   :  { %10649 = vst [vmem:[#allocation248_spill] sm:$0xff] %v8107_v3  ;;  %10650 = vst [vmem:[#allocation249_spill] sm:$0xff] %v8109_v32  ;;  %v3041_v6 = vadd.f32 %v2254_v25, %v10655_v26  ;;  %v3042_v5 = vadd.f32 %v2254_v25, %v10656_v23  ;;  %v3043_v60 = vadd.f32 %v2254_v25, %v10657_v31  ;;  %v2262_v32 = vpop.permute.xlu0 %2261 }
 0x20c   :  { %10651 = vst [vmem:[#allocation250_spill] sm:$0xff] %v8113_v4  ;;  %10652 = vst [vmem:[#allocation251_spill] sm:$0xff] %v8115_v63  ;;  %v2504_v51 = vsub.f32 %v2250_v16, %v10658_v8  ;;  %v2505_v17 = vsub.f32 %v2250_v16, %v10659_v45  ;;  %v2506_v58 = vsub.f32 %v2250_v16, %v10660_v22  ;;  %v10662_v63 = vld [vmem:[#allocation3_spill] sm:$0xff] }
 0x20d   :  { %10653 = vst [vmem:[#allocation252_spill] sm:$0xff] %v8117_v39  ;;  %v2507_v19 = vsub.f32 %v2250_v16, %v5357_v20  ;;  %v3036_v0 = vadd.f32 %v2250_v16, %v10658_v8  ;;  %v3037_v49 = vadd.f32 %v2250_v16, %v10659_v45  ;;  %v3038_v10 = vadd.f32 %v2250_v16, %v10660_v22 }
 0x20e   :  { %v2760_v28 = vmax.f32 %v2504_v51, %v2508_v21  ;;  %v3039_v59 = vadd.f32 %v2250_v16, %v5357_v20  ;;  %v2829_v12 = vmax.f32 %v2505_v17, %v2509_v1  ;;  %v2898_v9 = vmax.f32 %v2506_v58, %v2510_v61 }
 0x20f   :  { %v2967_v29 = vmax.f32 %v2507_v19, %v2511_v30  ;;  %v3292_v24 = vmin.f32 %v3036_v0, %v3040_v33  ;;  %v3361_v57 = vmin.f32 %v3037_v49, %v3041_v6  ;;  %v3430_v46 = vmin.f32 %v3038_v10, %v3042_v5  ;;  %v10663_v19 = vld [vmem:[#allocation7_spill] sm:$0xff]  ;;  %v10664_v49 = vld [vmem:[#allocation8_spill] sm:$0xff] }
 0x210   :  { %v3499_v13 = vmin.f32 %v3039_v59, %v3043_v60  ;;  %v2512_v25 = vsub.f32 %v2258_v27, %v5324_v11  ;;  %v2513_v39 = vsub.f32 %v2258_v27, %v10661_v7  ;;  %v2514_v4 = vsub.f32 %v2258_v27, %v10662_v63  ;;  %v10665_v59 = vld [vmem:[#allocation9_spill] sm:$0xff] }
 0x211   :  { %v2515_v21 = vsub.f32 %v2258_v27, %v5333_v14  ;;  %v3044_v51 = vadd.f32 %v2258_v27, %v5324_v11  ;;  %v3045_v16 = vadd.f32 %v2258_v27, %v10661_v7  ;;  %v3046_v1 = vadd.f32 %v2258_v27, %v10662_v63 }
 0x212   :  { %v2761_v3 = vmax.f32 %v2760_v28, %v2512_v25  ;;  %v3047_v61 = vadd.f32 %v2258_v27, %v5333_v14  ;;  %v2830_v30 = vmax.f32 %v2829_v12, %v2513_v39  ;;  %v2899_v33 = vmax.f32 %v2898_v9, %v2514_v4  ;;  %v10666_v28 = vld [vmem:[#allocation10_spill] sm:$0xff]  ;;  %v2266_v12 = vpop.permute.xlu1 %2265 }
 0x213   :  { %v2968_v6 = vmax.f32 %v2967_v29, %v2515_v21  ;;  %v3293_v5 = vmin.f32 %v3292_v24, %v3044_v51  ;;  %v3362_v60 = vmin.f32 %v3361_v57, %v3045_v16  ;;  %v3431_v17 = vmin.f32 %v3430_v46, %v3046_v1 }
 0x214   :  { %v3500_v58 = vmin.f32 %v3499_v13, %v3047_v61  ;;  %v2516_v0 = vsub.f32 %v2262_v32, %v10663_v19  ;;  %v2517_v10 = vsub.f32 %v2262_v32, %v10664_v49  ;;  %v2518_v18 = vsub.f32 %v2262_v32, %v10665_v59 }
 0x215   :  { %v2519_v25 = vsub.f32 %v2262_v32, %v10666_v28  ;;  %v3048_v7 = vadd.f32 %v2262_v32, %v10663_v19  ;;  %v3049_v27 = vadd.f32 %v2262_v32, %v10664_v49  ;;  %v3050_v4 = vadd.f32 %v2262_v32, %v10665_v59 }
 0x216   :  { %v2762_v63 = vmax.f32 %v2761_v3, %v2516_v0  ;;  %v3051_v39 = vadd.f32 %v2262_v32, %v10666_v28  ;;  %v2831_v9 = vmax.f32 %v2830_v30, %v2517_v10  ;;  %v2900_v29 = vmax.f32 %v2899_v33, %v2518_v18  ;;  %v5017_v18 = vld [vmem:[%s9470_s1] sm:$0xff] }
 0x217   :  { %v2969_v24 = vmax.f32 %v2968_v6, %v2519_v25  ;;  %v3294_v57 = vmin.f32 %v3293_v5, %v3048_v7  ;;  %v3363_v46 = vmin.f32 %v3362_v60, %v3049_v27  ;;  %v3432_v13 = vmin.f32 %v3431_v17, %v3050_v4  ;;  %v5018_v7 = vld [vmem:[%s9470_s1 + $0x8] sm:$0xff]  ;;  %v2270_v5 = vpop.permute.xlu0 %2269 }
 0x218   :  { %v3501_v21 = vmin.f32 %v3500_v58, %v3051_v39  ;;  %v5084_v16 = vmov 2   ;;  %v2520_v3 = vsub.f32 %v2266_v12, %v5450_v41  ;;  %v2521_v1 = vsub.f32 %v2266_v12, %v5455_v42 }
 0x219   :  { %4951 = vset.pattern.permute.xlu1 %v5084_v16  ;;  %4952 = vset.pattern.permute.xlu0 %v5084_v16  ;;  %v2522_v61 = vsub.f32 %v2266_v12, %v5460_v43  ;;  %v2523_v30 = vsub.f32 %v2266_v12, %v5465_v44  ;;  %v3052_v33 = vadd.f32 %v2266_v12, %v5450_v41 }
 0x21a   :  { %3569 = vperm.xlu1 %4951, %v5017_v18   ;;  %3573 = vperm.xlu0 %4952, %v5018_v7   ;;  %v3053_v6 = vadd.f32 %v2266_v12, %v5455_v42  ;;  %v2763_v60 = vmax.f32 %v2762_v63, %v2520_v3  ;;  %v2832_v17 = vmax.f32 %v2831_v9, %v2521_v1 }
 0x21b   :  { %v2901_v58 = vmax.f32 %v2900_v29, %v2522_v61  ;;  %v3054_v0 = vadd.f32 %v2266_v12, %v5460_v43  ;;  %v2970_v10 = vmax.f32 %v2969_v24, %v2523_v30  ;;  %v3055_v25 = vadd.f32 %v2266_v12, %v5465_v44  ;;  %v5019_v12 = vld [vmem:[%s9470_s1 + $0x10] sm:$0xff]  ;;  %v2274_v29 = vpop.permute.xlu1 %2273 }
 0x21c   :  { %v3295_v27 = vmin.f32 %v3294_v57, %v3052_v33  ;;  %v3364_v4 = vmin.f32 %v3363_v46, %v3053_v6  ;;  %v2524_v16 = vsub.f32 %v2270_v5, %v5426_v35  ;;  %v2525_v18 = vsub.f32 %v2270_v5, %v5431_v36 }
 0x21d   :  { %v3433_v39 = vmin.f32 %v3432_v13, %v3054_v0  ;;  %v2526_v7 = vsub.f32 %v2270_v5, %v5436_v37  ;;  %v3502_v32 = vmin.f32 %v3501_v21, %v3055_v25  ;;  %v2527_v51 = vsub.f32 %v2270_v5, %v5441_v38  ;;  %v5020_v21 = vld [vmem:[%s9470_s1 + $0x20] sm:$0xff] }
 0x21e   :  { %v3056_v63 = vadd.f32 %v2270_v5, %v5426_v35  ;;  %v3057_v9 = vadd.f32 %v2270_v5, %v5431_v36  ;;  %3577 = vperm.xlu1 %4951, %v5019_v12   ;;  %v2764_v24 = vmax.f32 %v2763_v60, %v2524_v16  ;;  %v2833_v57 = vmax.f32 %v2832_v17, %v2525_v18  ;;  %v2278_v18 = vpop.permute.xlu0 %2277  ;;  %v10784_v35 = vld [vmem:[#allocation142_spill] sm:$0xff] }
 0x21f   :  { %v2902_v46 = vmax.f32 %v2901_v58, %v2526_v7  ;;  %v3058_v13 = vadd.f32 %v2270_v5, %v5436_v37  ;;  %3585 = vperm.xlu0 %4952, %v5020_v21   ;;  %v2971_v3 = vmax.f32 %v2970_v10, %v2527_v51  ;;  %v3059_v1 = vadd.f32 %v2270_v5, %v5441_v38  ;;  %v5021_v51 = vld [vmem:[%s9470_s1 + $0x18] sm:$0xff] }
 0x220   :  { %v3296_v61 = vmin.f32 %v3295_v27, %v3056_v63  ;;  %v3365_v30 = vmin.f32 %v3364_v4, %v3057_v9  ;;  %v2528_v6 = vsub.f32 %v2274_v29, %v5504_v53  ;;  %v2529_v0 = vsub.f32 %v2274_v29, %v5509_v54  ;;  %v10783_v38 = vld [vmem:[#allocation141_spill] sm:$0xff] }
 0x221   :  { %v3434_v33 = vmin.f32 %v3433_v39, %v3058_v13  ;;  %v2530_v60 = vsub.f32 %v2274_v29, %v5514_v55  ;;  %v3503_v17 = vmin.f32 %v3502_v32, %v3059_v1  ;;  %v2531_v58 = vsub.f32 %v2274_v29, %v5519_v56  ;;  %v5022_v32 = vld [vmem:[%s9470_s1 + $0x30] sm:$0xff]  ;;  %v10668_v1 = vld [vmem:[#allocation22_spill] sm:$0xff] }
 0x222   :  { %v3060_v25 = vadd.f32 %v2274_v29, %v5504_v53  ;;  %v3061_v16 = vadd.f32 %v2274_v29, %v5509_v54  ;;  %3581 = vperm.xlu1 %4951, %v5021_v51   ;;  %v2765_v5 = vmax.f32 %v2764_v24, %v2528_v6  ;;  %v2834_v10 = vmax.f32 %v2833_v57, %v2529_v0  ;;  %v10667_v24 = vld [vmem:[#allocation21_spill] sm:$0xff]  ;;  %v2282_v51 = vpop.permute.xlu1 %2281 }
 0x223   :  { %v2903_v27 = vmax.f32 %v2902_v46, %v2530_v60  ;;  %v3062_v4 = vadd.f32 %v2274_v29, %v5514_v55  ;;  %3593 = vperm.xlu0 %4952, %v5022_v32   ;;  %v2972_v39 = vmax.f32 %v2971_v3, %v2531_v58  ;;  %v3063_v7 = vadd.f32 %v2274_v29, %v5519_v56  ;;  %v5023_v29 = vld [vmem:[%s9470_s1 + $0x28] sm:$0xff] }
 0x224   :  { %v3297_v63 = vmin.f32 %v3296_v61, %v3060_v25  ;;  %v3366_v9 = vmin.f32 %v3365_v30, %v3061_v16  ;;  %v2532_v13 = vsub.f32 %v2278_v18, %v5480_v47  ;;  %v2533_v21 = vsub.f32 %v2278_v18, %v5485_v48 }
 0x225   :  { %v3435_v12 = vmin.f32 %v3434_v33, %v3062_v4  ;;  %v2534_v57 = vsub.f32 %v2278_v18, %v10667_v24  ;;  %v3504_v46 = vmin.f32 %v3503_v17, %v3063_v7  ;;  %v2535_v6 = vsub.f32 %v2278_v18, %v10668_v1  ;;  %v5024_v17 = vld [vmem:[%s9470_s1 + $0x40] sm:$0xff]  ;;  %v10669_v7 = vld [vmem:[#allocation27_spill] sm:$0xff] }
 0x226   :  { %v3064_v0 = vadd.f32 %v2278_v18, %v5480_v47  ;;  %v3065_v60 = vadd.f32 %v2278_v18, %v5485_v48  ;;  %3589 = vperm.xlu1 %4951, %v5023_v29   ;;  %v2766_v3 = vmax.f32 %v2765_v5, %v2532_v13  ;;  %v2835_v61 = vmax.f32 %v2834_v10, %v2533_v21  ;;  %v10670_v47 = vld [vmem:[#allocation28_spill] sm:$0xff]  ;;  %v10671_v5 = vld [vmem:[#allocation29_spill] sm:$0xff]  ;;  %v10672_v13 = vld [vmem:[#allocation30_spill] sm:$0xff] }
 0x227   :  { %v2904_v30 = vmax.f32 %v2903_v27, %v2534_v57  ;;  %v3066_v33 = vadd.f32 %v2278_v18, %v10667_v24  ;;  %3601 = vperm.xlu0 %4952, %v5024_v17   ;;  %v2973_v58 = vmax.f32 %v2972_v39, %v2535_v6  ;;  %v3067_v25 = vadd.f32 %v2278_v18, %v10668_v1  ;;  %v2286_v17 = vpop.permute.xlu0 %2285  ;;  %v5025_v18 = vld [vmem:[%s9470_s1 + $0x38] sm:$0xff]  ;;  %v10673_v1 = vld [vmem:[#allocation23_spill] sm:$0xff] }
 0x228   :  { %v3298_v16 = vmin.f32 %v3297_v63, %v3064_v0  ;;  %v3367_v4 = vmin.f32 %v3366_v9, %v3065_v60  ;;  %v2536_v48 = vsub.f32 %v2282_v51, %v10669_v7  ;;  %v2537_v29 = vsub.f32 %v2282_v51, %v10670_v47 }
 0x229   :  { %v3436_v32 = vmin.f32 %v3435_v12, %v3066_v33  ;;  %v2538_v10 = vsub.f32 %v2282_v51, %v10671_v5  ;;  %v3505_v27 = vmin.f32 %v3504_v46, %v3067_v25  ;;  %v2539_v21 = vsub.f32 %v2282_v51, %v10672_v13  ;;  %v5026_v46 = vld [vmem:[%s9470_s1 + $0x50] sm:$0xff] }
 0x22a   :  { %v3068_v57 = vadd.f32 %v2282_v51, %v10669_v7  ;;  %v3069_v24 = vadd.f32 %v2282_v51, %v10670_v47  ;;  %3597 = vperm.xlu1 %4951, %v5025_v18   ;;  %v2767_v39 = vmax.f32 %v2766_v3, %v2536_v48  ;;  %v2836_v63 = vmax.f32 %v2835_v61, %v2537_v29  ;;  %v10674_v7 = vld [vmem:[#allocation24_spill] sm:$0xff]  ;;  %v10675_v48 = vld [vmem:[#allocation25_spill] sm:$0xff] }
 0x22b   :  { %v2905_v9 = vmax.f32 %v2904_v30, %v2538_v10  ;;  %v3070_v12 = vadd.f32 %v2282_v51, %v10671_v5  ;;  %3609 = vperm.xlu0 %4952, %v5026_v46   ;;  %v2974_v6 = vmax.f32 %v2973_v58, %v2539_v21  ;;  %v3071_v0 = vadd.f32 %v2282_v51, %v10672_v13  ;;  %v10676_v30 = vld [vmem:[#allocation26_spill] sm:$0xff]  ;;  %v2290_v46 = vpop.permute.xlu1 %2289  ;;  %v5027_v51 = vld [vmem:[%s9470_s1 + $0x48] sm:$0xff]  ;;  %v10678_v13 = vld [vmem:[#allocation36_spill] sm:$0xff] }
 0x22c   :  { %v3299_v60 = vmin.f32 %v3298_v16, %v3068_v57  ;;  %v3368_v33 = vmin.f32 %v3367_v4, %v3069_v24  ;;  %v2540_v47 = vsub.f32 %v2286_v17, %v10673_v1  ;;  %v2541_v18 = vsub.f32 %v2286_v17, %v10674_v7 }
 0x22d   :  { %v3437_v25 = vmin.f32 %v3436_v32, %v3070_v12  ;;  %v2542_v3 = vsub.f32 %v2286_v17, %v10675_v48  ;;  %v3506_v61 = vmin.f32 %v3505_v27, %v3071_v0  ;;  %v2543_v29 = vsub.f32 %v2286_v17, %v10676_v30  ;;  %v5028_v32 = vld [vmem:[%s9470_s1 + $0x60] sm:$0xff] }
 0x22e   :  { %v3072_v10 = vadd.f32 %v2286_v17, %v10673_v1  ;;  %v3073_v5 = vadd.f32 %v2286_v17, %v10674_v7  ;;  %3605 = vperm.xlu1 %4951, %v5027_v51   ;;  %v2768_v24 = vmax.f32 %v2767_v39, %v2540_v47  ;;  %v2837_v58 = vmax.f32 %v2836_v63, %v2541_v18  ;;  %v10677_v7 = vld [vmem:[#allocation35_spill] sm:$0xff]  ;;  %v10679_v47 = vld [vmem:[#allocation37_spill] sm:$0xff] }
 0x22f   :  { %v2906_v16 = vmax.f32 %v2905_v9, %v2542_v3  ;;  %v3074_v4 = vadd.f32 %v2286_v17, %v10675_v48  ;;  %3617 = vperm.xlu0 %4952, %v5028_v32   ;;  %v2975_v27 = vmax.f32 %v2974_v6, %v2543_v29  ;;  %v3075_v21 = vadd.f32 %v2286_v17, %v10676_v30  ;;  %v10680_v9 = vld [vmem:[#allocation38_spill] sm:$0xff]  ;;  %v2294_v32 = vpop.permute.xlu0 %2293  ;;  %v5029_v17 = vld [vmem:[%s9470_s1 + $0x58] sm:$0xff]  ;;  %v10681_v30 = vld [vmem:[#allocation31_spill] sm:$0xff] }
 0x230   :  { %v3300_v57 = vmin.f32 %v3299_v60, %v3072_v10  ;;  %v3369_v12 = vmin.f32 %v3368_v33, %v3073_v5  ;;  %v2544_v1 = vsub.f32 %v2290_v46, %v10677_v7  ;;  %v2545_v51 = vsub.f32 %v2290_v46, %v10678_v13 }
 0x231   :  { %v3438_v0 = vmin.f32 %v3437_v25, %v3074_v4  ;;  %v2546_v39 = vsub.f32 %v2290_v46, %v10679_v47  ;;  %v3507_v63 = vmin.f32 %v3506_v61, %v3075_v21  ;;  %v2547_v18 = vsub.f32 %v2290_v46, %v10680_v9  ;;  %v5030_v25 = vld [vmem:[%s9470_s1 + $0x70] sm:$0xff] }
 0x232   :  { %v3076_v3 = vadd.f32 %v2290_v46, %v10677_v7  ;;  %v3077_v48 = vadd.f32 %v2290_v46, %v10678_v13  ;;  %3613 = vperm.xlu1 %4951, %v5029_v17   ;;  %v2769_v5 = vmax.f32 %v2768_v24, %v2544_v1  ;;  %v2838_v6 = vmax.f32 %v2837_v58, %v2545_v51  ;;  %v10682_v7 = vld [vmem:[#allocation32_spill] sm:$0xff]  ;;  %v10683_v1 = vld [vmem:[#allocation33_spill] sm:$0xff] }
 0x233   :  { %v2907_v60 = vmax.f32 %v2906_v16, %v2546_v39  ;;  %v3078_v33 = vadd.f32 %v2290_v46, %v10679_v47  ;;  %3625 = vperm.xlu0 %4952, %v5030_v25   ;;  %v2976_v61 = vmax.f32 %v2975_v27, %v2547_v18  ;;  %v3079_v29 = vadd.f32 %v2290_v46, %v10680_v9  ;;  %v10684_v16 = vld [vmem:[#allocation34_spill] sm:$0xff]  ;;  %v2298_v25 = vpop.permute.xlu1 %2297  ;;  %v5031_v46 = vld [vmem:[%s9470_s1 + $0x68] sm:$0xff]  ;;  %v10686_v9 = vld [vmem:[#allocation44_spill] sm:$0xff] }
 0x234   :  { %v3301_v10 = vmin.f32 %v3300_v57, %v3076_v3  ;;  %v3370_v4 = vmin.f32 %v3369_v12, %v3077_v48  ;;  %v2548_v13 = vsub.f32 %v2294_v32, %v10681_v30  ;;  %v2549_v17 = vsub.f32 %v2294_v32, %v10682_v7 }
 0x235   :  { %v3439_v21 = vmin.f32 %v3438_v0, %v3078_v33  ;;  %v2550_v24 = vsub.f32 %v2294_v32, %v10683_v1  ;;  %v3508_v58 = vmin.f32 %v3507_v63, %v3079_v29  ;;  %v2551_v51 = vsub.f32 %v2294_v32, %v10684_v16  ;;  %v5032_v0 = vld [vmem:[%s9470_s1 + $0x80] sm:$0xff] }
 0x236   :  { %v3080_v39 = vadd.f32 %v2294_v32, %v10681_v30  ;;  %v3081_v47 = vadd.f32 %v2294_v32, %v10682_v7  ;;  %3621 = vperm.xlu1 %4951, %v5031_v46   ;;  %v2770_v48 = vmax.f32 %v2769_v5, %v2548_v13  ;;  %v2839_v27 = vmax.f32 %v2838_v6, %v2549_v17  ;;  %v10685_v7 = vld [vmem:[#allocation43_spill] sm:$0xff]  ;;  %v10687_v13 = vld [vmem:[#allocation45_spill] sm:$0xff] }
 0x237   :  { %v2908_v57 = vmax.f32 %v2907_v60, %v2550_v24  ;;  %v3082_v12 = vadd.f32 %v2294_v32, %v10683_v1  ;;  %3633 = vperm.xlu0 %4952, %v5032_v0   ;;  %v2977_v63 = vmax.f32 %v2976_v61, %v2551_v51  ;;  %v3083_v18 = vadd.f32 %v2294_v32, %v10684_v16  ;;  %v10688_v60 = vld [vmem:[#allocation46_spill] sm:$0xff]  ;;  %v2302_v0 = vpop.permute.xlu0 %2301  ;;  %v5033_v32 = vld [vmem:[%s9470_s1 + $0x78] sm:$0xff]  ;;  %v10689_v16 = vld [vmem:[#allocation39_spill] sm:$0xff] }
 0x238   :  { %v3302_v3 = vmin.f32 %v3301_v10, %v3080_v39  ;;  %v3371_v33 = vmin.f32 %v3370_v4, %v3081_v47  ;;  %v2552_v30 = vsub.f32 %v2298_v25, %v10685_v7  ;;  %v2553_v46 = vsub.f32 %v2298_v25, %v10686_v9 }
 0x239   :  { %v3440_v29 = vmin.f32 %v3439_v21, %v3082_v12  ;;  %v2554_v5 = vsub.f32 %v2298_v25, %v10687_v13  ;;  %v3509_v6 = vmin.f32 %v3508_v58, %v3083_v18  ;;  %v2555_v17 = vsub.f32 %v2298_v25, %v10688_v60  ;;  %v5034_v21 = vld [vmem:[%s9470_s1 + $0x90] sm:$0xff] }
 0x23a   :  { %v3084_v24 = vadd.f32 %v2298_v25, %v10685_v7  ;;  %v3085_v1 = vadd.f32 %v2298_v25, %v10686_v9  ;;  %3629 = vperm.xlu1 %4951, %v5033_v32   ;;  %v2771_v47 = vmax.f32 %v2770_v48, %v2552_v30  ;;  %v2840_v61 = vmax.f32 %v2839_v27, %v2553_v46  ;;  %v10690_v7 = vld [vmem:[#allocation40_spill] sm:$0xff]  ;;  %v10691_v30 = vld [vmem:[#allocation41_spill] sm:$0xff] }
 0x23b   :  { %v2909_v10 = vmax.f32 %v2908_v57, %v2554_v5  ;;  %v3086_v4 = vadd.f32 %v2298_v25, %v10687_v13  ;;  %3641 = vperm.xlu0 %4952, %v5034_v21   ;;  %v2978_v58 = vmax.f32 %v2977_v63, %v2555_v17  ;;  %v3087_v51 = vadd.f32 %v2298_v25, %v10688_v60  ;;  %v10692_v57 = vld [vmem:[#allocation42_spill] sm:$0xff]  ;;  %v2306_v21 = vpop.permute.xlu1 %2305  ;;  %v5035_v25 = vld [vmem:[%s9470_s1 + $0x88] sm:$0xff]  ;;  %v10694_v60 = vld [vmem:[#allocation52_spill] sm:$0xff] }
 0x23c   :  { %v3303_v39 = vmin.f32 %v3302_v3, %v3084_v24  ;;  %v3372_v12 = vmin.f32 %v3371_v33, %v3085_v1  ;;  %v2556_v9 = vsub.f32 %v2302_v0, %v10689_v16  ;;  %v2557_v32 = vsub.f32 %v2302_v0, %v10690_v7 }
 0x23d   :  { %v3441_v18 = vmin.f32 %v3440_v29, %v3086_v4  ;;  %v2558_v48 = vsub.f32 %v2302_v0, %v10691_v30  ;;  %v3510_v27 = vmin.f32 %v3509_v6, %v3087_v51  ;;  %v2559_v46 = vsub.f32 %v2302_v0, %v10692_v57  ;;  %v5036_v29 = vld [vmem:[%s9470_s1 + $0xa0] sm:$0xff] }
 0x23e   :  { %v3088_v5 = vadd.f32 %v2302_v0, %v10689_v16  ;;  %v3089_v13 = vadd.f32 %v2302_v0, %v10690_v7  ;;  %3637 = vperm.xlu1 %4951, %v5035_v25   ;;  %v2772_v1 = vmax.f32 %v2771_v47, %v2556_v9  ;;  %v2841_v63 = vmax.f32 %v2840_v61, %v2557_v32  ;;  %v10693_v7 = vld [vmem:[#allocation51_spill] sm:$0xff]  ;;  %v10695_v9 = vld [vmem:[#allocation53_spill] sm:$0xff] }
 0x23f   :  { %v2910_v3 = vmax.f32 %v2909_v10, %v2558_v48  ;;  %v3090_v33 = vadd.f32 %v2302_v0, %v10691_v30  ;;  %3649 = vperm.xlu0 %4952, %v5036_v29   ;;  %v2979_v6 = vmax.f32 %v2978_v58, %v2559_v46  ;;  %v3091_v17 = vadd.f32 %v2302_v0, %v10692_v57  ;;  %v10696_v10 = vld [vmem:[#allocation54_spill] sm:$0xff]  ;;  %v2310_v29 = vpop.permute.xlu0 %2309  ;;  %v5037_v0 = vld [vmem:[%s9470_s1 + $0x98] sm:$0xff]  ;;  %v10697_v57 = vld [vmem:[#allocation47_spill] sm:$0xff] }
 0x240   :  { %v3304_v24 = vmin.f32 %v3303_v39, %v3088_v5  ;;  %v3373_v4 = vmin.f32 %v3372_v12, %v3089_v13  ;;  %v2560_v16 = vsub.f32 %v2306_v21, %v10693_v7  ;;  %v2561_v25 = vsub.f32 %v2306_v21, %v10694_v60 }
 0x241   :  { %v3442_v51 = vmin.f32 %v3441_v18, %v3090_v33  ;;  %v2562_v47 = vsub.f32 %v2306_v21, %v10695_v9  ;;  %v3511_v61 = vmin.f32 %v3510_v27, %v3091_v17  ;;  %v2563_v32 = vsub.f32 %v2306_v21, %v10696_v10  ;;  %v5038_v18 = vld [vmem:[%s9470_s1 + $0xb0] sm:$0xff] }
 0x242   :  { %v3092_v48 = vadd.f32 %v2306_v21, %v10693_v7  ;;  %v3093_v30 = vadd.f32 %v2306_v21, %v10694_v60  ;;  %3645 = vperm.xlu1 %4951, %v5037_v0   ;;  %v2773_v13 = vmax.f32 %v2772_v1, %v2560_v16  ;;  %v2842_v58 = vmax.f32 %v2841_v63, %v2561_v25  ;;  %v10698_v7 = vld [vmem:[#allocation48_spill] sm:$0xff]  ;;  %v10699_v16 = vld [vmem:[#allocation49_spill] sm:$0xff] }
 0x243   :  { %v2911_v39 = vmax.f32 %v2910_v3, %v2562_v47  ;;  %v3094_v12 = vadd.f32 %v2306_v21, %v10695_v9  ;;  %3657 = vperm.xlu0 %4952, %v5038_v18   ;;  %v2980_v27 = vmax.f32 %v2979_v6, %v2563_v32  ;;  %v3095_v46 = vadd.f32 %v2306_v21, %v10696_v10  ;;  %v10700_v3 = vld [vmem:[#allocation50_spill] sm:$0xff]  ;;  %v2314_v18 = vpop.permute.xlu1 %2313  ;;  %v5039_v21 = vld [vmem:[%s9470_s1 + $0xa8] sm:$0xff]  ;;  %v10702_v10 = vld [vmem:[#allocation60_spill] sm:$0xff] }
 0x244   :  { %v3305_v5 = vmin.f32 %v3304_v24, %v3092_v48  ;;  %v3374_v33 = vmin.f32 %v3373_v4, %v3093_v30  ;;  %v2564_v60 = vsub.f32 %v2310_v29, %v10697_v57  ;;  %v2565_v0 = vsub.f32 %v2310_v29, %v10698_v7 }
 0x245   :  { %v3443_v17 = vmin.f32 %v3442_v51, %v3094_v12  ;;  %v2566_v1 = vsub.f32 %v2310_v29, %v10699_v16  ;;  %v3512_v63 = vmin.f32 %v3511_v61, %v3095_v46  ;;  %v2567_v25 = vsub.f32 %v2310_v29, %v10700_v3  ;;  %v5040_v51 = vld [vmem:[%s9470_s1 + $0xc0] sm:$0xff] }
 0x246   :  { %v3096_v47 = vadd.f32 %v2310_v29, %v10697_v57  ;;  %v3097_v9 = vadd.f32 %v2310_v29, %v10698_v7  ;;  %3653 = vperm.xlu1 %4951, %v5039_v21   ;;  %v2774_v30 = vmax.f32 %v2773_v13, %v2564_v60  ;;  %v2843_v6 = vmax.f32 %v2842_v58, %v2565_v0  ;;  %v10701_v7 = vld [vmem:[#allocation59_spill] sm:$0xff]  ;;  %v10703_v60 = vld [vmem:[#allocation61_spill] sm:$0xff] }
 0x247   :  { %v2912_v24 = vmax.f32 %v2911_v39, %v2566_v1  ;;  %v3098_v4 = vadd.f32 %v2310_v29, %v10699_v16  ;;  %3665 = vperm.xlu0 %4952, %v5040_v51   ;;  %v2981_v61 = vmax.f32 %v2980_v27, %v2567_v25  ;;  %v3099_v32 = vadd.f32 %v2310_v29, %v10700_v3  ;;  %v10704_v39 = vld [vmem:[#allocation62_spill] sm:$0xff]  ;;  %v2318_v51 = vpop.permute.xlu0 %2317  ;;  %v5041_v29 = vld [vmem:[%s9470_s1 + $0xb8] sm:$0xff]  ;;  %v10705_v3 = vld [vmem:[#allocation55_spill] sm:$0xff] }
 0x248   :  { %v3306_v48 = vmin.f32 %v3305_v5, %v3096_v47  ;;  %v3375_v12 = vmin.f32 %v3374_v33, %v3097_v9  ;;  %v2568_v57 = vsub.f32 %v2314_v18, %v10701_v7  ;;  %v2569_v21 = vsub.f32 %v2314_v18, %v10702_v10 }
 0x249   :  { %v3444_v46 = vmin.f32 %v3443_v17, %v3098_v4  ;;  %v2570_v13 = vsub.f32 %v2314_v18, %v10703_v60  ;;  %v3513_v58 = vmin.f32 %v3512_v63, %v3099_v32  ;;  %v2571_v0 = vsub.f32 %v2314_v18, %v10704_v39  ;;  %v5042_v17 = vld [vmem:[%s9470_s1 + $0xd0] sm:$0xff] }
 0x24a   :  { %v3100_v1 = vadd.f32 %v2314_v18, %v10701_v7  ;;  %v3101_v16 = vadd.f32 %v2314_v18, %v10702_v10  ;;  %3661 = vperm.xlu1 %4951, %v5041_v29   ;;  %v2775_v9 = vmax.f32 %v2774_v30, %v2568_v57  ;;  %v2844_v27 = vmax.f32 %v2843_v6, %v2569_v21  ;;  %v10706_v7 = vld [vmem:[#allocation56_spill] sm:$0xff]  ;;  %v10707_v57 = vld [vmem:[#allocation57_spill] sm:$0xff] }
 0x24b   :  { %v2913_v5 = vmax.f32 %v2912_v24, %v2570_v13  ;;  %v3102_v33 = vadd.f32 %v2314_v18, %v10703_v60  ;;  %3673 = vperm.xlu0 %4952, %v5042_v17   ;;  %v2982_v63 = vmax.f32 %v2981_v61, %v2571_v0  ;;  %v3103_v25 = vadd.f32 %v2314_v18, %v10704_v39  ;;  %v10708_v24 = vld [vmem:[#allocation58_spill] sm:$0xff]  ;;  %v2322_v17 = vpop.permute.xlu1 %2321  ;;  %v5043_v18 = vld [vmem:[%s9470_s1 + $0xc8] sm:$0xff]  ;;  %v10710_v39 = vld [vmem:[#allocation68_spill] sm:$0xff] }
 0x24c   :  { %v3307_v47 = vmin.f32 %v3306_v48, %v3100_v1  ;;  %v3376_v4 = vmin.f32 %v3375_v12, %v3101_v16  ;;  %v2572_v10 = vsub.f32 %v2318_v51, %v10705_v3  ;;  %v2573_v29 = vsub.f32 %v2318_v51, %v10706_v7 }
 0x24d   :  { %v3445_v32 = vmin.f32 %v3444_v46, %v3102_v33  ;;  %v2574_v30 = vsub.f32 %v2318_v51, %v10707_v57  ;;  %v3514_v6 = vmin.f32 %v3513_v58, %v3103_v25  ;;  %v2575_v21 = vsub.f32 %v2318_v51, %v10708_v24  ;;  %v5044_v46 = vld [vmem:[%s9470_s1 + $0xe0] sm:$0xff] }
 0x24e   :  { %v3104_v13 = vadd.f32 %v2318_v51, %v10705_v3  ;;  %v3105_v60 = vadd.f32 %v2318_v51, %v10706_v7  ;;  %3669 = vperm.xlu1 %4951, %v5043_v18   ;;  %v2776_v16 = vmax.f32 %v2775_v9, %v2572_v10  ;;  %v2845_v61 = vmax.f32 %v2844_v27, %v2573_v29  ;;  %v10709_v7 = vld [vmem:[#allocation67_spill] sm:$0xff]  ;;  %v10711_v10 = vld [vmem:[#allocation69_spill] sm:$0xff] }
 0x24f   :  { %v2914_v48 = vmax.f32 %v2913_v5, %v2574_v30  ;;  %v3106_v12 = vadd.f32 %v2318_v51, %v10707_v57  ;;  %3681 = vperm.xlu0 %4952, %v5044_v46   ;;  %v2983_v58 = vmax.f32 %v2982_v63, %v2575_v21  ;;  %v3107_v0 = vadd.f32 %v2318_v51, %v10708_v24  ;;  %v10712_v5 = vld [vmem:[#allocation70_spill] sm:$0xff]  ;;  %v2326_v46 = vpop.permute.xlu0 %2325  ;;  %v5045_v51 = vld [vmem:[%s9470_s1 + $0xd8] sm:$0xff]  ;;  %v10713_v24 = vld [vmem:[#allocation63_spill] sm:$0xff] }
 0x250   :  { %v3308_v1 = vmin.f32 %v3307_v47, %v3104_v13  ;;  %v3377_v33 = vmin.f32 %v3376_v4, %v3105_v60  ;;  %v2576_v3 = vsub.f32 %v2322_v17, %v10709_v7  ;;  %v2577_v18 = vsub.f32 %v2322_v17, %v10710_v39 }
 0x251   :  { %v3446_v25 = vmin.f32 %v3445_v32, %v3106_v12  ;;  %v2578_v9 = vsub.f32 %v2322_v17, %v10711_v10  ;;  %v3515_v27 = vmin.f32 %v3514_v6, %v3107_v0  ;;  %v2579_v29 = vsub.f32 %v2322_v17, %v10712_v5  ;;  %v5046_v32 = vld [vmem:[%s9470_s1 + $0xf0] sm:$0xff] }
 0x252   :  { %v3108_v30 = vadd.f32 %v2322_v17, %v10709_v7  ;;  %v3109_v57 = vadd.f32 %v2322_v17, %v10710_v39  ;;  %3677 = vperm.xlu1 %4951, %v5045_v51   ;;  %v2777_v60 = vmax.f32 %v2776_v16, %v2576_v3  ;;  %v2846_v63 = vmax.f32 %v2845_v61, %v2577_v18  ;;  %v10714_v7 = vld [vmem:[#allocation64_spill] sm:$0xff]  ;;  %v10715_v3 = vld [vmem:[#allocation65_spill] sm:$0xff] }
 0x253   :  { %v2915_v47 = vmax.f32 %v2914_v48, %v2578_v9  ;;  %v3110_v4 = vadd.f32 %v2322_v17, %v10711_v10  ;;  %3689 = vperm.xlu0 %4952, %v5046_v32   ;;  %v2984_v6 = vmax.f32 %v2983_v58, %v2579_v29  ;;  %v3111_v21 = vadd.f32 %v2322_v17, %v10712_v5  ;;  %v10716_v48 = vld [vmem:[#allocation66_spill] sm:$0xff]  ;;  %v2330_v32 = vpop.permute.xlu1 %2329  ;;  %v5047_v17 = vld [vmem:[%s9470_s1 + $0xe8] sm:$0xff]  ;;  %v10718_v5 = vld [vmem:[#allocation76_spill] sm:$0xff] }
 0x254   :  { %v3309_v13 = vmin.f32 %v3308_v1, %v3108_v30  ;;  %v3378_v12 = vmin.f32 %v3377_v33, %v3109_v57  ;;  %v2580_v39 = vsub.f32 %v2326_v46, %v10713_v24  ;;  %v2581_v51 = vsub.f32 %v2326_v46, %v10714_v7 }
 0x255   :  { %v3447_v0 = vmin.f32 %v3446_v25, %v3110_v4  ;;  %v2582_v16 = vsub.f32 %v2326_v46, %v10715_v3  ;;  %v3516_v61 = vmin.f32 %v3515_v27, %v3111_v21  ;;  %v2583_v18 = vsub.f32 %v2326_v46, %v10716_v48  ;;  %v5048_v25 = vld [vmem:[%s9470_s1 + $0x100] sm:$0xff] }
 0x256   :  { %v3112_v9 = vadd.f32 %v2326_v46, %v10713_v24  ;;  %v3113_v10 = vadd.f32 %v2326_v46, %v10714_v7  ;;  %3685 = vperm.xlu1 %4951, %v5047_v17   ;;  %v2778_v57 = vmax.f32 %v2777_v60, %v2580_v39  ;;  %v2847_v58 = vmax.f32 %v2846_v63, %v2581_v51  ;;  %v10717_v7 = vld [vmem:[#allocation75_spill] sm:$0xff]  ;;  %v10719_v39 = vld [vmem:[#allocation77_spill] sm:$0xff] }
 0x257   :  { %v2916_v1 = vmax.f32 %v2915_v47, %v2582_v16  ;;  %v3114_v33 = vadd.f32 %v2326_v46, %v10715_v3  ;;  %3697 = vperm.xlu0 %4952, %v5048_v25   ;;  %v2985_v27 = vmax.f32 %v2984_v6, %v2583_v18  ;;  %v3115_v29 = vadd.f32 %v2326_v46, %v10716_v48  ;;  %v10720_v47 = vld [vmem:[#allocation78_spill] sm:$0xff]  ;;  %v2334_v25 = vpop.permute.xlu0 %2333  ;;  %v5049_v46 = vld [vmem:[%s9470_s1 + $0xf8] sm:$0xff]  ;;  %v10721_v48 = vld [vmem:[#allocation71_spill] sm:$0xff] }
 0x258   :  { %v3310_v30 = vmin.f32 %v3309_v13, %v3112_v9  ;;  %v3379_v4 = vmin.f32 %v3378_v12, %v3113_v10  ;;  %v2584_v24 = vsub.f32 %v2330_v32, %v10717_v7  ;;  %v2585_v17 = vsub.f32 %v2330_v32, %v10718_v5 }
 0x259   :  { %v3448_v21 = vmin.f32 %v3447_v0, %v3114_v33  ;;  %v2586_v60 = vsub.f32 %v2330_v32, %v10719_v39  ;;  %v3517_v63 = vmin.f32 %v3516_v61, %v3115_v29  ;;  %v2587_v51 = vsub.f32 %v2330_v32, %v10720_v47  ;;  %v5050_v0 = vld [vmem:[%s9470_s1 + $0x110] sm:$0xff] }
 0x25a   :  { %v3116_v16 = vadd.f32 %v2330_v32, %v10717_v7  ;;  %v3117_v3 = vadd.f32 %v2330_v32, %v10718_v5  ;;  %3693 = vperm.xlu1 %4951, %v5049_v46   ;;  %v2779_v10 = vmax.f32 %v2778_v57, %v2584_v24  ;;  %v2848_v6 = vmax.f32 %v2847_v58, %v2585_v17  ;;  %v10722_v7 = vld [vmem:[#allocation72_spill] sm:$0xff]  ;;  %v10723_v24 = vld [vmem:[#allocation73_spill] sm:$0xff] }
 0x25b   :  { %v2917_v13 = vmax.f32 %v2916_v1, %v2586_v60  ;;  %v3118_v12 = vadd.f32 %v2330_v32, %v10719_v39  ;;  %3705 = vperm.xlu0 %4952, %v5050_v0   ;;  %v2986_v61 = vmax.f32 %v2985_v27, %v2587_v51  ;;  %v3119_v18 = vadd.f32 %v2330_v32, %v10720_v47  ;;  %v10724_v1 = vld [vmem:[#allocation74_spill] sm:$0xff]  ;;  %v2338_v0 = vpop.permute.xlu1 %2337  ;;  %v5051_v32 = vld [vmem:[%s9470_s1 + $0x108] sm:$0xff]  ;;  %v10726_v47 = vld [vmem:[#allocation84_spill] sm:$0xff] }
 0x25c   :  { %v3311_v9 = vmin.f32 %v3310_v30, %v3116_v16  ;;  %v3380_v33 = vmin.f32 %v3379_v4, %v3117_v3  ;;  %v2588_v5 = vsub.f32 %v2334_v25, %v10721_v48  ;;  %v2589_v46 = vsub.f32 %v2334_v25, %v10722_v7 }
 0x25d   :  { %v3449_v29 = vmin.f32 %v3448_v21, %v3118_v12  ;;  %v2590_v57 = vsub.f32 %v2334_v25, %v10723_v24  ;;  %v3518_v58 = vmin.f32 %v3517_v63, %v3119_v18  ;;  %v2591_v17 = vsub.f32 %v2334_v25, %v10724_v1  ;;  %v5052_v21 = vld [vmem:[%s9470_s1 + $0x120] sm:$0xff] }
 0x25e   :  { %v3120_v60 = vadd.f32 %v2334_v25, %v10721_v48  ;;  %v3121_v39 = vadd.f32 %v2334_v25, %v10722_v7  ;;  %3701 = vperm.xlu1 %4951, %v5051_v32   ;;  %v2780_v3 = vmax.f32 %v2779_v10, %v2588_v5  ;;  %v2849_v27 = vmax.f32 %v2848_v6, %v2589_v46  ;;  %v10725_v7 = vld [vmem:[#allocation83_spill] sm:$0xff]  ;;  %v10727_v5 = vld [vmem:[#allocation85_spill] sm:$0xff] }
 0x25f   :  { %v2918_v30 = vmax.f32 %v2917_v13, %v2590_v57  ;;  %v3122_v4 = vadd.f32 %v2334_v25, %v10723_v24  ;;  %3713 = vperm.xlu0 %4952, %v5052_v21   ;;  %v2987_v63 = vmax.f32 %v2986_v61, %v2591_v17  ;;  %v3123_v51 = vadd.f32 %v2334_v25, %v10724_v1  ;;  %v10728_v13 = vld [vmem:[#allocation86_spill] sm:$0xff]  ;;  %v2342_v21 = vpop.permute.xlu0 %2341  ;;  %v5053_v25 = vld [vmem:[%s9470_s1 + $0x118] sm:$0xff]  ;;  %v10729_v1 = vld [vmem:[#allocation79_spill] sm:$0xff] }
 0x260   :  { %v3312_v16 = vmin.f32 %v3311_v9, %v3120_v60  ;;  %v3381_v12 = vmin.f32 %v3380_v33, %v3121_v39  ;;  %v2592_v48 = vsub.f32 %v2338_v0, %v10725_v7  ;;  %v2593_v32 = vsub.f32 %v2338_v0, %v10726_v47 }
 0x261   :  { %v3450_v18 = vmin.f32 %v3449_v29, %v3122_v4  ;;  %v2594_v10 = vsub.f32 %v2338_v0, %v10727_v5  ;;  %v3519_v6 = vmin.f32 %v3518_v58, %v3123_v51  ;;  %v2595_v46 = vsub.f32 %v2338_v0, %v10728_v13  ;;  %v5054_v29 = vld [vmem:[%s9470_s1 + $0x130] sm:$0xff] }
 0x262   :  { %v3124_v57 = vadd.f32 %v2338_v0, %v10725_v7  ;;  %v3125_v24 = vadd.f32 %v2338_v0, %v10726_v47  ;;  %3709 = vperm.xlu1 %4951, %v5053_v25   ;;  %v2781_v39 = vmax.f32 %v2780_v3, %v2592_v48  ;;  %v2850_v61 = vmax.f32 %v2849_v27, %v2593_v32  ;;  %v10730_v7 = vld [vmem:[#allocation80_spill] sm:$0xff]  ;;  %v10731_v48 = vld [vmem:[#allocation81_spill] sm:$0xff] }
 0x263   :  { %v2919_v9 = vmax.f32 %v2918_v30, %v2594_v10  ;;  %v3126_v33 = vadd.f32 %v2338_v0, %v10727_v5  ;;  %3721 = vperm.xlu0 %4952, %v5054_v29   ;;  %v2988_v58 = vmax.f32 %v2987_v63, %v2595_v46  ;;  %v3127_v17 = vadd.f32 %v2338_v0, %v10728_v13  ;;  %v10732_v30 = vld [vmem:[#allocation82_spill] sm:$0xff]  ;;  %v2346_v29 = vpop.permute.xlu1 %2345  ;;  %v5055_v0 = vld [vmem:[%s9470_s1 + $0x128] sm:$0xff]  ;;  %v10734_v13 = vld [vmem:[#allocation92_spill] sm:$0xff] }
 0x264   :  { %v3313_v60 = vmin.f32 %v3312_v16, %v3124_v57  ;;  %v3382_v4 = vmin.f32 %v3381_v12, %v3125_v24  ;;  %v2596_v47 = vsub.f32 %v2342_v21, %v10729_v1  ;;  %v2597_v25 = vsub.f32 %v2342_v21, %v10730_v7 }
 0x265   :  { %v3451_v51 = vmin.f32 %v3450_v18, %v3126_v33  ;;  %v2598_v3 = vsub.f32 %v2342_v21, %v10731_v48  ;;  %v3520_v27 = vmin.f32 %v3519_v6, %v3127_v17  ;;  %v2599_v32 = vsub.f32 %v2342_v21, %v10732_v30  ;;  %v5056_v18 = vld [vmem:[%s9470_s1 + $0x140] sm:$0xff] }
 0x266   :  { %v3128_v10 = vadd.f32 %v2342_v21, %v10729_v1  ;;  %v3129_v5 = vadd.f32 %v2342_v21, %v10730_v7  ;;  %3717 = vperm.xlu1 %4951, %v5055_v0   ;;  %v2782_v24 = vmax.f32 %v2781_v39, %v2596_v47  ;;  %v2851_v63 = vmax.f32 %v2850_v61, %v2597_v25  ;;  %v10733_v7 = vld [vmem:[#allocation91_spill] sm:$0xff]  ;;  %v10735_v47 = vld [vmem:[#allocation93_spill] sm:$0xff] }
 0x267   :  { %v2920_v16 = vmax.f32 %v2919_v9, %v2598_v3  ;;  %v3130_v12 = vadd.f32 %v2342_v21, %v10731_v48  ;;  %3729 = vperm.xlu0 %4952, %v5056_v18   ;;  %v2989_v6 = vmax.f32 %v2988_v58, %v2599_v32  ;;  %v3131_v46 = vadd.f32 %v2342_v21, %v10732_v30  ;;  %v10736_v9 = vld [vmem:[#allocation94_spill] sm:$0xff]  ;;  %v2350_v18 = vpop.permute.xlu0 %2349  ;;  %v5057_v21 = vld [vmem:[%s9470_s1 + $0x138] sm:$0xff]  ;;  %v10737_v30 = vld [vmem:[#allocation87_spill] sm:$0xff] }
 0x268   :  { %v3314_v57 = vmin.f32 %v3313_v60, %v3128_v10  ;;  %v3383_v33 = vmin.f32 %v3382_v4, %v3129_v5  ;;  %v2600_v1 = vsub.f32 %v2346_v29, %v10733_v7  ;;  %v2601_v0 = vsub.f32 %v2346_v29, %v10734_v13 }
 0x269   :  { %v3452_v17 = vmin.f32 %v3451_v51, %v3130_v12  ;;  %v2602_v39 = vsub.f32 %v2346_v29, %v10735_v47  ;;  %v3521_v61 = vmin.f32 %v3520_v27, %v3131_v46  ;;  %v2603_v25 = vsub.f32 %v2346_v29, %v10736_v9  ;;  %v5058_v51 = vld [vmem:[%s9470_s1 + $0x150] sm:$0xff] }
 0x26a   :  { %v3132_v3 = vadd.f32 %v2346_v29, %v10733_v7  ;;  %v3133_v48 = vadd.f32 %v2346_v29, %v10734_v13  ;;  %3725 = vperm.xlu1 %4951, %v5057_v21   ;;  %v2783_v5 = vmax.f32 %v2782_v24, %v2600_v1  ;;  %v2852_v58 = vmax.f32 %v2851_v63, %v2601_v0  ;;  %v10738_v7 = vld [vmem:[#allocation88_spill] sm:$0xff]  ;;  %v10739_v1 = vld [vmem:[#allocation89_spill] sm:$0xff] }
 0x26b   :  { %v2921_v60 = vmax.f32 %v2920_v16, %v2602_v39  ;;  %v3134_v4 = vadd.f32 %v2346_v29, %v10735_v47  ;;  %3737 = vperm.xlu0 %4952, %v5058_v51   ;;  %v2990_v27 = vmax.f32 %v2989_v6, %v2603_v25  ;;  %v3135_v32 = vadd.f32 %v2346_v29, %v10736_v9  ;;  %v10740_v16 = vld [vmem:[#allocation90_spill] sm:$0xff]  ;;  %v2354_v51 = vpop.permute.xlu1 %2353  ;;  %v5059_v29 = vld [vmem:[%s9470_s1 + $0x148] sm:$0xff]  ;;  %v10742_v9 = vld [vmem:[#allocation100_spill] sm:$0xff] }
 0x26c   :  { %v3315_v10 = vmin.f32 %v3314_v57, %v3132_v3  ;;  %v3384_v12 = vmin.f32 %v3383_v33, %v3133_v48  ;;  %v2604_v13 = vsub.f32 %v2350_v18, %v10737_v30  ;;  %v2605_v21 = vsub.f32 %v2350_v18, %v10738_v7 }
 0x26d   :  { %v3453_v46 = vmin.f32 %v3452_v17, %v3134_v4  ;;  %v2606_v24 = vsub.f32 %v2350_v18, %v10739_v1  ;;  %v3522_v63 = vmin.f32 %v3521_v61, %v3135_v32  ;;  %v2607_v0 = vsub.f32 %v2350_v18, %v10740_v16  ;;  %v5060_v17 = vld [vmem:[%s9470_s1 + $0x160] sm:$0xff] }
 0x26e   :  { %v3136_v39 = vadd.f32 %v2350_v18, %v10737_v30  ;;  %v3137_v47 = vadd.f32 %v2350_v18, %v10738_v7  ;;  %3733 = vperm.xlu1 %4951, %v5059_v29   ;;  %v2784_v48 = vmax.f32 %v2783_v5, %v2604_v13  ;;  %v2853_v6 = vmax.f32 %v2852_v58, %v2605_v21  ;;  %v10741_v7 = vld [vmem:[#allocation99_spill] sm:$0xff]  ;;  %v10743_v13 = vld [vmem:[#allocation101_spill] sm:$0xff] }
 0x26f   :  { %v2922_v57 = vmax.f32 %v2921_v60, %v2606_v24  ;;  %v3138_v33 = vadd.f32 %v2350_v18, %v10739_v1  ;;  %3745 = vperm.xlu0 %4952, %v5060_v17   ;;  %v2991_v61 = vmax.f32 %v2990_v27, %v2607_v0  ;;  %v3139_v25 = vadd.f32 %v2350_v18, %v10740_v16  ;;  %v10744_v60 = vld [vmem:[#allocation102_spill] sm:$0xff]  ;;  %v2358_v17 = vpop.permute.xlu0 %2357  ;;  %v5061_v18 = vld [vmem:[%s9470_s1 + $0x158] sm:$0xff]  ;;  %v10745_v16 = vld [vmem:[#allocation95_spill] sm:$0xff] }
 0x270   :  { %v3316_v3 = vmin.f32 %v3315_v10, %v3136_v39  ;;  %v3385_v4 = vmin.f32 %v3384_v12, %v3137_v47  ;;  %v2608_v30 = vsub.f32 %v2354_v51, %v10741_v7  ;;  %v2609_v29 = vsub.f32 %v2354_v51, %v10742_v9 }
 0x271   :  { %v3454_v32 = vmin.f32 %v3453_v46, %v3138_v33  ;;  %v2610_v5 = vsub.f32 %v2354_v51, %v10743_v13  ;;  %v3523_v58 = vmin.f32 %v3522_v63, %v3139_v25  ;;  %v2611_v21 = vsub.f32 %v2354_v51, %v10744_v60  ;;  %v5062_v46 = vld [vmem:[%s9470_s1 + $0x170] sm:$0xff] }
 0x272   :  { %v3140_v24 = vadd.f32 %v2354_v51, %v10741_v7  ;;  %v3141_v1 = vadd.f32 %v2354_v51, %v10742_v9  ;;  %3741 = vperm.xlu1 %4951, %v5061_v18   ;;  %v2785_v47 = vmax.f32 %v2784_v48, %v2608_v30  ;;  %v2854_v27 = vmax.f32 %v2853_v6, %v2609_v29  ;;  %v10746_v7 = vld [vmem:[#allocation96_spill] sm:$0xff]  ;;  %v10747_v30 = vld [vmem:[#allocation97_spill] sm:$0xff] }
 0x273   :  { %v2923_v10 = vmax.f32 %v2922_v57, %v2610_v5  ;;  %v3142_v12 = vadd.f32 %v2354_v51, %v10743_v13  ;;  %3753 = vperm.xlu0 %4952, %v5062_v46   ;;  %v2992_v63 = vmax.f32 %v2991_v61, %v2611_v21  ;;  %v3143_v0 = vadd.f32 %v2354_v51, %v10744_v60  ;;  %v10748_v57 = vld [vmem:[#allocation98_spill] sm:$0xff]  ;;  %v2362_v46 = vpop.permute.xlu1 %2361  ;;  %v5063_v51 = vld [vmem:[%s9470_s1 + $0x168] sm:$0xff]  ;;  %v10750_v60 = vld [vmem:[#allocation108_spill] sm:$0xff] }
 0x274   :  { %v3317_v39 = vmin.f32 %v3316_v3, %v3140_v24  ;;  %v3386_v33 = vmin.f32 %v3385_v4, %v3141_v1  ;;  %v2612_v9 = vsub.f32 %v2358_v17, %v10745_v16  ;;  %v2613_v18 = vsub.f32 %v2358_v17, %v10746_v7 }
 0x275   :  { %v3455_v25 = vmin.f32 %v3454_v32, %v3142_v12  ;;  %v2614_v48 = vsub.f32 %v2358_v17, %v10747_v30  ;;  %v3524_v6 = vmin.f32 %v3523_v58, %v3143_v0  ;;  %v2615_v29 = vsub.f32 %v2358_v17, %v10748_v57  ;;  %v5064_v32 = vld [vmem:[%s9470_s1 + $0x180] sm:$0xff] }
 0x276   :  { %v3144_v5 = vadd.f32 %v2358_v17, %v10745_v16  ;;  %v3145_v13 = vadd.f32 %v2358_v17, %v10746_v7  ;;  %3749 = vperm.xlu1 %4951, %v5063_v51   ;;  %v2786_v1 = vmax.f32 %v2785_v47, %v2612_v9  ;;  %v2855_v61 = vmax.f32 %v2854_v27, %v2613_v18  ;;  %v10749_v7 = vld [vmem:[#allocation107_spill] sm:$0xff]  ;;  %v10751_v9 = vld [vmem:[#allocation109_spill] sm:$0xff] }
 0x277   :  { %v2924_v3 = vmax.f32 %v2923_v10, %v2614_v48  ;;  %v3146_v4 = vadd.f32 %v2358_v17, %v10747_v30  ;;  %3761 = vperm.xlu0 %4952, %v5064_v32   ;;  %v2993_v58 = vmax.f32 %v2992_v63, %v2615_v29  ;;  %v3147_v21 = vadd.f32 %v2358_v17, %v10748_v57  ;;  %v10752_v10 = vld [vmem:[#allocation110_spill] sm:$0xff]  ;;  %v2366_v32 = vpop.permute.xlu0 %2365  ;;  %v5065_v17 = vld [vmem:[%s9470_s1 + $0x178] sm:$0xff]  ;;  %v10753_v57 = vld [vmem:[#allocation103_spill] sm:$0xff] }
 0x278   :  { %v3318_v24 = vmin.f32 %v3317_v39, %v3144_v5  ;;  %v3387_v12 = vmin.f32 %v3386_v33, %v3145_v13  ;;  %v2616_v16 = vsub.f32 %v2362_v46, %v10749_v7  ;;  %v2617_v51 = vsub.f32 %v2362_v46, %v10750_v60 }
 0x279   :  { %v3456_v0 = vmin.f32 %v3455_v25, %v3146_v4  ;;  %v2618_v47 = vsub.f32 %v2362_v46, %v10751_v9  ;;  %v3525_v27 = vmin.f32 %v3524_v6, %v3147_v21  ;;  %v2619_v18 = vsub.f32 %v2362_v46, %v10752_v10  ;;  %v5066_v25 = vld [vmem:[%s9470_s1 + $0x190] sm:$0xff] }
 0x27a   :  { %v3148_v48 = vadd.f32 %v2362_v46, %v10749_v7  ;;  %v3149_v30 = vadd.f32 %v2362_v46, %v10750_v60  ;;  %3757 = vperm.xlu1 %4951, %v5065_v17   ;;  %v2787_v13 = vmax.f32 %v2786_v1, %v2616_v16  ;;  %v2856_v63 = vmax.f32 %v2855_v61, %v2617_v51  ;;  %v10754_v7 = vld [vmem:[#allocation104_spill] sm:$0xff]  ;;  %v10755_v16 = vld [vmem:[#allocation105_spill] sm:$0xff] }
 0x27b   :  { %v2925_v39 = vmax.f32 %v2924_v3, %v2618_v47  ;;  %v3150_v33 = vadd.f32 %v2362_v46, %v10751_v9  ;;  %3769 = vperm.xlu0 %4952, %v5066_v25   ;;  %v2994_v6 = vmax.f32 %v2993_v58, %v2619_v18  ;;  %v3151_v29 = vadd.f32 %v2362_v46, %v10752_v10  ;;  %v10756_v3 = vld [vmem:[#allocation106_spill] sm:$0xff]  ;;  %v2370_v25 = vpop.permute.xlu1 %2369  ;;  %v5067_v46 = vld [vmem:[%s9470_s1 + $0x188] sm:$0xff]  ;;  %v10758_v10 = vld [vmem:[#allocation116_spill] sm:$0xff] }
 0x27c   :  { %v3319_v5 = vmin.f32 %v3318_v24, %v3148_v48  ;;  %v3388_v4 = vmin.f32 %v3387_v12, %v3149_v30  ;;  %v2620_v60 = vsub.f32 %v2366_v32, %v10753_v57  ;;  %v2621_v17 = vsub.f32 %v2366_v32, %v10754_v7 }
 0x27d   :  { %v3457_v21 = vmin.f32 %v3456_v0, %v3150_v33  ;;  %v2622_v1 = vsub.f32 %v2366_v32, %v10755_v16  ;;  %v3526_v61 = vmin.f32 %v3525_v27, %v3151_v29  ;;  %v2623_v51 = vsub.f32 %v2366_v32, %v10756_v3  ;;  %v5068_v0 = vld [vmem:[%s9470_s1 + $0x1a0] sm:$0xff] }
 0x27e   :  { %v3152_v47 = vadd.f32 %v2366_v32, %v10753_v57  ;;  %v3153_v9 = vadd.f32 %v2366_v32, %v10754_v7  ;;  %3765 = vperm.xlu1 %4951, %v5067_v46   ;;  %v2788_v30 = vmax.f32 %v2787_v13, %v2620_v60  ;;  %v2857_v58 = vmax.f32 %v2856_v63, %v2621_v17  ;;  %v10757_v7 = vld [vmem:[#allocation115_spill] sm:$0xff]  ;;  %v10759_v60 = vld [vmem:[#allocation117_spill] sm:$0xff] }
 0x27f   :  { %v2926_v24 = vmax.f32 %v2925_v39, %v2622_v1  ;;  %v3154_v12 = vadd.f32 %v2366_v32, %v10755_v16  ;;  %3777 = vperm.xlu0 %4952, %v5068_v0   ;;  %v2995_v27 = vmax.f32 %v2994_v6, %v2623_v51  ;;  %v3155_v18 = vadd.f32 %v2366_v32, %v10756_v3  ;;  %v10760_v39 = vld [vmem:[#allocation118_spill] sm:$0xff]  ;;  %v2374_v0 = vpop.permute.xlu0 %2373  ;;  %v5069_v32 = vld [vmem:[%s9470_s1 + $0x198] sm:$0xff]  ;;  %v10761_v3 = vld [vmem:[#allocation111_spill] sm:$0xff] }
 0x280   :  { %v3320_v48 = vmin.f32 %v3319_v5, %v3152_v47  ;;  %v3389_v33 = vmin.f32 %v3388_v4, %v3153_v9  ;;  %v2624_v57 = vsub.f32 %v2370_v25, %v10757_v7  ;;  %v2625_v46 = vsub.f32 %v2370_v25, %v10758_v10 }
 0x281   :  { %v3458_v29 = vmin.f32 %v3457_v21, %v3154_v12  ;;  %v2626_v13 = vsub.f32 %v2370_v25, %v10759_v60  ;;  %v3527_v63 = vmin.f32 %v3526_v61, %v3155_v18  ;;  %v2627_v17 = vsub.f32 %v2370_v25, %v10760_v39  ;;  %v5070_v21 = vld [vmem:[%s9470_s1 + $0x1b0] sm:$0xff] }
 0x282   :  { %v3156_v1 = vadd.f32 %v2370_v25, %v10757_v7  ;;  %v3157_v16 = vadd.f32 %v2370_v25, %v10758_v10  ;;  %3773 = vperm.xlu1 %4951, %v5069_v32   ;;  %v2789_v9 = vmax.f32 %v2788_v30, %v2624_v57  ;;  %v2858_v6 = vmax.f32 %v2857_v58, %v2625_v46  ;;  %v10762_v7 = vld [vmem:[#allocation112_spill] sm:$0xff]  ;;  %v10763_v57 = vld [vmem:[#allocation113_spill] sm:$0xff] }
 0x283   :  { %v2927_v5 = vmax.f32 %v2926_v24, %v2626_v13  ;;  %v3158_v4 = vadd.f32 %v2370_v25, %v10759_v60  ;;  %3785 = vperm.xlu0 %4952, %v5070_v21   ;;  %v2996_v61 = vmax.f32 %v2995_v27, %v2627_v17  ;;  %v3159_v51 = vadd.f32 %v2370_v25, %v10760_v39  ;;  %v10764_v24 = vld [vmem:[#allocation114_spill] sm:$0xff]  ;;  %v2378_v21 = vpop.permute.xlu1 %2377  ;;  %v5071_v25 = vld [vmem:[%s9470_s1 + $0x1a8] sm:$0xff]  ;;  %v10766_v39 = vld [vmem:[#allocation124_spill] sm:$0xff] }
 0x284   :  { %v3321_v47 = vmin.f32 %v3320_v48, %v3156_v1  ;;  %v3390_v12 = vmin.f32 %v3389_v33, %v3157_v16  ;;  %v2628_v10 = vsub.f32 %v2374_v0, %v10761_v3  ;;  %v2629_v32 = vsub.f32 %v2374_v0, %v10762_v7 }
 0x285   :  { %v3459_v18 = vmin.f32 %v3458_v29, %v3158_v4  ;;  %v2630_v30 = vsub.f32 %v2374_v0, %v10763_v57  ;;  %v3528_v58 = vmin.f32 %v3527_v63, %v3159_v51  ;;  %v2631_v46 = vsub.f32 %v2374_v0, %v10764_v24  ;;  %v5072_v29 = vld [vmem:[%s9470_s1 + $0x1c0] sm:$0xff] }
 0x286   :  { %v3160_v13 = vadd.f32 %v2374_v0, %v10761_v3  ;;  %v3161_v60 = vadd.f32 %v2374_v0, %v10762_v7  ;;  %3781 = vperm.xlu1 %4951, %v5071_v25   ;;  %v2790_v16 = vmax.f32 %v2789_v9, %v2628_v10  ;;  %v2859_v27 = vmax.f32 %v2858_v6, %v2629_v32  ;;  %v10765_v7 = vld [vmem:[#allocation123_spill] sm:$0xff]  ;;  %v10767_v10 = vld [vmem:[#allocation125_spill] sm:$0xff] }
 0x287   :  { %v2928_v48 = vmax.f32 %v2927_v5, %v2630_v30  ;;  %v3162_v33 = vadd.f32 %v2374_v0, %v10763_v57  ;;  %3793 = vperm.xlu0 %4952, %v5072_v29   ;;  %v2997_v63 = vmax.f32 %v2996_v61, %v2631_v46  ;;  %v3163_v17 = vadd.f32 %v2374_v0, %v10764_v24  ;;  %v10768_v5 = vld [vmem:[#allocation126_spill] sm:$0xff]  ;;  %v2382_v29 = vpop.permute.xlu0 %2381  ;;  %v5073_v0 = vld [vmem:[%s9470_s1 + $0x1b8] sm:$0xff]  ;;  %v10769_v24 = vld [vmem:[#allocation119_spill] sm:$0xff] }
 0x288   :  { %v3322_v1 = vmin.f32 %v3321_v47, %v3160_v13  ;;  %v3391_v4 = vmin.f32 %v3390_v12, %v3161_v60  ;;  %v2632_v3 = vsub.f32 %v2378_v21, %v10765_v7  ;;  %v2633_v25 = vsub.f32 %v2378_v21, %v10766_v39 }
 0x289   :  { %v3460_v51 = vmin.f32 %v3459_v18, %v3162_v33  ;;  %v2634_v9 = vsub.f32 %v2378_v21, %v10767_v10  ;;  %v3529_v6 = vmin.f32 %v3528_v58, %v3163_v17  ;;  %v2635_v32 = vsub.f32 %v2378_v21, %v10768_v5  ;;  %v5074_v18 = vld [vmem:[%s9470_s1 + $0x1d0] sm:$0xff] }
 0x28a   :  { %v3164_v30 = vadd.f32 %v2378_v21, %v10765_v7  ;;  %v3165_v57 = vadd.f32 %v2378_v21, %v10766_v39  ;;  %3789 = vperm.xlu1 %4951, %v5073_v0   ;;  %v2791_v60 = vmax.f32 %v2790_v16, %v2632_v3  ;;  %v2860_v61 = vmax.f32 %v2859_v27, %v2633_v25  ;;  %v10770_v7 = vld [vmem:[#allocation120_spill] sm:$0xff]  ;;  %v10771_v3 = vld [vmem:[#allocation121_spill] sm:$0xff] }
 0x28b   :  { %v2929_v47 = vmax.f32 %v2928_v48, %v2634_v9  ;;  %v3166_v12 = vadd.f32 %v2378_v21, %v10767_v10  ;;  %3801 = vperm.xlu0 %4952, %v5074_v18   ;;  %v2998_v58 = vmax.f32 %v2997_v63, %v2635_v32  ;;  %v3167_v46 = vadd.f32 %v2378_v21, %v10768_v5  ;;  %v10772_v48 = vld [vmem:[#allocation122_spill] sm:$0xff]  ;;  %v2386_v18 = vpop.permute.xlu1 %2385  ;;  %v5075_v21 = vld [vmem:[%s9470_s1 + $0x1c8] sm:$0xff]  ;;  %v10774_v5 = vld [vmem:[#allocation132_spill] sm:$0xff] }
 0x28c   :  { %v3323_v13 = vmin.f32 %v3322_v1, %v3164_v30  ;;  %v3392_v33 = vmin.f32 %v3391_v4, %v3165_v57  ;;  %v2636_v39 = vsub.f32 %v2382_v29, %v10769_v24  ;;  %v2637_v0 = vsub.f32 %v2382_v29, %v10770_v7 }
 0x28d   :  { %v3461_v17 = vmin.f32 %v3460_v51, %v3166_v12  ;;  %v2638_v16 = vsub.f32 %v2382_v29, %v10771_v3  ;;  %v3530_v27 = vmin.f32 %v3529_v6, %v3167_v46  ;;  %v2639_v25 = vsub.f32 %v2382_v29, %v10772_v48  ;;  %v5076_v51 = vld [vmem:[%s9470_s1 + $0x1e0] sm:$0xff] }
 0x28e   :  { %v3168_v9 = vadd.f32 %v2382_v29, %v10769_v24  ;;  %v3169_v10 = vadd.f32 %v2382_v29, %v10770_v7  ;;  %3797 = vperm.xlu1 %4951, %v5075_v21   ;;  %v2792_v57 = vmax.f32 %v2791_v60, %v2636_v39  ;;  %v2861_v63 = vmax.f32 %v2860_v61, %v2637_v0  ;;  %v10773_v7 = vld [vmem:[#allocation131_spill] sm:$0xff]  ;;  %v10775_v39 = vld [vmem:[#allocation133_spill] sm:$0xff] }
 0x28f   :  { %v2930_v1 = vmax.f32 %v2929_v47, %v2638_v16  ;;  %v3170_v4 = vadd.f32 %v2382_v29, %v10771_v3  ;;  %3809 = vperm.xlu0 %4952, %v5076_v51   ;;  %v2999_v6 = vmax.f32 %v2998_v58, %v2639_v25  ;;  %v3171_v32 = vadd.f32 %v2382_v29, %v10772_v48  ;;  %v10776_v47 = vld [vmem:[#allocation134_spill] sm:$0xff]  ;;  %v2390_v51 = vpop.permute.xlu0 %2389  ;;  %v5077_v29 = vld [vmem:[%s9470_s1 + $0x1d8] sm:$0xff]  ;;  %v10777_v48 = vld [vmem:[#allocation127_spill] sm:$0xff] }
 0x290   :  { %v3324_v30 = vmin.f32 %v3323_v13, %v3168_v9  ;;  %v3393_v12 = vmin.f32 %v3392_v33, %v3169_v10  ;;  %v2640_v24 = vsub.f32 %v2386_v18, %v10773_v7  ;;  %v2641_v21 = vsub.f32 %v2386_v18, %v10774_v5 }
 0x291   :  { %v3462_v46 = vmin.f32 %v3461_v17, %v3170_v4  ;;  %v2642_v60 = vsub.f32 %v2386_v18, %v10775_v39  ;;  %v3531_v61 = vmin.f32 %v3530_v27, %v3171_v32  ;;  %v2643_v0 = vsub.f32 %v2386_v18, %v10776_v47  ;;  %v5078_v17 = vld [vmem:[%s9470_s1 + $0x1f0] sm:$0xff] }
 0x292   :  { %v3172_v16 = vadd.f32 %v2386_v18, %v10773_v7  ;;  %v3173_v3 = vadd.f32 %v2386_v18, %v10774_v5  ;;  %3805 = vperm.xlu1 %4951, %v5077_v29   ;;  %v2793_v10 = vmax.f32 %v2792_v57, %v2640_v24  ;;  %v2862_v58 = vmax.f32 %v2861_v63, %v2641_v21  ;;  %v10778_v7 = vld [vmem:[#allocation128_spill] sm:$0xff]  ;;  %v10779_v24 = vld [vmem:[#allocation129_spill] sm:$0xff] }
 0x293   :  { %v2931_v13 = vmax.f32 %v2930_v1, %v2642_v60  ;;  %v3174_v33 = vadd.f32 %v2386_v18, %v10775_v39  ;;  %3817 = vperm.xlu0 %4952, %v5078_v17   ;;  %v3000_v27 = vmax.f32 %v2999_v6, %v2643_v0  ;;  %v3175_v25 = vadd.f32 %v2386_v18, %v10776_v47  ;;  %v10780_v1 = vld [vmem:[#allocation130_spill] sm:$0xff]  ;;  %v2394_v17 = vpop.permute.xlu1 %2393  ;;  %v5079_v18 = vld [vmem:[%s9470_s1 + $0x1e8] sm:$0xff] }
 0x294   :  { %v3325_v9 = vmin.f32 %v3324_v30, %v3172_v16  ;;  %v3394_v4 = vmin.f32 %v3393_v12, %v3173_v3  ;;  %v2644_v5 = vsub.f32 %v2390_v51, %v10777_v48  ;;  %v2645_v29 = vsub.f32 %v2390_v51, %v10778_v7 }
 0x295   :  { %v3463_v32 = vmin.f32 %v3462_v46, %v3174_v33  ;;  %v2646_v57 = vsub.f32 %v2390_v51, %v10779_v24  ;;  %v3532_v63 = vmin.f32 %v3531_v61, %v3175_v25  ;;  %v2647_v21 = vsub.f32 %v2390_v51, %v10780_v1  ;;  %v10781_v25 = vld [vmem:[#allocation139_spill] sm:$0xff] }
 0x296   :  { %v3176_v60 = vadd.f32 %v2390_v51, %v10777_v48  ;;  %v3177_v39 = vadd.f32 %v2390_v51, %v10778_v7  ;;  %3813 = vperm.xlu1 %4951, %v5079_v18   ;;  %v2794_v3 = vmax.f32 %v2793_v10, %v2644_v5  ;;  %v2863_v6 = vmax.f32 %v2862_v58, %v2645_v29  ;;  %v10782_v7 = vld [vmem:[#allocation140_spill] sm:$0xff]  ;;  %v2398_v58 = vpop.permute.xlu0 %2397 }
 0x297   :  { %v2932_v30 = vmax.f32 %v2931_v13, %v2646_v57  ;;  %v3178_v12 = vadd.f32 %v2390_v51, %v10779_v24  ;;  %v3001_v46 = vmax.f32 %v3000_v27, %v2647_v21  ;;  %v3179_v61 = vadd.f32 %v2390_v51, %v10780_v1  ;;  %v5080_v51 = vld [vmem:[%s9470_s1 + $0x1f8] sm:$0xff]  ;;  %v10785_v21 = vld [vmem:[#allocation135_spill] sm:$0xff] }
 0x298   :  { %v3326_v0 = vmin.f32 %v3325_v9, %v3176_v60  ;;  %v3395_v16 = vmin.f32 %v3394_v4, %v3177_v39  ;;  %v2648_v48 = vsub.f32 %v2394_v17, %v10781_v25  ;;  %v2649_v47 = vsub.f32 %v2394_v17, %v10782_v7  ;;  %v10787_v1 = vld [vmem:[#allocation137_spill] sm:$0xff] }
 0x299   :  { %v3464_v33 = vmin.f32 %v3463_v32, %v3178_v12  ;;  %v2650_v37 = vsub.f32 %v2394_v17, %v10783_v38  ;;  %v3533_v36 = vmin.f32 %v3532_v63, %v3179_v61  ;;  %v2651_v18 = vsub.f32 %v2394_v17, %v10784_v35  ;;  %v10786_v12 = vld [vmem:[#allocation136_spill] sm:$0xff] }
 0x29a   :  { %v3180_v5 = vadd.f32 %v2394_v17, %v10781_v25  ;;  %v3181_v10 = vadd.f32 %v2394_v17, %v10782_v7  ;;  %3821 = vperm.xlu1 %4951, %v5080_v51   ;;  %v2795_v39 = vmax.f32 %v2794_v3, %v2648_v48  ;;  %v2864_v13 = vmax.f32 %v2863_v6, %v2649_v47  ;;  %v10788_v25 = vld [vmem:[#allocation138_spill] sm:$0xff]  ;;  %v2402_v47 = vpop.permute.xlu1 %2401 }
 0x29b   :  { %v2933_v27 = vmax.f32 %v2932_v30, %v2650_v37  ;;  %v3182_v9 = vadd.f32 %v2394_v17, %v10783_v38  ;;  %v3002_v4 = vmax.f32 %v3001_v46, %v2651_v18  ;;  %v3183_v32 = vadd.f32 %v2394_v17, %v10784_v35 }
 0x29c   :  { %v3327_v29 = vmin.f32 %v3326_v0, %v3180_v5  ;;  %v3396_v57 = vmin.f32 %v3395_v16, %v3181_v10  ;;  %v2652_v60 = vsub.f32 %v2398_v58, %v10785_v21  ;;  %v2653_v61 = vsub.f32 %v2398_v58, %v10786_v12  ;;  %v10789_v5 = vld [vmem:[#allocation147_spill] sm:$0xff]  ;;  %v10790_v10 = vld [vmem:[#allocation148_spill] sm:$0xff] }
 0x29d   :  { %v3465_v63 = vmin.f32 %v3464_v33, %v3182_v9  ;;  %v2654_v24 = vsub.f32 %v2398_v58, %v10787_v1  ;;  %v3534_v7 = vmin.f32 %v3533_v36, %v3183_v32  ;;  %v2655_v51 = vsub.f32 %v2398_v58, %v10788_v25  ;;  %v10791_v32 = vld [vmem:[#allocation149_spill] sm:$0xff] }
 0x29e   :  { %v3184_v48 = vadd.f32 %v2398_v58, %v10785_v21  ;;  %v3185_v37 = vadd.f32 %v2398_v58, %v10786_v12  ;;  %v2796_v3 = vmax.f32 %v2795_v39, %v2652_v60  ;;  %v2865_v6 = vmax.f32 %v2864_v13, %v2653_v61  ;;  %v10792_v12 = vld [vmem:[#allocation150_spill] sm:$0xff]  ;;  %v2406_v13 = vpop.permute.xlu0 %2405 }
 0x29f   :  { %v2934_v17 = vmax.f32 %v2933_v27, %v2654_v24  ;;  %v3186_v30 = vadd.f32 %v2398_v58, %v10787_v1  ;;  %v3003_v46 = vmax.f32 %v3002_v4, %v2655_v51  ;;  %v3187_v0 = vadd.f32 %v2398_v58, %v10788_v25 }
 0x2a0   :  { %v3328_v16 = vmin.f32 %v3327_v29, %v3184_v48  ;;  %v3397_v33 = vmin.f32 %v3396_v57, %v3185_v37  ;;  %v2656_v36 = vsub.f32 %v2402_v47, %v10789_v5  ;;  %v2657_v9 = vsub.f32 %v2402_v47, %v10790_v10  ;;  %v10793_v48 = vld [vmem:[#allocation143_spill] sm:$0xff]  ;;  %v10794_v37 = vld [vmem:[#allocation144_spill] sm:$0xff] }
 0x2a1   :  { %v3466_v18 = vmin.f32 %v3465_v63, %v3186_v30  ;;  %v2658_v21 = vsub.f32 %v2402_v47, %v10791_v32  ;;  %v3535_v35 = vmin.f32 %v3534_v7, %v3187_v0  ;;  %v2659_v38 = vsub.f32 %v2402_v47, %v10792_v12  ;;  %v10795_v0 = vld [vmem:[#allocation145_spill] sm:$0xff] }
 0x2a2   :  { %v3188_v39 = vadd.f32 %v2402_v47, %v10789_v5  ;;  %v3189_v24 = vadd.f32 %v2402_v47, %v10790_v10  ;;  %v2797_v27 = vmax.f32 %v2796_v3, %v2656_v36  ;;  %v2866_v4 = vmax.f32 %v2865_v6, %v2657_v9  ;;  %v10796_v10 = vld [vmem:[#allocation146_spill] sm:$0xff]  ;;  %v2410_v6 = vpop.permute.xlu1 %2409 }
 0x2a3   :  { %v2935_v58 = vmax.f32 %v2934_v17, %v2658_v21  ;;  %v3190_v29 = vadd.f32 %v2402_v47, %v10791_v32  ;;  %v3004_v57 = vmax.f32 %v3003_v46, %v2659_v38  ;;  %v3191_v63 = vadd.f32 %v2402_v47, %v10792_v12 }
 0x2a4   :  { %v3329_v60 = vmin.f32 %v3328_v16, %v3188_v39  ;;  %v3398_v61 = vmin.f32 %v3397_v33, %v3189_v24  ;;  %v2660_v7 = vsub.f32 %v2406_v13, %v10793_v48  ;;  %v2661_v30 = vsub.f32 %v2406_v13, %v10794_v37  ;;  %v10797_v39 = vld [vmem:[#allocation155_spill] sm:$0xff]  ;;  %v10798_v24 = vld [vmem:[#allocation156_spill] sm:$0xff] }
 0x2a5   :  { %v3467_v51 = vmin.f32 %v3466_v18, %v3190_v29  ;;  %v2662_v25 = vsub.f32 %v2406_v13, %v10795_v0  ;;  %v3536_v1 = vmin.f32 %v3535_v35, %v3191_v63  ;;  %v2663_v5 = vsub.f32 %v2406_v13, %v10796_v10  ;;  %v10799_v63 = vld [vmem:[#allocation157_spill] sm:$0xff] }
 0x2a6   :  { %v3192_v3 = vadd.f32 %v2406_v13, %v10793_v48  ;;  %v3193_v21 = vadd.f32 %v2406_v13, %v10794_v37  ;;  %v2798_v38 = vmax.f32 %v2797_v27, %v2660_v7  ;;  %v2867_v17 = vmax.f32 %v2866_v4, %v2661_v30  ;;  %v10800_v37 = vld [vmem:[#allocation158_spill] sm:$0xff]  ;;  %v2414_v4 = vpop.permute.xlu0 %2413 }
 0x2a7   :  { %v2936_v47 = vmax.f32 %v2935_v58, %v2662_v25  ;;  %v3194_v46 = vadd.f32 %v2406_v13, %v10795_v0  ;;  %v3005_v16 = vmax.f32 %v3004_v57, %v2663_v5  ;;  %v3195_v33 = vadd.f32 %v2406_v13, %v10796_v10 }
 0x2a8   :  { %v3330_v18 = vmin.f32 %v3329_v60, %v3192_v3  ;;  %v3399_v36 = vmin.f32 %v3398_v61, %v3193_v21  ;;  %v2664_v35 = vsub.f32 %v2410_v6, %v10797_v39  ;;  %v2665_v29 = vsub.f32 %v2410_v6, %v10798_v24  ;;  %v10801_v3 = vld [vmem:[#allocation151_spill] sm:$0xff]  ;;  %v10802_v21 = vld [vmem:[#allocation152_spill] sm:$0xff] }
 0x2a9   :  { %v3468_v9 = vmin.f32 %v3467_v51, %v3194_v46  ;;  %v2666_v48 = vsub.f32 %v2410_v6, %v10799_v63  ;;  %v3537_v12 = vmin.f32 %v3536_v1, %v3195_v33  ;;  %v2667_v32 = vsub.f32 %v2410_v6, %v10800_v37  ;;  %v10803_v33 = vld [vmem:[#allocation153_spill] sm:$0xff] }
 0x2aa   :  { %v3196_v27 = vadd.f32 %v2410_v6, %v10797_v39  ;;  %v3197_v25 = vadd.f32 %v2410_v6, %v10798_v24  ;;  %v2799_v5 = vmax.f32 %v2798_v38, %v2664_v35  ;;  %v2868_v58 = vmax.f32 %v2867_v17, %v2665_v29  ;;  %v10804_v24 = vld [vmem:[#allocation154_spill] sm:$0xff]  ;;  %v2418_v17 = vpop.permute.xlu1 %2417 }
 0x2ab   :  { %v2937_v13 = vmax.f32 %v2936_v47, %v2666_v48  ;;  %v3198_v57 = vadd.f32 %v2410_v6, %v10799_v63  ;;  %v3006_v60 = vmax.f32 %v3005_v16, %v2667_v32  ;;  %v3199_v61 = vadd.f32 %v2410_v6, %v10800_v37 }
 0x2ac   :  { %v3331_v51 = vmin.f32 %v3330_v18, %v3196_v27  ;;  %v3400_v7 = vmin.f32 %v3399_v36, %v3197_v25  ;;  %v2668_v1 = vsub.f32 %v2414_v4, %v10801_v3  ;;  %v2669_v46 = vsub.f32 %v2414_v4, %v10802_v21  ;;  %v10805_v27 = vld [vmem:[#allocation163_spill] sm:$0xff]  ;;  %v10806_v25 = vld [vmem:[#allocation164_spill] sm:$0xff] }
 0x2ad   :  { %v3469_v30 = vmin.f32 %v3468_v9, %v3198_v57  ;;  %v2670_v10 = vsub.f32 %v2414_v4, %v10803_v33  ;;  %v3538_v0 = vmin.f32 %v3537_v12, %v3199_v61  ;;  %v2671_v39 = vsub.f32 %v2414_v4, %v10804_v24  ;;  %v10807_v61 = vld [vmem:[#allocation165_spill] sm:$0xff] }
 0x2ae   :  { %v3200_v38 = vadd.f32 %v2414_v4, %v10801_v3  ;;  %v3201_v48 = vadd.f32 %v2414_v4, %v10802_v21  ;;  %v2800_v32 = vmax.f32 %v2799_v5, %v2668_v1  ;;  %v2869_v47 = vmax.f32 %v2868_v58, %v2669_v46  ;;  %v10808_v21 = vld [vmem:[#allocation166_spill] sm:$0xff]  ;;  %v2422_v58 = vpop.permute.xlu0 %2421 }
 0x2af   :  { %v2938_v6 = vmax.f32 %v2937_v13, %v2670_v10  ;;  %v3202_v16 = vadd.f32 %v2414_v4, %v10803_v33  ;;  %v3007_v18 = vmax.f32 %v3006_v60, %v2671_v39  ;;  %v3203_v36 = vadd.f32 %v2414_v4, %v10804_v24 }
 0x2b0   :  { %v3332_v9 = vmin.f32 %v3331_v51, %v3200_v38  ;;  %v3401_v35 = vmin.f32 %v3400_v7, %v3201_v48  ;;  %v2672_v12 = vsub.f32 %v2418_v17, %v10805_v27  ;;  %v2673_v57 = vsub.f32 %v2418_v17, %v10806_v25  ;;  %v10809_v38 = vld [vmem:[#allocation159_spill] sm:$0xff]  ;;  %v10810_v48 = vld [vmem:[#allocation160_spill] sm:$0xff] }
 0x2b1   :  { %v3470_v29 = vmin.f32 %v3469_v30, %v3202_v16  ;;  %v2674_v3 = vsub.f32 %v2418_v17, %v10807_v61  ;;  %v3539_v37 = vmin.f32 %v3538_v0, %v3203_v36  ;;  %v2675_v63 = vsub.f32 %v2418_v17, %v10808_v21  ;;  %v10811_v36 = vld [vmem:[#allocation161_spill] sm:$0xff] }
 0x2b2   :  { %v3204_v5 = vadd.f32 %v2418_v17, %v10805_v27  ;;  %v3205_v10 = vadd.f32 %v2418_v17, %v10806_v25  ;;  %v2801_v39 = vmax.f32 %v2800_v32, %v2672_v12  ;;  %v2870_v13 = vmax.f32 %v2869_v47, %v2673_v57  ;;  %v10812_v25 = vld [vmem:[#allocation162_spill] sm:$0xff]  ;;  %v2426_v47 = vpop.permute.xlu1 %2425 }
 0x2b3   :  { %v2939_v4 = vmax.f32 %v2938_v6, %v2674_v3  ;;  %v3206_v60 = vadd.f32 %v2418_v17, %v10807_v61  ;;  %v3008_v51 = vmax.f32 %v3007_v18, %v2675_v63  ;;  %v3207_v7 = vadd.f32 %v2418_v17, %v10808_v21 }
 0x2b4   :  { %v3333_v30 = vmin.f32 %v3332_v9, %v3204_v5  ;;  %v3402_v1 = vmin.f32 %v3401_v35, %v3205_v10  ;;  %v2676_v0 = vsub.f32 %v2422_v58, %v10809_v38  ;;  %v2677_v16 = vsub.f32 %v2422_v58, %v10810_v48  ;;  %v10813_v5 = vld [vmem:[#allocation171_spill] sm:$0xff]  ;;  %v10814_v10 = vld [vmem:[#allocation172_spill] sm:$0xff] }
 0x2b5   :  { %v3471_v46 = vmin.f32 %v3470_v29, %v3206_v60  ;;  %v2678_v24 = vsub.f32 %v2422_v58, %v10811_v36  ;;  %v3540_v33 = vmin.f32 %v3539_v37, %v3207_v7  ;;  %v2679_v27 = vsub.f32 %v2422_v58, %v10812_v25  ;;  %v10815_v7 = vld [vmem:[#allocation173_spill] sm:$0xff] }
 0x2b6   :  { %v3208_v32 = vadd.f32 %v2422_v58, %v10809_v38  ;;  %v3209_v3 = vadd.f32 %v2422_v58, %v10810_v48  ;;  %v2802_v63 = vmax.f32 %v2801_v39, %v2676_v0  ;;  %v2871_v6 = vmax.f32 %v2870_v13, %v2677_v16  ;;  %v10816_v48 = vld [vmem:[#allocation174_spill] sm:$0xff]  ;;  %v2430_v13 = vpop.permute.xlu0 %2429 }
 0x2b7   :  { %v2940_v17 = vmax.f32 %v2939_v4, %v2678_v24  ;;  %v3210_v18 = vadd.f32 %v2422_v58, %v10811_v36  ;;  %v3009_v9 = vmax.f32 %v3008_v51, %v2679_v27  ;;  %v3211_v35 = vadd.f32 %v2422_v58, %v10812_v25 }
 0x2b8   :  { %v3334_v29 = vmin.f32 %v3333_v30, %v3208_v32  ;;  %v3403_v12 = vmin.f32 %v3402_v1, %v3209_v3  ;;  %v2680_v37 = vsub.f32 %v2426_v47, %v10813_v5  ;;  %v2681_v60 = vsub.f32 %v2426_v47, %v10814_v10  ;;  %v10817_v32 = vld [vmem:[#allocation167_spill] sm:$0xff]  ;;  %v10818_v3 = vld [vmem:[#allocation168_spill] sm:$0xff] }
 0x2b9   :  { %v3472_v57 = vmin.f32 %v3471_v46, %v3210_v18  ;;  %v2682_v38 = vsub.f32 %v2426_v47, %v10815_v7  ;;  %v3541_v21 = vmin.f32 %v3540_v33, %v3211_v35  ;;  %v2683_v61 = vsub.f32 %v2426_v47, %v10816_v48  ;;  %v10819_v35 = vld [vmem:[#allocation169_spill] sm:$0xff] }
 0x2ba   :  { %v3212_v39 = vadd.f32 %v2426_v47, %v10813_v5  ;;  %v3213_v24 = vadd.f32 %v2426_v47, %v10814_v10  ;;  %v2803_v27 = vmax.f32 %v2802_v63, %v2680_v37  ;;  %v2872_v4 = vmax.f32 %v2871_v6, %v2681_v60  ;;  %v10820_v10 = vld [vmem:[#allocation170_spill] sm:$0xff]  ;;  %v2434_v6 = vpop.permute.xlu1 %2433 }
 0x2bb   :  { %v2941_v58 = vmax.f32 %v2940_v17, %v2682_v38  ;;  %v3214_v51 = vadd.f32 %v2426_v47, %v10815_v7  ;;  %v3010_v30 = vmax.f32 %v3009_v9, %v2683_v61  ;;  %v3215_v1 = vadd.f32 %v2426_v47, %v10816_v48 }
 0x2bc   :  { %v3335_v46 = vmin.f32 %v3334_v29, %v3212_v39  ;;  %v3404_v0 = vmin.f32 %v3403_v12, %v3213_v24  ;;  %v2684_v33 = vsub.f32 %v2430_v13, %v10817_v32  ;;  %v2685_v18 = vsub.f32 %v2430_v13, %v10818_v3  ;;  %v10821_v39 = vld [vmem:[#allocation179_spill] sm:$0xff]  ;;  %v10822_v24 = vld [vmem:[#allocation180_spill] sm:$0xff] }
 0x2bd   :  { %v3473_v16 = vmin.f32 %v3472_v57, %v3214_v51  ;;  %v2686_v25 = vsub.f32 %v2430_v13, %v10819_v35  ;;  %v3542_v36 = vmin.f32 %v3541_v21, %v3215_v1  ;;  %v2687_v5 = vsub.f32 %v2430_v13, %v10820_v10  ;;  %v10823_v1 = vld [vmem:[#allocation181_spill] sm:$0xff] }
 0x2be   :  { %v3216_v63 = vadd.f32 %v2430_v13, %v10817_v32  ;;  %v3217_v38 = vadd.f32 %v2430_v13, %v10818_v3  ;;  %v2804_v61 = vmax.f32 %v2803_v27, %v2684_v33  ;;  %v2873_v17 = vmax.f32 %v2872_v4, %v2685_v18  ;;  %v10824_v3 = vld [vmem:[#allocation182_spill] sm:$0xff]  ;;  %v2438_v4 = vpop.permute.xlu0 %2437 }
 0x2bf   :  { %v2942_v47 = vmax.f32 %v2941_v58, %v2686_v25  ;;  %v3218_v9 = vadd.f32 %v2430_v13, %v10819_v35  ;;  %v3011_v29 = vmax.f32 %v3010_v30, %v2687_v5  ;;  %v3219_v12 = vadd.f32 %v2430_v13, %v10820_v10 }
 0x2c0   :  { %v3336_v57 = vmin.f32 %v3335_v46, %v3216_v63  ;;  %v3405_v37 = vmin.f32 %v3404_v0, %v3217_v38  ;;  %v2688_v21 = vsub.f32 %v2434_v6, %v10821_v39  ;;  %v2689_v51 = vsub.f32 %v2434_v6, %v10822_v24  ;;  %v10825_v63 = vld [vmem:[#allocation175_spill] sm:$0xff]  ;;  %v10826_v38 = vld [vmem:[#allocation176_spill] sm:$0xff] }
 0x2c1   :  { %v3474_v60 = vmin.f32 %v3473_v16, %v3218_v9  ;;  %v2690_v32 = vsub.f32 %v2434_v6, %v10823_v1  ;;  %v3543_v48 = vmin.f32 %v3542_v36, %v3219_v12  ;;  %v2691_v7 = vsub.f32 %v2434_v6, %v10824_v3  ;;  %v10827_v12 = vld [vmem:[#allocation177_spill] sm:$0xff] }
 0x2c2   :  { %v3220_v27 = vadd.f32 %v2434_v6, %v10821_v39  ;;  %v3221_v25 = vadd.f32 %v2434_v6, %v10822_v24  ;;  %v2805_v5 = vmax.f32 %v2804_v61, %v2688_v21  ;;  %v2874_v58 = vmax.f32 %v2873_v17, %v2689_v51  ;;  %v10828_v24 = vld [vmem:[#allocation178_spill] sm:$0xff]  ;;  %v2442_v17 = vpop.permute.xlu1 %2441 }
 0x2c3   :  { %v2943_v13 = vmax.f32 %v2942_v47, %v2690_v32  ;;  %v3222_v30 = vadd.f32 %v2434_v6, %v10823_v1  ;;  %v3012_v46 = vmax.f32 %v3011_v29, %v2691_v7  ;;  %v3223_v0 = vadd.f32 %v2434_v6, %v10824_v3 }
 0x2c4   :  { %v3337_v16 = vmin.f32 %v3336_v57, %v3220_v27  ;;  %v3406_v33 = vmin.f32 %v3405_v37, %v3221_v25  ;;  %v2692_v36 = vsub.f32 %v2438_v4, %v10825_v63  ;;  %v2693_v9 = vsub.f32 %v2438_v4, %v10826_v38  ;;  %v10829_v27 = vld [vmem:[#allocation187_spill] sm:$0xff]  ;;  %v10830_v25 = vld [vmem:[#allocation188_spill] sm:$0xff] }
 0x2c5   :  { %v3475_v18 = vmin.f32 %v3474_v60, %v3222_v30  ;;  %v2694_v10 = vsub.f32 %v2438_v4, %v10827_v12  ;;  %v3544_v35 = vmin.f32 %v3543_v48, %v3223_v0  ;;  %v2695_v39 = vsub.f32 %v2438_v4, %v10828_v24  ;;  %v10831_v0 = vld [vmem:[#allocation189_spill] sm:$0xff] }
 0x2c6   :  { %v3224_v61 = vadd.f32 %v2438_v4, %v10825_v63  ;;  %v3225_v32 = vadd.f32 %v2438_v4, %v10826_v38  ;;  %v2806_v7 = vmax.f32 %v2805_v5, %v2692_v36  ;;  %v2875_v47 = vmax.f32 %v2874_v58, %v2693_v9  ;;  %v10832_v38 = vld [vmem:[#allocation190_spill] sm:$0xff]  ;;  %v2446_v58 = vpop.permute.xlu0 %2445 }
 0x2c7   :  { %v2944_v6 = vmax.f32 %v2943_v13, %v2694_v10  ;;  %v3226_v29 = vadd.f32 %v2438_v4, %v10827_v12  ;;  %v3013_v57 = vmax.f32 %v3012_v46, %v2695_v39  ;;  %v3227_v37 = vadd.f32 %v2438_v4, %v10828_v24 }
 0x2c8   :  { %v3338_v60 = vmin.f32 %v3337_v16, %v3224_v61  ;;  %v3407_v21 = vmin.f32 %v3406_v33, %v3225_v32  ;;  %v2696_v48 = vsub.f32 %v2442_v17, %v10829_v27  ;;  %v2697_v30 = vsub.f32 %v2442_v17, %v10830_v25  ;;  %v10833_v61 = vld [vmem:[#allocation183_spill] sm:$0xff]  ;;  %v10834_v32 = vld [vmem:[#allocation184_spill] sm:$0xff] }
 0x2c9   :  { %v3476_v51 = vmin.f32 %v3475_v18, %v3226_v29  ;;  %v2698_v63 = vsub.f32 %v2442_v17, %v10831_v0  ;;  %v3545_v3 = vmin.f32 %v3544_v35, %v3227_v37  ;;  %v2699_v1 = vsub.f32 %v2442_v17, %v10832_v38  ;;  %v10835_v37 = vld [vmem:[#allocation185_spill] sm:$0xff] }
 0x2ca   :  { %v3228_v5 = vadd.f32 %v2442_v17, %v10829_v27  ;;  %v3229_v10 = vadd.f32 %v2442_v17, %v10830_v25  ;;  %v2807_v39 = vmax.f32 %v2806_v7, %v2696_v48  ;;  %v2876_v13 = vmax.f32 %v2875_v47, %v2697_v30  ;;  %v10836_v25 = vld [vmem:[#allocation186_spill] sm:$0xff]  ;;  %v2450_v47 = vpop.permute.xlu1 %2449 }
 0x2cb   :  { %v2945_v4 = vmax.f32 %v2944_v6, %v2698_v63  ;;  %v3230_v46 = vadd.f32 %v2442_v17, %v10831_v0  ;;  %v3014_v16 = vmax.f32 %v3013_v57, %v2699_v1  ;;  %v3231_v33 = vadd.f32 %v2442_v17, %v10832_v38 }
 0x2cc   :  { %v3339_v18 = vmin.f32 %v3338_v60, %v3228_v5  ;;  %v3408_v36 = vmin.f32 %v3407_v21, %v3229_v10  ;;  %v2700_v35 = vsub.f32 %v2446_v58, %v10833_v61  ;;  %v2701_v29 = vsub.f32 %v2446_v58, %v10834_v32  ;;  %v10837_v5 = vld [vmem:[#allocation195_spill] sm:$0xff]  ;;  %v10838_v10 = vld [vmem:[#allocation196_spill] sm:$0xff] }
 0x2cd   :  { %v3477_v9 = vmin.f32 %v3476_v51, %v3230_v46  ;;  %v2702_v24 = vsub.f32 %v2446_v58, %v10835_v37  ;;  %v3546_v12 = vmin.f32 %v3545_v3, %v3231_v33  ;;  %v2703_v27 = vsub.f32 %v2446_v58, %v10836_v25  ;;  %v10839_v33 = vld [vmem:[#allocation197_spill] sm:$0xff] }
 0x2ce   :  { %v3232_v7 = vadd.f32 %v2446_v58, %v10833_v61  ;;  %v3233_v63 = vadd.f32 %v2446_v58, %v10834_v32  ;;  %v2808_v1 = vmax.f32 %v2807_v39, %v2700_v35  ;;  %v2877_v6 = vmax.f32 %v2876_v13, %v2701_v29  ;;  %v10840_v32 = vld [vmem:[#allocation198_spill] sm:$0xff]  ;;  %v2454_v13 = vpop.permute.xlu0 %2453 }
 0x2cf   :  { %v2946_v17 = vmax.f32 %v2945_v4, %v2702_v24  ;;  %v3234_v57 = vadd.f32 %v2446_v58, %v10835_v37  ;;  %v3015_v60 = vmax.f32 %v3014_v16, %v2703_v27  ;;  %v3235_v21 = vadd.f32 %v2446_v58, %v10836_v25 }
 0x2d0   :  { %v3340_v51 = vmin.f32 %v3339_v18, %v3232_v7  ;;  %v3409_v48 = vmin.f32 %v3408_v36, %v3233_v63  ;;  %v2704_v3 = vsub.f32 %v2450_v47, %v10837_v5  ;;  %v2705_v46 = vsub.f32 %v2450_v47, %v10838_v10  ;;  %v10841_v7 = vld [vmem:[#allocation191_spill] sm:$0xff]  ;;  %v10842_v63 = vld [vmem:[#allocation192_spill] sm:$0xff] }
 0x2d1   :  { %v3478_v30 = vmin.f32 %v3477_v9, %v3234_v57  ;;  %v2706_v61 = vsub.f32 %v2450_v47, %v10839_v33  ;;  %v3547_v38 = vmin.f32 %v3546_v12, %v3235_v21  ;;  %v2707_v0 = vsub.f32 %v2450_v47, %v10840_v32  ;;  %v10843_v21 = vld [vmem:[#allocation193_spill] sm:$0xff] }
 0x2d2   :  { %v3236_v39 = vadd.f32 %v2450_v47, %v10837_v5  ;;  %v3237_v24 = vadd.f32 %v2450_v47, %v10838_v10  ;;  %v2809_v27 = vmax.f32 %v2808_v1, %v2704_v3  ;;  %v2878_v4 = vmax.f32 %v2877_v6, %v2705_v46  ;;  %v10844_v10 = vld [vmem:[#allocation194_spill] sm:$0xff]  ;;  %v2458_v6 = vpop.permute.xlu1 %2457 }
 0x2d3   :  { %v2947_v58 = vmax.f32 %v2946_v17, %v2706_v61  ;;  %v3238_v16 = vadd.f32 %v2450_v47, %v10839_v33  ;;  %v3016_v18 = vmax.f32 %v3015_v60, %v2707_v0  ;;  %v3239_v36 = vadd.f32 %v2450_v47, %v10840_v32 }
 0x2d4   :  { %v3341_v9 = vmin.f32 %v3340_v51, %v3236_v39  ;;  %v3410_v35 = vmin.f32 %v3409_v48, %v3237_v24  ;;  %v2708_v12 = vsub.f32 %v2454_v13, %v10841_v7  ;;  %v2709_v57 = vsub.f32 %v2454_v13, %v10842_v63  ;;  %v10845_v39 = vld [vmem:[#allocation203_spill] sm:$0xff]  ;;  %v10846_v24 = vld [vmem:[#allocation204_spill] sm:$0xff] }
 0x2d5   :  { %v3479_v29 = vmin.f32 %v3478_v30, %v3238_v16  ;;  %v2710_v25 = vsub.f32 %v2454_v13, %v10843_v21  ;;  %v3548_v37 = vmin.f32 %v3547_v38, %v3239_v36  ;;  %v2711_v5 = vsub.f32 %v2454_v13, %v10844_v10  ;;  %v10847_v36 = vld [vmem:[#allocation205_spill] sm:$0xff] }
 0x2d6   :  { %v3240_v1 = vadd.f32 %v2454_v13, %v10841_v7  ;;  %v3241_v61 = vadd.f32 %v2454_v13, %v10842_v63  ;;  %v2810_v0 = vmax.f32 %v2809_v27, %v2708_v12  ;;  %v2879_v17 = vmax.f32 %v2878_v4, %v2709_v57  ;;  %v10848_v63 = vld [vmem:[#allocation206_spill] sm:$0xff]  ;;  %v2462_v4 = vpop.permute.xlu0 %2461 }
 0x2d7   :  { %v2948_v47 = vmax.f32 %v2947_v58, %v2710_v25  ;;  %v3242_v60 = vadd.f32 %v2454_v13, %v10843_v21  ;;  %v3017_v51 = vmax.f32 %v3016_v18, %v2711_v5  ;;  %v3243_v48 = vadd.f32 %v2454_v13, %v10844_v10 }
 0x2d8   :  { %v3342_v30 = vmin.f32 %v3341_v9, %v3240_v1  ;;  %v3411_v3 = vmin.f32 %v3410_v35, %v3241_v61  ;;  %v2712_v38 = vsub.f32 %v2458_v6, %v10845_v39  ;;  %v2713_v16 = vsub.f32 %v2458_v6, %v10846_v24  ;;  %v10849_v1 = vld [vmem:[#allocation199_spill] sm:$0xff]  ;;  %v10850_v61 = vld [vmem:[#allocation200_spill] sm:$0xff] }
 0x2d9   :  { %v3480_v46 = vmin.f32 %v3479_v29, %v3242_v60  ;;  %v2714_v7 = vsub.f32 %v2458_v6, %v10847_v36  ;;  %v3549_v32 = vmin.f32 %v3548_v37, %v3243_v48  ;;  %v2715_v33 = vsub.f32 %v2458_v6, %v10848_v63  ;;  %v10851_v48 = vld [vmem:[#allocation201_spill] sm:$0xff] }
 0x2da   :  { %v3244_v27 = vadd.f32 %v2458_v6, %v10845_v39  ;;  %v3245_v25 = vadd.f32 %v2458_v6, %v10846_v24  ;;  %v2811_v5 = vmax.f32 %v2810_v0, %v2712_v38  ;;  %v2880_v58 = vmax.f32 %v2879_v17, %v2713_v16  ;;  %v10852_v24 = vld [vmem:[#allocation202_spill] sm:$0xff]  ;;  %v2466_v17 = vpop.permute.xlu1 %2465 }
 0x2db   :  { %v2949_v13 = vmax.f32 %v2948_v47, %v2714_v7  ;;  %v3246_v18 = vadd.f32 %v2458_v6, %v10847_v36  ;;  %v3018_v9 = vmax.f32 %v3017_v51, %v2715_v33  ;;  %v3247_v35 = vadd.f32 %v2458_v6, %v10848_v63 }
 0x2dc   :  { %v3343_v29 = vmin.f32 %v3342_v30, %v3244_v27  ;;  %v3412_v12 = vmin.f32 %v3411_v3, %v3245_v25  ;;  %v2716_v37 = vsub.f32 %v2462_v4, %v10849_v1  ;;  %v2717_v60 = vsub.f32 %v2462_v4, %v10850_v61  ;;  %v10853_v27 = vld [vmem:[#allocation211_spill] sm:$0xff]  ;;  %v10854_v25 = vld [vmem:[#allocation212_spill] sm:$0xff] }
 0x2dd   :  { %v3481_v57 = vmin.f32 %v3480_v46, %v3246_v18  ;;  %v2718_v10 = vsub.f32 %v2462_v4, %v10851_v48  ;;  %v3550_v21 = vmin.f32 %v3549_v32, %v3247_v35  ;;  %v2719_v39 = vsub.f32 %v2462_v4, %v10852_v24  ;;  %v10855_v35 = vld [vmem:[#allocation213_spill] sm:$0xff] }
 0x2de   :  { %v3248_v0 = vadd.f32 %v2462_v4, %v10849_v1  ;;  %v3249_v7 = vadd.f32 %v2462_v4, %v10850_v61  ;;  %v2812_v33 = vmax.f32 %v2811_v5, %v2716_v37  ;;  %v2881_v47 = vmax.f32 %v2880_v58, %v2717_v60  ;;  %v10856_v61 = vld [vmem:[#allocation214_spill] sm:$0xff]  ;;  %v2470_v58 = vpop.permute.xlu0 %2469 }
 0x2df   :  { %v2950_v6 = vmax.f32 %v2949_v13, %v2718_v10  ;;  %v3250_v51 = vadd.f32 %v2462_v4, %v10851_v48  ;;  %v3019_v30 = vmax.f32 %v3018_v9, %v2719_v39  ;;  %v3251_v3 = vadd.f32 %v2462_v4, %v10852_v24 }
 0x2e0   :  { %v3344_v46 = vmin.f32 %v3343_v29, %v3248_v0  ;;  %v3413_v38 = vmin.f32 %v3412_v12, %v3249_v7  ;;  %v2720_v32 = vsub.f32 %v2466_v17, %v10853_v27  ;;  %v2721_v18 = vsub.f32 %v2466_v17, %v10854_v25  ;;  %v10857_v0 = vld [vmem:[#allocation207_spill] sm:$0xff]  ;;  %v10858_v7 = vld [vmem:[#allocation208_spill] sm:$0xff] }
 0x2e1   :  { %v3482_v16 = vmin.f32 %v3481_v57, %v3250_v51  ;;  %v2722_v1 = vsub.f32 %v2466_v17, %v10855_v35  ;;  %v3551_v63 = vmin.f32 %v3550_v21, %v3251_v3  ;;  %v2723_v36 = vsub.f32 %v2466_v17, %v10856_v61  ;;  %v10859_v3 = vld [vmem:[#allocation209_spill] sm:$0xff] }
 0x2e2   :  { %v3252_v5 = vadd.f32 %v2466_v17, %v10853_v27  ;;  %v3253_v10 = vadd.f32 %v2466_v17, %v10854_v25  ;;  %v2813_v39 = vmax.f32 %v2812_v33, %v2720_v32  ;;  %v2882_v13 = vmax.f32 %v2881_v47, %v2721_v18  ;;  %v10860_v25 = vld [vmem:[#allocation210_spill] sm:$0xff]  ;;  %v2474_v47 = vpop.permute.xlu1 %2473 }
 0x2e3   :  { %v2951_v4 = vmax.f32 %v2950_v6, %v2722_v1  ;;  %v3254_v9 = vadd.f32 %v2466_v17, %v10855_v35  ;;  %v3020_v29 = vmax.f32 %v3019_v30, %v2723_v36  ;;  %v3255_v12 = vadd.f32 %v2466_v17, %v10856_v61 }
 0x2e4   :  { %v3345_v57 = vmin.f32 %v3344_v46, %v3252_v5  ;;  %v3414_v37 = vmin.f32 %v3413_v38, %v3253_v10  ;;  %v2724_v21 = vsub.f32 %v2470_v58, %v10857_v0  ;;  %v2725_v51 = vsub.f32 %v2470_v58, %v10858_v7  ;;  %v10861_v5 = vld [vmem:[#allocation219_spill] sm:$0xff]  ;;  %v10862_v10 = vld [vmem:[#allocation220_spill] sm:$0xff] }
 0x2e5   :  { %v3483_v60 = vmin.f32 %v3482_v16, %v3254_v9  ;;  %v2726_v24 = vsub.f32 %v2470_v58, %v10859_v3  ;;  %v3552_v48 = vmin.f32 %v3551_v63, %v3255_v12  ;;  %v2727_v27 = vsub.f32 %v2470_v58, %v10860_v25  ;;  %v10863_v12 = vld [vmem:[#allocation221_spill] sm:$0xff] }
 0x2e6   :  { %v3256_v33 = vadd.f32 %v2470_v58, %v10857_v0  ;;  %v3257_v1 = vadd.f32 %v2470_v58, %v10858_v7  ;;  %v2814_v36 = vmax.f32 %v2813_v39, %v2724_v21  ;;  %v2883_v6 = vmax.f32 %v2882_v13, %v2725_v51  ;;  %v10864_v7 = vld [vmem:[#allocation222_spill] sm:$0xff]  ;;  %v2478_v13 = vpop.permute.xlu0 %2477 }
 0x2e7   :  { %v2952_v17 = vmax.f32 %v2951_v4, %v2726_v24  ;;  %v3258_v30 = vadd.f32 %v2470_v58, %v10859_v3  ;;  %v3021_v46 = vmax.f32 %v3020_v29, %v2727_v27  ;;  %v3259_v38 = vadd.f32 %v2470_v58, %v10860_v25 }
 0x2e8   :  { %v3346_v16 = vmin.f32 %v3345_v57, %v3256_v33  ;;  %v3415_v32 = vmin.f32 %v3414_v37, %v3257_v1  ;;  %v2728_v63 = vsub.f32 %v2474_v47, %v10861_v5  ;;  %v2729_v9 = vsub.f32 %v2474_v47, %v10862_v10  ;;  %v10865_v33 = vld [vmem:[#allocation215_spill] sm:$0xff]  ;;  %v10866_v1 = vld [vmem:[#allocation216_spill] sm:$0xff] }
 0x2e9   :  { %v3484_v18 = vmin.f32 %v3483_v60, %v3258_v30  ;;  %v2730_v0 = vsub.f32 %v2474_v47, %v10863_v12  ;;  %v3553_v61 = vmin.f32 %v3552_v48, %v3259_v38  ;;  %v2731_v35 = vsub.f32 %v2474_v47, %v10864_v7  ;;  %v10867_v38 = vld [vmem:[#allocation217_spill] sm:$0xff] }
 0x2ea   :  { %v3260_v39 = vadd.f32 %v2474_v47, %v10861_v5  ;;  %v3261_v24 = vadd.f32 %v2474_v47, %v10862_v10  ;;  %v2815_v27 = vmax.f32 %v2814_v36, %v2728_v63  ;;  %v2884_v4 = vmax.f32 %v2883_v6, %v2729_v9  ;;  %v10868_v10 = vld [vmem:[#allocation218_spill] sm:$0xff]  ;;  %v2482_v6 = vpop.permute.xlu1 %2481 }
 0x2eb   :  { %v2953_v58 = vmax.f32 %v2952_v17, %v2730_v0  ;;  %v3262_v29 = vadd.f32 %v2474_v47, %v10863_v12  ;;  %v3022_v57 = vmax.f32 %v3021_v46, %v2731_v35  ;;  %v3263_v37 = vadd.f32 %v2474_v47, %v10864_v7 }
 0x2ec   :  { %v3347_v60 = vmin.f32 %v3346_v16, %v3260_v39  ;;  %v3416_v21 = vmin.f32 %v3415_v32, %v3261_v24  ;;  %v2732_v48 = vsub.f32 %v2478_v13, %v10865_v33  ;;  %v2733_v30 = vsub.f32 %v2478_v13, %v10866_v1  ;;  %v10869_v39 = vld [vmem:[#allocation227_spill] sm:$0xff]  ;;  %v10870_v24 = vld [vmem:[#allocation228_spill] sm:$0xff] }
 0x2ed   :  { %v3485_v51 = vmin.f32 %v3484_v18, %v3262_v29  ;;  %v2734_v25 = vsub.f32 %v2478_v13, %v10867_v38  ;;  %v3554_v3 = vmin.f32 %v3553_v61, %v3263_v37  ;;  %v2735_v5 = vsub.f32 %v2478_v13, %v10868_v10  ;;  %v10871_v37 = vld [vmem:[#allocation229_spill] sm:$0xff] }
 0x2ee   :  { %v3264_v36 = vadd.f32 %v2478_v13, %v10865_v33  ;;  %v3265_v0 = vadd.f32 %v2478_v13, %v10866_v1  ;;  %v2816_v35 = vmax.f32 %v2815_v27, %v2732_v48  ;;  %v2885_v17 = vmax.f32 %v2884_v4, %v2733_v30  ;;  %v10872_v1 = vld [vmem:[#allocation230_spill] sm:$0xff]  ;;  %v2486_v4 = vpop.permute.xlu0 %2485 }
 0x2ef   :  { %v2954_v47 = vmax.f32 %v2953_v58, %v2734_v25  ;;  %v3266_v46 = vadd.f32 %v2478_v13, %v10867_v38  ;;  %v3023_v16 = vmax.f32 %v3022_v57, %v2735_v5  ;;  %v3267_v32 = vadd.f32 %v2478_v13, %v10868_v10 }
 0x2f0   :  { %v3348_v18 = vmin.f32 %v3347_v60, %v3264_v36  ;;  %v3417_v63 = vmin.f32 %v3416_v21, %v3265_v0  ;;  %v2736_v61 = vsub.f32 %v2482_v6, %v10869_v39  ;;  %v2737_v29 = vsub.f32 %v2482_v6, %v10870_v24  ;;  %v10873_v36 = vld [vmem:[#allocation223_spill] sm:$0xff]  ;;  %v10874_v0 = vld [vmem:[#allocation224_spill] sm:$0xff] }
 0x2f1   :  { %v3486_v9 = vmin.f32 %v3485_v51, %v3266_v46  ;;  %v2738_v33 = vsub.f32 %v2482_v6, %v10871_v37  ;;  %v3555_v7 = vmin.f32 %v3554_v3, %v3267_v32  ;;  %v2739_v12 = vsub.f32 %v2482_v6, %v10872_v1  ;;  %v10875_v32 = vld [vmem:[#allocation225_spill] sm:$0xff] }
 0x2f2   :  { %v3268_v27 = vadd.f32 %v2482_v6, %v10869_v39  ;;  %v3269_v25 = vadd.f32 %v2482_v6, %v10870_v24  ;;  %v2817_v5 = vmax.f32 %v2816_v35, %v2736_v61  ;;  %v2886_v58 = vmax.f32 %v2885_v17, %v2737_v29  ;;  %v10876_v24 = vld [vmem:[#allocation226_spill] sm:$0xff]  ;;  %v2490_v17 = vpop.permute.xlu1 %2489 }
 0x2f3   :  { %v2955_v13 = vmax.f32 %v2954_v47, %v2738_v33  ;;  %v3270_v57 = vadd.f32 %v2482_v6, %v10871_v37  ;;  %v3024_v60 = vmax.f32 %v3023_v16, %v2739_v12  ;;  %v3271_v21 = vadd.f32 %v2482_v6, %v10872_v1 }
 0x2f4   :  { %v3349_v51 = vmin.f32 %v3348_v18, %v3268_v27  ;;  %v3418_v48 = vmin.f32 %v3417_v63, %v3269_v25  ;;  %v2740_v3 = vsub.f32 %v2486_v4, %v10873_v36  ;;  %v2741_v46 = vsub.f32 %v2486_v4, %v10874_v0  ;;  %v10877_v25 = vld [vmem:[#allocation237_spill] sm:$0xff] }
 0x2f5   :  { %v3487_v30 = vmin.f32 %v3486_v9, %v3270_v57  ;;  %v2742_v10 = vsub.f32 %v2486_v4, %v10875_v32  ;;  %v3556_v38 = vmin.f32 %v3555_v7, %v3271_v21  ;;  %v2743_v39 = vsub.f32 %v2486_v4, %v10876_v24 }
 0x2f6   :  { %v3272_v35 = vadd.f32 %v2486_v4, %v10873_v36  ;;  %v3273_v33 = vadd.f32 %v2486_v4, %v10874_v0  ;;  %v2818_v12 = vmax.f32 %v2817_v5, %v2740_v3  ;;  %v2887_v47 = vmax.f32 %v2886_v58, %v2741_v46  ;;  %v10878_v0 = vld [vmem:[#allocation238_spill] sm:$0xff]  ;;  %v2494_v58 = vpop.permute.xlu0 %2493 }
 0x2f7   :  { %v2956_v6 = vmax.f32 %v2955_v13, %v2742_v10  ;;  %v3274_v16 = vadd.f32 %v2486_v4, %v10875_v32  ;;  %v3025_v18 = vmax.f32 %v3024_v60, %v2743_v39  ;;  %v3275_v63 = vadd.f32 %v2486_v4, %v10876_v24 }
 0x2f8   :  { %v3350_v9 = vmin.f32 %v3349_v51, %v3272_v35  ;;  %v3419_v61 = vmin.f32 %v3418_v48, %v3273_v33  ;;  %v2744_v7 = vsub.f32 %v2490_v17, %v10638_v62  ;;  %v2745_v27 = vsub.f32 %v2490_v17, %v10639_v50  ;;  %v10879_v35 = vld [vmem:[#allocation231_spill] sm:$0xff]  ;;  %v10880_v33 = vld [vmem:[#allocation232_spill] sm:$0xff] }
 0x2f9   :  { %v3488_v29 = vmin.f32 %v3487_v30, %v3274_v16  ;;  %v2746_v57 = vsub.f32 %v2490_v17, %v10877_v25  ;;  %v3557_v21 = vmin.f32 %v3556_v38, %v3275_v63  ;;  %v2747_v36 = vsub.f32 %v2490_v17, %v10878_v0  ;;  %v10881_v63 = vld [vmem:[#allocation233_spill] sm:$0xff] }
 0x2fa   :  { %v3276_v5 = vadd.f32 %v2490_v17, %v10638_v62  ;;  %v3277_v10 = vadd.f32 %v2490_v17, %v10639_v50  ;;  %v2819_v39 = vmax.f32 %v2818_v12, %v2744_v7  ;;  %v2888_v13 = vmax.f32 %v2887_v47, %v2745_v27  ;;  %v10882_v50 = vld [vmem:[#allocation234_spill] sm:$0xff] }
 0x2fb   :  { %v2957_v4 = vmax.f32 %v2956_v6, %v2746_v57  ;;  %v3278_v60 = vadd.f32 %v2490_v17, %v10877_v25  ;;  %v3026_v51 = vmax.f32 %v3025_v18, %v2747_v36  ;;  %v3279_v48 = vadd.f32 %v2490_v17, %v10878_v0  ;;  %v2498_v6 = vpop.permute.xlu1 %2497 }
 0x2fc   :  { %v3351_v30 = vmin.f32 %v3350_v9, %v3276_v5  ;;  %v3420_v3 = vmin.f32 %v3419_v61, %v3277_v10  ;;  %v2748_v38 = vsub.f32 %v2494_v58, %v10879_v35  ;;  %v2749_v16 = vsub.f32 %v2494_v58, %v10880_v33  ;;  %v10883_v5 = vld [vmem:[#allocation244_spill] sm:$0xff] }
 0x2fd   :  { %v3489_v46 = vmin.f32 %v3488_v29, %v3278_v60  ;;  %v2750_v24 = vsub.f32 %v2494_v58, %v10881_v63  ;;  %v3558_v32 = vmin.f32 %v3557_v21, %v3279_v48  ;;  %v2751_v62 = vsub.f32 %v2494_v58, %v10882_v50  ;;  %v10884_v60 = vld [vmem:[#allocation245_spill] sm:$0xff] }
 0x2fe   :  { %v3280_v12 = vadd.f32 %v2494_v58, %v10879_v35  ;;  %v3281_v47 = vadd.f32 %v2494_v58, %v10880_v33  ;;  %v2820_v36 = vmax.f32 %v2819_v39, %v2748_v38  ;;  %v2889_v18 = vmax.f32 %v2888_v13, %v2749_v16  ;;  %v2502_v13 = vpop.permute.xlu0 %2501 }
 0x2ff   :  { %v2958_v17 = vmax.f32 %v2957_v4, %v2750_v24  ;;  %v3282_v9 = vadd.f32 %v2494_v58, %v10881_v63  ;;  %v3027_v61 = vmax.f32 %v3026_v51, %v2751_v62  ;;  %v3283_v29 = vadd.f32 %v2494_v58, %v10882_v50 }
 0x300   :  { %v3352_v7 = vmin.f32 %v3351_v30, %v3280_v12  ;;  %v3421_v27 = vmin.f32 %v3420_v3, %v3281_v47  ;;  %v2752_v21 = vsub.f32 %v2498_v6, %v10646_v34  ;;  %v2753_v10 = vsub.f32 %v2498_v6, %v10883_v5  ;;  %v10885_v12 = vld [vmem:[#allocation239_spill] sm:$0xff]  ;;  %v10886_v47 = vld [vmem:[#allocation240_spill] sm:$0xff] }
 0x301   :  { %v3490_v57 = vmin.f32 %v3489_v46, %v3282_v9  ;;  %v2754_v48 = vsub.f32 %v2498_v6, %v10884_v60  ;;  %v3559_v35 = vmin.f32 %v3558_v32, %v3283_v29  ;;  %v2755_v33 = vsub.f32 %v2498_v6, %v7081_v2  ;;  %v10887_v29 = vld [vmem:[#allocation241_spill] sm:$0xff] }
 0x302   :  { %v3284_v39 = vadd.f32 %v2498_v6, %v10646_v34  ;;  %v3285_v24 = vadd.f32 %v2498_v6, %v10883_v5  ;;  %v2821_v62 = vmax.f32 %v2820_v36, %v2752_v21  ;;  %v2890_v4 = vmax.f32 %v2889_v18, %v2753_v10  ;;  %v10888_v5 = vld [vmem:[#allocation242_spill] sm:$0xff] }
 0x303   :  { %v2959_v58 = vmax.f32 %v2958_v17, %v2754_v48  ;;  %v3286_v51 = vadd.f32 %v2498_v6, %v10884_v60  ;;  %v3028_v30 = vmax.f32 %v3027_v61, %v2755_v33  ;;  %v3287_v3 = vadd.f32 %v2498_v6, %v7081_v2 }
 0x304   :  { %v3353_v46 = vmin.f32 %v3352_v7, %v3284_v39  ;;  %v3422_v38 = vmin.f32 %v3421_v27, %v3285_v24  ;;  %v2756_v32 = vsub.f32 %v2502_v13, %v10885_v12  ;;  %v2757_v9 = vsub.f32 %v2502_v13, %v10886_v47 }
 0x305   :  { %v3491_v16 = vmin.f32 %v3490_v57, %v3286_v51  ;;  %v2758_v50 = vsub.f32 %v2502_v13, %v10887_v29  ;;  %v3560_v63 = vmin.f32 %v3559_v35, %v3287_v3  ;;  %v2759_v34 = vsub.f32 %v2502_v13, %v10888_v5 }
 0x306   :  { %v3288_v36 = vadd.f32 %v2502_v13, %v10885_v12  ;;  %v3289_v18 = vadd.f32 %v2502_v13, %v10886_v47  ;;  %v2822_v17 = vmax.f32 %v2821_v62, %v2756_v32  ;;  %v2891_v33 = vmax.f32 %v2890_v4, %v2757_v9 }
 0x307   :  { %v2960_v61 = vmax.f32 %v2959_v58, %v2758_v50  ;;  %v3290_v6 = vadd.f32 %v2502_v13, %v10887_v29  ;;  %v3029_v7 = vmax.f32 %v3028_v30, %v2759_v34  ;;  %v3291_v27 = vadd.f32 %v2502_v13, %v10888_v5 }
 0x308   :  { %v3354_v57 = vmin.f32 %v3353_v46, %v3288_v36  ;;  %v3423_v21 = vmin.f32 %v3422_v38, %v3289_v18  ;;  %v2823_v10 = vrot.slane %v2822_v17, 4  ;;  %v2892_v48 = vrot.slane %v2891_v33, 4 }
 0x309   :  { %v2961_v39 = vrot.slane %v2960_v61, 4  ;;  %v3492_v35 = vmin.f32 %v3491_v16, %v3290_v6  ;;  %v3030_v24 = vrot.slane %v3029_v7, 4  ;;  %v3561_v12 = vmin.f32 %v3560_v63, %v3291_v27 }
 0x30a   :  { %v3355_v51 = vrot.slane %v3354_v57, 4  ;;  %v3424_v3 = vrot.slane %v3423_v21, 4  ;;  %v2824_v2 = vmax.f32 %v2822_v17, %v2823_v10  ;;  %v2893_v47 = vmax.f32 %v2891_v33, %v2892_v48 }
 0x30b   :  { %v2962_v62 = vmax.f32 %v2960_v61, %v2961_v39  ;;  %v3493_v4 = vrot.slane %v3492_v35, 4  ;;  %v3031_v50 = vmax.f32 %v3029_v7, %v3030_v24  ;;  %v3562_v34 = vrot.slane %v3561_v12, 4 }
 0x30c   :  { %v3356_v58 = vmin.f32 %v3354_v57, %v3355_v51  ;;  %v3425_v32 = vmin.f32 %v3423_v21, %v3424_v3  ;;  %v2825_v30 = vrot.slane %v2824_v2, 2  ;;  %v2894_v13 = vrot.slane %v2893_v47, 2  ;;  %v3570_v51 = vpop.permute.xlu1 %3569 }
 0x30d   :  { %v2963_v46 = vrot.slane %v2962_v62, 2  ;;  %v3494_v38 = vmin.f32 %v3492_v35, %v3493_v4  ;;  %v3032_v9 = vrot.slane %v3031_v50, 2  ;;  %v3563_v16 = vmin.f32 %v3561_v12, %v3562_v34 }
 0x30e   :  { %v3357_v36 = vrot.slane %v3356_v58, 2  ;;  %v3426_v18 = vrot.slane %v3425_v32, 2  ;;  %v2826_v6 = vmax.f32 %v2824_v2, %v2825_v30  ;;  %v2895_v5 = vmax.f32 %v2893_v47, %v2894_v13  ;;  %v3574_v30 = vpop.permute.xlu0 %3573 }
 0x30f   :  { %v2964_v29 = vmax.f32 %v2962_v62, %v2963_v46  ;;  %v3495_v63 = vrot.slane %v3494_v38, 2  ;;  %v3033_v17 = vmax.f32 %v3031_v50, %v3032_v9  ;;  %v3564_v27 = vrot.slane %v3563_v16, 2 }
 0x310   :  { %v3358_v33 = vmin.f32 %v3356_v58, %v3357_v36  ;;  %v3427_v61 = vmin.f32 %v3425_v32, %v3426_v18  ;;  %v2827_v7 = vrot.slane %v2826_v6, 1  ;;  %v2896_v57 = vrot.slane %v2895_v5, 1 }
 0x311   :  { %v2965_v21 = vrot.slane %v2964_v29, 1  ;;  %v3496_v10 = vmin.f32 %v3494_v38, %v3495_v63  ;;  %v3034_v48 = vrot.slane %v3033_v17, 1  ;;  %v3565_v35 = vmin.f32 %v3563_v16, %v3564_v27  ;;  %v3578_v27 = vpop.permute.xlu1 %3577 }
 0x312   :  { %v3359_v39 = vrot.slane %v3358_v33, 1  ;;  %v3428_v24 = vrot.slane %v3427_v61, 1  ;;  %v10889_v3 = vrot.slane %v8103_v52, 1  ;;  %v10890_v12 = vrot.slane %v8111_v40, 1 }
 0x313   :  { %v8835_v62 = vmax.f32 %v2826_v6, %v2827_v7  ;;  %v3497_v4 = vrot.slane %v3496_v10, 1  ;;  %v8837_v50 = vmax.f32 %v2895_v5, %v2896_v57  ;;  %v8839_v58 = vmax.f32 %v2964_v29, %v2965_v21 }
 0x314   :  { %v8828_v2 = vmin.f32 %v8103_v52, %v10889_v3  ;;  %v8833_v47 = vmin.f32 %v8111_v40, %v10890_v12  ;;  %v8841_v32 = vmax.f32 %v3033_v17, %v3034_v48  ;;  %v3566_v34 = vrot.slane %v3565_v35, 1 }
 0x315   :  { %v8843_v13 = vmin.f32 %v3358_v33, %v3359_v39  ;;  %v8845_v52 = vmin.f32 %v3427_v61, %v3428_v24  ;;  %v8847_v46 = vmin.f32 %v3496_v10, %v3497_v4  ;;  %v3824_v40 = vsub.f32 %v3570_v51, %v10658_v8 }
 0x316   :  { %10891 = vst [vmem:[#allocation11_spill] sm:$0xff] %v8833_v47  ;;  %v8850_v38 = vmin.f32 %v3565_v35, %v3566_v34  ;;  %v3825_v9 = vsub.f32 %v3570_v51, %v10659_v45  ;;  %v3826_v5 = vsub.f32 %v3570_v51, %v10660_v22  ;;  %v3827_v29 = vsub.f32 %v3570_v51, %v5357_v20 }
 0x317   :  { %v4356_v36 = vadd.f32 %v3570_v51, %v10658_v8  ;;  %v4357_v18 = vadd.f32 %v3570_v51, %v10659_v45  ;;  %v3828_v16 = vsub.f32 %v3574_v30, %v10654_v15  ;;  %v3829_v6 = vsub.f32 %v3574_v30, %v10655_v26 }
 0x318   :  { %v3830_v63 = vsub.f32 %v3574_v30, %v10656_v23  ;;  %v3831_v17 = vsub.f32 %v3574_v30, %v10657_v31  ;;  %v4360_v33 = vadd.f32 %v3574_v30, %v10654_v15  ;;  %v4361_v61 = vadd.f32 %v3574_v30, %v10655_v26  ;;  %v10892_v15 = vld [vmem:[#allocation2_spill] sm:$0xff]  ;;  %v10893_v26 = vld [vmem:[#allocation3_spill] sm:$0xff] }
 0x319   :  { %v4358_v7 = vadd.f32 %v3570_v51, %v10660_v22  ;;  %v4359_v57 = vadd.f32 %v3570_v51, %v5357_v20  ;;  %v4362_v8 = vadd.f32 %v3574_v30, %v10656_v23  ;;  %v4363_v45 = vadd.f32 %v3574_v30, %v10657_v31 }
 0x31a   :  { %v4080_v21 = vmax.f32 %v3824_v40, %v3828_v16  ;;  %v4149_v10 = vmax.f32 %v3825_v9, %v3829_v6  ;;  %v4218_v48 = vmax.f32 %v3826_v5, %v3830_v63  ;;  %v4287_v39 = vmax.f32 %v3827_v29, %v3831_v17  ;;  %v3586_v40 = vpop.permute.xlu0 %3585 }
 0x31b   :  { %v4612_v24 = vmin.f32 %v4356_v36, %v4360_v33  ;;  %v4681_v35 = vmin.f32 %v4357_v18, %v4361_v61  ;;  %v3832_v3 = vsub.f32 %v3578_v27, %v5324_v11  ;;  %v3833_v12 = vsub.f32 %v3578_v27, %v10892_v15  ;;  %v3582_v18 = vpop.permute.xlu1 %3581 }
 0x31c   :  { %v3834_v4 = vsub.f32 %v3578_v27, %v10893_v26  ;;  %v3835_v22 = vsub.f32 %v3578_v27, %v5333_v14  ;;  %v4364_v20 = vadd.f32 %v3578_v27, %v5324_v11  ;;  %v4365_v23 = vadd.f32 %v3578_v27, %v10892_v15 }
 0x31d   :  { %v4750_v51 = vmin.f32 %v4358_v7, %v4362_v8  ;;  %v4819_v31 = vmin.f32 %v4359_v57, %v4363_v45  ;;  %v4366_v34 = vadd.f32 %v3578_v27, %v10893_v26  ;;  %v4367_v30 = vadd.f32 %v3578_v27, %v5333_v14 }
 0x31e   :  { %v4081_v9 = vmax.f32 %v4080_v21, %v3832_v3  ;;  %v4150_v5 = vmax.f32 %v4149_v10, %v3833_v12  ;;  %v4219_v29 = vmax.f32 %v4218_v48, %v3834_v4  ;;  %v4288_v36 = vmax.f32 %v4287_v39, %v3835_v22 }
 0x31f   :  { %v4613_v16 = vmin.f32 %v4612_v24, %v4364_v20  ;;  %v4682_v6 = vmin.f32 %v4681_v35, %v4365_v23  ;;  %v4751_v63 = vmin.f32 %v4750_v51, %v4366_v34  ;;  %v4820_v17 = vmin.f32 %v4819_v31, %v4367_v30  ;;  %v3594_v35 = vpop.permute.xlu0 %3593  ;;  %v3590_v4 = vpop.permute.xlu1 %3589  ;;  %v10894_v31 = vld [vmem:[#allocation15_spill] sm:$0xff]  ;;  %v10895_v30 = vld [vmem:[#allocation16_spill] sm:$0xff] }
 0x320   :  { %v3840_v11 = vsub.f32 %v3586_v40, %v5450_v41  ;;  %v3841_v33 = vsub.f32 %v3586_v40, %v5455_v42  ;;  %v3842_v61 = vsub.f32 %v3586_v40, %v5460_v43  ;;  %v3843_v7 = vsub.f32 %v3586_v40, %v5465_v44 }
 0x321   :  { %v4372_v14 = vadd.f32 %v3586_v40, %v5450_v41  ;;  %v4373_v27 = vadd.f32 %v3586_v40, %v5455_v42  ;;  %v3836_v57 = vsub.f32 %v3582_v18, %v10663_v19  ;;  %v3837_v8 = vsub.f32 %v3582_v18, %v10664_v49 }
 0x322   :  { %v3838_v45 = vsub.f32 %v3582_v18, %v10665_v59  ;;  %v3839_v21 = vsub.f32 %v3582_v18, %v10666_v28  ;;  %v4368_v10 = vadd.f32 %v3582_v18, %v10663_v19  ;;  %v4369_v48 = vadd.f32 %v3582_v18, %v10664_v49 }
 0x323   :  { %v4374_v39 = vadd.f32 %v3586_v40, %v5460_v43  ;;  %v4375_v24 = vadd.f32 %v3586_v40, %v5465_v44  ;;  %v4370_v41 = vadd.f32 %v3582_v18, %v10665_v59  ;;  %v4371_v42 = vadd.f32 %v3582_v18, %v10666_v28 }
 0x324   :  { %v4082_v3 = vmax.f32 %v4081_v9, %v3836_v57  ;;  %v4151_v15 = vmax.f32 %v4150_v5, %v3837_v8  ;;  %v4220_v12 = vmax.f32 %v4219_v29, %v3838_v45  ;;  %v4289_v26 = vmax.f32 %v4288_v36, %v3839_v21  ;;  %v10896_v9 = vld [vmem:[#allocation17_spill] sm:$0xff]  ;;  %v10897_v29 = vld [vmem:[#allocation18_spill] sm:$0xff]  ;;  %v3602_v21 = vpop.permute.xlu0 %3601 }
 0x325   :  { %v4614_v22 = vmin.f32 %v4613_v16, %v4368_v10  ;;  %v4683_v20 = vmin.f32 %v4682_v6, %v4369_v48  ;;  %v4752_v23 = vmin.f32 %v4751_v63, %v4370_v41  ;;  %v4821_v19 = vmin.f32 %v4820_v17, %v4371_v42 }
 0x326   :  { %v3848_v49 = vsub.f32 %v3594_v35, %v5504_v53  ;;  %v3849_v43 = vsub.f32 %v3594_v35, %v5509_v54  ;;  %v3850_v44 = vsub.f32 %v3594_v35, %v5514_v55  ;;  %v3851_v59 = vsub.f32 %v3594_v35, %v5519_v56 }
 0x327   :  { %v4380_v28 = vadd.f32 %v3594_v35, %v5504_v53  ;;  %v4381_v51 = vadd.f32 %v3594_v35, %v5509_v54  ;;  %v3844_v34 = vsub.f32 %v3590_v4, %v10894_v31  ;;  %v3845_v40 = vsub.f32 %v3590_v4, %v10895_v30 }
 0x328   :  { %v3846_v5 = vsub.f32 %v3590_v4, %v10896_v9  ;;  %v3847_v36 = vsub.f32 %v3590_v4, %v10897_v29  ;;  %v4083_v18 = vmax.f32 %v4082_v3, %v3840_v11  ;;  %v4152_v16 = vmax.f32 %v4151_v15, %v3841_v33  ;;  %v3598_v3 = vpop.permute.xlu1 %3597 }
 0x329   :  { %v4221_v6 = vmax.f32 %v4220_v12, %v3842_v61  ;;  %v4290_v63 = vmax.f32 %v4289_v26, %v3843_v7  ;;  %v4376_v17 = vadd.f32 %v3590_v4, %v10894_v31  ;;  %v4377_v57 = vadd.f32 %v3590_v4, %v10895_v30  ;;  %v10898_v26 = vld [vmem:[#allocation27_spill] sm:$0xff]  ;;  %v10899_v31 = vld [vmem:[#allocation28_spill] sm:$0xff] }
 0x32a   :  { %v4382_v53 = vadd.f32 %v3594_v35, %v5514_v55  ;;  %v4383_v54 = vadd.f32 %v3594_v35, %v5519_v56  ;;  %v4378_v8 = vadd.f32 %v3590_v4, %v10896_v9  ;;  %v4379_v45 = vadd.f32 %v3590_v4, %v10897_v29  ;;  %v10900_v9 = vld [vmem:[#allocation29_spill] sm:$0xff]  ;;  %v10901_v29 = vld [vmem:[#allocation30_spill] sm:$0xff] }
 0x32b   :  { %v4084_v10 = vmax.f32 %v4083_v18, %v3844_v34  ;;  %v4153_v48 = vmax.f32 %v4152_v16, %v3845_v40  ;;  %v4615_v41 = vmin.f32 %v4614_v22, %v4372_v14  ;;  %v4684_v11 = vmin.f32 %v4683_v20, %v4373_v27  ;;  %v10902_v22 = vld [vmem:[#allocation19_spill] sm:$0xff]  ;;  %v10905_v40 = vld [vmem:[#allocation22_spill] sm:$0xff] }
 0x32c   :  { %v4222_v33 = vmax.f32 %v4221_v6, %v3846_v5  ;;  %v4291_v61 = vmax.f32 %v4290_v63, %v3847_v36  ;;  %v4753_v7 = vmin.f32 %v4752_v23, %v4374_v39  ;;  %v4822_v42 = vmin.f32 %v4821_v19, %v4375_v24  ;;  %v10903_v24 = vld [vmem:[#allocation20_spill] sm:$0xff]  ;;  %v10904_v23 = vld [vmem:[#allocation21_spill] sm:$0xff] }
 0x32d   :  { %v4616_v15 = vmin.f32 %v4615_v41, %v4376_v17  ;;  %v4685_v12 = vmin.f32 %v4684_v11, %v4377_v57  ;;  %v3856_v55 = vsub.f32 %v3602_v21, %v10898_v26  ;;  %v3857_v56 = vsub.f32 %v3602_v21, %v10899_v31  ;;  %v3610_v11 = vpop.permute.xlu0 %3609 }
 0x32e   :  { %v4754_v35 = vmin.f32 %v4753_v7, %v4378_v8  ;;  %v4823_v30 = vmin.f32 %v4822_v42, %v4379_v45  ;;  %v3858_v4 = vsub.f32 %v3602_v21, %v10900_v9  ;;  %v3859_v34 = vsub.f32 %v3602_v21, %v10901_v29 }
 0x32f   :  { %v4388_v14 = vadd.f32 %v3602_v21, %v10898_v26  ;;  %v4389_v27 = vadd.f32 %v3602_v21, %v10899_v31  ;;  %v3852_v39 = vsub.f32 %v3598_v3, %v10902_v22  ;;  %v3853_v20 = vsub.f32 %v3598_v3, %v10903_v24  ;;  %v10906_v31 = vld [vmem:[#allocation35_spill] sm:$0xff] }
 0x330   :  { %v3854_v19 = vsub.f32 %v3598_v3, %v10904_v23  ;;  %v3855_v5 = vsub.f32 %v3598_v3, %v10905_v40  ;;  %v4085_v36 = vmax.f32 %v4084_v10, %v3848_v49  ;;  %v4154_v18 = vmax.f32 %v4153_v48, %v3849_v43  ;;  %v3606_v48 = vpop.permute.xlu1 %3605 }
 0x331   :  { %v4223_v16 = vmax.f32 %v4222_v33, %v3850_v44  ;;  %v4292_v6 = vmax.f32 %v4291_v61, %v3851_v59  ;;  %v4384_v63 = vadd.f32 %v3598_v3, %v10902_v22  ;;  %v4385_v17 = vadd.f32 %v3598_v3, %v10903_v24  ;;  %v10907_v22 = vld [vmem:[#allocation36_spill] sm:$0xff] }
 0x332   :  { %v4390_v57 = vadd.f32 %v3602_v21, %v10900_v9  ;;  %v4391_v8 = vadd.f32 %v3602_v21, %v10901_v29  ;;  %v4386_v45 = vadd.f32 %v3598_v3, %v10904_v23  ;;  %v4387_v41 = vadd.f32 %v3598_v3, %v10905_v40  ;;  %v10908_v23 = vld [vmem:[#allocation37_spill] sm:$0xff]  ;;  %v10909_v40 = vld [vmem:[#allocation38_spill] sm:$0xff] }
 0x333   :  { %v4086_v7 = vmax.f32 %v4085_v36, %v3852_v39  ;;  %v4155_v42 = vmax.f32 %v4154_v18, %v3853_v20  ;;  %v4617_v26 = vmin.f32 %v4616_v15, %v4380_v28  ;;  %v4686_v49 = vmin.f32 %v4685_v12, %v4381_v51  ;;  %v10910_v15 = vld [vmem:[#allocation23_spill] sm:$0xff]  ;;  %v10913_v20 = vld [vmem:[#allocation26_spill] sm:$0xff] }
 0x334   :  { %v4224_v43 = vmax.f32 %v4223_v16, %v3854_v19  ;;  %v4293_v44 = vmax.f32 %v4292_v6, %v3855_v5  ;;  %v4755_v59 = vmin.f32 %v4754_v35, %v4382_v53  ;;  %v4824_v10 = vmin.f32 %v4823_v30, %v4383_v54  ;;  %v10911_v54 = vld [vmem:[#allocation24_spill] sm:$0xff]  ;;  %v10912_v35 = vld [vmem:[#allocation25_spill] sm:$0xff] }
 0x335   :  { %v4618_v33 = vmin.f32 %v4617_v26, %v4384_v63  ;;  %v4687_v61 = vmin.f32 %v4686_v49, %v4385_v17  ;;  %v3864_v9 = vsub.f32 %v3610_v11, %v10906_v31  ;;  %v3865_v21 = vsub.f32 %v3610_v11, %v10907_v22  ;;  %v3618_v49 = vpop.permute.xlu0 %3617 }
 0x336   :  { %v4756_v29 = vmin.f32 %v4755_v59, %v4386_v45  ;;  %v4825_v24 = vmin.f32 %v4824_v10, %v4387_v41  ;;  %v3866_v3 = vsub.f32 %v3610_v11, %v10908_v23  ;;  %v3867_v39 = vsub.f32 %v3610_v11, %v10909_v40 }
 0x337   :  { %v4396_v28 = vadd.f32 %v3610_v11, %v10906_v31  ;;  %v4397_v51 = vadd.f32 %v3610_v11, %v10907_v22  ;;  %v3860_v53 = vsub.f32 %v3606_v48, %v10910_v15  ;;  %v3861_v12 = vsub.f32 %v3606_v48, %v10911_v54  ;;  %v10914_v22 = vld [vmem:[#allocation43_spill] sm:$0xff] }
 0x338   :  { %v3862_v30 = vsub.f32 %v3606_v48, %v10912_v35  ;;  %v3863_v19 = vsub.f32 %v3606_v48, %v10913_v20  ;;  %v4087_v5 = vmax.f32 %v4086_v7, %v3856_v55  ;;  %v4156_v36 = vmax.f32 %v4155_v42, %v3857_v56  ;;  %v3614_v42 = vpop.permute.xlu1 %3613 }
 0x339   :  { %v4225_v18 = vmax.f32 %v4224_v43, %v3858_v4  ;;  %v4294_v16 = vmax.f32 %v4293_v44, %v3859_v34  ;;  %v4392_v6 = vadd.f32 %v3606_v48, %v10910_v15  ;;  %v4393_v63 = vadd.f32 %v3606_v48, %v10911_v54  ;;  %v10915_v15 = vld [vmem:[#allocation44_spill] sm:$0xff] }
 0x33a   :  { %v4398_v17 = vadd.f32 %v3610_v11, %v10908_v23  ;;  %v4399_v45 = vadd.f32 %v3610_v11, %v10909_v40  ;;  %v4394_v41 = vadd.f32 %v3606_v48, %v10912_v35  ;;  %v4395_v26 = vadd.f32 %v3606_v48, %v10913_v20  ;;  %v10916_v35 = vld [vmem:[#allocation45_spill] sm:$0xff]  ;;  %v10917_v20 = vld [vmem:[#allocation46_spill] sm:$0xff] }
 0x33b   :  { %v4088_v59 = vmax.f32 %v4087_v5, %v3860_v53  ;;  %v4157_v10 = vmax.f32 %v4156_v36, %v3861_v12  ;;  %v4619_v31 = vmin.f32 %v4618_v33, %v4388_v14  ;;  %v4688_v55 = vmin.f32 %v4687_v61, %v4389_v27  ;;  %v10918_v33 = vld [vmem:[#allocation31_spill] sm:$0xff]  ;;  %v10921_v12 = vld [vmem:[#allocation34_spill] sm:$0xff] }
 0x33c   :  { %v4226_v56 = vmax.f32 %v4225_v18, %v3862_v30  ;;  %v4295_v4 = vmax.f32 %v4294_v16, %v3863_v19  ;;  %v4757_v34 = vmin.f32 %v4756_v29, %v4390_v57  ;;  %v4826_v7 = vmin.f32 %v4825_v24, %v4391_v8  ;;  %v10919_v8 = vld [vmem:[#allocation32_spill] sm:$0xff]  ;;  %v10920_v29 = vld [vmem:[#allocation33_spill] sm:$0xff] }
 0x33d   :  { %v4620_v43 = vmin.f32 %v4619_v31, %v4392_v6  ;;  %v4689_v44 = vmin.f32 %v4688_v55, %v4393_v63  ;;  %v3872_v23 = vsub.f32 %v3618_v49, %v10914_v22  ;;  %v3873_v11 = vsub.f32 %v3618_v49, %v10915_v15  ;;  %v3626_v55 = vpop.permute.xlu0 %3625 }
 0x33e   :  { %v4758_v40 = vmin.f32 %v4757_v34, %v4394_v41  ;;  %v4827_v54 = vmin.f32 %v4826_v7, %v4395_v26  ;;  %v3874_v48 = vsub.f32 %v3618_v49, %v10916_v35  ;;  %v3875_v53 = vsub.f32 %v3618_v49, %v10917_v20 }
 0x33f   :  { %v4404_v14 = vadd.f32 %v3618_v49, %v10914_v22  ;;  %v4405_v27 = vadd.f32 %v3618_v49, %v10915_v15  ;;  %v3868_v57 = vsub.f32 %v3614_v42, %v10918_v33  ;;  %v3869_v61 = vsub.f32 %v3614_v42, %v10919_v8  ;;  %v10922_v15 = vld [vmem:[#allocation51_spill] sm:$0xff] }
 0x340   :  { %v3870_v24 = vsub.f32 %v3614_v42, %v10920_v29  ;;  %v3871_v30 = vsub.f32 %v3614_v42, %v10921_v12  ;;  %v4089_v19 = vmax.f32 %v4088_v59, %v3864_v9  ;;  %v4158_v5 = vmax.f32 %v4157_v10, %v3865_v21  ;;  %v3622_v10 = vpop.permute.xlu1 %3621 }
 0x341   :  { %v4227_v36 = vmax.f32 %v4226_v56, %v3866_v3  ;;  %v4296_v18 = vmax.f32 %v4295_v4, %v3867_v39  ;;  %v4400_v16 = vadd.f32 %v3614_v42, %v10918_v33  ;;  %v4401_v6 = vadd.f32 %v3614_v42, %v10919_v8  ;;  %v10923_v33 = vld [vmem:[#allocation52_spill] sm:$0xff] }
 0x342   :  { %v4406_v63 = vadd.f32 %v3618_v49, %v10916_v35  ;;  %v4407_v41 = vadd.f32 %v3618_v49, %v10917_v20  ;;  %v4402_v26 = vadd.f32 %v3614_v42, %v10920_v29  ;;  %v4403_v31 = vadd.f32 %v3614_v42, %v10921_v12  ;;  %v10924_v29 = vld [vmem:[#allocation53_spill] sm:$0xff]  ;;  %v10925_v12 = vld [vmem:[#allocation54_spill] sm:$0xff] }
 0x343   :  { %v4090_v34 = vmax.f32 %v4089_v19, %v3868_v57  ;;  %v4159_v7 = vmax.f32 %v4158_v5, %v3869_v61  ;;  %v4621_v22 = vmin.f32 %v4620_v43, %v4396_v28  ;;  %v4690_v9 = vmin.f32 %v4689_v44, %v4397_v51  ;;  %v10926_v43 = vld [vmem:[#allocation39_spill] sm:$0xff]  ;;  %v10929_v61 = vld [vmem:[#allocation42_spill] sm:$0xff] }
 0x344   :  { %v4228_v21 = vmax.f32 %v4227_v36, %v3870_v24  ;;  %v4297_v3 = vmax.f32 %v4296_v18, %v3871_v30  ;;  %v4759_v39 = vmin.f32 %v4758_v40, %v4398_v17  ;;  %v4828_v59 = vmin.f32 %v4827_v54, %v4399_v45  ;;  %v10927_v45 = vld [vmem:[#allocation40_spill] sm:$0xff]  ;;  %v10928_v40 = vld [vmem:[#allocation41_spill] sm:$0xff] }
 0x345   :  { %v4622_v56 = vmin.f32 %v4621_v22, %v4400_v16  ;;  %v4691_v4 = vmin.f32 %v4690_v9, %v4401_v6  ;;  %v3880_v35 = vsub.f32 %v3626_v55, %v10922_v15  ;;  %v3881_v49 = vsub.f32 %v3626_v55, %v10923_v33  ;;  %v3634_v9 = vpop.permute.xlu0 %3633 }
 0x346   :  { %v4760_v20 = vmin.f32 %v4759_v39, %v4402_v26  ;;  %v4829_v8 = vmin.f32 %v4828_v59, %v4403_v31  ;;  %v3882_v42 = vsub.f32 %v3626_v55, %v10924_v29  ;;  %v3883_v57 = vsub.f32 %v3626_v55, %v10925_v12 }
 0x347   :  { %v4412_v28 = vadd.f32 %v3626_v55, %v10922_v15  ;;  %v4413_v51 = vadd.f32 %v3626_v55, %v10923_v33  ;;  %v3876_v17 = vsub.f32 %v3622_v10, %v10926_v43  ;;  %v3877_v44 = vsub.f32 %v3622_v10, %v10927_v45  ;;  %v10930_v33 = vld [vmem:[#allocation59_spill] sm:$0xff] }
 0x348   :  { %v3878_v54 = vsub.f32 %v3622_v10, %v10928_v40  ;;  %v3879_v24 = vsub.f32 %v3622_v10, %v10929_v61  ;;  %v4091_v30 = vmax.f32 %v4090_v34, %v3872_v23  ;;  %v4160_v19 = vmax.f32 %v4159_v7, %v3873_v11  ;;  %v3630_v7 = vpop.permute.xlu1 %3629 }
 0x349   :  { %v4229_v5 = vmax.f32 %v4228_v21, %v3874_v48  ;;  %v4298_v36 = vmax.f32 %v4297_v3, %v3875_v53  ;;  %v4408_v18 = vadd.f32 %v3622_v10, %v10926_v43  ;;  %v4409_v16 = vadd.f32 %v3622_v10, %v10927_v45  ;;  %v10931_v43 = vld [vmem:[#allocation60_spill] sm:$0xff] }
 0x34a   :  { %v4414_v6 = vadd.f32 %v3626_v55, %v10924_v29  ;;  %v4415_v26 = vadd.f32 %v3626_v55, %v10925_v12  ;;  %v4410_v31 = vadd.f32 %v3622_v10, %v10928_v40  ;;  %v4411_v22 = vadd.f32 %v3622_v10, %v10929_v61  ;;  %v10932_v40 = vld [vmem:[#allocation61_spill] sm:$0xff]  ;;  %v10933_v61 = vld [vmem:[#allocation62_spill] sm:$0xff] }
 0x34b   :  { %v4092_v39 = vmax.f32 %v4091_v30, %v3876_v17  ;;  %v4161_v59 = vmax.f32 %v4160_v19, %v3877_v44  ;;  %v4623_v15 = vmin.f32 %v4622_v56, %v4404_v14  ;;  %v4692_v23 = vmin.f32 %v4691_v4, %v4405_v27  ;;  %v10934_v56 = vld [vmem:[#allocation47_spill] sm:$0xff]  ;;  %v10937_v44 = vld [vmem:[#allocation50_spill] sm:$0xff] }
 0x34c   :  { %v4230_v11 = vmax.f32 %v4229_v5, %v3878_v54  ;;  %v4299_v48 = vmax.f32 %v4298_v36, %v3879_v24  ;;  %v4761_v53 = vmin.f32 %v4760_v20, %v4406_v63  ;;  %v4830_v34 = vmin.f32 %v4829_v8, %v4407_v41  ;;  %v10935_v41 = vld [vmem:[#allocation48_spill] sm:$0xff]  ;;  %v10936_v20 = vld [vmem:[#allocation49_spill] sm:$0xff] }
 0x34d   :  { %v4624_v21 = vmin.f32 %v4623_v15, %v4408_v18  ;;  %v4693_v3 = vmin.f32 %v4692_v23, %v4409_v16  ;;  %v3888_v29 = vsub.f32 %v3634_v9, %v10930_v33  ;;  %v3889_v55 = vsub.f32 %v3634_v9, %v10931_v43  ;;  %v3642_v23 = vpop.permute.xlu0 %3641 }
 0x34e   :  { %v4762_v12 = vmin.f32 %v4761_v53, %v4410_v31  ;;  %v4831_v45 = vmin.f32 %v4830_v34, %v4411_v22  ;;  %v3890_v10 = vsub.f32 %v3634_v9, %v10932_v40  ;;  %v3891_v17 = vsub.f32 %v3634_v9, %v10933_v61 }
 0x34f   :  { %v4420_v14 = vadd.f32 %v3634_v9, %v10930_v33  ;;  %v4421_v27 = vadd.f32 %v3634_v9, %v10931_v43  ;;  %v3884_v63 = vsub.f32 %v3630_v7, %v10934_v56  ;;  %v3885_v4 = vsub.f32 %v3630_v7, %v10935_v41  ;;  %v10938_v43 = vld [vmem:[#allocation67_spill] sm:$0xff] }
 0x350   :  { %v3886_v8 = vsub.f32 %v3630_v7, %v10936_v20  ;;  %v3887_v54 = vsub.f32 %v3630_v7, %v10937_v44  ;;  %v4093_v24 = vmax.f32 %v4092_v39, %v3880_v35  ;;  %v4162_v30 = vmax.f32 %v4161_v59, %v3881_v49  ;;  %v3638_v59 = vpop.permute.xlu1 %3637 }
 0x351   :  { %v4231_v19 = vmax.f32 %v4230_v11, %v3882_v42  ;;  %v4300_v5 = vmax.f32 %v4299_v48, %v3883_v57  ;;  %v4416_v36 = vadd.f32 %v3630_v7, %v10934_v56  ;;  %v4417_v18 = vadd.f32 %v3630_v7, %v10935_v41  ;;  %v10939_v56 = vld [vmem:[#allocation68_spill] sm:$0xff] }
 0x352   :  { %v4422_v16 = vadd.f32 %v3634_v9, %v10932_v40  ;;  %v4423_v31 = vadd.f32 %v3634_v9, %v10933_v61  ;;  %v4418_v22 = vadd.f32 %v3630_v7, %v10936_v20  ;;  %v4419_v15 = vadd.f32 %v3630_v7, %v10937_v44  ;;  %v10940_v20 = vld [vmem:[#allocation69_spill] sm:$0xff]  ;;  %v10941_v44 = vld [vmem:[#allocation70_spill] sm:$0xff] }
 0x353   :  { %v4094_v53 = vmax.f32 %v4093_v24, %v3884_v63  ;;  %v4163_v34 = vmax.f32 %v4162_v30, %v3885_v4  ;;  %v4625_v33 = vmin.f32 %v4624_v21, %v4412_v28  ;;  %v4694_v35 = vmin.f32 %v4693_v3, %v4413_v51  ;;  %v10942_v21 = vld [vmem:[#allocation55_spill] sm:$0xff]  ;;  %v10945_v4 = vld [vmem:[#allocation58_spill] sm:$0xff] }
 0x354   :  { %v4232_v49 = vmax.f32 %v4231_v19, %v3886_v8  ;;  %v4301_v42 = vmax.f32 %v4300_v5, %v3887_v54  ;;  %v4763_v57 = vmin.f32 %v4762_v12, %v4414_v6  ;;  %v4832_v39 = vmin.f32 %v4831_v45, %v4415_v26  ;;  %v10943_v26 = vld [vmem:[#allocation56_spill] sm:$0xff]  ;;  %v10944_v12 = vld [vmem:[#allocation57_spill] sm:$0xff] }
 0x355   :  { %v4626_v11 = vmin.f32 %v4625_v33, %v4416_v36  ;;  %v4695_v48 = vmin.f32 %v4694_v35, %v4417_v18  ;;  %v3896_v40 = vsub.f32 %v3642_v23, %v10938_v43  ;;  %v3897_v9 = vsub.f32 %v3642_v23, %v10939_v56  ;;  %v3650_v35 = vpop.permute.xlu0 %3649 }
 0x356   :  { %v4764_v61 = vmin.f32 %v4763_v57, %v4418_v22  ;;  %v4833_v41 = vmin.f32 %v4832_v39, %v4419_v15  ;;  %v3898_v7 = vsub.f32 %v3642_v23, %v10940_v20  ;;  %v3899_v63 = vsub.f32 %v3642_v23, %v10941_v44 }
 0x357   :  { %v4428_v28 = vadd.f32 %v3642_v23, %v10938_v43  ;;  %v4429_v51 = vadd.f32 %v3642_v23, %v10939_v56  ;;  %v3892_v6 = vsub.f32 %v3638_v59, %v10942_v21  ;;  %v3893_v3 = vsub.f32 %v3638_v59, %v10943_v26  ;;  %v10946_v56 = vld [vmem:[#allocation75_spill] sm:$0xff] }
 0x358   :  { %v3894_v45 = vsub.f32 %v3638_v59, %v10944_v12  ;;  %v3895_v8 = vsub.f32 %v3638_v59, %v10945_v4  ;;  %v4095_v54 = vmax.f32 %v4094_v53, %v3888_v29  ;;  %v4164_v24 = vmax.f32 %v4163_v34, %v3889_v55  ;;  %v3646_v34 = vpop.permute.xlu1 %3645 }
 0x359   :  { %v4233_v30 = vmax.f32 %v4232_v49, %v3890_v10  ;;  %v4302_v19 = vmax.f32 %v4301_v42, %v3891_v17  ;;  %v4424_v5 = vadd.f32 %v3638_v59, %v10942_v21  ;;  %v4425_v36 = vadd.f32 %v3638_v59, %v10943_v26  ;;  %v10947_v21 = vld [vmem:[#allocation76_spill] sm:$0xff] }
 0x35a   :  { %v4430_v18 = vadd.f32 %v3642_v23, %v10940_v20  ;;  %v4431_v22 = vadd.f32 %v3642_v23, %v10941_v44  ;;  %v4426_v15 = vadd.f32 %v3638_v59, %v10944_v12  ;;  %v4427_v33 = vadd.f32 %v3638_v59, %v10945_v4  ;;  %v10948_v12 = vld [vmem:[#allocation77_spill] sm:$0xff]  ;;  %v10949_v4 = vld [vmem:[#allocation78_spill] sm:$0xff] }
 0x35b   :  { %v4096_v57 = vmax.f32 %v4095_v54, %v3892_v6  ;;  %v4165_v39 = vmax.f32 %v4164_v24, %v3893_v3  ;;  %v4627_v43 = vmin.f32 %v4626_v11, %v4420_v14  ;;  %v4696_v29 = vmin.f32 %v4695_v48, %v4421_v27  ;;  %v10950_v11 = vld [vmem:[#allocation63_spill] sm:$0xff]  ;;  %v10953_v3 = vld [vmem:[#allocation66_spill] sm:$0xff] }
 0x35c   :  { %v4234_v55 = vmax.f32 %v4233_v30, %v3894_v45  ;;  %v4303_v10 = vmax.f32 %v4302_v19, %v3895_v8  ;;  %v4765_v17 = vmin.f32 %v4764_v61, %v4422_v16  ;;  %v4834_v53 = vmin.f32 %v4833_v41, %v4423_v31  ;;  %v10951_v31 = vld [vmem:[#allocation64_spill] sm:$0xff]  ;;  %v10952_v61 = vld [vmem:[#allocation65_spill] sm:$0xff] }
 0x35d   :  { %v4628_v49 = vmin.f32 %v4627_v43, %v4424_v5  ;;  %v4697_v42 = vmin.f32 %v4696_v29, %v4425_v36  ;;  %v3904_v20 = vsub.f32 %v3650_v35, %v10946_v56  ;;  %v3905_v23 = vsub.f32 %v3650_v35, %v10947_v21  ;;  %v3658_v29 = vpop.permute.xlu0 %3657 }
 0x35e   :  { %v4766_v44 = vmin.f32 %v4765_v17, %v4426_v15  ;;  %v4835_v26 = vmin.f32 %v4834_v53, %v4427_v33  ;;  %v3906_v59 = vsub.f32 %v3650_v35, %v10948_v12  ;;  %v3907_v6 = vsub.f32 %v3650_v35, %v10949_v4 }
 0x35f   :  { %v4436_v14 = vadd.f32 %v3650_v35, %v10946_v56  ;;  %v4437_v27 = vadd.f32 %v3650_v35, %v10947_v21  ;;  %v3900_v16 = vsub.f32 %v3646_v34, %v10950_v11  ;;  %v3901_v48 = vsub.f32 %v3646_v34, %v10951_v31  ;;  %v10954_v21 = vld [vmem:[#allocation83_spill] sm:$0xff] }
 0x360   :  { %v3902_v41 = vsub.f32 %v3646_v34, %v10952_v61  ;;  %v3903_v45 = vsub.f32 %v3646_v34, %v10953_v3  ;;  %v4097_v8 = vmax.f32 %v4096_v57, %v3896_v40  ;;  %v4166_v54 = vmax.f32 %v4165_v39, %v3897_v9  ;;  %v3654_v39 = vpop.permute.xlu1 %3653 }
 0x361   :  { %v4235_v24 = vmax.f32 %v4234_v55, %v3898_v7  ;;  %v4304_v30 = vmax.f32 %v4303_v10, %v3899_v63  ;;  %v4432_v19 = vadd.f32 %v3646_v34, %v10950_v11  ;;  %v4433_v5 = vadd.f32 %v3646_v34, %v10951_v31  ;;  %v10955_v11 = vld [vmem:[#allocation84_spill] sm:$0xff] }
 0x362   :  { %v4438_v36 = vadd.f32 %v3650_v35, %v10948_v12  ;;  %v4439_v15 = vadd.f32 %v3650_v35, %v10949_v4  ;;  %v4434_v33 = vadd.f32 %v3646_v34, %v10952_v61  ;;  %v4435_v43 = vadd.f32 %v3646_v34, %v10953_v3  ;;  %v10956_v61 = vld [vmem:[#allocation85_spill] sm:$0xff]  ;;  %v10957_v3 = vld [vmem:[#allocation86_spill] sm:$0xff] }
 0x363   :  { %v4098_v17 = vmax.f32 %v4097_v8, %v3900_v16  ;;  %v4167_v53 = vmax.f32 %v4166_v54, %v3901_v48  ;;  %v4629_v56 = vmin.f32 %v4628_v49, %v4428_v28  ;;  %v4698_v40 = vmin.f32 %v4697_v42, %v4429_v51  ;;  %v10958_v49 = vld [vmem:[#allocation71_spill] sm:$0xff]  ;;  %v10961_v48 = vld [vmem:[#allocation74_spill] sm:$0xff] }
 0x364   :  { %v4236_v9 = vmax.f32 %v4235_v24, %v3902_v41  ;;  %v4305_v7 = vmax.f32 %v4304_v30, %v3903_v45  ;;  %v4767_v63 = vmin.f32 %v4766_v44, %v4430_v18  ;;  %v4836_v57 = vmin.f32 %v4835_v26, %v4431_v22  ;;  %v10959_v22 = vld [vmem:[#allocation72_spill] sm:$0xff]  ;;  %v10960_v44 = vld [vmem:[#allocation73_spill] sm:$0xff] }
 0x365   :  { %v4630_v55 = vmin.f32 %v4629_v56, %v4432_v19  ;;  %v4699_v10 = vmin.f32 %v4698_v40, %v4433_v5  ;;  %v3912_v12 = vsub.f32 %v3658_v29, %v10954_v21  ;;  %v3913_v35 = vsub.f32 %v3658_v29, %v10955_v11  ;;  %v3666_v40 = vpop.permute.xlu0 %3665 }
 0x366   :  { %v4768_v4 = vmin.f32 %v4767_v63, %v4434_v33  ;;  %v4837_v31 = vmin.f32 %v4836_v57, %v4435_v43  ;;  %v3914_v34 = vsub.f32 %v3658_v29, %v10956_v61  ;;  %v3915_v16 = vsub.f32 %v3658_v29, %v10957_v3 }
 0x367   :  { %v4444_v28 = vadd.f32 %v3658_v29, %v10954_v21  ;;  %v4445_v51 = vadd.f32 %v3658_v29, %v10955_v11  ;;  %v3908_v18 = vsub.f32 %v3654_v39, %v10958_v49  ;;  %v3909_v42 = vsub.f32 %v3654_v39, %v10959_v22  ;;  %v10962_v11 = vld [vmem:[#allocation91_spill] sm:$0xff] }
 0x368   :  { %v3910_v26 = vsub.f32 %v3654_v39, %v10960_v44  ;;  %v3911_v41 = vsub.f32 %v3654_v39, %v10961_v48  ;;  %v4099_v45 = vmax.f32 %v4098_v17, %v3904_v20  ;;  %v4168_v8 = vmax.f32 %v4167_v53, %v3905_v23  ;;  %v3662_v53 = vpop.permute.xlu1 %3661 }
 0x369   :  { %v4237_v54 = vmax.f32 %v4236_v9, %v3906_v59  ;;  %v4306_v24 = vmax.f32 %v4305_v7, %v3907_v6  ;;  %v4440_v30 = vadd.f32 %v3654_v39, %v10958_v49  ;;  %v4441_v19 = vadd.f32 %v3654_v39, %v10959_v22  ;;  %v10963_v49 = vld [vmem:[#allocation92_spill] sm:$0xff] }
 0x36a   :  { %v4446_v5 = vadd.f32 %v3658_v29, %v10956_v61  ;;  %v4447_v33 = vadd.f32 %v3658_v29, %v10957_v3  ;;  %v4442_v43 = vadd.f32 %v3654_v39, %v10960_v44  ;;  %v4443_v56 = vadd.f32 %v3654_v39, %v10961_v48  ;;  %v10964_v44 = vld [vmem:[#allocation93_spill] sm:$0xff]  ;;  %v10965_v48 = vld [vmem:[#allocation94_spill] sm:$0xff] }
 0x36b   :  { %v4100_v63 = vmax.f32 %v4099_v45, %v3908_v18  ;;  %v4169_v57 = vmax.f32 %v4168_v8, %v3909_v42  ;;  %v4631_v21 = vmin.f32 %v4630_v55, %v4436_v14  ;;  %v4700_v20 = vmin.f32 %v4699_v10, %v4437_v27  ;;  %v10966_v55 = vld [vmem:[#allocation79_spill] sm:$0xff]  ;;  %v10969_v42 = vld [vmem:[#allocation82_spill] sm:$0xff] }
 0x36c   :  { %v4238_v23 = vmax.f32 %v4237_v54, %v3910_v26  ;;  %v4307_v59 = vmax.f32 %v4306_v24, %v3911_v41  ;;  %v4769_v6 = vmin.f32 %v4768_v4, %v4438_v36  ;;  %v4838_v17 = vmin.f32 %v4837_v31, %v4439_v15  ;;  %v10967_v15 = vld [vmem:[#allocation80_spill] sm:$0xff]  ;;  %v10968_v4 = vld [vmem:[#allocation81_spill] sm:$0xff] }
 0x36d   :  { %v4632_v9 = vmin.f32 %v4631_v21, %v4440_v30  ;;  %v4701_v7 = vmin.f32 %v4700_v20, %v4441_v19  ;;  %v3920_v61 = vsub.f32 %v3666_v40, %v10962_v11  ;;  %v3921_v29 = vsub.f32 %v3666_v40, %v10963_v49  ;;  %v3674_v20 = vpop.permute.xlu0 %3673 }
 0x36e   :  { %v4770_v3 = vmin.f32 %v4769_v6, %v4442_v43  ;;  %v4839_v22 = vmin.f32 %v4838_v17, %v4443_v56  ;;  %v3922_v39 = vsub.f32 %v3666_v40, %v10964_v44  ;;  %v3923_v18 = vsub.f32 %v3666_v40, %v10965_v48 }
 0x36f   :  { %v4452_v14 = vadd.f32 %v3666_v40, %v10962_v11  ;;  %v4453_v27 = vadd.f32 %v3666_v40, %v10963_v49  ;;  %v3916_v36 = vsub.f32 %v3662_v53, %v10966_v55  ;;  %v3917_v10 = vsub.f32 %v3662_v53, %v10967_v15  ;;  %v10970_v49 = vld [vmem:[#allocation99_spill] sm:$0xff] }
 0x370   :  { %v3918_v31 = vsub.f32 %v3662_v53, %v10968_v4  ;;  %v3919_v26 = vsub.f32 %v3662_v53, %v10969_v42  ;;  %v4101_v41 = vmax.f32 %v4100_v63, %v3912_v12  ;;  %v4170_v45 = vmax.f32 %v4169_v57, %v3913_v35  ;;  %v3670_v57 = vpop.permute.xlu1 %3669 }
 0x371   :  { %v4239_v8 = vmax.f32 %v4238_v23, %v3914_v34  ;;  %v4308_v54 = vmax.f32 %v4307_v59, %v3915_v16  ;;  %v4448_v24 = vadd.f32 %v3662_v53, %v10966_v55  ;;  %v4449_v30 = vadd.f32 %v3662_v53, %v10967_v15  ;;  %v10971_v55 = vld [vmem:[#allocation100_spill] sm:$0xff] }
 0x372   :  { %v4454_v19 = vadd.f32 %v3666_v40, %v10964_v44  ;;  %v4455_v43 = vadd.f32 %v3666_v40, %v10965_v48  ;;  %v4450_v56 = vadd.f32 %v3662_v53, %v10968_v4  ;;  %v4451_v21 = vadd.f32 %v3662_v53, %v10969_v42  ;;  %v10972_v4 = vld [vmem:[#allocation101_spill] sm:$0xff]  ;;  %v10973_v42 = vld [vmem:[#allocation102_spill] sm:$0xff] }
 0x373   :  { %v4102_v6 = vmax.f32 %v4101_v41, %v3916_v36  ;;  %v4171_v17 = vmax.f32 %v4170_v45, %v3917_v10  ;;  %v4633_v11 = vmin.f32 %v4632_v9, %v4444_v28  ;;  %v4702_v12 = vmin.f32 %v4701_v7, %v4445_v51  ;;  %v10974_v9 = vld [vmem:[#allocation87_spill] sm:$0xff]  ;;  %v10977_v10 = vld [vmem:[#allocation90_spill] sm:$0xff] }
 0x374   :  { %v4240_v35 = vmax.f32 %v4239_v8, %v3918_v31  ;;  %v4309_v34 = vmax.f32 %v4308_v54, %v3919_v26  ;;  %v4771_v16 = vmin.f32 %v4770_v3, %v4446_v5  ;;  %v4840_v63 = vmin.f32 %v4839_v22, %v4447_v33  ;;  %v10975_v33 = vld [vmem:[#allocation88_spill] sm:$0xff]  ;;  %v10976_v3 = vld [vmem:[#allocation89_spill] sm:$0xff] }
 0x375   :  { %v4634_v23 = vmin.f32 %v4633_v11, %v4448_v24  ;;  %v4703_v59 = vmin.f32 %v4702_v12, %v4449_v30  ;;  %v3928_v44 = vsub.f32 %v3674_v20, %v10970_v49  ;;  %v3929_v40 = vsub.f32 %v3674_v20, %v10971_v55  ;;  %v3682_v12 = vpop.permute.xlu0 %3681 }
 0x376   :  { %v4772_v48 = vmin.f32 %v4771_v16, %v4450_v56  ;;  %v4841_v15 = vmin.f32 %v4840_v63, %v4451_v21  ;;  %v3930_v53 = vsub.f32 %v3674_v20, %v10972_v4  ;;  %v3931_v36 = vsub.f32 %v3674_v20, %v10973_v42 }
 0x377   :  { %v4460_v28 = vadd.f32 %v3674_v20, %v10970_v49  ;;  %v4461_v51 = vadd.f32 %v3674_v20, %v10971_v55  ;;  %v3924_v5 = vsub.f32 %v3670_v57, %v10974_v9  ;;  %v3925_v7 = vsub.f32 %v3670_v57, %v10975_v33  ;;  %v10978_v55 = vld [vmem:[#allocation107_spill] sm:$0xff] }
 0x378   :  { %v3926_v22 = vsub.f32 %v3670_v57, %v10976_v3  ;;  %v3927_v31 = vsub.f32 %v3670_v57, %v10977_v10  ;;  %v4103_v26 = vmax.f32 %v4102_v6, %v3920_v61  ;;  %v4172_v41 = vmax.f32 %v4171_v17, %v3921_v29  ;;  %v3678_v17 = vpop.permute.xlu1 %3677 }
 0x379   :  { %v4241_v45 = vmax.f32 %v4240_v35, %v3922_v39  ;;  %v4310_v8 = vmax.f32 %v4309_v34, %v3923_v18  ;;  %v4456_v54 = vadd.f32 %v3670_v57, %v10974_v9  ;;  %v4457_v24 = vadd.f32 %v3670_v57, %v10975_v33  ;;  %v10979_v9 = vld [vmem:[#allocation108_spill] sm:$0xff] }
 0x37a   :  { %v4462_v30 = vadd.f32 %v3674_v20, %v10972_v4  ;;  %v4463_v56 = vadd.f32 %v3674_v20, %v10973_v42  ;;  %v4458_v21 = vadd.f32 %v3670_v57, %v10976_v3  ;;  %v4459_v11 = vadd.f32 %v3670_v57, %v10977_v10  ;;  %v10980_v3 = vld [vmem:[#allocation109_spill] sm:$0xff]  ;;  %v10981_v10 = vld [vmem:[#allocation110_spill] sm:$0xff] }
 0x37b   :  { %v4104_v16 = vmax.f32 %v4103_v26, %v3924_v5  ;;  %v4173_v63 = vmax.f32 %v4172_v41, %v3925_v7  ;;  %v4635_v49 = vmin.f32 %v4634_v23, %v4452_v14  ;;  %v4704_v61 = vmin.f32 %v4703_v59, %v4453_v27  ;;  %v10982_v23 = vld [vmem:[#allocation95_spill] sm:$0xff]  ;;  %v10985_v7 = vld [vmem:[#allocation98_spill] sm:$0xff] }
 0x37c   :  { %v4242_v29 = vmax.f32 %v4241_v45, %v3926_v22  ;;  %v4311_v39 = vmax.f32 %v4310_v8, %v3927_v31  ;;  %v4773_v18 = vmin.f32 %v4772_v48, %v4454_v19  ;;  %v4842_v6 = vmin.f32 %v4841_v15, %v4455_v43  ;;  %v10983_v43 = vld [vmem:[#allocation96_spill] sm:$0xff]  ;;  %v10984_v48 = vld [vmem:[#allocation97_spill] sm:$0xff] }
 0x37d   :  { %v4636_v35 = vmin.f32 %v4635_v49, %v4456_v54  ;;  %v4705_v34 = vmin.f32 %v4704_v61, %v4457_v24  ;;  %v3936_v4 = vsub.f32 %v3682_v12, %v10978_v55  ;;  %v3937_v20 = vsub.f32 %v3682_v12, %v10979_v9  ;;  %v9083_v61 = vpop.permute.xlu0 %3689 }
 0x37e   :  { %v4774_v42 = vmin.f32 %v4773_v18, %v4458_v21  ;;  %v4843_v33 = vmin.f32 %v4842_v6, %v4459_v11  ;;  %v3938_v57 = vsub.f32 %v3682_v12, %v10980_v3  ;;  %v3939_v5 = vsub.f32 %v3682_v12, %v10981_v10 }
 0x37f   :  { %v4468_v14 = vadd.f32 %v3682_v12, %v10978_v55  ;;  %v4469_v27 = vadd.f32 %v3682_v12, %v10979_v9  ;;  %v3932_v19 = vsub.f32 %v3678_v17, %v10982_v23  ;;  %v3933_v59 = vsub.f32 %v3678_v17, %v10983_v43  ;;  %v10986_v9 = vld [vmem:[#allocation115_spill] sm:$0xff] }
 0x380   :  { %v3934_v15 = vsub.f32 %v3678_v17, %v10984_v48  ;;  %v3935_v22 = vsub.f32 %v3678_v17, %v10985_v7  ;;  %v4105_v31 = vmax.f32 %v4104_v16, %v3928_v44  ;;  %v4174_v26 = vmax.f32 %v4173_v63, %v3929_v40 }
 0x381   :  { %v4243_v41 = vmax.f32 %v4242_v29, %v3930_v53  ;;  %v4312_v45 = vmax.f32 %v4311_v39, %v3931_v36  ;;  %v4464_v8 = vadd.f32 %v3678_v17, %v10982_v23  ;;  %v4465_v54 = vadd.f32 %v3678_v17, %v10983_v43  ;;  %v3686_v29 = vpop.permute.xlu1 %3685  ;;  %v10988_v43 = vld [vmem:[#allocation117_spill] sm:$0xff] }
 0x382   :  { %v4470_v24 = vadd.f32 %v3682_v12, %v10980_v3  ;;  %v4471_v21 = vadd.f32 %v3682_v12, %v10981_v10  ;;  %v4466_v11 = vadd.f32 %v3678_v17, %v10984_v48  ;;  %v4467_v49 = vadd.f32 %v3678_v17, %v10985_v7  ;;  %v10987_v3 = vld [vmem:[#allocation116_spill] sm:$0xff] }
 0x383   :  { %v4106_v18 = vmax.f32 %v4105_v31, %v3932_v19  ;;  %v4175_v6 = vmax.f32 %v4174_v26, %v3933_v59  ;;  %v4637_v44 = vmin.f32 %v4636_v35, %v4460_v28  ;;  %v4706_v40 = vmin.f32 %v4705_v34, %v4461_v51  ;;  %v10989_v28 = vld [vmem:[#allocation118_spill] sm:$0xff]  ;;  %v10990_v35 = vld [vmem:[#allocation103_spill] sm:$0xff]  ;;  %v10992_v59 = vld [vmem:[#allocation105_spill] sm:$0xff] }
 0x384   :  { %v4244_v53 = vmax.f32 %v4243_v41, %v3934_v15  ;;  %v4313_v36 = vmax.f32 %v4312_v45, %v3935_v22  ;;  %v4775_v16 = vmin.f32 %v4774_v42, %v4462_v30  ;;  %v4844_v63 = vmin.f32 %v4843_v33, %v4463_v56  ;;  %v10991_v42 = vld [vmem:[#allocation104_spill] sm:$0xff]  ;;  %v10993_v15 = vld [vmem:[#allocation106_spill] sm:$0xff] }
 0x385   :  { %v4638_v39 = vmin.f32 %v4637_v44, %v4464_v8  ;;  %v4707_v55 = vmin.f32 %v4706_v40, %v4465_v54  ;;  %v3944_v12 = vsub.f32 %v9083_v61, %v10986_v9  ;;  %v3945_v10 = vsub.f32 %v9083_v61, %v10987_v3  ;;  %v9109_v40 = vpop.permute.xlu0 %3697 }
 0x386   :  { %v4776_v17 = vmin.f32 %v4775_v16, %v4466_v11  ;;  %v4845_v23 = vmin.f32 %v4844_v63, %v4467_v49  ;;  %v3946_v19 = vsub.f32 %v9083_v61, %v10988_v43  ;;  %v3947_v51 = vsub.f32 %v9083_v61, %v10989_v28  ;;  %v3694_v16 = vpop.permute.xlu1 %3693 }
 0x387   :  { %v4476_v30 = vadd.f32 %v9083_v61, %v10986_v9  ;;  %v4477_v56 = vadd.f32 %v9083_v61, %v10987_v3  ;;  %v3940_v34 = vsub.f32 %v3686_v29, %v10990_v35  ;;  %v3941_v33 = vsub.f32 %v3686_v29, %v10991_v42  ;;  %v10995_v9 = vld [vmem:[#allocation123_spill] sm:$0xff] }
 0x388   :  { %v3942_v48 = vsub.f32 %v3686_v29, %v10992_v59  ;;  %v3943_v7 = vsub.f32 %v3686_v29, %v10993_v15  ;;  %v4107_v22 = vmax.f32 %v4106_v18, %v3936_v4  ;;  %v4176_v31 = vmax.f32 %v4175_v6, %v3937_v20 }
 0x389   :  { %v4245_v26 = vmax.f32 %v4244_v53, %v3938_v57  ;;  %v4314_v41 = vmax.f32 %v4313_v36, %v3939_v5  ;;  %v4472_v45 = vadd.f32 %v3686_v29, %v10990_v35  ;;  %v4473_v8 = vadd.f32 %v3686_v29, %v10991_v42 }
 0x38a   :  { %v4478_v54 = vadd.f32 %v9083_v61, %v10988_v43  ;;  %v4479_v11 = vadd.f32 %v9083_v61, %v10989_v28  ;;  %v4474_v49 = vadd.f32 %v3686_v29, %v10992_v59  ;;  %v4475_v44 = vadd.f32 %v3686_v29, %v10993_v15  ;;  %v10996_v43 = vld [vmem:[#allocation124_spill] sm:$0xff]  ;;  %v10997_v59 = vld [vmem:[#allocation125_spill] sm:$0xff]  ;;  %v11002_v15 = vld [vmem:[#allocation114_spill] sm:$0xff] }
 0x38b   :  { %v10994_v4 = vmov inf   ;;  %v4108_v20 = vmax.f32 %v4107_v22, %v3940_v34  ;;  %v4177_v57 = vmax.f32 %v4176_v31, %v3941_v33  ;;  %v4639_v5 = vmin.f32 %v4638_v39, %v4468_v14  ;;  %v10998_v14 = vld [vmem:[#allocation126_spill] sm:$0xff]  ;;  %v10999_v39 = vld [vmem:[#allocation111_spill] sm:$0xff]  ;;  %v11001_v33 = vld [vmem:[#allocation113_spill] sm:$0xff] }
 0x38c   :  { %19 = vst [vmem:[%s9471_s3] sm:$0x77] %v10994_v4  ;;  %20 = vst [vmem:[%s9471_s3 + $0x8] sm:$0x77] %v10994_v4  ;;  %v4708_v61 = vmin.f32 %v4707_v55, %v4469_v27  ;;  %v4246_v18 = vmax.f32 %v4245_v26, %v3942_v48  ;;  %v4315_v6 = vmax.f32 %v4314_v41, %v3943_v7 }
 0x38d   :  { %v4777_v53 = vmin.f32 %v4776_v17, %v4470_v24  ;;  %v4846_v36 = vmin.f32 %v4845_v23, %v4471_v21  ;;  %v4640_v63 = vmin.f32 %v4639_v5, %v4472_v45  ;;  %v3952_v3 = vsub.f32 %v9109_v40, %v10995_v9  ;;  %v11000_v17 = vld [vmem:[#allocation112_spill] sm:$0xff] }
 0x38e   :  { %v4709_v29 = vmin.f32 %v4708_v61, %v4473_v8  ;;  %v3953_v28 = vsub.f32 %v9109_v40, %v10996_v43  ;;  %v3954_v34 = vsub.f32 %v9109_v40, %v10997_v59  ;;  %v3955_v27 = vsub.f32 %v9109_v40, %v10998_v14  ;;  %v3706_v61 = vpop.permute.xlu0 %3705 }
 0x38f   :  { %v4778_v35 = vmin.f32 %v4777_v53, %v4474_v49  ;;  %v4847_v42 = vmin.f32 %v4846_v36, %v4475_v44  ;;  %v4484_v24 = vadd.f32 %v9109_v40, %v10995_v9  ;;  %v4485_v21 = vadd.f32 %v9109_v40, %v10996_v43  ;;  %v11003_v43 = vld [vmem:[#allocation131_spill] sm:$0xff] }
 0x390   :  { %v3948_v55 = vsub.f32 %v3694_v16, %v10999_v39  ;;  %v3949_v23 = vsub.f32 %v3694_v16, %v11000_v17  ;;  %v3950_v48 = vsub.f32 %v3694_v16, %v11001_v33  ;;  %v3951_v7 = vsub.f32 %v3694_v16, %v11002_v15 }
 0x391   :  { %v4109_v22 = vmax.f32 %v4108_v20, %v3944_v12  ;;  %v4178_v31 = vmax.f32 %v4177_v57, %v3945_v10  ;;  %v4247_v26 = vmax.f32 %v4246_v18, %v3946_v19  ;;  %v4316_v41 = vmax.f32 %v4315_v6, %v3947_v51  ;;  %v3702_v6 = vpop.permute.xlu1 %3701 }
 0x392   :  { %v4480_v45 = vadd.f32 %v3694_v16, %v10999_v39  ;;  %v4481_v8 = vadd.f32 %v3694_v16, %v11000_v17  ;;  %v4486_v49 = vadd.f32 %v9109_v40, %v10997_v59  ;;  %v4487_v44 = vadd.f32 %v9109_v40, %v10998_v14  ;;  %v11004_v39 = vld [vmem:[#allocation132_spill] sm:$0xff] }
 0x393   :  { %v4482_v4 = vadd.f32 %v3694_v16, %v11001_v33  ;;  %v4483_v5 = vadd.f32 %v3694_v16, %v11002_v15  ;;  %v4110_v53 = vmax.f32 %v4109_v22, %v3948_v55  ;;  %v4179_v12 = vmax.f32 %v4178_v31, %v3949_v23  ;;  %v11005_v33 = vld [vmem:[#allocation133_spill] sm:$0xff]  ;;  %v11006_v15 = vld [vmem:[#allocation134_spill] sm:$0xff] }
 0x394   :  { %v4641_v10 = vmin.f32 %v4640_v63, %v4476_v30  ;;  %v4710_v19 = vmin.f32 %v4709_v29, %v4477_v56  ;;  %v4248_v51 = vmax.f32 %v4247_v26, %v3950_v48  ;;  %v4317_v20 = vmax.f32 %v4316_v41, %v3951_v7  ;;  %v11007_v63 = vld [vmem:[#allocation119_spill] sm:$0xff]  ;;  %v11010_v23 = vld [vmem:[#allocation122_spill] sm:$0xff] }
 0x395   :  { %v4779_v57 = vmin.f32 %v4778_v35, %v4478_v54  ;;  %v4848_v18 = vmin.f32 %v4847_v42, %v4479_v11  ;;  %v3960_v59 = vsub.f32 %v3706_v61, %v11003_v43  ;;  %v3961_v40 = vsub.f32 %v3706_v61, %v11004_v39  ;;  %v11008_v11 = vld [vmem:[#allocation120_spill] sm:$0xff]  ;;  %v11009_v35 = vld [vmem:[#allocation121_spill] sm:$0xff] }
 0x396   :  { %v4642_v36 = vmin.f32 %v4641_v10, %v4480_v45  ;;  %v4711_v9 = vmin.f32 %v4710_v19, %v4481_v8  ;;  %v3962_v16 = vsub.f32 %v3706_v61, %v11005_v33  ;;  %v3963_v55 = vsub.f32 %v3706_v61, %v11006_v15  ;;  %v3714_v19 = vpop.permute.xlu0 %3713 }
 0x397   :  { %v4780_v14 = vmin.f32 %v4779_v57, %v4482_v4  ;;  %v4849_v17 = vmin.f32 %v4848_v18, %v4483_v5  ;;  %v4492_v30 = vadd.f32 %v3706_v61, %v11003_v43  ;;  %v4493_v56 = vadd.f32 %v3706_v61, %v11004_v39  ;;  %v11011_v39 = vld [vmem:[#allocation139_spill] sm:$0xff] }
 0x398   :  { %v3956_v54 = vsub.f32 %v3702_v6, %v11007_v63  ;;  %v3957_v29 = vsub.f32 %v3702_v6, %v11008_v11  ;;  %v3958_v42 = vsub.f32 %v3702_v6, %v11009_v35  ;;  %v3959_v48 = vsub.f32 %v3702_v6, %v11010_v23 }
 0x399   :  { %v4111_v7 = vmax.f32 %v4110_v53, %v3952_v3  ;;  %v4180_v22 = vmax.f32 %v4179_v12, %v3953_v28  ;;  %v4249_v31 = vmax.f32 %v4248_v51, %v3954_v34  ;;  %v4318_v26 = vmax.f32 %v4317_v20, %v3955_v27  ;;  %v3710_v12 = vpop.permute.xlu1 %3709 }
 0x39a   :  { %v4488_v41 = vadd.f32 %v3702_v6, %v11007_v63  ;;  %v4489_v45 = vadd.f32 %v3702_v6, %v11008_v11  ;;  %v4494_v8 = vadd.f32 %v3706_v61, %v11005_v33  ;;  %v4495_v4 = vadd.f32 %v3706_v61, %v11006_v15  ;;  %v11012_v63 = vld [vmem:[#allocation140_spill] sm:$0xff] }
 0x39b   :  { %v4490_v5 = vadd.f32 %v3702_v6, %v11009_v35  ;;  %v4491_v10 = vadd.f32 %v3702_v6, %v11010_v23  ;;  %v4112_v57 = vmax.f32 %v4111_v7, %v3956_v54  ;;  %v4181_v18 = vmax.f32 %v4180_v22, %v3957_v29  ;;  %v11013_v35 = vld [vmem:[#allocation141_spill] sm:$0xff]  ;;  %v11014_v23 = vld [vmem:[#allocation142_spill] sm:$0xff] }
 0x39c   :  { %v4643_v43 = vmin.f32 %v4642_v36, %v4484_v24  ;;  %v4712_v3 = vmin.f32 %v4711_v9, %v4485_v21  ;;  %v4250_v28 = vmax.f32 %v4249_v31, %v3958_v42  ;;  %v4319_v34 = vmax.f32 %v4318_v26, %v3959_v48  ;;  %v11015_v36 = vld [vmem:[#allocation127_spill] sm:$0xff]  ;;  %v11018_v29 = vld [vmem:[#allocation130_spill] sm:$0xff] }
 0x39d   :  { %v4781_v27 = vmin.f32 %v4780_v14, %v4486_v49  ;;  %v4850_v53 = vmin.f32 %v4849_v17, %v4487_v44  ;;  %v3968_v33 = vsub.f32 %v3714_v19, %v11011_v39  ;;  %v3969_v61 = vsub.f32 %v3714_v19, %v11012_v63  ;;  %v11016_v44 = vld [vmem:[#allocation128_spill] sm:$0xff]  ;;  %v11017_v14 = vld [vmem:[#allocation129_spill] sm:$0xff] }
 0x39e   :  { %v4644_v51 = vmin.f32 %v4643_v43, %v4488_v41  ;;  %v4713_v20 = vmin.f32 %v4712_v3, %v4489_v45  ;;  %v3970_v6 = vsub.f32 %v3714_v19, %v11013_v35  ;;  %v3971_v54 = vsub.f32 %v3714_v19, %v11014_v23  ;;  %v3722_v3 = vpop.permute.xlu0 %3721 }
 0x39f   :  { %v4782_v15 = vmin.f32 %v4781_v27, %v4490_v5  ;;  %v4851_v11 = vmin.f32 %v4850_v53, %v4491_v10  ;;  %v4500_v24 = vadd.f32 %v3714_v19, %v11011_v39  ;;  %v4501_v21 = vadd.f32 %v3714_v19, %v11012_v63  ;;  %v11019_v63 = vld [vmem:[#allocation147_spill] sm:$0xff] }
 0x3a0   :  { %v3964_v49 = vsub.f32 %v3710_v12, %v11015_v36  ;;  %v3965_v9 = vsub.f32 %v3710_v12, %v11016_v44  ;;  %v3966_v17 = vsub.f32 %v3710_v12, %v11017_v14  ;;  %v3967_v42 = vsub.f32 %v3710_v12, %v11018_v29 }
 0x3a1   :  { %v4113_v48 = vmax.f32 %v4112_v57, %v3960_v59  ;;  %v4182_v7 = vmax.f32 %v4181_v18, %v3961_v40  ;;  %v4251_v22 = vmax.f32 %v4250_v28, %v3962_v16  ;;  %v4320_v31 = vmax.f32 %v4319_v34, %v3963_v55  ;;  %v3718_v18 = vpop.permute.xlu1 %3717 }
 0x3a2   :  { %v4496_v26 = vadd.f32 %v3710_v12, %v11015_v36  ;;  %v4497_v41 = vadd.f32 %v3710_v12, %v11016_v44  ;;  %v4502_v45 = vadd.f32 %v3714_v19, %v11013_v35  ;;  %v4503_v5 = vadd.f32 %v3714_v19, %v11014_v23  ;;  %v11020_v36 = vld [vmem:[#allocation148_spill] sm:$0xff] }
 0x3a3   :  { %v4498_v10 = vadd.f32 %v3710_v12, %v11017_v14  ;;  %v4499_v43 = vadd.f32 %v3710_v12, %v11018_v29  ;;  %v4114_v27 = vmax.f32 %v4113_v48, %v3964_v49  ;;  %v4183_v53 = vmax.f32 %v4182_v7, %v3965_v9  ;;  %v11021_v14 = vld [vmem:[#allocation149_spill] sm:$0xff]  ;;  %v11022_v29 = vld [vmem:[#allocation150_spill] sm:$0xff] }
 0x3a4   :  { %v4645_v39 = vmin.f32 %v4644_v51, %v4492_v30  ;;  %v4714_v59 = vmin.f32 %v4713_v20, %v4493_v56  ;;  %v4252_v40 = vmax.f32 %v4251_v22, %v3966_v17  ;;  %v4321_v16 = vmax.f32 %v4320_v31, %v3967_v42  ;;  %v11023_v51 = vld [vmem:[#allocation135_spill] sm:$0xff]  ;;  %v11026_v9 = vld [vmem:[#allocation138_spill] sm:$0xff] }
 0x3a5   :  { %v4783_v55 = vmin.f32 %v4782_v15, %v4494_v8  ;;  %v4852_v57 = vmin.f32 %v4851_v11, %v4495_v4  ;;  %v3976_v35 = vsub.f32 %v3722_v3, %v11019_v63  ;;  %v3977_v19 = vsub.f32 %v3722_v3, %v11020_v36  ;;  %v11024_v4 = vld [vmem:[#allocation136_spill] sm:$0xff]  ;;  %v11025_v15 = vld [vmem:[#allocation137_spill] sm:$0xff] }
 0x3a6   :  { %v4646_v28 = vmin.f32 %v4645_v39, %v4496_v26  ;;  %v4715_v34 = vmin.f32 %v4714_v59, %v4497_v41  ;;  %v3978_v12 = vsub.f32 %v3722_v3, %v11021_v14  ;;  %v3979_v49 = vsub.f32 %v3722_v3, %v11022_v29  ;;  %v3730_v59 = vpop.permute.xlu0 %3729 }
 0x3a7   :  { %v4784_v23 = vmin.f32 %v4783_v55, %v4498_v10  ;;  %v4853_v44 = vmin.f32 %v4852_v57, %v4499_v43  ;;  %v4508_v30 = vadd.f32 %v3722_v3, %v11019_v63  ;;  %v4509_v56 = vadd.f32 %v3722_v3, %v11020_v36  ;;  %v11027_v36 = vld [vmem:[#allocation155_spill] sm:$0xff] }
 0x3a8   :  { %v3972_v8 = vsub.f32 %v3718_v18, %v11023_v51  ;;  %v3973_v20 = vsub.f32 %v3718_v18, %v11024_v4  ;;  %v3974_v11 = vsub.f32 %v3718_v18, %v11025_v15  ;;  %v3975_v17 = vsub.f32 %v3718_v18, %v11026_v9 }
 0x3a9   :  { %v4115_v42 = vmax.f32 %v4114_v27, %v3968_v33  ;;  %v4184_v48 = vmax.f32 %v4183_v53, %v3969_v61  ;;  %v4253_v7 = vmax.f32 %v4252_v40, %v3970_v6  ;;  %v4322_v22 = vmax.f32 %v4321_v16, %v3971_v54  ;;  %v3726_v53 = vpop.permute.xlu1 %3725 }
 0x3aa   :  { %v4504_v31 = vadd.f32 %v3718_v18, %v11023_v51  ;;  %v4505_v26 = vadd.f32 %v3718_v18, %v11024_v4  ;;  %v4510_v41 = vadd.f32 %v3722_v3, %v11021_v14  ;;  %v4511_v10 = vadd.f32 %v3722_v3, %v11022_v29  ;;  %v11028_v51 = vld [vmem:[#allocation156_spill] sm:$0xff] }
 0x3ab   :  { %v4506_v43 = vadd.f32 %v3718_v18, %v11025_v15  ;;  %v4507_v39 = vadd.f32 %v3718_v18, %v11026_v9  ;;  %v4116_v55 = vmax.f32 %v4115_v42, %v3972_v8  ;;  %v4185_v57 = vmax.f32 %v4184_v48, %v3973_v20  ;;  %v11029_v15 = vld [vmem:[#allocation157_spill] sm:$0xff]  ;;  %v11030_v9 = vld [vmem:[#allocation158_spill] sm:$0xff] }
 0x3ac   :  { %v4647_v63 = vmin.f32 %v4646_v28, %v4500_v24  ;;  %v4716_v33 = vmin.f32 %v4715_v34, %v4501_v21  ;;  %v4254_v61 = vmax.f32 %v4253_v7, %v3974_v11  ;;  %v4323_v6 = vmax.f32 %v4322_v22, %v3975_v17  ;;  %v11031_v28 = vld [vmem:[#allocation143_spill] sm:$0xff]  ;;  %v11034_v20 = vld [vmem:[#allocation146_spill] sm:$0xff] }
 0x3ad   :  { %v4785_v54 = vmin.f32 %v4784_v23, %v4502_v45  ;;  %v4854_v27 = vmin.f32 %v4853_v44, %v4503_v5  ;;  %v3984_v14 = vsub.f32 %v3730_v59, %v11027_v36  ;;  %v3985_v3 = vsub.f32 %v3730_v59, %v11028_v51  ;;  %v11032_v5 = vld [vmem:[#allocation144_spill] sm:$0xff]  ;;  %v11033_v23 = vld [vmem:[#allocation145_spill] sm:$0xff] }
 0x3ae   :  { %v4648_v40 = vmin.f32 %v4647_v63, %v4504_v31  ;;  %v4717_v16 = vmin.f32 %v4716_v33, %v4505_v26  ;;  %v3986_v18 = vsub.f32 %v3730_v59, %v11029_v15  ;;  %v3987_v8 = vsub.f32 %v3730_v59, %v11030_v9  ;;  %v3738_v33 = vpop.permute.xlu0 %3737 }
 0x3af   :  { %v4786_v29 = vmin.f32 %v4785_v54, %v4506_v43  ;;  %v4855_v4 = vmin.f32 %v4854_v27, %v4507_v39  ;;  %v4516_v24 = vadd.f32 %v3730_v59, %v11027_v36  ;;  %v4517_v21 = vadd.f32 %v3730_v59, %v11028_v51  ;;  %v11035_v51 = vld [vmem:[#allocation163_spill] sm:$0xff] }
 0x3b0   :  { %v3980_v45 = vsub.f32 %v3726_v53, %v11031_v28  ;;  %v3981_v34 = vsub.f32 %v3726_v53, %v11032_v5  ;;  %v3982_v44 = vsub.f32 %v3726_v53, %v11033_v23  ;;  %v3983_v11 = vsub.f32 %v3726_v53, %v11034_v20 }
 0x3b1   :  { %v4117_v17 = vmax.f32 %v4116_v55, %v3976_v35  ;;  %v4186_v42 = vmax.f32 %v4185_v57, %v3977_v19  ;;  %v4255_v48 = vmax.f32 %v4254_v61, %v3978_v12  ;;  %v4324_v7 = vmax.f32 %v4323_v6, %v3979_v49  ;;  %v3734_v57 = vpop.permute.xlu1 %3733 }
 0x3b2   :  { %v4512_v22 = vadd.f32 %v3726_v53, %v11031_v28  ;;  %v4513_v31 = vadd.f32 %v3726_v53, %v11032_v5  ;;  %v4518_v26 = vadd.f32 %v3730_v59, %v11029_v15  ;;  %v4519_v43 = vadd.f32 %v3730_v59, %v11030_v9  ;;  %v11036_v28 = vld [vmem:[#allocation164_spill] sm:$0xff] }
 0x3b3   :  { %v4514_v39 = vadd.f32 %v3726_v53, %v11033_v23  ;;  %v4515_v63 = vadd.f32 %v3726_v53, %v11034_v20  ;;  %v4118_v54 = vmax.f32 %v4117_v17, %v3980_v45  ;;  %v4187_v27 = vmax.f32 %v4186_v42, %v3981_v34  ;;  %v11037_v23 = vld [vmem:[#allocation165_spill] sm:$0xff]  ;;  %v11038_v20 = vld [vmem:[#allocation166_spill] sm:$0xff] }
 0x3b4   :  { %v4649_v36 = vmin.f32 %v4648_v40, %v4508_v30  ;;  %v4718_v35 = vmin.f32 %v4717_v16, %v4509_v56  ;;  %v4256_v19 = vmax.f32 %v4255_v48, %v3982_v44  ;;  %v4325_v12 = vmax.f32 %v4324_v7, %v3983_v11  ;;  %v11039_v40 = vld [vmem:[#allocation151_spill] sm:$0xff]  ;;  %v11042_v34 = vld [vmem:[#allocation154_spill] sm:$0xff] }
 0x3b5   :  { %v4787_v49 = vmin.f32 %v4786_v29, %v4510_v41  ;;  %v4856_v55 = vmin.f32 %v4855_v4, %v4511_v10  ;;  %v3992_v15 = vsub.f32 %v3738_v33, %v11035_v51  ;;  %v3993_v59 = vsub.f32 %v3738_v33, %v11036_v28  ;;  %v11040_v10 = vld [vmem:[#allocation152_spill] sm:$0xff]  ;;  %v11041_v29 = vld [vmem:[#allocation153_spill] sm:$0xff] }
 0x3b6   :  { %v4650_v61 = vmin.f32 %v4649_v36, %v4512_v22  ;;  %v4719_v6 = vmin.f32 %v4718_v35, %v4513_v31  ;;  %v3994_v53 = vsub.f32 %v3738_v33, %v11037_v23  ;;  %v3995_v45 = vsub.f32 %v3738_v33, %v11038_v20  ;;  %v3746_v35 = vpop.permute.xlu0 %3745 }
 0x3b7   :  { %v4788_v9 = vmin.f32 %v4787_v49, %v4514_v39  ;;  %v4857_v5 = vmin.f32 %v4856_v55, %v4515_v63  ;;  %v4524_v30 = vadd.f32 %v3738_v33, %v11035_v51  ;;  %v4525_v56 = vadd.f32 %v3738_v33, %v11036_v28  ;;  %v11043_v28 = vld [vmem:[#allocation171_spill] sm:$0xff] }
 0x3b8   :  { %v3988_v41 = vsub.f32 %v3734_v57, %v11039_v40  ;;  %v3989_v16 = vsub.f32 %v3734_v57, %v11040_v10  ;;  %v3990_v4 = vsub.f32 %v3734_v57, %v11041_v29  ;;  %v3991_v44 = vsub.f32 %v3734_v57, %v11042_v34 }
 0x3b9   :  { %v4119_v11 = vmax.f32 %v4118_v54, %v3984_v14  ;;  %v4188_v17 = vmax.f32 %v4187_v27, %v3985_v3  ;;  %v4257_v42 = vmax.f32 %v4256_v19, %v3986_v18  ;;  %v4326_v48 = vmax.f32 %v4325_v12, %v3987_v8  ;;  %v3742_v27 = vpop.permute.xlu1 %3741 }
 0x3ba   :  { %v4520_v7 = vadd.f32 %v3734_v57, %v11039_v40  ;;  %v4521_v22 = vadd.f32 %v3734_v57, %v11040_v10  ;;  %v4526_v31 = vadd.f32 %v3738_v33, %v11037_v23  ;;  %v4527_v39 = vadd.f32 %v3738_v33, %v11038_v20  ;;  %v11044_v40 = vld [vmem:[#allocation172_spill] sm:$0xff] }
 0x3bb   :  { %v4522_v63 = vadd.f32 %v3734_v57, %v11041_v29  ;;  %v4523_v36 = vadd.f32 %v3734_v57, %v11042_v34  ;;  %v4120_v49 = vmax.f32 %v4119_v11, %v3988_v41  ;;  %v4189_v55 = vmax.f32 %v4188_v17, %v3989_v16  ;;  %v11045_v29 = vld [vmem:[#allocation173_spill] sm:$0xff]  ;;  %v11046_v34 = vld [vmem:[#allocation174_spill] sm:$0xff] }
 0x3bc   :  { %v4651_v51 = vmin.f32 %v4650_v61, %v4516_v24  ;;  %v4720_v14 = vmin.f32 %v4719_v6, %v4517_v21  ;;  %v4258_v3 = vmax.f32 %v4257_v42, %v3990_v4  ;;  %v4327_v18 = vmax.f32 %v4326_v48, %v3991_v44  ;;  %v11047_v61 = vld [vmem:[#allocation159_spill] sm:$0xff]  ;;  %v11050_v16 = vld [vmem:[#allocation162_spill] sm:$0xff] }
 0x3bd   :  { %v4789_v8 = vmin.f32 %v4788_v9, %v4518_v26  ;;  %v4858_v54 = vmin.f32 %v4857_v5, %v4519_v43  ;;  %v4000_v23 = vsub.f32 %v3746_v35, %v11043_v28  ;;  %v4001_v33 = vsub.f32 %v3746_v35, %v11044_v40  ;;  %v11048_v43 = vld [vmem:[#allocation160_spill] sm:$0xff]  ;;  %v11049_v9 = vld [vmem:[#allocation161_spill] sm:$0xff] }
 0x3be   :  { %v4652_v19 = vmin.f32 %v4651_v51, %v4520_v7  ;;  %v4721_v12 = vmin.f32 %v4720_v14, %v4521_v22  ;;  %v4002_v57 = vsub.f32 %v3746_v35, %v11045_v29  ;;  %v4003_v41 = vsub.f32 %v3746_v35, %v11046_v34  ;;  %v3754_v14 = vpop.permute.xlu0 %3753 }
 0x3bf   :  { %v4790_v20 = vmin.f32 %v4789_v8, %v4522_v63  ;;  %v4859_v10 = vmin.f32 %v4858_v54, %v4523_v36  ;;  %v4532_v24 = vadd.f32 %v3746_v35, %v11043_v28  ;;  %v4533_v21 = vadd.f32 %v3746_v35, %v11044_v40  ;;  %v11051_v40 = vld [vmem:[#allocation179_spill] sm:$0xff] }
 0x3c0   :  { %v3996_v26 = vsub.f32 %v3742_v27, %v11047_v61  ;;  %v3997_v6 = vsub.f32 %v3742_v27, %v11048_v43  ;;  %v3998_v5 = vsub.f32 %v3742_v27, %v11049_v9  ;;  %v3999_v4 = vsub.f32 %v3742_v27, %v11050_v16 }
 0x3c1   :  { %v4121_v44 = vmax.f32 %v4120_v49, %v3992_v15  ;;  %v4190_v11 = vmax.f32 %v4189_v55, %v3993_v59  ;;  %v4259_v17 = vmax.f32 %v4258_v3, %v3994_v53  ;;  %v4328_v42 = vmax.f32 %v4327_v18, %v3995_v45  ;;  %v3750_v55 = vpop.permute.xlu1 %3749 }
 0x3c2   :  { %v4528_v48 = vadd.f32 %v3742_v27, %v11047_v61  ;;  %v4529_v7 = vadd.f32 %v3742_v27, %v11048_v43  ;;  %v4534_v22 = vadd.f32 %v3746_v35, %v11045_v29  ;;  %v4535_v63 = vadd.f32 %v3746_v35, %v11046_v34  ;;  %v11052_v61 = vld [vmem:[#allocation180_spill] sm:$0xff] }
 0x3c3   :  { %v4530_v36 = vadd.f32 %v3742_v27, %v11049_v9  ;;  %v4531_v51 = vadd.f32 %v3742_v27, %v11050_v16  ;;  %v4122_v8 = vmax.f32 %v4121_v44, %v3996_v26  ;;  %v4191_v54 = vmax.f32 %v4190_v11, %v3997_v6  ;;  %v11053_v9 = vld [vmem:[#allocation181_spill] sm:$0xff]  ;;  %v11054_v16 = vld [vmem:[#allocation182_spill] sm:$0xff] }
 0x3c4   :  { %v4653_v28 = vmin.f32 %v4652_v19, %v4524_v30  ;;  %v4722_v15 = vmin.f32 %v4721_v12, %v4525_v56  ;;  %v4260_v59 = vmax.f32 %v4259_v17, %v3998_v5  ;;  %v4329_v53 = vmax.f32 %v4328_v42, %v3999_v4  ;;  %v11055_v19 = vld [vmem:[#allocation167_spill] sm:$0xff]  ;;  %v11058_v6 = vld [vmem:[#allocation170_spill] sm:$0xff] }
 0x3c5   :  { %v4791_v45 = vmin.f32 %v4790_v20, %v4526_v31  ;;  %v4860_v49 = vmin.f32 %v4859_v10, %v4527_v39  ;;  %v4008_v29 = vsub.f32 %v3754_v14, %v11051_v40  ;;  %v4009_v35 = vsub.f32 %v3754_v14, %v11052_v61  ;;  %v11056_v39 = vld [vmem:[#allocation168_spill] sm:$0xff]  ;;  %v11057_v20 = vld [vmem:[#allocation169_spill] sm:$0xff] }
 0x3c6   :  { %v4654_v3 = vmin.f32 %v4653_v28, %v4528_v48  ;;  %v4723_v18 = vmin.f32 %v4722_v15, %v4529_v7  ;;  %v4010_v27 = vsub.f32 %v3754_v14, %v11053_v9  ;;  %v4011_v26 = vsub.f32 %v3754_v14, %v11054_v16  ;;  %v3762_v15 = vpop.permute.xlu0 %3761 }
 0x3c7   :  { %v4792_v34 = vmin.f32 %v4791_v45, %v4530_v36  ;;  %v4861_v43 = vmin.f32 %v4860_v49, %v4531_v51  ;;  %v4540_v30 = vadd.f32 %v3754_v14, %v11051_v40  ;;  %v4541_v56 = vadd.f32 %v3754_v14, %v11052_v61  ;;  %v11059_v61 = vld [vmem:[#allocation187_spill] sm:$0xff] }
 0x3c8   :  { %v4004_v31 = vsub.f32 %v3750_v55, %v11055_v19  ;;  %v4005_v12 = vsub.f32 %v3750_v55, %v11056_v39  ;;  %v4006_v10 = vsub.f32 %v3750_v55, %v11057_v20  ;;  %v4007_v5 = vsub.f32 %v3750_v55, %v11058_v6 }
 0x3c9   :  { %v4123_v4 = vmax.f32 %v4122_v8, %v4000_v23  ;;  %v4192_v44 = vmax.f32 %v4191_v54, %v4001_v33  ;;  %v4261_v11 = vmax.f32 %v4260_v59, %v4002_v57  ;;  %v4330_v17 = vmax.f32 %v4329_v53, %v4003_v41  ;;  %v3758_v54 = vpop.permute.xlu1 %3757 }
 0x3ca   :  { %v4536_v42 = vadd.f32 %v3750_v55, %v11055_v19  ;;  %v4537_v48 = vadd.f32 %v3750_v55, %v11056_v39  ;;  %v4542_v7 = vadd.f32 %v3754_v14, %v11053_v9  ;;  %v4543_v36 = vadd.f32 %v3754_v14, %v11054_v16  ;;  %v11060_v19 = vld [vmem:[#allocation188_spill] sm:$0xff] }
 0x3cb   :  { %v4538_v51 = vadd.f32 %v3750_v55, %v11057_v20  ;;  %v4539_v28 = vadd.f32 %v3750_v55, %v11058_v6  ;;  %v4124_v45 = vmax.f32 %v4123_v4, %v4004_v31  ;;  %v4193_v49 = vmax.f32 %v4192_v44, %v4005_v12  ;;  %v11061_v20 = vld [vmem:[#allocation189_spill] sm:$0xff]  ;;  %v11062_v6 = vld [vmem:[#allocation190_spill] sm:$0xff] }
 0x3cc   :  { %v4655_v40 = vmin.f32 %v4654_v3, %v4532_v24  ;;  %v4724_v23 = vmin.f32 %v4723_v18, %v4533_v21  ;;  %v4262_v33 = vmax.f32 %v4261_v11, %v4006_v10  ;;  %v4331_v57 = vmax.f32 %v4330_v17, %v4007_v5  ;;  %v11063_v3 = vld [vmem:[#allocation175_spill] sm:$0xff]  ;;  %v11066_v12 = vld [vmem:[#allocation178_spill] sm:$0xff] }
 0x3cd   :  { %v4793_v41 = vmin.f32 %v4792_v34, %v4534_v22  ;;  %v4862_v8 = vmin.f32 %v4861_v43, %v4535_v63  ;;  %v4016_v9 = vsub.f32 %v3762_v15, %v11059_v61  ;;  %v4017_v14 = vsub.f32 %v3762_v15, %v11060_v19  ;;  %v11064_v63 = vld [vmem:[#allocation176_spill] sm:$0xff]  ;;  %v11065_v34 = vld [vmem:[#allocation177_spill] sm:$0xff] }
 0x3ce   :  { %v4656_v59 = vmin.f32 %v4655_v40, %v4536_v42  ;;  %v4725_v53 = vmin.f32 %v4724_v23, %v4537_v48  ;;  %v4018_v55 = vsub.f32 %v3762_v15, %v11061_v20  ;;  %v4019_v31 = vsub.f32 %v3762_v15, %v11062_v6  ;;  %v3770_v23 = vpop.permute.xlu0 %3769 }
 0x3cf   :  { %v4794_v16 = vmin.f32 %v4793_v41, %v4538_v51  ;;  %v4863_v39 = vmin.f32 %v4862_v8, %v4539_v28  ;;  %v4548_v24 = vadd.f32 %v3762_v15, %v11059_v61  ;;  %v4549_v21 = vadd.f32 %v3762_v15, %v11060_v19  ;;  %v11067_v19 = vld [vmem:[#allocation195_spill] sm:$0xff] }
 0x3d0   :  { %v4012_v22 = vsub.f32 %v3758_v54, %v11063_v3  ;;  %v4013_v18 = vsub.f32 %v3758_v54, %v11064_v63  ;;  %v4014_v43 = vsub.f32 %v3758_v54, %v11065_v34  ;;  %v4015_v10 = vsub.f32 %v3758_v54, %v11066_v12 }
 0x3d1   :  { %v4125_v5 = vmax.f32 %v4124_v45, %v4008_v29  ;;  %v4194_v4 = vmax.f32 %v4193_v49, %v4009_v35  ;;  %v4263_v44 = vmax.f32 %v4262_v33, %v4010_v27  ;;  %v4332_v11 = vmax.f32 %v4331_v57, %v4011_v26  ;;  %v3766_v49 = vpop.permute.xlu1 %3765 }
 0x3d2   :  { %v4544_v17 = vadd.f32 %v3758_v54, %v11063_v3  ;;  %v4545_v42 = vadd.f32 %v3758_v54, %v11064_v63  ;;  %v4550_v48 = vadd.f32 %v3762_v15, %v11061_v20  ;;  %v4551_v51 = vadd.f32 %v3762_v15, %v11062_v6  ;;  %v11068_v3 = vld [vmem:[#allocation196_spill] sm:$0xff] }
 0x3d3   :  { %v4546_v28 = vadd.f32 %v3758_v54, %v11065_v34  ;;  %v4547_v40 = vadd.f32 %v3758_v54, %v11066_v12  ;;  %v4126_v41 = vmax.f32 %v4125_v5, %v4012_v22  ;;  %v4195_v8 = vmax.f32 %v4194_v4, %v4013_v18  ;;  %v11069_v34 = vld [vmem:[#allocation197_spill] sm:$0xff]  ;;  %v11070_v12 = vld [vmem:[#allocation198_spill] sm:$0xff] }
 0x3d4   :  { %v4657_v61 = vmin.f32 %v4656_v59, %v4540_v30  ;;  %v4726_v29 = vmin.f32 %v4725_v53, %v4541_v56  ;;  %v4264_v35 = vmax.f32 %v4263_v44, %v4014_v43  ;;  %v4333_v27 = vmax.f32 %v4332_v11, %v4015_v10  ;;  %v11071_v59 = vld [vmem:[#allocation183_spill] sm:$0xff]  ;;  %v11074_v18 = vld [vmem:[#allocation186_spill] sm:$0xff] }
 0x3d5   :  { %v4795_v26 = vmin.f32 %v4794_v16, %v4542_v7  ;;  %v4864_v45 = vmin.f32 %v4863_v39, %v4543_v36  ;;  %v4024_v20 = vsub.f32 %v3770_v23, %v11067_v19  ;;  %v4025_v15 = vsub.f32 %v3770_v23, %v11068_v3  ;;  %v11072_v36 = vld [vmem:[#allocation184_spill] sm:$0xff]  ;;  %v11073_v16 = vld [vmem:[#allocation185_spill] sm:$0xff] }
 0x3d6   :  { %v4658_v33 = vmin.f32 %v4657_v61, %v4544_v17  ;;  %v4727_v57 = vmin.f32 %v4726_v29, %v4545_v42  ;;  %v4026_v54 = vsub.f32 %v3770_v23, %v11069_v34  ;;  %v4027_v22 = vsub.f32 %v3770_v23, %v11070_v12  ;;  %v3778_v29 = vpop.permute.xlu0 %3777 }
 0x3d7   :  { %v4796_v6 = vmin.f32 %v4795_v26, %v4546_v28  ;;  %v4865_v63 = vmin.f32 %v4864_v45, %v4547_v40  ;;  %v4556_v30 = vadd.f32 %v3770_v23, %v11067_v19  ;;  %v4557_v56 = vadd.f32 %v3770_v23, %v11068_v3  ;;  %v11075_v3 = vld [vmem:[#allocation203_spill] sm:$0xff] }
 0x3d8   :  { %v4020_v7 = vsub.f32 %v3766_v49, %v11071_v59  ;;  %v4021_v53 = vsub.f32 %v3766_v49, %v11072_v36  ;;  %v4022_v39 = vsub.f32 %v3766_v49, %v11073_v16  ;;  %v4023_v43 = vsub.f32 %v3766_v49, %v11074_v18 }
 0x3d9   :  { %v4127_v10 = vmax.f32 %v4126_v41, %v4016_v9  ;;  %v4196_v5 = vmax.f32 %v4195_v8, %v4017_v14  ;;  %v4265_v4 = vmax.f32 %v4264_v35, %v4018_v55  ;;  %v4334_v44 = vmax.f32 %v4333_v27, %v4019_v31  ;;  %v3774_v8 = vpop.permute.xlu1 %3773 }
 0x3da   :  { %v4552_v11 = vadd.f32 %v3766_v49, %v11071_v59  ;;  %v4553_v17 = vadd.f32 %v3766_v49, %v11072_v36  ;;  %v4558_v42 = vadd.f32 %v3770_v23, %v11069_v34  ;;  %v4559_v28 = vadd.f32 %v3770_v23, %v11070_v12  ;;  %v11076_v59 = vld [vmem:[#allocation204_spill] sm:$0xff] }
 0x3db   :  { %v4554_v40 = vadd.f32 %v3766_v49, %v11073_v16  ;;  %v4555_v61 = vadd.f32 %v3766_v49, %v11074_v18  ;;  %v4128_v26 = vmax.f32 %v4127_v10, %v4020_v7  ;;  %v4197_v45 = vmax.f32 %v4196_v5, %v4021_v53  ;;  %v11077_v16 = vld [vmem:[#allocation205_spill] sm:$0xff]  ;;  %v11078_v18 = vld [vmem:[#allocation206_spill] sm:$0xff] }
 0x3dc   :  { %v4659_v19 = vmin.f32 %v4658_v33, %v4548_v24  ;;  %v4728_v9 = vmin.f32 %v4727_v57, %v4549_v21  ;;  %v4266_v14 = vmax.f32 %v4265_v4, %v4022_v39  ;;  %v4335_v55 = vmax.f32 %v4334_v44, %v4023_v43  ;;  %v11079_v33 = vld [vmem:[#allocation191_spill] sm:$0xff]  ;;  %v11082_v53 = vld [vmem:[#allocation194_spill] sm:$0xff] }
 0x3dd   :  { %v4797_v31 = vmin.f32 %v4796_v6, %v4550_v48  ;;  %v4866_v41 = vmin.f32 %v4865_v63, %v4551_v51  ;;  %v4032_v34 = vsub.f32 %v3778_v29, %v11075_v3  ;;  %v4033_v23 = vsub.f32 %v3778_v29, %v11076_v59  ;;  %v11080_v51 = vld [vmem:[#allocation192_spill] sm:$0xff]  ;;  %v11081_v6 = vld [vmem:[#allocation193_spill] sm:$0xff] }
 0x3de   :  { %v4660_v35 = vmin.f32 %v4659_v19, %v4552_v11  ;;  %v4729_v27 = vmin.f32 %v4728_v9, %v4553_v17  ;;  %v4034_v49 = vsub.f32 %v3778_v29, %v11077_v16  ;;  %v4035_v7 = vsub.f32 %v3778_v29, %v11078_v18  ;;  %v3786_v9 = vpop.permute.xlu0 %3785 }
 0x3df   :  { %v4798_v12 = vmin.f32 %v4797_v31, %v4554_v40  ;;  %v4867_v36 = vmin.f32 %v4866_v41, %v4555_v61  ;;  %v4564_v24 = vadd.f32 %v3778_v29, %v11075_v3  ;;  %v4565_v21 = vadd.f32 %v3778_v29, %v11076_v59  ;;  %v11083_v59 = vld [vmem:[#allocation211_spill] sm:$0xff] }
 0x3e0   :  { %v4028_v48 = vsub.f32 %v3774_v8, %v11079_v33  ;;  %v4029_v57 = vsub.f32 %v3774_v8, %v11080_v51  ;;  %v4030_v63 = vsub.f32 %v3774_v8, %v11081_v6  ;;  %v4031_v39 = vsub.f32 %v3774_v8, %v11082_v53 }
 0x3e1   :  { %v4129_v43 = vmax.f32 %v4128_v26, %v4024_v20  ;;  %v4198_v10 = vmax.f32 %v4197_v45, %v4025_v15  ;;  %v4267_v5 = vmax.f32 %v4266_v14, %v4026_v54  ;;  %v4336_v4 = vmax.f32 %v4335_v55, %v4027_v22  ;;  %v3782_v45 = vpop.permute.xlu1 %3781 }
 0x3e2   :  { %v4560_v44 = vadd.f32 %v3774_v8, %v11079_v33  ;;  %v4561_v11 = vadd.f32 %v3774_v8, %v11080_v51  ;;  %v4566_v17 = vadd.f32 %v3778_v29, %v11077_v16  ;;  %v4567_v40 = vadd.f32 %v3778_v29, %v11078_v18  ;;  %v11084_v33 = vld [vmem:[#allocation212_spill] sm:$0xff] }
 0x3e3   :  { %v4562_v61 = vadd.f32 %v3774_v8, %v11081_v6  ;;  %v4563_v19 = vadd.f32 %v3774_v8, %v11082_v53  ;;  %v4130_v31 = vmax.f32 %v4129_v43, %v4028_v48  ;;  %v4199_v41 = vmax.f32 %v4198_v10, %v4029_v57  ;;  %v11085_v6 = vld [vmem:[#allocation213_spill] sm:$0xff]  ;;  %v11086_v53 = vld [vmem:[#allocation214_spill] sm:$0xff] }
 0x3e4   :  { %v4661_v3 = vmin.f32 %v4660_v35, %v4556_v30  ;;  %v4730_v20 = vmin.f32 %v4729_v27, %v4557_v56  ;;  %v4268_v15 = vmax.f32 %v4267_v5, %v4030_v63  ;;  %v4337_v54 = vmax.f32 %v4336_v4, %v4031_v39  ;;  %v11087_v35 = vld [vmem:[#allocation199_spill] sm:$0xff]  ;;  %v11090_v57 = vld [vmem:[#allocation202_spill] sm:$0xff] }
 0x3e5   :  { %v4799_v22 = vmin.f32 %v4798_v12, %v4558_v42  ;;  %v4868_v26 = vmin.f32 %v4867_v36, %v4559_v28  ;;  %v4040_v16 = vsub.f32 %v3786_v9, %v11083_v59  ;;  %v4041_v29 = vsub.f32 %v3786_v9, %v11084_v33  ;;  %v11088_v28 = vld [vmem:[#allocation200_spill] sm:$0xff]  ;;  %v11089_v12 = vld [vmem:[#allocation201_spill] sm:$0xff] }
 0x3e6   :  { %v4662_v14 = vmin.f32 %v4661_v3, %v4560_v44  ;;  %v4731_v55 = vmin.f32 %v4730_v20, %v4561_v11  ;;  %v4042_v8 = vsub.f32 %v3786_v9, %v11085_v6  ;;  %v4043_v48 = vsub.f32 %v3786_v9, %v11086_v53  ;;  %v3794_v20 = vpop.permute.xlu0 %3793 }
 0x3e7   :  { %v4800_v18 = vmin.f32 %v4799_v22, %v4562_v61  ;;  %v4869_v51 = vmin.f32 %v4868_v26, %v4563_v19  ;;  %v4572_v30 = vadd.f32 %v3786_v9, %v11083_v59  ;;  %v4573_v56 = vadd.f32 %v3786_v9, %v11084_v33  ;;  %v11091_v33 = vld [vmem:[#allocation219_spill] sm:$0xff] }
 0x3e8   :  { %v4036_v42 = vsub.f32 %v3782_v45, %v11087_v35  ;;  %v4037_v27 = vsub.f32 %v3782_v45, %v11088_v28  ;;  %v4038_v36 = vsub.f32 %v3782_v45, %v11089_v12  ;;  %v4039_v63 = vsub.f32 %v3782_v45, %v11090_v57 }
 0x3e9   :  { %v4131_v39 = vmax.f32 %v4130_v31, %v4032_v34  ;;  %v4200_v43 = vmax.f32 %v4199_v41, %v4033_v23  ;;  %v4269_v10 = vmax.f32 %v4268_v15, %v4034_v49  ;;  %v4338_v5 = vmax.f32 %v4337_v54, %v4035_v7  ;;  %v3790_v41 = vpop.permute.xlu1 %3789 }
 0x3ea   :  { %v4568_v4 = vadd.f32 %v3782_v45, %v11087_v35  ;;  %v4569_v44 = vadd.f32 %v3782_v45, %v11088_v28  ;;  %v4574_v11 = vadd.f32 %v3786_v9, %v11085_v6  ;;  %v4575_v61 = vadd.f32 %v3786_v9, %v11086_v53  ;;  %v11092_v35 = vld [vmem:[#allocation220_spill] sm:$0xff] }
 0x3eb   :  { %v4570_v19 = vadd.f32 %v3782_v45, %v11089_v12  ;;  %v4571_v3 = vadd.f32 %v3782_v45, %v11090_v57  ;;  %v4132_v22 = vmax.f32 %v4131_v39, %v4036_v42  ;;  %v4201_v26 = vmax.f32 %v4200_v43, %v4037_v27  ;;  %v11093_v12 = vld [vmem:[#allocation221_spill] sm:$0xff]  ;;  %v11094_v57 = vld [vmem:[#allocation222_spill] sm:$0xff] }
 0x3ec   :  { %v4663_v59 = vmin.f32 %v4662_v14, %v4564_v24  ;;  %v4732_v34 = vmin.f32 %v4731_v55, %v4565_v21  ;;  %v4270_v23 = vmax.f32 %v4269_v10, %v4038_v36  ;;  %v4339_v49 = vmax.f32 %v4338_v5, %v4039_v63  ;;  %v11095_v14 = vld [vmem:[#allocation207_spill] sm:$0xff]  ;;  %v11098_v27 = vld [vmem:[#allocation210_spill] sm:$0xff] }
 0x3ed   :  { %v4801_v7 = vmin.f32 %v4800_v18, %v4566_v17  ;;  %v4870_v31 = vmin.f32 %v4869_v51, %v4567_v40  ;;  %v4048_v6 = vsub.f32 %v3794_v20, %v11091_v33  ;;  %v4049_v9 = vsub.f32 %v3794_v20, %v11092_v35  ;;  %v11096_v40 = vld [vmem:[#allocation208_spill] sm:$0xff]  ;;  %v11097_v18 = vld [vmem:[#allocation209_spill] sm:$0xff] }
 0x3ee   :  { %v4664_v15 = vmin.f32 %v4663_v59, %v4568_v4  ;;  %v4733_v54 = vmin.f32 %v4732_v34, %v4569_v44  ;;  %v4050_v45 = vsub.f32 %v3794_v20, %v11093_v12  ;;  %v4051_v42 = vsub.f32 %v3794_v20, %v11094_v57  ;;  %v3802_v34 = vpop.permute.xlu0 %3801 }
 0x3ef   :  { %v4802_v53 = vmin.f32 %v4801_v7, %v4570_v19  ;;  %v4871_v28 = vmin.f32 %v4870_v31, %v4571_v3  ;;  %v4580_v24 = vadd.f32 %v3794_v20, %v11091_v33  ;;  %v4581_v21 = vadd.f32 %v3794_v20, %v11092_v35  ;;  %v11099_v35 = vld [vmem:[#allocation227_spill] sm:$0xff] }
 0x3f0   :  { %v4044_v17 = vsub.f32 %v3790_v41, %v11095_v14  ;;  %v4045_v55 = vsub.f32 %v3790_v41, %v11096_v40  ;;  %v4046_v51 = vsub.f32 %v3790_v41, %v11097_v18  ;;  %v4047_v36 = vsub.f32 %v3790_v41, %v11098_v27 }
 0x3f1   :  { %v4133_v63 = vmax.f32 %v4132_v22, %v4040_v16  ;;  %v4202_v39 = vmax.f32 %v4201_v26, %v4041_v29  ;;  %v4271_v43 = vmax.f32 %v4270_v23, %v4042_v8  ;;  %v4340_v10 = vmax.f32 %v4339_v49, %v4043_v48  ;;  %v3798_v26 = vpop.permute.xlu1 %3797 }
 0x3f2   :  { %v4576_v5 = vadd.f32 %v3790_v41, %v11095_v14  ;;  %v4577_v4 = vadd.f32 %v3790_v41, %v11096_v40  ;;  %v4582_v44 = vadd.f32 %v3794_v20, %v11093_v12  ;;  %v4583_v19 = vadd.f32 %v3794_v20, %v11094_v57  ;;  %v11100_v14 = vld [vmem:[#allocation228_spill] sm:$0xff] }
 0x3f3   :  { %v4578_v3 = vadd.f32 %v3790_v41, %v11097_v18  ;;  %v4579_v59 = vadd.f32 %v3790_v41, %v11098_v27  ;;  %v4134_v7 = vmax.f32 %v4133_v63, %v4044_v17  ;;  %v4203_v31 = vmax.f32 %v4202_v39, %v4045_v55  ;;  %v11104_v55 = vld [vmem:[#allocation218_spill] sm:$0xff] }
 0x3f4   :  { %v4665_v33 = vmin.f32 %v4664_v15, %v4572_v30  ;;  %v4734_v16 = vmin.f32 %v4733_v54, %v4573_v56  ;;  %v4272_v29 = vmax.f32 %v4271_v43, %v4046_v51  ;;  %v4341_v8 = vmax.f32 %v4340_v10, %v4047_v36  ;;  %v11101_v15 = vld [vmem:[#allocation215_spill] sm:$0xff] }
 0x3f5   :  { %v4803_v48 = vmin.f32 %v4802_v53, %v4574_v11  ;;  %v4872_v22 = vmin.f32 %v4871_v28, %v4575_v61  ;;  %v4056_v12 = vsub.f32 %v3802_v34, %v11099_v35  ;;  %v4057_v20 = vsub.f32 %v3802_v34, %v11100_v14  ;;  %v11102_v61 = vld [vmem:[#allocation216_spill] sm:$0xff]  ;;  %v11103_v53 = vld [vmem:[#allocation217_spill] sm:$0xff] }
 0x3f6   :  { %v4666_v23 = vmin.f32 %v4665_v33, %v4576_v5  ;;  %v4735_v49 = vmin.f32 %v4734_v16, %v4577_v4  ;;  %v4058_v41 = vsub.f32 %v3802_v34, %v10871_v37  ;;  %v4059_v17 = vsub.f32 %v3802_v34, %v10872_v1 }
 0x3f7   :  { %v4804_v57 = vmin.f32 %v4803_v48, %v4578_v3  ;;  %v4873_v40 = vmin.f32 %v4872_v22, %v4579_v59  ;;  %v4588_v30 = vadd.f32 %v3802_v34, %v11099_v35  ;;  %v4589_v56 = vadd.f32 %v3802_v34, %v11100_v14  ;;  %v9351_v59 = vpop.permute.xlu0 %3809 }
 0x3f8   :  { %v4052_v11 = vsub.f32 %v3798_v26, %v11101_v15  ;;  %v4053_v54 = vsub.f32 %v3798_v26, %v11102_v61  ;;  %v4054_v28 = vsub.f32 %v3798_v26, %v11103_v53  ;;  %v4055_v18 = vsub.f32 %v3798_v26, %v11104_v55 }
 0x3f9   :  { %v4135_v51 = vmax.f32 %v4134_v7, %v4048_v6  ;;  %v4204_v27 = vmax.f32 %v4203_v31, %v4049_v9  ;;  %v4273_v36 = vmax.f32 %v4272_v29, %v4050_v45  ;;  %v4342_v63 = vmax.f32 %v4341_v8, %v4051_v42  ;;  %v3806_v45 = vpop.permute.xlu1 %3805 }
 0x3fa   :  { %v4584_v39 = vadd.f32 %v3798_v26, %v11101_v15  ;;  %v4585_v43 = vadd.f32 %v3798_v26, %v11102_v61  ;;  %v4590_v10 = vadd.f32 %v3802_v34, %v10871_v37  ;;  %v4591_v5 = vadd.f32 %v3802_v34, %v10872_v1  ;;  %v11105_v37 = vld [vmem:[#allocation235_spill] sm:$0xff]  ;;  %v11106_v34 = vld [vmem:[#allocation236_spill] sm:$0xff] }
 0x3fb   :  { %v4586_v4 = vadd.f32 %v3798_v26, %v11103_v53  ;;  %v4587_v3 = vadd.f32 %v3798_v26, %v11104_v55  ;;  %v4136_v33 = vmax.f32 %v4135_v51, %v4052_v11  ;;  %v4205_v16 = vmax.f32 %v4204_v27, %v4053_v54  ;;  %v11110_v11 = vld [vmem:[#allocation226_spill] sm:$0xff] }
 0x3fc   :  { %v4667_v6 = vmin.f32 %v4666_v23, %v4580_v24  ;;  %v4736_v9 = vmin.f32 %v4735_v49, %v4581_v21  ;;  %v4274_v42 = vmax.f32 %v4273_v36, %v4054_v28  ;;  %v4343_v7 = vmax.f32 %v4342_v63, %v4055_v18  ;;  %v11108_v49 = vld [vmem:[#allocation224_spill] sm:$0xff] }
 0x3fd   :  { %v4805_v31 = vmin.f32 %v4804_v57, %v4582_v44  ;;  %v4874_v29 = vmin.f32 %v4873_v40, %v4583_v19  ;;  %v4064_v1 = vsub.f32 %v9351_v59, %v11105_v37  ;;  %v4065_v22 = vsub.f32 %v9351_v59, %v11106_v34  ;;  %v11107_v19 = vld [vmem:[#allocation223_spill] sm:$0xff]  ;;  %v11109_v40 = vld [vmem:[#allocation225_spill] sm:$0xff]  ;;  %v3814_v27 = vpop.permute.xlu1 %3813 }
 0x3fe   :  { %v4668_v8 = vmin.f32 %v4667_v6, %v4584_v39  ;;  %v4737_v48 = vmin.f32 %v4736_v9, %v4585_v43  ;;  %v4066_v14 = vsub.f32 %v9351_v59, %v10877_v25  ;;  %v4067_v24 = vsub.f32 %v9351_v59, %v10878_v0 }
 0x3ff   :  { %v4806_v26 = vmin.f32 %v4805_v31, %v4586_v4  ;;  %v4875_v35 = vmin.f32 %v4874_v29, %v4587_v3  ;;  %v9363_v21 = vadd.f32 %v9351_v59, %v11105_v37  ;;  %v9367_v44 = vadd.f32 %v9351_v59, %v11106_v34  ;;  %v3818_v4 = vpop.permute.xlu0 %3817  ;;  %v11112_v31 = vld [vmem:[#allocation244_spill] sm:$0xff] }
 0x400   :  { %v4060_v23 = vsub.f32 %v3806_v45, %v11107_v19  ;;  %v4061_v57 = vsub.f32 %v3806_v45, %v11108_v49  ;;  %v4062_v15 = vsub.f32 %v3806_v45, %v11109_v40  ;;  %v4063_v61 = vsub.f32 %v3806_v45, %v11110_v11 }
 0x401   :  { %v4137_v54 = vmax.f32 %v4136_v33, %v4056_v12  ;;  %v4206_v53 = vmax.f32 %v4205_v16, %v4057_v20  ;;  %v4275_v28 = vmax.f32 %v4274_v42, %v4058_v41  ;;  %v4344_v55 = vmax.f32 %v4343_v7, %v4059_v17  ;;  %v11111_v7 = vld [vmem:[#allocation243_spill] sm:$0xff] }
 0x402   :  { %v4592_v18 = vadd.f32 %v3806_v45, %v11107_v19  ;;  %v4593_v51 = vadd.f32 %v3806_v45, %v11108_v49  ;;  %v4598_v36 = vadd.f32 %v9351_v59, %v10877_v25  ;;  %v4599_v63 = vadd.f32 %v9351_v59, %v10878_v0 }
 0x403   :  { %v4594_v39 = vadd.f32 %v3806_v45, %v11109_v40  ;;  %v4595_v43 = vadd.f32 %v3806_v45, %v11110_v11  ;;  %v4138_v12 = vmax.f32 %v4137_v54, %v4060_v23  ;;  %v4207_v20 = vmax.f32 %v4206_v53, %v4061_v57  ;;  %v11113_v45 = vld [vmem:[#allocation246_spill] sm:$0xff]  ;;  %v11116_v23 = vld [vmem:[#allocation233_spill] sm:$0xff]  ;;  %v11118_v53 = vld [vmem:[#allocation239_spill] sm:$0xff] }
 0x404   :  { %v4669_v41 = vmin.f32 %v4668_v8, %v4588_v30  ;;  %v4738_v17 = vmin.f32 %v4737_v48, %v4589_v56  ;;  %v4276_v3 = vmax.f32 %v4275_v28, %v4062_v15  ;;  %v4345_v33 = vmax.f32 %v4344_v55, %v4063_v61  ;;  %v11114_v8 = vld [vmem:[#allocation231_spill] sm:$0xff]  ;;  %v11117_v57 = vld [vmem:[#allocation234_spill] sm:$0xff]  ;;  %v11119_v55 = vld [vmem:[#allocation240_spill] sm:$0xff] }
 0x405   :  { %v4807_v16 = vmin.f32 %v4806_v26, %v4590_v10  ;;  %v4876_v6 = vmin.f32 %v4875_v35, %v4591_v5  ;;  %v4072_v25 = vsub.f32 %v3818_v4, %v11111_v7  ;;  %v4073_v29 = vsub.f32 %v3818_v4, %v11112_v31  ;;  %v3822_v5 = vpop.permute.xlu1 %3821  ;;  %v11115_v26 = vld [vmem:[#allocation232_spill] sm:$0xff] }
 0x406   :  { %v4670_v9 = vmin.f32 %v4669_v41, %v4592_v18  ;;  %v4739_v42 = vmin.f32 %v4738_v17, %v4593_v51  ;;  %v4074_v37 = vsub.f32 %v3818_v4, %v10884_v60  ;;  %v4075_v34 = vsub.f32 %v3818_v4, %v11113_v45  ;;  %v11120_v51 = vld [vmem:[#allocation241_spill] sm:$0xff] }
 0x407   :  { %v4808_v0 = vmin.f32 %v4807_v16, %v4594_v39  ;;  %v4877_v59 = vmin.f32 %v4876_v6, %v4595_v43  ;;  %v4604_v19 = vadd.f32 %v3818_v4, %v11111_v7  ;;  %v4605_v30 = vadd.f32 %v3818_v4, %v11112_v31  ;;  %v11121_v43 = vld [vmem:[#allocation242_spill] sm:$0xff] }
 0x408   :  { %v4606_v56 = vadd.f32 %v3818_v4, %v10884_v60  ;;  %v4607_v10 = vadd.f32 %v3818_v4, %v11113_v45  ;;  %v4068_v48 = vsub.f32 %v3814_v27, %v11114_v8  ;;  %v4069_v35 = vsub.f32 %v3814_v27, %v11115_v26 }
 0x409   :  { %v4070_v49 = vsub.f32 %v3814_v27, %v11116_v23  ;;  %v4071_v40 = vsub.f32 %v3814_v27, %v11117_v57  ;;  %v4600_v15 = vadd.f32 %v3814_v27, %v11114_v8  ;;  %v4601_v11 = vadd.f32 %v3814_v27, %v11115_v26 }
 0x40a   :  { %v4602_v61 = vadd.f32 %v3814_v27, %v11116_v23  ;;  %v4603_v54 = vadd.f32 %v3814_v27, %v11117_v57  ;;  %v5085_v60 = vmov -inf   ;;  %v4076_v28 = vsub.f32 %v3822_v5, %v11118_v53 }
 0x40b   :  { %17 = vst [vmem:[%s9472_s2] sm:$0x77] %v5085_v60  ;;  %18 = vst [vmem:[%s9472_s2 + $0x8] sm:$0x77] %v5085_v60  ;;  %v4077_v18 = vsub.f32 %v3822_v5, %v11119_v55  ;;  %v4078_v39 = vsub.f32 %v3822_v5, %v11120_v51  ;;  %v4079_v4 = vsub.f32 %v3822_v5, %v11121_v43 }
 0x40c   :  { %v4139_v41 = vmax.f32 %v4138_v12, %v4064_v1  ;;  %v4208_v17 = vmax.f32 %v4207_v20, %v4065_v22  ;;  %v4277_v27 = vmax.f32 %v4276_v3, %v4066_v14  ;;  %v4346_v16 = vmax.f32 %v4345_v33, %v4067_v24 }
 0x40d   :  { %v4608_v6 = vadd.f32 %v3822_v5, %v11118_v53  ;;  %v4609_v7 = vadd.f32 %v3822_v5, %v11119_v55  ;;  %v4610_v31 = vadd.f32 %v3822_v5, %v11120_v51  ;;  %v4611_v23 = vadd.f32 %v3822_v5, %v11121_v43 }
 0x40e   :  { %v4140_v45 = vmax.f32 %v4139_v41, %v4068_v48  ;;  %v4209_v8 = vmax.f32 %v4208_v17, %v4069_v35  ;;  %v4278_v26 = vmax.f32 %v4277_v27, %v4070_v49  ;;  %v4347_v57 = vmax.f32 %v4346_v16, %v4071_v40 }
 0x40f   :  { %v4671_v60 = vmin.f32 %v4670_v9, %v9363_v21  ;;  %v4740_v47 = vmin.f32 %v4739_v42, %v9367_v44  ;;  %v4809_v1 = vmin.f32 %v4808_v0, %v4598_v36  ;;  %v4878_v12 = vmin.f32 %v4877_v59, %v4599_v63 }
 0x410   :  { %v4141_v22 = vmax.f32 %v4140_v45, %v4072_v25  ;;  %v4210_v14 = vmax.f32 %v4209_v8, %v4073_v29  ;;  %v4279_v24 = vmax.f32 %v4278_v26, %v4074_v37  ;;  %v4348_v20 = vmax.f32 %v4347_v57, %v4075_v34 }
 0x411   :  { %v4672_v3 = vmin.f32 %v4671_v60, %v4600_v15  ;;  %v4741_v33 = vmin.f32 %v4740_v47, %v4601_v11  ;;  %v4810_v53 = vmin.f32 %v4809_v1, %v4602_v61  ;;  %v4879_v49 = vmin.f32 %v4878_v12, %v4603_v54 }
 0x412   :  { %v4142_v55 = vmax.f32 %v4141_v22, %v4076_v28  ;;  %v4211_v48 = vmax.f32 %v4210_v14, %v4077_v18  ;;  %v4280_v35 = vmax.f32 %v4279_v24, %v4078_v39  ;;  %v4349_v51 = vmax.f32 %v4348_v20, %v4079_v4 }
 0x413   :  { %v4673_v5 = vmin.f32 %v4672_v3, %v4604_v19  ;;  %v4742_v40 = vmin.f32 %v4741_v33, %v4605_v30  ;;  %v4811_v43 = vmin.f32 %v4810_v53, %v4606_v56  ;;  %v4880_v36 = vmin.f32 %v4879_v49, %v4607_v10 }
 0x414   :  { %v4143_v21 = vrot.slane %v4142_v55, 4  ;;  %v4212_v9 = vrot.slane %v4211_v48, 4  ;;  %v4281_v44 = vrot.slane %v4280_v35, 4  ;;  %v4350_v42 = vrot.slane %v4349_v51, 4 }
 0x415   :  { %v4674_v25 = vmin.f32 %v4673_v5, %v4608_v6  ;;  %v4743_v63 = vmin.f32 %v4742_v40, %v4609_v7  ;;  %v4812_v29 = vmin.f32 %v4811_v43, %v4610_v31  ;;  %v4881_v37 = vmin.f32 %v4880_v36, %v4611_v23  ;;  %v11124_v40 = vld [vmem:[#allocation249_spill] sm:$0xff]  ;;  %v11125_v36 = vld [vmem:[#allocation250_spill] sm:$0xff] }
 0x416   :  { %v4144_v0 = vmax.f32 %v4142_v55, %v4143_v21  ;;  %v4213_v47 = vmax.f32 %v4211_v48, %v4212_v9  ;;  %v4282_v59 = vmax.f32 %v4280_v35, %v4281_v44  ;;  %v4351_v34 = vmax.f32 %v4349_v51, %v4350_v42  ;;  %v11122_v35 = vld [vmem:[#allocation247_spill] sm:$0xff]  ;;  %v11123_v51 = vld [vmem:[#allocation248_spill] sm:$0xff] }
 0x417   :  { %v4675_v15 = vrot.slane %v4674_v25, 4  ;;  %v4744_v11 = vrot.slane %v4743_v63, 4  ;;  %v4813_v19 = vrot.slane %v4812_v29, 4  ;;  %v4882_v54 = vrot.slane %v4881_v37, 4 }
 0x418   :  { %v4145_v30 = vrot.slane %v4144_v0, 2  ;;  %v4214_v56 = vrot.slane %v4213_v47, 2  ;;  %v4283_v61 = vrot.slane %v4282_v59, 2  ;;  %v4352_v28 = vrot.slane %v4351_v34, 2 }
 0x419   :  { %v4676_v10 = vmin.f32 %v4674_v25, %v4675_v15  ;;  %v4745_v18 = vmin.f32 %v4743_v63, %v4744_v11  ;;  %v4814_v39 = vmin.f32 %v4812_v29, %v4813_v19  ;;  %v4883_v27 = vmin.f32 %v4881_v37, %v4882_v54  ;;  %v4888_v25 = vld [vmem:[%s9472_s2] sm:$0x77]  ;;  %v11127_v37 = vld [vmem:[#allocation252_spill] sm:$0xff]  ;;  %v11128_v19 = vld [vmem:[#allocation11_spill] sm:$0xff] }
 0x41a   :  { %v4146_v4 = vmax.f32 %v4144_v0, %v4145_v30  ;;  %v4215_v41 = vmax.f32 %v4213_v47, %v4214_v56  ;;  %v4284_v17 = vmax.f32 %v4282_v59, %v4283_v61  ;;  %v4353_v16 = vmax.f32 %v4351_v34, %v4352_v28  ;;  %v4912_v61 = vld [vmem:[%s9471_s3] sm:$0x77] }
 0x41b   :  { %v4677_v6 = vrot.slane %v4676_v10, 2  ;;  %v4746_v7 = vrot.slane %v4745_v18, 2  ;;  %v4815_v31 = vrot.slane %v4814_v39, 2  ;;  %v4884_v23 = vrot.slane %v4883_v27, 2 }
 0x41c   :  { %v4147_v45 = vrot.slane %v4146_v4, 1  ;;  %v4216_v8 = vrot.slane %v4215_v41, 1  ;;  %v4285_v26 = vrot.slane %v4284_v17, 1  ;;  %v4354_v57 = vrot.slane %v4353_v16, 1 }
 0x41d   :  { %v4678_v60 = vmin.f32 %v4676_v10, %v4677_v6  ;;  %v4747_v1 = vmin.f32 %v4745_v18, %v4746_v7  ;;  %v4816_v22 = vmin.f32 %v4814_v39, %v4815_v31  ;;  %v4885_v20 = vmin.f32 %v4883_v27, %v4884_v23 }
 0x41e   :  { %v4148_v14 = vmax.f32 %v4146_v4, %v4147_v45  ;;  %v4217_v24 = vmax.f32 %v4215_v41, %v4216_v8  ;;  %v4286_v12 = vmax.f32 %v4284_v17, %v4285_v26  ;;  %v4355_v3 = vmax.f32 %v4353_v16, %v4354_v57 }
 0x41f   :  { %v4679_v33 = vrot.slane %v4678_v60, 1  ;;  %v4748_v53 = vrot.slane %v4747_v1, 1  ;;  %v4817_v55 = vrot.slane %v4816_v22, 1  ;;  %v4886_v48 = vrot.slane %v4885_v20, 1 }
 0x420   :  { %v4891_v49 = vsel %vm4890_vm0, %v11122_v35, %v8835_v62  ;;  %v4892_v5 = vsel %vm4890_vm0, %v11123_v51, %v8837_v50  ;;  %v4893_v43 = vsel %vm4890_vm0, %v11124_v40, %v8839_v58  ;;  %v4894_v42 = vsel %vm4890_vm0, %v11125_v36, %v8841_v32  ;;  %v4889_v58 = vld [vmem:[%s9472_s2 + $0x8] sm:$0x77] }
 0x421   :  { %v4680_v21 = vmin.f32 %v4678_v60, %v4679_v33  ;;  %v4749_v9 = vmin.f32 %v4747_v1, %v4748_v53  ;;  %v4818_v44 = vmin.f32 %v4816_v22, %v4817_v55  ;;  %v4887_v62 = vmin.f32 %v4885_v20, %v4886_v48  ;;  %v11126_v32 = vld [vmem:[#allocation251_spill] sm:$0xff] }
 0x422   :  { %v4896_v63 = vsel %vm4895_vm1, %v4891_v49, %v4148_v14  ;;  %v4897_v50 = vsel %vm4895_vm1, %v4892_v5, %v4217_v24  ;;  %v4898_v29 = vsel %vm4895_vm1, %v4893_v43, %v4286_v12  ;;  %v4899_v0 = vsel %vm4895_vm1, %v4894_v42, %v4355_v3 }
 0x423   :  { %v4904_v47 = vcombine.low %v4896_v63, %v4897_v50  ;;  %v4914_v59 = vsel %vm4890_vm0, %v11126_v32, %v8843_v13  ;;  %v4915_v34 = vsel %vm4890_vm0, %v11127_v37, %v8845_v52  ;;  %v4905_v15 = vcombine.low %v4898_v29, %v4899_v0  ;;  %v4913_v13 = vld [vmem:[%s9471_s3 + $0x8] sm:$0x77] }
 0x424   :  { %v4916_v11 = vsel %vm4890_vm0, %v8828_v2, %v8847_v46  ;;  %v4917_v30 = vsel %vm4890_vm0, %v11128_v19, %v8850_v38  ;;  %v4918_v56 = vsel %vm4895_vm1, %v4914_v59, %v4680_v21  ;;  %v4919_v54 = vsel %vm4895_vm1, %v4915_v34, %v4749_v9 }
 0x425   :  { %v4908_v52 = vmax.f32 %v4888_v25, %v4904_v47  ;;  %v4920_v28 = vsel %vm4895_vm1, %v4916_v11, %v4818_v44  ;;  %v4921_v2 = vsel %vm4895_vm1, %v4917_v30, %v4887_v62  ;;  %v4909_v46 = vmax.f32 %v4889_v58, %v4905_v15 }
 0x426   :  { %v4926_v10 = vcombine.low %v4918_v56, %v4919_v54  ;;  %v4927_v38 = vcombine.low %v4920_v28, %v4921_v2 }
 0x427   :  { %4910 = vst [vmem:[%s9472_s2] sm:$0x77] %v4908_v52  ;;  %4911 = vst [vmem:[%s9472_s2 + $0x8] sm:$0x77] %v4909_v46 }
 0x428   :  { %v4930_v18 = vmin.f32 %v4912_v61, %v4926_v10  ;;  %v4931_v39 = vmin.f32 %v4913_v13, %v4927_v38 }
 0x42a   :  { %4932 = vst [vmem:[%s9471_s3] sm:$0x77] %v4930_v18  ;;  %4933 = vst [vmem:[%s9471_s3 + $0x8] sm:$0x77] %v4931_v39 }

</bundles_post_ra>
